<compile_context>
chip_gen: v7x
topology: tpu7x:2x2x1
jax: 0.10.0
libtpu: 0.0.40
codegen_flags: <defaults>
</compile_context>

<pallas_src>
import jax
import jax.numpy as jnp
from jax.experimental import pallas as pl
from jax.experimental.pallas import tpu as pltpu

_SQRT_HALF = 0.7071067811865476
_VMEM_LIMIT = 32 * 1024 * 1024  # safe scoped-VMEM budget on v5e/v6e/v7x


def _gelu_exact(x):
    # torch.nn.GELU() default (erf-based, not the tanh approximation).
    return 0.5 * x * (1.0 + jax.lax.erf(x * _SQRT_HALF))


def _pick_tile(total, preferred, align):
    """Largest tile <= preferred that divides `total` and is a multiple of
    `align`; falls back to the full extent (always a legal block shape)."""
    t = min(preferred, total)
    t -= t % align
    while t >= align:
        if total % t == 0:
            return t
        t -= align
    return total


# --------------------- last-layer weight norm (one shot) --------------------

def _weight_norm_kernel(v_ref, w_ref):
    # torch weight_norm on Linear(bottleneck, out_dim, bias=False) with
    # weight_g == 1:  w = v / ||v||, norm per output unit.  v is stored
    # transposed here as (bottleneck, out_dim), so the norm is per column.
    v = v_ref[...]
    w_ref[...] = v * jax.lax.rsqrt(jnp.sum(v * v, axis=0, keepdims=True))


def weight_norm_pallas(v, *, col_tile=2048):
    bottleneck, out_dim = v.shape
    tc = _pick_tile(out_dim, col_tile, 128)
    return pl.pallas_call(
        _weight_norm_kernel,
        out_shape=jax.ShapeDtypeStruct((bottleneck, out_dim), jnp.float32),
        grid_spec=pltpu.PrefetchScalarGridSpec(
            num_scalar_prefetch=0,
            grid=(out_dim // tc,),
            in_specs=[pl.BlockSpec((bottleneck, tc), lambda j: (0, j))],
            out_specs=pl.BlockSpec((bottleneck, tc), lambda j: (0, j)),
        ),
        compiler_params=pltpu.CompilerParams(
            dimension_semantics=("parallel",),
            vmem_limit_bytes=_VMEM_LIMIT),
    )(v)


# ------------------------------ fused head ----------------------------------

def _make_dino_head_kernel(n_mlp):
    def kernel(*refs):
        x_ref = refs[0]
        mlp_refs = refs[1:1 + 2 * n_mlp]
        wl_ref = refs[1 + 2 * n_mlp]
        logits_ref, emb_ref, zn_ref = refs[2 + 2 * n_mlp:]

        # Compute the MLP + L2-normalize once per batch tile (j == 0) and
        # cache the normalized bottleneck activations in VMEM scratch.
        @pl.when(pl.program_id(1) == 0)
        def _():
            h = x_ref[...]
            for li in range(n_mlp):
                w = mlp_refs[2 * li][...]
                b = mlp_refs[2 * li + 1][...]
                h = jnp.dot(h, w, preferred_element_type=jnp.float32) + b
                if li < n_mlp - 1:
                    h = _gelu_exact(h)
            # F.normalize(h, dim=-1, p=2, eps=1e-12)
            #   == h * rsqrt(max(sum(h^2), eps^2))   (rsqrt -> EUP slot)
            ss = jnp.sum(h * h, axis=-1, keepdims=True)
            zn = h * jax.lax.rsqrt(jnp.maximum(ss, 1e-24))
            zn_ref[...] = zn
            emb_ref[...] = zn

        # Weight-normalized projection, tiled over out_dim columns.
        logits_ref[...] = jnp.dot(zn_ref[...], wl_ref[...],
                                  preferred_element_type=jnp.float32)

    return kernel


def dino_head_pallas(x, mlp_params, wl_eff, *, batch_tile=128, out_tile=512):
    n, in_dim = x.shape
    bottleneck, out_dim = wl_eff.shape
    n_mlp = len(mlp_params)

    tb = _pick_tile(n, batch_tile, 8)
    to = _pick_tile(out_dim, out_tile, 128)

    in_specs = [pl.BlockSpec((tb, in_dim), lambda i, j: (i, 0))]
    flat_args = [x]
    for w, b in mlp_params:
        in_specs.append(pl.BlockSpec(w.shape, lambda i, j: (0, 0)))
        in_specs.append(pl.BlockSpec(b.shape, lambda i, j: (0, 0)))
        flat_args += [w, b]
    in_specs.append(pl.BlockSpec((bottleneck, to), lambda i, j: (0, j)))
    flat_args.append(wl_eff)

    out_shape = (jax.ShapeDtypeStruct((n, out_dim), jnp.float32),
                 jax.ShapeDtypeStruct((n, bottleneck), jnp.float32))
    out_specs = [pl.BlockSpec((tb, to), lambda i, j: (i, j)),
                 pl.BlockSpec((tb, bottleneck), lambda i, j: (i, 0))]

    logits, emb = pl.pallas_call(
        _make_dino_head_kernel(n_mlp),
        out_shape=out_shape,
        grid_spec=pltpu.PrefetchScalarGridSpec(
            num_scalar_prefetch=0,
            grid=(n // tb, out_dim // to),
            in_specs=in_specs,
            out_specs=out_specs,
            scratch_shapes=[pltpu.VMEM((tb, bottleneck), jnp.float32)],
        ),
        compiler_params=pltpu.CompilerParams(
            dimension_semantics=("parallel", "arbitrary"),
            vmem_limit_bytes=_VMEM_LIMIT),
    )(*flat_args)
    return logits, emb


@jax.jit
def _dino_head_forward(x, mlp_params, wl_v):
    wl_eff = weight_norm_pallas(wl_v)            # hoisted, once per step
    return dino_head_pallas(x, mlp_params, wl_eff)


# ------------------------------- module port --------------------------------

class DINOHeadPallas:
    """JAX/Pallas port of DINOHead (use_bn=False, norm_last_layer=True)."""

    def __init__(self, in_dim, out_dim, nlayers=3, hidden_dim=2048,
                 bottleneck_dim=256, seed=0):
        # TODO(synk): use_bn=True (BatchNorm1d between linears) not implemented.
        nlayers = max(nlayers, 1)
        if nlayers == 1:
            dims = [(in_dim, bottleneck_dim)]
        else:
            dims = ([(in_dim, hidden_dim)]
                    + [(hidden_dim, hidden_dim)] * (nlayers - 2)
                    + [(hidden_dim, bottleneck_dim)])

        key = jax.random.PRNGKey(seed)
        keys = jax.random.split(key, len(dims) + 1)
        mlp = []
        for k, (din, dout) in zip(keys[:-1], dims):
            w = 0.02 * jax.random.truncated_normal(k, -2.0, 2.0, (din, dout),
                                                   jnp.float32)
            b = jnp.zeros((1, dout), jnp.float32)   # constant_(bias, 0)
            mlp.append((w, b))
        self.mlp = tuple(mlp)
        # last_layer weight_v, stored transposed as (bottleneck, out_dim)
        self.wl_v = 0.02 * jax.random.truncated_normal(
            keys[-1], -2.0, 2.0, (bottleneck_dim, out_dim), jnp.float32)
        self.out_dim = out_dim
        self.bottleneck_dim = bottleneck_dim

    def __call__(self, x):
        out, emb = _dino_head_forward(x, self.mlp, self.wl_v)
        return out, emb


# ----------------------------- pure-JAX reference ---------------------------

def dino_head_reference(x, mlp_params, wl_v):
    h = x
    n_mlp = len(mlp_params)
    for li, (w, b) in enumerate(mlp_params):
        h = h @ w + b
        if li < n_mlp - 1:
            h = _gelu_exact(h)
    norm = jnp.linalg.norm(h, axis=-1, keepdims=True)
    zn = h / jnp.maximum(norm, 1e-12)
    w_eff = wl_v / jnp.linalg.norm(wl_v, axis=0, keepdims=True)
    return zn @ w_eff, zn


# ----------------------------------- main ------------------------------------

if __name__ == "__main__":
    # Small but lane-dense shapes (all feature dims multiples of 128).
    N, IN_DIM, HIDDEN, BOTTLENECK, OUT_DIM = 256, 384, 512, 256, 1024

    key = jax.random.PRNGKey(0)
    x = jax.random.normal(key, (N, IN_DIM), jnp.float32)

    head = DINOHeadPallas(IN_DIM, OUT_DIM, nlayers=3, hidden_dim=HIDDEN,
                          bottleneck_dim=BOTTLENECK, seed=0)

    out, emb = head(x)
    jax.block_until_ready((out, emb))

    assert out.shape == (N, OUT_DIM) and out.dtype == jnp.float32
    assert emb.shape == (N, BOTTLENECK) and emb.dtype == jnp.float32

    out_ref, emb_ref = dino_head_reference(x, head.mlp, head.wl_v)
    assert jnp.allclose(emb, emb_ref, atol=5e-3, rtol=5e-3), \
        float(jnp.max(jnp.abs(emb - emb_ref)))
    assert jnp.allclose(out, out_ref, atol=5e-3, rtol=5e-3), \
        float(jnp.max(jnp.abs(out - out_ref)))
    # embedding rows must be L2-normalized
    assert jnp.allclose(jnp.linalg.norm(emb, axis=-1), 1.0, atol=1e-3)

    print("KERNEL_OK")
</pallas_src>

<mosaic_0001>
module attributes {stable_mosaic.version = 11 : i64} {
  func.func @_weight_norm_kernel(%arg0: i32, %arg1: memref<256x1024xf32, #tpu.memory_space<vmem>>, %arg2: memref<256x1024xf32, #tpu.memory_space<vmem>>) attributes {dimension_semantics = [#tpu.dimension_semantics<parallel>], iteration_bounds = array<i64: 1>, scalar_prefetch = 0 : i64, scratch_operands = 0 : i64, tpu.core_type = #tpu.core_type<tc>, window_params = [{transform_indices = @transform_0, window_bounds = array<i64: 256, 1024>}, {transform_indices = @transform_1, window_bounds = array<i64: 256, 1024>}]} {
    %c0 = arith.constant 0 : index
    %c0_0 = arith.constant 0 : index
    %0 = vector.load %arg1[%c0, %c0_0] : memref<256x1024xf32, #tpu.memory_space<vmem>>, vector<256x1024xf32>
    %1 = arith.mulf %0, %0 : vector<256x1024xf32>
    %cst = arith.constant dense<0.000000e+00> : vector<1024xf32>
    %2 = vector.multi_reduction <add>, %1, %cst [0] : vector<256x1024xf32> to vector<1024xf32>
    %3 = vector.shape_cast %2 : vector<1024xf32> to vector<1x1024xf32>
    %4 = math.rsqrt %3 : vector<1x1024xf32>
    %5 = vector.broadcast %4 : vector<1x1024xf32> to vector<256x1024xf32>
    %6 = arith.mulf %0, %5 : vector<256x1024xf32>
    %c0_1 = arith.constant 0 : index
    %c0_2 = arith.constant 0 : index
    %7 = vector.load %arg2[%c0_1, %c0_2] : memref<256x1024xf32, #tpu.memory_space<vmem>>, vector<256x1024xf32>
    tpu.vector_store %arg2[%c0_1, %c0_2], %6 {strides = array<i32>} : memref<256x1024xf32, #tpu.memory_space<vmem>>, vector<256x1024xf32>,
    return
  }
  func.func @transform_0(%arg0: i32) -> (i32, i32) {
    %c0_i32 = arith.constant 0 : i32
    %c0_i32_0 = arith.constant 0 : i32
    return %c0_i32, %arg0 : i32, i32
  }
  func.func @transform_1(%arg0: i32) -> (i32, i32) {
    %c0_i32 = arith.constant 0 : i32
    %c0_i32_0 = arith.constant 0 : i32
    return %c0_i32, %arg0 : i32, i32
  }
}

module attributes {stable_mosaic.version = 11 : i64} {
  func.func @kernel(%arg0: i32, %arg1: i32, %arg2: memref<128x384xf32, #tpu.memory_space<vmem>>, %arg3: memref<384x512xf32, #tpu.memory_space<vmem>>, %arg4: memref<1x512xf32, #tpu.memory_space<vmem>>, %arg5: memref<512x512xf32, #tpu.memory_space<vmem>>, %arg6: memref<1x512xf32, #tpu.memory_space<vmem>>, %arg7: memref<512x256xf32, #tpu.memory_space<vmem>>, %arg8: memref<1x256xf32, #tpu.memory_space<vmem>>, %arg9: memref<256x512xf32, #tpu.memory_space<vmem>>, %arg10: memref<128x512xf32, #tpu.memory_space<vmem>>, %arg11: memref<128x256xf32, #tpu.memory_space<vmem>>, %arg12: memref<128x256xf32, #tpu.memory_space<vmem>>) attributes {dimension_semantics = [#tpu.dimension_semantics<parallel>, #tpu.dimension_semantics<arbitrary>], iteration_bounds = array<i64: 2, 2>, scalar_prefetch = 0 : i64, scratch_operands = 1 : i64, tpu.core_type = #tpu.core_type<tc>, window_params = [{transform_indices = @transform_0, window_bounds = array<i64: 128, 384>}, {pipeline_mode = #tpu.pipeline_mode<synchronous>, transform_indices = @transform_1, window_bounds = array<i64: 384, 512>}, {pipeline_mode = #tpu.pipeline_mode<synchronous>, transform_indices = @transform_2, window_bounds = array<i64: 1, 512>}, {pipeline_mode = #tpu.pipeline_mode<synchronous>, transform_indices = @transform_3, window_bounds = array<i64: 512, 512>}, {pipeline_mode = #tpu.pipeline_mode<synchronous>, transform_indices = @transform_4, window_bounds = array<i64: 1, 512>}, {pipeline_mode = #tpu.pipeline_mode<synchronous>, transform_indices = @transform_5, window_bounds = array<i64: 512, 256>}, {pipeline_mode = #tpu.pipeline_mode<synchronous>, transform_indices = @transform_6, window_bounds = array<i64: 1, 256>}, {transform_indices = @transform_7, window_bounds = array<i64: 256, 512>}, {transform_indices = @transform_8, window_bounds = array<i64: 128, 512>}, {transform_indices = @transform_9, window_bounds = array<i64: 128, 256>}]} {
    %c0_i32 = arith.constant 0 : i32
    %0 = arith.cmpi eq, %arg1, %c0_i32 : i32
    %1 = arith.extui %0 : i1 to i32
    %c0_i32_0 = arith.constant 0 : i32
    %2 = arith.cmpi ne, %1, %c0_i32_0 : i32
    scf.if %2 {
      %c0_6 = arith.constant 0 : index
      %c0_7 = arith.constant 0 : index
      %7 = vector.load %arg2[%c0_6, %c0_7] : memref<128x384xf32, #tpu.memory_space<vmem>>, vector<128x384xf32>
      %c0_8 = arith.constant 0 : index
      %c0_9 = arith.constant 0 : index
      %8 = vector.load %arg3[%c0_8, %c0_9] : memref<384x512xf32, #tpu.memory_space<vmem>>, vector<384x512xf32>
      %c0_10 = arith.constant 0 : index
      %c0_11 = arith.constant 0 : index
      %9 = vector.load %arg4[%c0_10, %c0_11] : memref<1x512xf32, #tpu.memory_space<vmem>>, vector<1x512xf32>
      %cst_12 = arith.constant dense<0.000000e+00> : vector<128x512xf32>
      %10 = tpu.matmul %7, %8, %cst_12 {dimension_numbers = #tpu.dot_dimension_numbers<[1], [0], [0], [1], [0, 0, 1, 1], [], []>} : vector<128x384xf32>, vector<384x512xf32>, vector<128x512xf32> -> vector<128x512xf32>
      %11 = vector.broadcast %9 : vector<1x512xf32> to vector<128x512xf32>
      %12 = arith.addf %10, %11 : vector<128x512xf32>
      %cst_13 = arith.constant 5.000000e-01 : f32
      %13 = vector.broadcast %cst_13 : f32 to vector<128x512xf32>
      %14 = arith.mulf %13, %12 : vector<128x512xf32>
      %cst_14 = arith.constant 0.707106769 : f32
      %15 = vector.broadcast %cst_14 : f32 to vector<128x512xf32>
      %16 = arith.mulf %12, %15 : vector<128x512xf32>
      %17 = math.erf %16 : vector<128x512xf32>
      %cst_15 = arith.constant 1.000000e+00 : f32
      %18 = vector.broadcast %cst_15 : f32 to vector<128x512xf32>
      %19 = arith.addf %18, %17 : vector<128x512xf32>
      %20 = arith.mulf %14, %19 : vector<128x512xf32>
      %c0_16 = arith.constant 0 : index
      %c0_17 = arith.constant 0 : index
      %21 = vector.load %arg5[%c0_16, %c0_17] : memref<512x512xf32, #tpu.memory_space<vmem>>, vector<512x512xf32>
      %c0_18 = arith.constant 0 : index
      %c0_19 = arith.constant 0 : index
      %22 = vector.load %arg6[%c0_18, %c0_19] : memref<1x512xf32, #tpu.memory_space<vmem>>, vector<1x512xf32>
      %cst_20 = arith.constant dense<0.000000e+00> : vector<128x512xf32>
      %23 = tpu.matmul %20, %21, %cst_20 {dimension_numbers = #tpu.dot_dimension_numbers<[1], [0], [0], [1], [0, 0, 1, 1], [], []>} : vector<128x512xf32>, vector<512x512xf32>, vector<128x512xf32> -> vector<128x512xf32>
      %24 = vector.broadcast %22 : vector<1x512xf32> to vector<128x512xf32>
      %25 = arith.addf %23, %24 : vector<128x512xf32>
      %cst_21 = arith.constant 5.000000e-01 : f32
      %26 = vector.broadcast %cst_21 : f32 to vector<128x512xf32>
      %27 = arith.mulf %26, %25 : vector<128x512xf32>
      %cst_22 = arith.constant 0.707106769 : f32
      %28 = vector.broadcast %cst_22 : f32 to vector<128x512xf32>
      %29 = arith.mulf %25, %28 : vector<128x512xf32>
      %30 = math.erf %29 : vector<128x512xf32>
      %cst_23 = arith.constant 1.000000e+00 : f32
      %31 = vector.broadcast %cst_23 : f32 to vector<128x512xf32>
      %32 = arith.addf %31, %30 : vector<128x512xf32>
      %33 = arith.mulf %27, %32 : vector<128x512xf32>
      %c0_24 = arith.constant 0 : index
      %c0_25 = arith.constant 0 : index
      %34 = vector.load %arg7[%c0_24, %c0_25] : memref<512x256xf32, #tpu.memory_space<vmem>>, vector<512x256xf32>
      %c0_26 = arith.constant 0 : index
      %c0_27 = arith.constant 0 : index
      %35 = vector.load %arg8[%c0_26, %c0_27] : memref<1x256xf32, #tpu.memory_space<vmem>>, vector<1x256xf32>
      %cst_28 = arith.constant dense<0.000000e+00> : vector<128x256xf32>
      %36 = tpu.matmul %33, %34, %cst_28 {dimension_numbers = #tpu.dot_dimension_numbers<[1], [0], [0], [1], [0, 0, 1, 1], [], []>} : vector<128x512xf32>, vector<512x256xf32>, vector<128x256xf32> -> vector<128x256xf32>
      %37 = vector.broadcast %35 : vector<1x256xf32> to vector<128x256xf32>
      %38 = arith.addf %36, %37 : vector<128x256xf32>
      %39 = arith.mulf %38, %38 : vector<128x256xf32>
      %cst_29 = arith.constant dense<0.000000e+00> : vector<128xf32>
      %40 = vector.multi_reduction <add>, %39, %cst_29 [1] : vector<128x256xf32> to vector<128xf32>
      %41 = vector.shape_cast %40 : vector<128xf32> to vector<128x1xf32>
      %cst_30 = arith.constant 1.000000e-24 : f32
      %42 = vector.broadcast %cst_30 : f32 to vector<128x1xf32>
      %43 = arith.maximumf %41, %42 : vector<128x1xf32>
      %44 = math.rsqrt %43 : vector<128x1xf32>
      %45 = vector.broadcast %44 : vector<128x1xf32> to vector<128x256xf32>
      %46 = arith.mulf %38, %45 : vector<128x256xf32>
      %c0_31 = arith.constant 0 : index
      %c0_32 = arith.constant 0 : index
      %47 = vector.load %arg12[%c0_31, %c0_32] : memref<128x256xf32, #tpu.memory_space<vmem>>, vector<128x256xf32>
      tpu.vector_store %arg12[%c0_31, %c0_32], %46 {strides = array<i32>} : memref<128x256xf32, #tpu.memory_space<vmem>>, vector<128x256xf32>,
      %c0_33 = arith.constant 0 : index
      %c0_34 = arith.constant 0 : index
      %48 = vector.load %arg11[%c0_33, %c0_34] : memref<128x256xf32, #tpu.memory_space<vmem>>, vector<128x256xf32>
      tpu.vector_store %arg11[%c0_33, %c0_34], %46 {strides = array<i32>} : memref<128x256xf32, #tpu.memory_space<vmem>>, vector<128x256xf32>,
    } else {
    }
    %c0 = arith.constant 0 : index
    %c0_1 = arith.constant 0 : index
    %3 = vector.load %arg12[%c0, %c0_1] : memref<128x256xf32, #tpu.memory_space<vmem>>, vector<128x256xf32>
    %c0_2 = arith.constant 0 : index
    %c0_3 = arith.constant 0 : index
    %4 = vector.load %arg9[%c0_2, %c0_3] : memref<256x512xf32, #tpu.memory_space<vmem>>, vector<256x512xf32>
    %cst = arith.constant dense<0.000000e+00> : vector<128x512xf32>
    %5 = tpu.matmul %3, %4, %cst {dimension_numbers = #tpu.dot_dimension_numbers<[1], [0], [0], [1], [0, 0, 1, 1], [], []>} : vector<128x256xf32>, vector<256x512xf32>, vector<128x512xf32> -> vector<128x512xf32>
    %c0_4 = arith.constant 0 : index
    %c0_5 = arith.constant 0 : index
    %6 = vector.load %arg10[%c0_4, %c0_5] : memref<128x512xf32, #tpu.memory_space<vmem>>, vector<128x512xf32>
    tpu.vector_store %arg10[%c0_4, %c0_5], %5 {strides = array<i32>} : memref<128x512xf32, #tpu.memory_space<vmem>>, vector<128x512xf32>,
    return
  }
  func.func @transform_0(%arg0: i32, %arg1: i32) -> (i32, i32) {
    %c0_i32 = arith.constant 0 : i32
    %c0_i32_0 = arith.constant 0 : i32
    return %arg0, %c0_i32 : i32, i32
  }
  func.func @transform_1(%arg0: i32, %arg1: i32) -> (i32, i32) {
    %c0_i32 = arith.constant 0 : i32
    %c0_i32_0 = arith.constant 0 : i32
    %c0_i32_1 = arith.constant 0 : i32
    return %c0_i32, %c0_i32_0 : i32, i32
  }
  func.func @transform_2(%arg0: i32, %arg1: i32) -> (i32, i32) {
    %c0_i32 = arith.constant 0 : i32
    %c0_i32_0 = arith.constant 0 : i32
    %c0_i32_1 = arith.constant 0 : i32
    return %c0_i32, %c0_i32_0 : i32, i32
  }
  func.func @transform_3(%arg0: i32, %arg1: i32) -> (i32, i32) {
    %c0_i32 = arith.constant 0 : i32
    %c0_i32_0 = arith.constant 0 : i32
    %c0_i32_1 = arith.constant 0 : i32
    return %c0_i32, %c0_i32_0 : i32, i32
  }
  func.func @transform_4(%arg0: i32, %arg1: i32) -> (i32, i32) {
    %c0_i32 = arith.constant 0 : i32
    %c0_i32_0 = arith.constant 0 : i32
    %c0_i32_1 = arith.constant 0 : i32
    return %c0_i32, %c0_i32_0 : i32, i32
  }
  func.func @transform_5(%arg0: i32, %arg1: i32) -> (i32, i32) {
    %c0_i32 = arith.constant 0 : i32
    %c0_i32_0 = arith.constant 0 : i32
    %c0_i32_1 = arith.constant 0 : i32
    return %c0_i32, %c0_i32_0 : i32, i32
  }
  func.func @transform_6(%arg0: i32, %arg1: i32) -> (i32, i32) {
    %c0_i32 = arith.constant 0 : i32
    %c0_i32_0 = arith.constant 0 : i32
    %c0_i32_1 = arith.constant 0 : i32
    return %c0_i32, %c0_i32_0 : i32, i32
  }
  func.func @transform_7(%arg0: i32, %arg1: i32) -> (i32, i32) {
    %c0_i32 = arith.constant 0 : i32
    %c0_i32_0 = arith.constant 0 : i32
    return %c0_i32, %arg1 : i32, i32
  }
  func.func @transform_8(%arg0: i32, %arg1: i32) -> (i32, i32) {
    %c0_i32 = arith.constant 0 : i32
    return %arg0, %arg1 : i32, i32
  }
  func.func @transform_9(%arg0: i32, %arg1: i32) -> (i32, i32) {
    %c0_i32 = arith.constant 0 : i32
    %c0_i32_0 = arith.constant 0 : i32
    return %arg0, %c0_i32 : i32, i32
  }
}

</mosaic_0001>

<bundles_post_ra>
// kernel: _dino_head_forward.2
= control target key start
LH: loop header
LB: loop body
LE: loop exit
PB: predicated region body
PF: predicated region fallthrough
CT: control target
= control target key end

     0   :  { %6 = vsyncpa [#allocation3], 0  ;;  %s1654_s6 = smov [#allocation2]   ;;  %s3448_s0 = inlined_call_operand.hbm [shape: f32[256,1024], index: 0, kind: input, shape index: {}]   ;;  %s3449_s1 = inlined_call_operand.vmem [shape: f32[256,1024], index: 1, kind: output, shape index: {}]  }
   0x1   :  { %s12_s7 = sshll.u32 %s1654_s6, 4  ;;  %s1630_s10 = scalar_lea.hbm %s3448_s0, 32768  ;;  %s13_s7 = int_to_ptr.vmem [resolvable:$true] %s12_s7 }
   0x2   :  { %p1631_p0 = scmp.ne.s32.totalorder %s3448_s0, %s1630_s10  ;;  %p1634_p1 = scmp.lt.u32.totalorder %s1630_s10, %s3448_s0 }
   0x4   :  { %p1636_p2 = pnand %p1634_p1, %p1631_p0 }
   0x6   :  { %1639 = shalt.err (!%p1636_p2)
}
   0x7   :  { %s1640_s15 = scalar_lea.vmem %s13_s7, 32768  ;;  %p1645_p4 = scmp.lt.s32.totalorder %s13_s7, %s13_s7 }
   0x8   :  { %p1641_p3 = scmp.ne.s32.totalorder %s13_s7, %s1640_s15  ;;  %p1646_p5 = scmp.lt.s32.totalorder %s1640_s15, %s1640_s15 }
   0xa   :  { %p1647_p6 = por %p1646_p5, %p1645_p4 }
   0xc   :  { %p1648_p7 = pnand %p1647_p6, %p1641_p3 }
   0xe   :  { %1651 = shalt.err (!%p1648_p7)
}
   0xf   :  { %s1655_s16 = smov 1024   ;;  %s1656_s17 = smov 64  }
  0x10   :  { %18 = dma.hbm_to_vmem [thread:$0]  %s3448_s0, 32768, %s13_s7, [#allocation3], %s1655_s16, %s1655_s16, %s1656_s17  }
  0x11   :  { %1652 = dma.done.wait [#allocation3], 32768  }
  0x12   :  { %1653 = vsyncadd [#allocation3], 4294934528  ;;  %v22_v0 = vld [vmem:[#allocation2] sm:$0xff] }
  0x13   :  { %v30_v1 = vld [vmem:[#allocation2 + $0x40] sm:$0xff]  ;;  %v278_v6 = vmul.f32 %v22_v0, %v22_v0 }
  0x14   :  { %v38_v2 = vld [vmem:[#allocation2 + $0x80] sm:$0xff]  ;;  %v286_v7 = vmul.f32 %v30_v1, %v30_v1  ;;  %v23_v1 = vld [vmem:[#allocation2 + $0x8] sm:$0xff] }
  0x15   :  { %v46_v3 = vld [vmem:[#allocation2 + $0xc0] sm:$0xff]  ;;  %v294_v8 = vmul.f32 %v38_v2, %v38_v2 }
  0x16   :  { %v54_v4 = vld [vmem:[#allocation2 + $0x100] sm:$0xff]  ;;  %v302_v15 = vmul.f32 %v46_v3, %v46_v3  ;;  %v534_v16 = vadd.f32 %v286_v7, %v278_v6  ;;  %v39_v6 = vld [vmem:[#allocation2 + $0x88] sm:$0xff] }
  0x17   :  { %v62_v5 = vld [vmem:[#allocation2 + $0x140] sm:$0xff]  ;;  %v310_v20 = vmul.f32 %v54_v4, %v54_v4  ;;  %v47_v7 = vld [vmem:[#allocation2 + $0xc8] sm:$0xff] }
  0x18   :  { %v70_v9 = vld [vmem:[#allocation2 + $0x180] sm:$0xff]  ;;  %v318_v21 = vmul.f32 %v62_v5, %v62_v5  ;;  %v535_v30 = vadd.f32 %v534_v16, %v294_v8  ;;  %v31_v5 = vld [vmem:[#allocation2 + $0x48] sm:$0xff]  ;;  %v279_v8 = vmul.f32 %v23_v1, %v23_v1 }
  0x19   :  { %v78_v10 = vld [vmem:[#allocation2 + $0x1c0] sm:$0xff]  ;;  %v326_v22 = vmul.f32 %v70_v9, %v70_v9 }
  0x1a   :  { %v86_v11 = vld [vmem:[#allocation2 + $0x200] sm:$0xff]  ;;  %v1679_v23 = vmul.f32 %v78_v10, %v78_v10  ;;  %v536_v44 = vadd.f32 %v535_v30, %v302_v15  ;;  %v55_v10 = vld [vmem:[#allocation2 + $0x108] sm:$0xff]  ;;  %v303_v15 = vmul.f32 %v47_v7, %v47_v7 }
  0x1b   :  { %v94_v12 = vld [vmem:[#allocation2 + $0x240] sm:$0xff]  ;;  %v1681_v27 = vmul.f32 %v86_v11, %v86_v11  ;;  %v63_v11 = vld [vmem:[#allocation2 + $0x148] sm:$0xff] }
  0x1c   :  { %v102_v13 = vld [vmem:[#allocation2 + $0x280] sm:$0xff]  ;;  %v1683_v28 = vmul.f32 %v94_v12, %v94_v12  ;;  %v537_v58 = vadd.f32 %v536_v44, %v310_v20  ;;  %v71_v12 = vld [vmem:[#allocation2 + $0x188] sm:$0xff]  ;;  %v311_v20 = vmul.f32 %v55_v10, %v55_v10 }
  0x1d   :  { %v110_v14 = vld [vmem:[#allocation2 + $0x2c0] sm:$0xff]  ;;  %v1685_v29 = vmul.f32 %v102_v13, %v102_v13  ;;  %v287_v13 = vmul.f32 %v31_v5, %v31_v5  ;;  %v119_v30 = vld [vmem:[#allocation2 + $0x308] sm:$0xff] }
  0x1e   :  { %v118_v17 = vld [vmem:[#allocation2 + $0x300] sm:$0xff]  ;;  %v1687_v34 = vmul.f32 %v110_v14, %v110_v14  ;;  %v538_v4 = vadd.f32 %v537_v58, %v318_v21  ;;  %v295_v14 = vmul.f32 %v39_v6, %v39_v6  ;;  %v103_v21 = vld [vmem:[#allocation2 + $0x288] sm:$0xff] }
  0x1f   :  { %v126_v18 = vld [vmem:[#allocation2 + $0x340] sm:$0xff]  ;;  %v1689_v35 = vmul.f32 %v118_v17, %v118_v17  ;;  %v79_v17 = vld [vmem:[#allocation2 + $0x1c8] sm:$0xff] }
  0x20   :  { %v134_v19 = vld [vmem:[#allocation2 + $0x380] sm:$0xff]  ;;  %v1691_v36 = vmul.f32 %v126_v18, %v126_v18  ;;  %v539_v16 = vadd.f32 %v538_v4, %v326_v22  ;;  %v87_v18 = vld [vmem:[#allocation2 + $0x208] sm:$0xff] }
  0x21   :  { %v142_v24 = vld [vmem:[#allocation2 + $0x3c0] sm:$0xff]  ;;  %v1693_v37 = vmul.f32 %v134_v19, %v134_v19  ;;  %v95_v19 = vld [vmem:[#allocation2 + $0x248] sm:$0xff] }
  0x22   :  { %v150_v25 = vld [vmem:[#allocation2 + $0x400] sm:$0xff]  ;;  %v1695_v41 = vmul.f32 %v142_v24, %v142_v24  ;;  %v319_v24 = vmul.f32 %v63_v11, %v63_v11  ;;  %v127_v22 = vld [vmem:[#allocation2 + $0x348] sm:$0xff] }
  0x23   :  { %v158_v26 = vld [vmem:[#allocation2 + $0x440] sm:$0xff]  ;;  %v1697_v42 = vmul.f32 %v150_v25, %v150_v25  ;;  %v1729_v25 = vmul.f32 %v71_v12, %v71_v12  ;;  %v143_v44 = vld [vmem:[#allocation2 + $0x3c8] sm:$0xff]  ;;  %v1744_v58 = vmul.f32 %v127_v22, %v127_v22 }
  0x24   :  { %v166_v31 = vld [vmem:[#allocation2 + $0x480] sm:$0xff]  ;;  %v1699_v43 = vmul.f32 %v158_v26, %v158_v26  ;;  %v111_v26 = vld [vmem:[#allocation2 + $0x2c8] sm:$0xff] }
  0x25   :  { %v174_v32 = vld [vmem:[#allocation2 + $0x4c0] sm:$0xff]  ;;  %v1701_v48 = vmul.f32 %v166_v31, %v166_v31  ;;  %v1731_v31 = vmul.f32 %v79_v17, %v79_v17  ;;  %v175_v4 = vld [vmem:[#allocation2 + $0x4c8] sm:$0xff] }
  0x26   :  { %v182_v33 = vld [vmem:[#allocation2 + $0x500] sm:$0xff]  ;;  %v1703_v49 = vmul.f32 %v174_v32, %v174_v32  ;;  %v1733_v32 = vmul.f32 %v87_v18, %v87_v18  ;;  %v183_v5 = vld [vmem:[#allocation2 + $0x508] sm:$0xff] }
  0x27   :  { %v190_v38 = vld [vmem:[#allocation2 + $0x540] sm:$0xff]  ;;  %v1705_v50 = vmul.f32 %v182_v33, %v182_v33  ;;  %v1735_v33 = vmul.f32 %v95_v19, %v95_v19  ;;  %v191_v6 = vld [vmem:[#allocation2 + $0x548] sm:$0xff]  ;;  %v1759_v17 = vmul.f32 %v183_v5, %v183_v5 }
  0x28   :  { %v198_v39 = vld [vmem:[#allocation2 + $0x580] sm:$0xff]  ;;  %v1707_v51 = vmul.f32 %v190_v38, %v190_v38  ;;  %v571_v38 = vadd.f32 %v287_v13, %v279_v8  ;;  %v199_v11 = vld [vmem:[#allocation2 + $0x588] sm:$0xff]  ;;  %v1761_v18 = vmul.f32 %v191_v6, %v191_v6  ;;  %v24_v6 = vld [vmem:[#allocation2 + $0x10] sm:$0xff] }
  0x29   :  { %v206_v40 = vld [vmem:[#allocation2 + $0x5c0] sm:$0xff]  ;;  %v1709_v55 = vmul.f32 %v198_v39, %v198_v39  ;;  %v540_v39 = vadd.f32 %v539_v16, %v1679_v23  ;;  %v207_v12 = vld [vmem:[#allocation2 + $0x5c8] sm:$0xff]  ;;  %v1757_v16 = vmul.f32 %v175_v4, %v175_v4 }
  0x2a   :  { %v214_v45 = vld [vmem:[#allocation2 + $0x600] sm:$0xff]  ;;  %v1711_v56 = vmul.f32 %v206_v40, %v206_v40  ;;  %v135_v40 = vld [vmem:[#allocation2 + $0x388] sm:$0xff]  ;;  %v572_v1 = vadd.f32 %v571_v38, %v295_v14  ;;  %v1766_v38 = vmul.f32 %v207_v12, %v207_v12 }
  0x2b   :  { %v222_v46 = vld [vmem:[#allocation2 + $0x640] sm:$0xff]  ;;  %v1713_v57 = vmul.f32 %v214_v45, %v214_v45  ;;  %v1738_v45 = vmul.f32 %v103_v21, %v103_v21  ;;  %v541_v23 = vadd.f32 %v540_v39, %v1681_v27  ;;  %v215_v13 = vld [vmem:[#allocation2 + $0x608] sm:$0xff] }
  0x2c   :  { %v230_v47 = vld [vmem:[#allocation2 + $0x680] sm:$0xff]  ;;  %v1715_v61 = vmul.f32 %v222_v46, %v222_v46  ;;  %v1740_v46 = vmul.f32 %v111_v26, %v111_v26  ;;  %v573_v14 = vadd.f32 %v572_v1, %v303_v15  ;;  %v223_v19 = vld [vmem:[#allocation2 + $0x648] sm:$0xff]  ;;  %3453 = vst [vmem:[#allocation8_spill] sm:$0xff] %v1766_v38  ;;  %v1768_v39 = vmul.f32 %v215_v13, %v215_v13 }
  0x2d   :  { %v238_v52 = vld [vmem:[#allocation2 + $0x6c0] sm:$0xff]  ;;  %v1717_v62 = vmul.f32 %v230_v47, %v230_v47  ;;  %v1742_v47 = vmul.f32 %v119_v30, %v119_v30  ;;  %v542_v27 = vadd.f32 %v541_v23, %v1683_v28  ;;  %v231_v21 = vld [vmem:[#allocation2 + $0x688] sm:$0xff]  ;;  %v1764_v30 = vmul.f32 %v199_v11, %v199_v11  ;;  %v32_v11 = vld [vmem:[#allocation2 + $0x50] sm:$0xff] }
  0x2e   :  { %v246_v53 = vld [vmem:[#allocation2 + $0x700] sm:$0xff]  ;;  %v1719_v63 = vmul.f32 %v238_v52, %v238_v52  ;;  %v151_v52 = vld [vmem:[#allocation2 + $0x408] sm:$0xff]  ;;  %3454 = vst [vmem:[#allocation9_spill] sm:$0xff] %v1768_v39  ;;  %v574_v15 = vadd.f32 %v573_v14, %v311_v20  ;;  %v1787_v20 = vmul.f32 %v32_v11, %v32_v11  ;;  %v64_v14 = vld [vmem:[#allocation2 + $0x150] sm:$0xff] }
  0x2f   :  { %v254_v54 = vld [vmem:[#allocation2 + $0x740] sm:$0xff]  ;;  %v1721_v0 = vmul.f32 %v246_v53, %v246_v53  ;;  %v159_v53 = vld [vmem:[#allocation2 + $0x448] sm:$0xff]  ;;  %v1751_v7 = vmul.f32 %v151_v52, %v151_v52  ;;  %v1770_v52 = vmul.f32 %v223_v19, %v223_v19  ;;  %v543_v28 = vadd.f32 %v542_v27, %v1685_v29  ;;  %v40_v19 = vld [vmem:[#allocation2 + $0x90] sm:$0xff] }
  0x30   :  { %v262_v59 = vld [vmem:[#allocation2 + $0x780] sm:$0xff]  ;;  %v1723_v2 = vmul.f32 %v254_v54, %v254_v54  ;;  %v167_v54 = vld [vmem:[#allocation2 + $0x488] sm:$0xff]  ;;  %v1753_v8 = vmul.f32 %v159_v53, %v159_v53  ;;  %v1772_v53 = vmul.f32 %v231_v21, %v231_v21  ;;  %v575_v13 = vadd.f32 %v574_v15, %v319_v24  ;;  %v48_v21 = vld [vmem:[#allocation2 + $0xd0] sm:$0xff] }
  0x31   :  { %v270_v60 = vld [vmem:[#allocation2 + $0x7c0] sm:$0xff]  ;;  %v1725_v3 = vmul.f32 %v262_v59, %v262_v59  ;;  %v1746_v59 = vmul.f32 %v135_v40, %v135_v40  ;;  %v1755_v10 = vmul.f32 %v167_v54, %v167_v54  ;;  %v239_v26 = vld [vmem:[#allocation2 + $0x6c8] sm:$0xff]  ;;  %3455 = vst [vmem:[#allocation10_spill] sm:$0xff] %v1770_v52  ;;  %v544_v29 = vadd.f32 %v543_v28, %v1687_v34  ;;  %v72_v27 = vld [vmem:[#allocation2 + $0x190] sm:$0xff] }
  0x32   :  { %3450 = vst [vmem:[#allocation5_spill] sm:$0xff] %v1723_v2  ;;  %v1727_v9 = vmul.f32 %v270_v60, %v270_v60  ;;  %v1748_v60 = vmul.f32 %v143_v44, %v143_v44  ;;  %v247_v22 = vld [vmem:[#allocation2 + $0x708] sm:$0xff]  ;;  %3456 = vst [vmem:[#allocation11_spill] sm:$0xff] %v1772_v53  ;;  %v1774_v54 = vmul.f32 %v239_v26, %v239_v26  ;;  %v56_v53 = vld [vmem:[#allocation2 + $0x110] sm:$0xff] }
  0x33   :  { %3451 = vst [vmem:[#allocation6_spill] sm:$0xff] %v1725_v3  ;;  %v255_v40 = vld [vmem:[#allocation2 + $0x748] sm:$0xff]  ;;  %v1777_v23 = vmul.f32 %v247_v22, %v247_v22  ;;  %v1785_v26 = vmul.f32 %v24_v6, %v24_v6  ;;  %v80_v22 = vld [vmem:[#allocation2 + $0x1d0] sm:$0xff]  ;;  %v576_v24 = vadd.f32 %v575_v13, %v1729_v25  ;;  %v1797_v6 = vmul.f32 %v64_v14, %v64_v14 }
  0x34   :  { %3452 = vst [vmem:[#allocation7_spill] sm:$0xff] %v1727_v9  ;;  %v263_v44 = vld [vmem:[#allocation2 + $0x788] sm:$0xff]  ;;  %3457 = vst [vmem:[#allocation12_spill] sm:$0xff] %v1774_v54  ;;  %v1779_v4 = vmul.f32 %v255_v40, %v255_v40  ;;  %v1790_v40 = vmul.f32 %v40_v19, %v40_v19  ;;  %v88_v15 = vld [vmem:[#allocation2 + $0x210] sm:$0xff]  ;;  %v1799_v11 = vmul.f32 %v72_v27, %v72_v27 }
  0x35   :  { %v271_v1 = vld [vmem:[#allocation2 + $0x7c8] sm:$0xff]  ;;  %3458 = vst [vmem:[#allocation13_spill] sm:$0xff] %v1777_v23  ;;  %v1781_v5 = vmul.f32 %v263_v44, %v263_v44  ;;  %v1792_v44 = vmul.f32 %v48_v21, %v48_v21  ;;  %v545_v34 = vadd.f32 %v544_v29, %v1689_v35  ;;  %v112_v28 = vld [vmem:[#allocation2 + $0x2d0] sm:$0xff]  ;;  %v1804_v21 = vmul.f32 %v88_v15, %v88_v15 }
  0x36   :  { %3459 = vst [vmem:[#allocation14_spill] sm:$0xff] %v1779_v4  ;;  %v1783_v12 = vmul.f32 %v271_v1, %v271_v1  ;;  %v96_v1 = vld [vmem:[#allocation2 + $0x250] sm:$0xff]  ;;  %v1801_v4 = vmul.f32 %v80_v22, %v80_v22  ;;  %v577_v25 = vadd.f32 %v576_v24, %v1731_v31  ;;  %v1811_v27 = vmul.f32 %v112_v28, %v112_v28 }
  0x37   :  { %3460 = vst [vmem:[#allocation15_spill] sm:$0xff] %v1781_v5  ;;  %v1794_v5 = vmul.f32 %v56_v53, %v56_v53  ;;  %v120_v19 = vld [vmem:[#allocation2 + $0x310] sm:$0xff]  ;;  %v1806_v53 = vmul.f32 %v96_v1, %v96_v1  ;;  %v546_v35 = vadd.f32 %v545_v34, %v1691_v36 }
  0x38   :  { %3461 = vst [vmem:[#allocation16_spill] sm:$0xff] %v1783_v12  ;;  %v104_v12 = vld [vmem:[#allocation2 + $0x290] sm:$0xff]  ;;  %v1813_v22 = vmul.f32 %v120_v19, %v120_v19  ;;  %v578_v31 = vadd.f32 %v577_v25, %v1733_v32 }
  0x39   :  { %v128_v23 = vld [vmem:[#allocation2 + $0x350] sm:$0xff]  ;;  %v1808_v54 = vmul.f32 %v104_v12, %v104_v12  ;;  %v547_v36 = vadd.f32 %v546_v35, %v1693_v37 }
  0x3a   :  { %v136_v13 = vld [vmem:[#allocation2 + $0x390] sm:$0xff]  ;;  %v1815_v52 = vmul.f32 %v128_v23, %v128_v23  ;;  %v579_v32 = vadd.f32 %v578_v31, %v1735_v33 }
  0x3b   :  { %v144_v14 = vld [vmem:[#allocation2 + $0x3d0] sm:$0xff]  ;;  %v1818_v1 = vmul.f32 %v136_v13, %v136_v13  ;;  %v548_v37 = vadd.f32 %v547_v36, %v1695_v41  ;;  %v41_v41 = vld [vmem:[#allocation2 + $0x98] sm:$0xff] }
  0x3c   :  { %v152_v9 = vld [vmem:[#allocation2 + $0x410] sm:$0xff]  ;;  %v1820_v12 = vmul.f32 %v144_v14, %v144_v14  ;;  %v580_v33 = vadd.f32 %v579_v32, %v1738_v45 }
  0x3d   :  { %v160_v29 = vld [vmem:[#allocation2 + $0x450] sm:$0xff]  ;;  %3462 = vst [vmem:[#allocation17_spill] sm:$0xff] %v1818_v1  ;;  %v1822_v39 = vmul.f32 %v152_v9, %v152_v9  ;;  %v549_v36 = vadd.f32 %v548_v37, %v1697_v42  ;;  %v97_v37 = vld [vmem:[#allocation2 + $0x258] sm:$0xff] }
  0x3e   :  { %v168_v15 = vld [vmem:[#allocation2 + $0x490] sm:$0xff]  ;;  %v1825_v19 = vmul.f32 %v160_v29, %v160_v29  ;;  %v581_v32 = vadd.f32 %v580_v33, %v1740_v46  ;;  %v121_v33 = vld [vmem:[#allocation2 + $0x318] sm:$0xff] }
  0x3f   :  { %v176_v3 = vld [vmem:[#allocation2 + $0x4d0] sm:$0xff]  ;;  %3463 = vst [vmem:[#allocation18_spill] sm:$0xff] %v1822_v39  ;;  %v1827_v23 = vmul.f32 %v168_v15, %v168_v15 }
  0x40   :  { %v184_v24 = vld [vmem:[#allocation2 + $0x510] sm:$0xff]  ;;  %3464 = vst [vmem:[#allocation19_spill] sm:$0xff] %v1825_v19  ;;  %v1829_v38 = vmul.f32 %v176_v3, %v176_v3  ;;  %v582_v46 = vadd.f32 %v581_v32, %v1742_v47  ;;  %v169_v32 = vld [vmem:[#allocation2 + $0x498] sm:$0xff] }
  0x41   :  { %v192_v28 = vld [vmem:[#allocation2 + $0x550] sm:$0xff]  ;;  %3465 = vst [vmem:[#allocation20_spill] sm:$0xff] %v1827_v23  ;;  %v1832_v14 = vmul.f32 %v184_v24, %v184_v24  ;;  %v185_v23 = vld [vmem:[#allocation2 + $0x518] sm:$0xff] }
  0x42   :  { %v200_v2 = vld [vmem:[#allocation2 + $0x590] sm:$0xff]  ;;  %3466 = vst [vmem:[#allocation21_spill] sm:$0xff] %v1829_v38  ;;  %v1834_v9 = vmul.f32 %v192_v28, %v192_v28  ;;  %v583_v47 = vadd.f32 %v582_v46, %v1744_v58  ;;  %v217_v46 = vld [vmem:[#allocation2 + $0x618] sm:$0xff] }
  0x43   :  { %v208_v34 = vld [vmem:[#allocation2 + $0x5d0] sm:$0xff]  ;;  %3467 = vst [vmem:[#allocation22_spill] sm:$0xff] %v1832_v14  ;;  %v1836_v39 = vmul.f32 %v200_v2, %v200_v2 }
  0x44   :  { %v216_v13 = vld [vmem:[#allocation2 + $0x610] sm:$0xff]  ;;  %3468 = vst [vmem:[#allocation23_spill] sm:$0xff] %v1834_v9  ;;  %v1839_v15 = vmul.f32 %v208_v34, %v208_v34  ;;  %v584_v58 = vadd.f32 %v583_v47, %v1746_v59  ;;  %v265_v47 = vld [vmem:[#allocation2 + $0x798] sm:$0xff] }
  0x45   :  { %v224_v1 = vld [vmem:[#allocation2 + $0x650] sm:$0xff]  ;;  %3469 = vst [vmem:[#allocation24_spill] sm:$0xff] %v1836_v39  ;;  %v1841_v3 = vmul.f32 %v216_v13, %v216_v13 }
  0x46   :  { %v232_v25 = vld [vmem:[#allocation2 + $0x690] sm:$0xff]  ;;  %3470 = vst [vmem:[#allocation25_spill] sm:$0xff] %v1839_v15  ;;  %v1843_v38 = vmul.f32 %v224_v1, %v224_v1  ;;  %v25_v1 = vld [vmem:[#allocation2 + $0x18] sm:$0xff]  ;;  %v1884_v15 = vmul.f32 %v97_v37, %v97_v37  ;;  %v585_v59 = vadd.f32 %v584_v58, %v1748_v60 }
  0x47   :  { %v240_v29 = vld [vmem:[#allocation2 + $0x6d0] sm:$0xff]  ;;  %3471 = vst [vmem:[#allocation26_spill] sm:$0xff] %v1841_v3  ;;  %v1846_v28 = vmul.f32 %v232_v25, %v232_v25  ;;  %v608_v25 = vadd.f32 %v1787_v20, %v1785_v26  ;;  %v550_v26 = vadd.f32 %v549_v36, %v1699_v43  ;;  %v137_v3 = vld [vmem:[#allocation2 + $0x398] sm:$0xff] }
  0x48   :  { %v248_v19 = vld [vmem:[#allocation2 + $0x710] sm:$0xff]  ;;  %3472 = vst [vmem:[#allocation27_spill] sm:$0xff] %v1843_v38  ;;  %v1848_v2 = vmul.f32 %v240_v29, %v240_v29  ;;  %v33_v38 = vld [vmem:[#allocation2 + $0x58] sm:$0xff]  ;;  %3479 = vst [vmem:[#allocation34_spill] sm:$0xff] %v1884_v15  ;;  %v1897_v15 = vmul.f32 %v137_v3, %v137_v3  ;;  %v1908_v3 = vmul.f32 %v169_v32, %v169_v32 }
  0x49   :  { %v256_v35 = vld [vmem:[#allocation2 + $0x750] sm:$0xff]  ;;  %3473 = vst [vmem:[#allocation28_spill] sm:$0xff] %v1846_v28  ;;  %v1850_v39 = vmul.f32 %v248_v19, %v248_v19  ;;  %v49_v29 = vld [vmem:[#allocation2 + $0xd8] sm:$0xff]  ;;  %v1864_v45 = vmul.f32 %v33_v38, %v33_v38  ;;  %v609_v20 = vadd.f32 %v608_v25, %v1790_v40  ;;  %v551_v43 = vadd.f32 %v550_v26, %v1701_v48 }
  0x4a   :  { %v264_v24 = vld [vmem:[#allocation2 + $0x790] sm:$0xff]  ;;  %3474 = vst [vmem:[#allocation29_spill] sm:$0xff] %v1848_v2  ;;  %v1853_v31 = vmul.f32 %v256_v35, %v256_v35  ;;  %v57_v2 = vld [vmem:[#allocation2 + $0x118] sm:$0xff]  ;;  %3482 = vst [vmem:[#allocation37_spill] sm:$0xff] %v1897_v15  ;;  %v586_v60 = vadd.f32 %v585_v59, %v1751_v7 }
  0x4b   :  { %v272_v14 = vld [vmem:[#allocation2 + $0x7d0] sm:$0xff]  ;;  %3475 = vst [vmem:[#allocation30_spill] sm:$0xff] %v1850_v39  ;;  %v1855_v34 = vmul.f32 %v264_v24, %v264_v24  ;;  %v65_v19 = vld [vmem:[#allocation2 + $0x158] sm:$0xff]  ;;  %v1862_v39 = vmul.f32 %v25_v1, %v25_v1  ;;  %v1871_v42 = vmul.f32 %v57_v2, %v57_v2  ;;  %v610_v40 = vadd.f32 %v609_v20, %v1792_v44 }
  0x4c   :  { %3476 = vst [vmem:[#allocation31_spill] sm:$0xff] %v1853_v31  ;;  %v1857_v13 = vmul.f32 %v272_v14, %v272_v14  ;;  %v73_v35 = vld [vmem:[#allocation2 + $0x198] sm:$0xff]  ;;  %v1875_v38 = vmul.f32 %v65_v19, %v65_v19  ;;  %v552_v48 = vadd.f32 %v551_v43, %v1703_v49  ;;  %v587_v7 = vadd.f32 %v586_v60, %v1753_v8  ;;  %v114_v60 = vld [vmem:[#allocation2 + $0x2e0] sm:$0xff] }
  0x4d   :  { %3477 = vst [vmem:[#allocation32_spill] sm:$0xff] %v1855_v34  ;;  %v81_v14 = vld [vmem:[#allocation2 + $0x1d8] sm:$0xff]  ;;  %v1869_v34 = vmul.f32 %v49_v29, %v49_v29  ;;  %v1877_v28 = vmul.f32 %v73_v35, %v73_v35  ;;  %v611_v44 = vadd.f32 %v610_v40, %v1794_v5 }
  0x4e   :  { %3478 = vst [vmem:[#allocation33_spill] sm:$0xff] %v1857_v13  ;;  %v89_v24 = vld [vmem:[#allocation2 + $0x218] sm:$0xff]  ;;  %v1867_v13 = vmul.f32 %v41_v41, %v41_v41  ;;  %v1880_v29 = vmul.f32 %v81_v14, %v81_v14  ;;  %v553_v49 = vadd.f32 %v552_v48, %v1705_v50  ;;  %v588_v8 = vadd.f32 %v587_v7, %v1755_v10  ;;  %v138_v7 = vld [vmem:[#allocation2 + $0x3a0] sm:$0xff] }
  0x4f   :  { %v105_v1 = vld [vmem:[#allocation2 + $0x298] sm:$0xff]  ;;  %v1882_v2 = vmul.f32 %v89_v24, %v89_v24  ;;  %v1893_v24 = vmul.f32 %v121_v33, %v121_v33  ;;  %v612_v5 = vadd.f32 %v611_v44, %v1797_v6  ;;  %v26_v44 = vld [vmem:[#allocation2 + $0x20] sm:$0xff] }
  0x50   :  { %v113_v31 = vld [vmem:[#allocation2 + $0x2d8] sm:$0xff]  ;;  %v1888_v35 = vmul.f32 %v105_v1, %v105_v1  ;;  %v554_v50 = vadd.f32 %v553_v49, %v1707_v51  ;;  %v58_v49 = vld [vmem:[#allocation2 + $0x120] sm:$0xff]  ;;  %v1947_v59 = vmul.f32 %v26_v44, %v26_v44  ;;  %v589_v10 = vadd.f32 %v588_v8, %v1757_v16 }
  0x51   :  { %v129_v41 = vld [vmem:[#allocation2 + $0x358] sm:$0xff]  ;;  %v1890_v9 = vmul.f32 %v113_v31, %v113_v31  ;;  %3481 = vst [vmem:[#allocation36_spill] sm:$0xff] %v1893_v24  ;;  %v613_v6 = vadd.f32 %v612_v5, %v1799_v11  ;;  %v66_v5 = vld [vmem:[#allocation2 + $0x160] sm:$0xff]  ;;  %v1959_v44 = vmul.f32 %v58_v49, %v58_v49 }
  0x52   :  { %v145_v36 = vld [vmem:[#allocation2 + $0x3d8] sm:$0xff]  ;;  %v1895_v37 = vmul.f32 %v129_v41, %v129_v41  ;;  %v555_v51 = vadd.f32 %v554_v50, %v1709_v55  ;;  %v590_v16 = vadd.f32 %v589_v10, %v1759_v17  ;;  %v170_v8 = vld [vmem:[#allocation2 + $0x4a0] sm:$0xff] }
  0x53   :  { %v153_v25 = vld [vmem:[#allocation2 + $0x418] sm:$0xff]  ;;  %3480 = vst [vmem:[#allocation35_spill] sm:$0xff] %v1890_v9  ;;  %v1901_v31 = vmul.f32 %v145_v36, %v145_v36  ;;  %v614_v11 = vadd.f32 %v613_v6, %v1801_v4  ;;  %v202_v10 = vld [vmem:[#allocation2 + $0x5a0] sm:$0xff] }
  0x54   :  { %v161_v19 = vld [vmem:[#allocation2 + $0x458] sm:$0xff]  ;;  %v1903_v9 = vmul.f32 %v153_v25, %v153_v25  ;;  %v1914_v25 = vmul.f32 %v185_v23, %v185_v23  ;;  %v556_v55 = vadd.f32 %v555_v51, %v1711_v56  ;;  %v122_v51 = vld [vmem:[#allocation2 + $0x320] sm:$0xff]  ;;  %v591_v17 = vadd.f32 %v590_v16, %v1761_v18 }
  0x55   :  { %v177_v14 = vld [vmem:[#allocation2 + $0x4d8] sm:$0xff]  ;;  %v1906_v41 = vmul.f32 %v161_v19, %v161_v19  ;;  %v615_v4 = vadd.f32 %v614_v11, %v1804_v21  ;;  %v130_v11 = vld [vmem:[#allocation2 + $0x360] sm:$0xff] }
  0x56   :  { %v193_v26 = vld [vmem:[#allocation2 + $0x558] sm:$0xff]  ;;  %3483 = vst [vmem:[#allocation38_spill] sm:$0xff] %v1903_v9  ;;  %v1910_v15 = vmul.f32 %v177_v14, %v177_v14  ;;  %v1923_v14 = vmul.f32 %v217_v46, %v217_v46  ;;  %v42_v46 = vld [vmem:[#allocation2 + $0xa0] sm:$0xff]  ;;  %v557_v56 = vadd.f32 %v556_v55, %v1713_v57  ;;  %v592_v18 = vadd.f32 %v591_v17, %v1764_v30 }
  0x57   :  { %v201_v20 = vld [vmem:[#allocation2 + $0x598] sm:$0xff]  ;;  %3484 = vst [vmem:[#allocation39_spill] sm:$0xff] %v1906_v41  ;;  %v1916_v9 = vmul.f32 %v193_v26, %v193_v26  ;;  %v34_v26 = vld [vmem:[#allocation2 + $0x60] sm:$0xff]  ;;  %v1953_v50 = vmul.f32 %v42_v46, %v42_v46  ;;  %v616_v21 = vadd.f32 %v615_v4, %v1806_v53 }
  0x58   :  { %v209_v1 = vld [vmem:[#allocation2 + $0x5d8] sm:$0xff]  ;;  %v1919_v41 = vmul.f32 %v201_v20, %v201_v20  ;;  %3485 = vst [vmem:[#allocation40_spill] sm:$0xff] %v1923_v14  ;;  %v50_v14 = vld [vmem:[#allocation2 + $0xe0] sm:$0xff]  ;;  %v558_v57 = vadd.f32 %v557_v56, %v1715_v61 }
  0x59   :  { %v225_v33 = vld [vmem:[#allocation2 + $0x658] sm:$0xff]  ;;  %v1921_v32 = vmul.f32 %v209_v1, %v209_v1  ;;  %v1955_v6 = vmul.f32 %v50_v14, %v50_v14  ;;  %v617_v53 = vadd.f32 %v616_v21, %v1808_v54  ;;  %v154_v55 = vld [vmem:[#allocation2 + $0x420] sm:$0xff] }
  0x5a   :  { %v233_v24 = vld [vmem:[#allocation2 + $0x698] sm:$0xff]  ;;  %v1927_v48 = vmul.f32 %v225_v33, %v225_v33  ;;  %v1940_v33 = vmul.f32 %v265_v47, %v265_v47  ;;  %v90_v47 = vld [vmem:[#allocation2 + $0x220] sm:$0xff]  ;;  %v559_v61 = vadd.f32 %v558_v57, %v1717_v62 }
  0x5b   :  { %v241_v43 = vld [vmem:[#allocation2 + $0x6d8] sm:$0xff]  ;;  %v1929_v23 = vmul.f32 %v233_v24, %v233_v24  ;;  %v1971_v49 = vmul.f32 %v90_v47, %v90_v47  ;;  %v162_v4 = vld [vmem:[#allocation2 + $0x460] sm:$0xff]  ;;  %v1983_v47 = vmul.f32 %v122_v51, %v122_v51  ;;  %v618_v54 = vadd.f32 %v617_v53, %v1811_v27 }
  0x5c   :  { %v249_v40 = vld [vmem:[#allocation2 + $0x718] sm:$0xff]  ;;  %v1932_v58 = vmul.f32 %v241_v43, %v241_v43  ;;  %3487 = vst [vmem:[#allocation42_spill] sm:$0xff] %v1940_v33  ;;  %v645_v43 = vadd.f32 %v1864_v45, %v1862_v39  ;;  %v106_v45 = vld [vmem:[#allocation2 + $0x2a0] sm:$0xff]  ;;  %v1995_v51 = vmul.f32 %v154_v55, %v154_v55  ;;  %v560_v62 = vadd.f32 %v559_v61, %v1719_v63 }
  0x5d   :  { %v257_v36 = vld [vmem:[#allocation2 + $0x758] sm:$0xff]  ;;  %v1934_v20 = vmul.f32 %v249_v40, %v249_v40  ;;  %v74_v40 = vld [vmem:[#allocation2 + $0x1a0] sm:$0xff]  ;;  %v619_v27 = vadd.f32 %v618_v54, %v1813_v22 }
  0x5e   :  { %v273_v19 = vld [vmem:[#allocation2 + $0x7d8] sm:$0xff]  ;;  %v1936_v1 = vmul.f32 %v257_v36, %v257_v36  ;;  %v82_v36 = vld [vmem:[#allocation2 + $0x1e0] sm:$0xff]  ;;  %v646_v39 = vadd.f32 %v645_v43, %v1867_v13  ;;  %v1965_v46 = vmul.f32 %v74_v40, %v74_v40  ;;  %v1977_v40 = vmul.f32 %v106_v45, %v106_v45 }
  0x5f   :  { %v1942_v24 = vmul.f32 %v273_v19, %v273_v19  ;;  %v98_v19 = vld [vmem:[#allocation2 + $0x260] sm:$0xff]  ;;  %v1967_v14 = vmul.f32 %v82_v36, %v82_v36  ;;  %v1979_v36 = vmul.f32 %v114_v60, %v114_v60  ;;  %v1989_v45 = vmul.f32 %v138_v7, %v138_v7 }
  0x60   :  { %3486 = vst [vmem:[#allocation41_spill] sm:$0xff] %v1936_v1  ;;  %v1949_v1 = vmul.f32 %v34_v26, %v34_v26  ;;  %v1961_v26 = vmul.f32 %v66_v5, %v66_v5  ;;  %v647_v13 = vadd.f32 %v646_v39, %v1869_v34  ;;  %v146_v43 = vld [vmem:[#allocation2 + $0x3e0] sm:$0xff]  ;;  %v1973_v5 = vmul.f32 %v98_v19, %v98_v19 }
  0x61   :  { %3488 = vst [vmem:[#allocation43_spill] sm:$0xff] %v1942_v24  ;;  %v178_v39 = vld [vmem:[#allocation2 + $0x4e0] sm:$0xff]  ;;  %v1985_v19 = vmul.f32 %v130_v11, %v130_v11  ;;  %v1991_v60 = vmul.f32 %v146_v43, %v146_v43  ;;  %v1997_v11 = vmul.f32 %v162_v4, %v162_v4  ;;  %v2001_v7 = vmul.f32 %v170_v8, %v170_v8  ;;  %v3493_v24 = vld [vmem:[#allocation8_spill] sm:$0xff] }
  0x62   :  { %v648_v34 = vadd.f32 %v647_v13, %v1871_v42  ;;  %v186_v56 = vld [vmem:[#allocation2 + $0x520] sm:$0xff]  ;;  %v2003_v43 = vmul.f32 %v178_v39, %v178_v39  ;;  %v561_v63 = vadd.f32 %v560_v62, %v1721_v0  ;;  %v620_v22 = vadd.f32 %v619_v27, %v1815_v52 }
  0x63   :  { %v194_v21 = vld [vmem:[#allocation2 + $0x560] sm:$0xff]  ;;  %v2007_v55 = vmul.f32 %v186_v56, %v186_v56  ;;  %v2013_v8 = vmul.f32 %v202_v10, %v202_v10  ;;  %v593_v30 = vadd.f32 %v592_v18, %v3493_v24 }
  0x64   :  { %v649_v42 = vadd.f32 %v648_v34, %v1875_v38  ;;  %v210_v13 = vld [vmem:[#allocation2 + $0x5e0] sm:$0xff]  ;;  %v2009_v4 = vmul.f32 %v194_v21, %v194_v21 }
  0x65   :  { %v218_v57 = vld [vmem:[#allocation2 + $0x620] sm:$0xff]  ;;  %3489 = vst [vmem:[#allocation44_spill] sm:$0xff] %v2007_v55  ;;  %3491 = vst [vmem:[#allocation46_spill] sm:$0xff] %v2013_v8  ;;  %v2015_v39 = vmul.f32 %v210_v13, %v210_v13  ;;  %v27_v13 = vld [vmem:[#allocation2 + $0x28] sm:$0xff] }
  0x66   :  { %v226_v53 = vld [vmem:[#allocation2 + $0x660] sm:$0xff]  ;;  %v650_v38 = vadd.f32 %v649_v42, %v1877_v28  ;;  %3490 = vst [vmem:[#allocation45_spill] sm:$0xff] %v2009_v4  ;;  %v2019_v56 = vmul.f32 %v218_v57, %v218_v57  ;;  %v35_v57 = vld [vmem:[#allocation2 + $0x68] sm:$0xff] }
  0x67   :  { %v234_v16 = vld [vmem:[#allocation2 + $0x6a0] sm:$0xff]  ;;  %3492 = vst [vmem:[#allocation47_spill] sm:$0xff] %v2015_v39  ;;  %v2021_v21 = vmul.f32 %v226_v53, %v226_v53  ;;  %v43_v53 = vld [vmem:[#allocation2 + $0xa8] sm:$0xff] }
  0x68   :  { %v242_v34 = vld [vmem:[#allocation2 + $0x6e0] sm:$0xff]  ;;  %v651_v28 = vadd.f32 %v650_v38, %v1880_v29  ;;  %3494 = vst [vmem:[#allocation8_spill] sm:$0xff] %v2019_v56  ;;  %v2025_v27 = vmul.f32 %v234_v16, %v234_v16  ;;  %v3503_v38 = vld [vmem:[#allocation6_spill] sm:$0xff]  ;;  %v3516_v56 = vld [vmem:[#allocation36_spill] sm:$0xff] }
  0x69   :  { %v250_v61 = vld [vmem:[#allocation2 + $0x720] sm:$0xff]  ;;  %3495 = vst [vmem:[#allocation48_spill] sm:$0xff] %v2021_v21  ;;  %v2027_v10 = vmul.f32 %v242_v34, %v242_v34  ;;  %v51_v34 = vld [vmem:[#allocation2 + $0xe8] sm:$0xff] }
  0x6a   :  { %v258_v54 = vld [vmem:[#allocation2 + $0x760] sm:$0xff]  ;;  %v652_v24 = vadd.f32 %v651_v28, %v1882_v2  ;;  %v2031_v29 = vmul.f32 %v250_v61, %v250_v61  ;;  %v682_v2 = vadd.f32 %v1949_v1, %v1947_v59  ;;  %v59_v61 = vld [vmem:[#allocation2 + $0x128] sm:$0xff]  ;;  %v2045_v28 = vmul.f32 %v27_v13, %v27_v13 }
  0x6b   :  { %v266_v17 = vld [vmem:[#allocation2 + $0x7a0] sm:$0xff]  ;;  %v2033_v18 = vmul.f32 %v258_v54, %v258_v54  ;;  %v67_v54 = vld [vmem:[#allocation2 + $0x168] sm:$0xff] }
  0x6c   :  { %v274_v42 = vld [vmem:[#allocation2 + $0x7e0] sm:$0xff]  ;;  %v83_v1 = vld [vmem:[#allocation2 + $0x1e8] sm:$0xff] }
  0x6d   :  { %v3496_v33 = vld [vmem:[#allocation5_spill] sm:$0xff]  ;;  %3502 = vst [vmem:[#allocation49_spill] sm:$0xff] %v2033_v18  ;;  %v2039_v16 = vmul.f32 %v274_v42, %v274_v42  ;;  %v3508_v18 = vld [vmem:[#allocation7_spill] sm:$0xff]  ;;  %v2051_v42 = vmul.f32 %v43_v53, %v43_v53  ;;  %v91_v59 = vld [vmem:[#allocation2 + $0x228] sm:$0xff] }
  0x6e   :  { %v562_v0 = vadd.f32 %v561_v63, %v3496_v33  ;;  %v3497_v62 = vld [vmem:[#allocation17_spill] sm:$0xff]  ;;  %3498 = vst [vmem:[#allocation5_spill] sm:$0xff] %v2025_v27  ;;  %v2037_v63 = vmul.f32 %v266_v17, %v266_v17  ;;  %v75_v17 = vld [vmem:[#allocation2 + $0x1a8] sm:$0xff]  ;;  %v3512_v53 = vld [vmem:[#allocation12_spill] sm:$0xff] }
  0x6f   :  { %v621_v52 = vadd.f32 %v620_v22, %v3497_v62  ;;  %3499 = vst [vmem:[#allocation17_spill] sm:$0xff] %v2027_v10  ;;  %v3500_v39 = vld [vmem:[#allocation9_spill] sm:$0xff]  ;;  %3505 = vst [vmem:[#allocation50_spill] sm:$0xff] %v2039_v16  ;;  %v3506_v22 = vld [vmem:[#allocation10_spill] sm:$0xff] }
  0x70   :  { %v594_v8 = vadd.f32 %v593_v30, %v3500_v39  ;;  %3501 = vst [vmem:[#allocation9_spill] sm:$0xff] %v2031_v29  ;;  %v563_v21 = vadd.f32 %v562_v0, %v3503_v38  ;;  %3504 = vst [vmem:[#allocation6_spill] sm:$0xff] %v2037_v63  ;;  %v3507_v39 = vld [vmem:[#allocation34_spill] sm:$0xff]  ;;  %v3510_v16 = vld [vmem:[#allocation11_spill] sm:$0xff] }
  0x71   :  { %v622_v33 = vadd.f32 %v621_v52, %v1820_v12  ;;  %v653_v30 = vadd.f32 %v652_v24, %v3507_v39  ;;  %v3509_v38 = vld [vmem:[#allocation18_spill] sm:$0xff]  ;;  %v2049_v52 = vmul.f32 %v35_v57, %v35_v57  ;;  %v2056_v39 = vmul.f32 %v51_v34, %v51_v34  ;;  %v3511_v63 = vld [vmem:[#allocation19_spill] sm:$0xff] }
  0x72   :  { %v595_v62 = vadd.f32 %v594_v8, %v3506_v22  ;;  %v564_v0 = vadd.f32 %v563_v21, %v3508_v18  ;;  %v683_v22 = vadd.f32 %v682_v2, %v1953_v50  ;;  %v99_v18 = vld [vmem:[#allocation2 + $0x268] sm:$0xff]  ;;  %v2061_v57 = vmul.f32 %v67_v54, %v67_v54  ;;  %v3513_v29 = vld [vmem:[#allocation35_spill] sm:$0xff]  ;;  %v3514_v2 = vld [vmem:[#allocation20_spill] sm:$0xff] }
  0x73   :  { %v623_v12 = vadd.f32 %v622_v33, %v3509_v38  ;;  %v654_v24 = vadd.f32 %v653_v30, %v1888_v35  ;;  %v2059_v33 = vmul.f32 %v59_v61, %v59_v61  ;;  %v115_v50 = vld [vmem:[#allocation2 + $0x2e8] sm:$0xff]  ;;  %v2066_v30 = vmul.f32 %v75_v17, %v75_v17  ;;  %v3515_v54 = vld [vmem:[#allocation13_spill] sm:$0xff] }
  0x74   :  { %v596_v8 = vadd.f32 %v595_v62, %v3510_v16  ;;  %v565_v13 = vrot.slane %v564_v0, 4  ;;  %v684_v35 = vadd.f32 %v683_v22, %v1955_v6  ;;  %v107_v62 = vld [vmem:[#allocation2 + $0x2a8] sm:$0xff]  ;;  %v2071_v61 = vmul.f32 %v91_v59, %v91_v59 }
  0x75   :  { %v624_v21 = vadd.f32 %v623_v12, %v3511_v63  ;;  %v655_v16 = vadd.f32 %v654_v24, %v3513_v29  ;;  %v123_v27 = vld [vmem:[#allocation2 + $0x328] sm:$0xff]  ;;  %v2069_v63 = vmul.f32 %v83_v1, %v83_v1  ;;  %v2076_v22 = vmul.f32 %v99_v18, %v99_v18 }
  0x76   :  { %v597_v38 = vadd.f32 %v596_v8, %v3512_v53  ;;  %v566_v34 = vadd.f32 %v565_v13, %v564_v0  ;;  %v685_v29 = vadd.f32 %v684_v35, %v1959_v44  ;;  %v131_v24 = vld [vmem:[#allocation2 + $0x368] sm:$0xff]  ;;  %v3517_v53 = vld [vmem:[#allocation21_spill] sm:$0xff]  ;;  %v2081_v1 = vmul.f32 %v115_v50, %v115_v50  ;;  %v3522_v50 = vld [vmem:[#allocation15_spill] sm:$0xff] }
  0x77   :  { %v625_v10 = vadd.f32 %v624_v21, %v3514_v2  ;;  %v656_v8 = vadd.f32 %v655_v16, %v3516_v56  ;;  %v139_v6 = vld [vmem:[#allocation2 + $0x3a8] sm:$0xff]  ;;  %v2079_v21 = vmul.f32 %v107_v62, %v107_v62  ;;  %v2086_v35 = vmul.f32 %v123_v27, %v123_v27 }
  0x78   :  { %v598_v12 = vadd.f32 %v597_v38, %v3515_v54  ;;  %v567_v17 = vrot.slane %v566_v34, 2  ;;  %v147_v13 = vld [vmem:[#allocation2 + $0x3e8] sm:$0xff]  ;;  %3518 = vst [vmem:[#allocation10_spill] sm:$0xff] %v2081_v1  ;;  %v686_v56 = vadd.f32 %v685_v29, %v1961_v26  ;;  %v2091_v62 = vmul.f32 %v139_v6, %v139_v6  ;;  %v3523_v1 = vld [vmem:[#allocation37_spill] sm:$0xff]  ;;  %v3527_v6 = vld [vmem:[#allocation16_spill] sm:$0xff] }
  0x79   :  { %v626_v0 = vadd.f32 %v625_v10, %v3517_v53  ;;  %v3519_v59 = vld [vmem:[#allocation14_spill] sm:$0xff]  ;;  %v657_v38 = vadd.f32 %v656_v8, %v1895_v37  ;;  %v2089_v10 = vmul.f32 %v131_v24, %v131_v24  ;;  %v2096_v29 = vmul.f32 %v147_v13, %v147_v13 }
  0x7a   :  { %v599_v2 = vadd.f32 %v598_v12, %v3519_v59  ;;  %v155_v16 = vld [vmem:[#allocation2 + $0x428] sm:$0xff]  ;;  %v568_v18 = vadd.f32 %v567_v17, %v566_v34  ;;  %3521 = vst [vmem:[#allocation34_spill] sm:$0xff] %v2091_v62  ;;  %v687_v37 = vadd.f32 %v686_v56, %v1965_v46  ;;  %v3525_v59 = vld [vmem:[#allocation23_spill] sm:$0xff] }
  0x7b   :  { %v163_v44 = vld [vmem:[#allocation2 + $0x468] sm:$0xff]  ;;  %v658_v12 = vadd.f32 %v657_v38, %v3523_v1  ;;  %3524 = vst [vmem:[#allocation7_spill] sm:$0xff] %v2096_v29 }
  0x7c   :  { %v3520_v54 = vld [vmem:[#allocation22_spill] sm:$0xff]  ;;  %v600_v53 = vadd.f32 %v599_v2, %v3522_v50  ;;  %v569_v27 = vrot.slane %v568_v18, 1  ;;  %v2101_v24 = vmul.f32 %v163_v44, %v163_v44  ;;  %v688_v1 = vadd.f32 %v687_v37, %v1967_v14  ;;  %v3528_v50 = vld [vmem:[#allocation24_spill] sm:$0xff] }
  0x7d   :  { %v627_v4 = vadd.f32 %v626_v0, %v3520_v54  ;;  %v171_v55 = vld [vmem:[#allocation2 + $0x4a8] sm:$0xff]  ;;  %v2099_v0 = vmul.f32 %v155_v16, %v155_v16  ;;  %v659_v2 = vadd.f32 %v658_v12, %v1901_v31 }
  0x7e   :  { %v179_v8 = vld [vmem:[#allocation2 + $0x4e8] sm:$0xff]  ;;  %3526 = vst [vmem:[#allocation18_spill] sm:$0xff] %v2101_v24  ;;  %v601_v54 = vadd.f32 %v600_v53, %v3527_v6  ;;  %v2106_v56 = vmul.f32 %v171_v55, %v171_v55  ;;  %v570_v13 = vadd.f32 %v569_v27, %v568_v18  ;;  %v689_v53 = vadd.f32 %v688_v1, %v1971_v49  ;;  %v3532_v55 = vld [vmem:[#allocation25_spill] sm:$0xff]  ;;  %v3533_v6 = vld [vmem:[#allocation39_spill] sm:$0xff] }
  0x7f   :  { %v187_v26 = vld [vmem:[#allocation2 + $0x528] sm:$0xff]  ;;  %v628_v34 = vadd.f32 %v627_v4, %v3525_v59  ;;  %v2109_v4 = vmul.f32 %v179_v8, %v179_v8 }
  0x80   :  { %v195_v17 = vld [vmem:[#allocation2 + $0x568] sm:$0xff]  ;;  %v2111_v16 = vmul.f32 %v187_v26, %v187_v26  ;;  %v602_v44 = vrot.slane %v601_v54, 4  ;;  %1358 = vrsqrt.f32 %v570_v13 }
  0x81   :  { %v203_v38 = vld [vmem:[#allocation2 + $0x5a8] sm:$0xff]  ;;  %v629_v29 = vadd.f32 %v628_v34, %v3528_v50  ;;  %v2115_v37 = vmul.f32 %v195_v17, %v195_v17 }
  0x82   :  { %v211_v46 = vld [vmem:[#allocation2 + $0x5e8] sm:$0xff]  ;;  %3529 = vst [vmem:[#allocation11_spill] sm:$0xff] %v2111_v16  ;;  %v2118_v34 = vmul.f32 %v203_v38, %v203_v38  ;;  %v603_v26 = vadd.f32 %v602_v44, %v601_v54 }
  0x83   :  { %v219_v62 = vld [vmem:[#allocation2 + $0x628] sm:$0xff]  ;;  %3531 = vst [vmem:[#allocation19_spill] sm:$0xff] %v2115_v37  ;;  %v630_v18 = vadd.f32 %v629_v29, %v3532_v55  ;;  %v2120_v8 = vmul.f32 %v211_v46, %v211_v46  ;;  %v44_v55 = vld [vmem:[#allocation2 + $0xb0] sm:$0xff] }
  0x84   :  { %v3530_v59 = vld [vmem:[#allocation38_spill] sm:$0xff]  ;;  %v2124_v16 = vmul.f32 %v219_v62, %v219_v62  ;;  %v604_v46 = vrot.slane %v603_v26, 2  ;;  %v3537_v62 = vld [vmem:[#allocation27_spill] sm:$0xff] }
  0x85   :  { %v660_v24 = vadd.f32 %v659_v2, %v3530_v59  ;;  %v227_v31 = vld [vmem:[#allocation2 + $0x668] sm:$0xff]  ;;  %v690_v2 = vadd.f32 %v689_v53, %v1973_v5  ;;  %v28_v5 = vld [vmem:[#allocation2 + $0x30] sm:$0xff] }
  0x86   :  { %v235_v12 = vld [vmem:[#allocation2 + $0x6a8] sm:$0xff]  ;;  %3534 = vst [vmem:[#allocation12_spill] sm:$0xff] %v2124_v16  ;;  %v2127_v13 = vmul.f32 %v227_v31, %v227_v31  ;;  %v36_v53 = vld [vmem:[#allocation2 + $0x70] sm:$0xff] }
  0x87   :  { %v243_v14 = vld [vmem:[#allocation2 + $0x6e8] sm:$0xff]  ;;  %v661_v50 = vadd.f32 %v660_v24, %v3533_v6  ;;  %v2129_v29 = vmul.f32 %v235_v12, %v235_v12  ;;  %v691_v24 = vadd.f32 %v690_v2, %v1977_v40  ;;  %v719_v40 = vadd.f32 %v2049_v52, %v2045_v28  ;;  %v68_v2 = vld [vmem:[#allocation2 + $0x170] sm:$0xff] }
  0x88   :  { %v251_v27 = vld [vmem:[#allocation2 + $0x728] sm:$0xff]  ;;  %v2131_v38 = vmul.f32 %v243_v14, %v243_v14  ;;  %v605_v14 = vadd.f32 %v604_v46, %v603_v26  ;;  %v76_v46 = vld [vmem:[#allocation2 + $0x1b0] sm:$0xff] }
  0x89   :  { %v259_v59 = vld [vmem:[#allocation2 + $0x768] sm:$0xff]  ;;  %v662_v54 = vadd.f32 %v661_v50, %v1908_v3  ;;  %v2135_v44 = vmul.f32 %v251_v27, %v251_v27  ;;  %v692_v3 = vadd.f32 %v691_v24, %v1979_v36  ;;  %v52_v27 = vld [vmem:[#allocation2 + $0xf0] sm:$0xff]  ;;  %v720_v36 = vadd.f32 %v719_v40, %v2051_v42 }
  0x8a   :  { %v267_v49 = vld [vmem:[#allocation2 + $0x7a8] sm:$0xff]  ;;  %v2138_v16 = vmul.f32 %v259_v59, %v259_v59  ;;  %v60_v50 = vld [vmem:[#allocation2 + $0x130] sm:$0xff]  ;;  %v2151_v59 = vmul.f32 %v36_v53, %v36_v53  ;;  %v2163_v53 = vmul.f32 %v68_v2, %v68_v2 }
  0x8b   :  { %v275_v1 = vld [vmem:[#allocation2 + $0x7e8] sm:$0xff]  ;;  %3536 = vst [vmem:[#allocation35_spill] sm:$0xff] %v2135_v44  ;;  %v2140_v31 = vmul.f32 %v267_v49, %v267_v49  ;;  %v2153_v49 = vmul.f32 %v44_v55, %v44_v55  ;;  %v84_v28 = vld [vmem:[#allocation2 + $0x1f0] sm:$0xff] }
  0x8c   :  { %v3535_v17 = vld [vmem:[#allocation26_spill] sm:$0xff]  ;;  %3538 = vst [vmem:[#allocation20_spill] sm:$0xff] %v2138_v16  ;;  %v2142_v12 = vmul.f32 %v275_v1, %v275_v1  ;;  %v606_v1 = vrot.slane %v605_v14, 1  ;;  %v92_v52 = vld [vmem:[#allocation2 + $0x230] sm:$0xff] }
  0x8d   :  { %v631_v37 = vadd.f32 %v630_v18, %v3535_v17  ;;  %3539 = vst [vmem:[#allocation13_spill] sm:$0xff] %v2140_v31  ;;  %v663_v18 = vadd.f32 %v662_v54, %v1910_v15  ;;  %v3541_v17 = vld [vmem:[#allocation28_spill] sm:$0xff]  ;;  %v693_v15 = vadd.f32 %v692_v3, %v1983_v47  ;;  %v3542_v54 = vld [vmem:[#allocation29_spill] sm:$0xff]  ;;  %v721_v47 = vadd.f32 %v720_v36, %v2056_v39  ;;  %v108_v42 = vld [vmem:[#allocation2 + $0x2b0] sm:$0xff]  ;;  %v2168_v3 = vpop.eup %1358 }
  0x8e   :  { %3540 = vst [vmem:[#allocation36_spill] sm:$0xff] %v2142_v12  ;;  %v607_v55 = vadd.f32 %v606_v1, %v605_v14  ;;  %v3543_v40 = vld [vmem:[#allocation30_spill] sm:$0xff]  ;;  %v2175_v2 = vmul.f32 %v92_v52, %v92_v52  ;;  %v1374_v14 = vld [vmem:[#allocation2] sm:$0xff]  ;;  %v132_v1 = vld [vmem:[#allocation2 + $0x370] sm:$0xff]  ;;  %v2184_v52 = vmul.f32 %v108_v42, %v108_v42 }
  0x8f   :  { %v632_v6 = vadd.f32 %v631_v37, %v3537_v62  ;;  %v2149_v37 = vmul.f32 %v28_v5, %v28_v5  ;;  %v664_v26 = vadd.f32 %v663_v18, %v1914_v25  ;;  %v2159_v62 = vmul.f32 %v52_v27, %v52_v27  ;;  %v100_v18 = vld [vmem:[#allocation2 + $0x270] sm:$0xff]  ;;  %v3547_v31 = vld [vmem:[#allocation33_spill] sm:$0xff] }
  0x90   :  { %v2161_v5 = vmul.f32 %v60_v50, %v60_v50  ;;  %v694_v25 = vadd.f32 %v693_v15, %v1985_v19  ;;  %v124_v27 = vld [vmem:[#allocation2 + $0x330] sm:$0xff]  ;;  %v2173_v50 = vmul.f32 %v84_v28, %v84_v28  ;;  %1360 = vrsqrt.f32 %v607_v55 }
  0x91   :  { %v633_v44 = vadd.f32 %v632_v6, %v3541_v17  ;;  %v665_v6 = vadd.f32 %v664_v26, %v1916_v9  ;;  %v838_v9 = vmul.f32 %v1374_v14, %v2168_v3  ;;  %v140_v26 = vld [vmem:[#allocation2 + $0x3b0] sm:$0xff]  ;;  %v2182_v28 = vmul.f32 %v100_v18, %v100_v18 }
  0x92   :  { %v695_v39 = vadd.f32 %v694_v25, %v1989_v45  ;;  %v3544_v15 = vld [vmem:[#allocation31_spill] sm:$0xff]  ;;  %v2199_v12 = vmul.f32 %v140_v26, %v140_v26 }
  0x93   :  { %v634_v24 = vadd.f32 %v633_v44, %v3542_v54  ;;  %v116_v44 = vld [vmem:[#allocation2 + $0x2f0] sm:$0xff]  ;;  %v2171_v54 = vmul.f32 %v76_v46, %v76_v46  ;;  %v666_v19 = vadd.f32 %v665_v6, %v1919_v41  ;;  %1094 = vst [vmem:[%s3449_s1] sm:$0xff] %v838_v9  ;;  %v3546_v9 = vld [vmem:[#allocation40_spill] sm:$0xff] }
  0x94   :  { %v148_v46 = vld [vmem:[#allocation2 + $0x3f0] sm:$0xff]  ;;  %v696_v45 = vadd.f32 %v695_v39, %v1991_v60  ;;  %v2191_v25 = vmul.f32 %v116_v44, %v116_v44 }
  0x95   :  { %v635_v17 = vadd.f32 %v634_v24, %v3543_v40  ;;  %v722_v24 = vadd.f32 %v721_v47, %v2059_v33  ;;  %v156_v40 = vld [vmem:[#allocation2 + $0x430] sm:$0xff]  ;;  %v667_v41 = vadd.f32 %v666_v19, %v1921_v32  ;;  %v3545_v33 = vld [vmem:[#allocation32_spill] sm:$0xff]  ;;  %v2203_v44 = vmul.f32 %v148_v46, %v148_v46 }
  0x96   :  { %v164_v55 = vld [vmem:[#allocation2 + $0x470] sm:$0xff]  ;;  %v697_v60 = vadd.f32 %v696_v45, %v1995_v51 }
  0x97   :  { %v636_v36 = vadd.f32 %v635_v17, %v3544_v15  ;;  %v172_v6 = vld [vmem:[#allocation2 + $0x4b0] sm:$0xff]  ;;  %v2193_v17 = vmul.f32 %v124_v27, %v124_v27  ;;  %v723_v18 = vadd.f32 %v722_v24, %v2061_v57  ;;  %v2197_v15 = vmul.f32 %v132_v1, %v132_v1 }
  0x98   :  { %v180_v42 = vld [vmem:[#allocation2 + $0x4f0] sm:$0xff]  ;;  %v668_v32 = vadd.f32 %v667_v41, %v3546_v9  ;;  %v2205_v27 = vmul.f32 %v156_v40, %v156_v40  ;;  %v2209_v1 = vmul.f32 %v164_v55, %v164_v55  ;;  %v2211_v26 = vmul.f32 %v172_v6, %v172_v6 }
  0x99   :  { %v637_v47 = vadd.f32 %v636_v36, %v3545_v33  ;;  %v188_v14 = vld [vmem:[#allocation2 + $0x530] sm:$0xff]  ;;  %v724_v57 = vadd.f32 %v723_v18, %v2066_v30  ;;  %v698_v51 = vadd.f32 %v697_v60, %v1997_v11  ;;  %v2215_v46 = vmul.f32 %v180_v42, %v180_v42 }
  0x9a   :  { %v196_v19 = vld [vmem:[#allocation2 + $0x570] sm:$0xff]  ;;  %v669_v41 = vadd.f32 %v668_v32, %v1927_v48  ;;  %v2217_v40 = vmul.f32 %v188_v14, %v188_v14 }
  0x9b   :  { %v204_v39 = vld [vmem:[#allocation2 + $0x5b0] sm:$0xff]  ;;  %v638_v36 = vadd.f32 %v637_v47, %v3547_v31  ;;  %v725_v31 = vadd.f32 %v724_v57, %v2069_v63  ;;  %v2220_v18 = vmul.f32 %v196_v19, %v196_v19  ;;  %v699_v48 = vadd.f32 %v698_v51, %v2001_v7 }
  0x9c   :  { %v212_v24 = vld [vmem:[#allocation2 + $0x5f0] sm:$0xff]  ;;  %3548 = vst [vmem:[#allocation21_spill] sm:$0xff] %v2217_v40  ;;  %v2222_v55 = vmul.f32 %v204_v39, %v204_v39  ;;  %v670_v6 = vadd.f32 %v669_v41, %v1929_v23  ;;  %v2235_v39 = vpop.eup %1360 }
  0x9d   :  { %v220_v33 = vld [vmem:[#allocation2 + $0x630] sm:$0xff]  ;;  %v639_v16 = vrot.slane %v638_v36, 4  ;;  %3549 = vst [vmem:[#allocation14_spill] sm:$0xff] %v2220_v18  ;;  %v2226_v32 = vmul.f32 %v212_v24, %v212_v24  ;;  %v726_v60 = vadd.f32 %v725_v31, %v2071_v61  ;;  %v700_v7 = vadd.f32 %v699_v48, %v2003_v43  ;;  %v45_v31 = vld [vmem:[#allocation2 + $0xb8] sm:$0xff] }
  0x9e   :  { %v228_v45 = vld [vmem:[#allocation2 + $0x670] sm:$0xff]  ;;  %3550 = vst [vmem:[#allocation22_spill] sm:$0xff] %v2222_v55  ;;  %v2228_v42 = vmul.f32 %v220_v33, %v220_v33  ;;  %v671_v23 = vadd.f32 %v670_v6, %v1932_v58  ;;  %v29_v33 = vld [vmem:[#allocation2 + $0x38] sm:$0xff] }
  0x9f   :  { %v236_v9 = vld [vmem:[#allocation2 + $0x6b0] sm:$0xff]  ;;  %3551 = vst [vmem:[#allocation15_spill] sm:$0xff] %v2226_v32  ;;  %v640_v14 = vadd.f32 %v639_v16, %v638_v36  ;;  %v2231_v57 = vmul.f32 %v228_v45, %v228_v45  ;;  %v1375_v16 = vld [vmem:[#allocation2 + $0x8] sm:$0xff]  ;;  %v727_v51 = vadd.f32 %v726_v60, %v2076_v22  ;;  %v3558_v58 = vld [vmem:[#allocation44_spill] sm:$0xff] }
  0xa0   :  { %v244_v30 = vld [vmem:[#allocation2 + $0x6f0] sm:$0xff]  ;;  %3552 = vst [vmem:[#allocation37_spill] sm:$0xff] %v2228_v42  ;;  %v2233_v19 = vmul.f32 %v236_v9, %v236_v9  ;;  %v839_v61 = vmul.f32 %v1375_v16, %v2235_v39  ;;  %v37_v9 = vld [vmem:[#allocation2 + $0x78] sm:$0xff]  ;;  %v701_v6 = vadd.f32 %v700_v7, %v3558_v58  ;;  %v3562_v7 = vld [vmem:[#allocation45_spill] sm:$0xff] }
  0xa1   :  { %v252_v47 = vld [vmem:[#allocation2 + $0x730] sm:$0xff]  ;;  %3553 = vst [vmem:[#allocation23_spill] sm:$0xff] %v2231_v57  ;;  %v2239_v41 = vmul.f32 %v244_v30, %v244_v30  ;;  %v641_v36 = vrot.slane %v640_v14, 2  ;;  %v728_v22 = vadd.f32 %v727_v51, %v2079_v21  ;;  %v61_v60 = vld [vmem:[#allocation2 + $0x138] sm:$0xff] }
  0xa2   :  { %v260_v11 = vld [vmem:[#allocation2 + $0x770] sm:$0xff]  ;;  %3554 = vst [vmem:[#allocation16_spill] sm:$0xff] %v2233_v19  ;;  %v2241_v24 = vmul.f32 %v252_v47, %v252_v47  ;;  %v672_v19 = vadd.f32 %v671_v23, %v1934_v20  ;;  %v53_v47 = vld [vmem:[#allocation2 + $0xf8] sm:$0xff]  ;;  %1095 = vst [vmem:[%s3449_s1 + $0x8] sm:$0xff] %v839_v61  ;;  %v2259_v20 = vmul.f32 %v29_v33, %v29_v33 }
  0xa3   :  { %v268_v40 = vld [vmem:[#allocation2 + $0x7b0] sm:$0xff]  ;;  %3555 = vst [vmem:[#allocation24_spill] sm:$0xff] %v2239_v41  ;;  %v2245_v45 = vmul.f32 %v260_v11, %v260_v11  ;;  %v642_v48 = vadd.f32 %v641_v36, %v640_v14  ;;  %v756_v11 = vadd.f32 %v2151_v59, %v2149_v37  ;;  %v69_v16 = vld [vmem:[#allocation2 + $0x178] sm:$0xff]  ;;  %v3561_v23 = vld [vmem:[#allocation41_spill] sm:$0xff]  ;;  %v2269_v59 = vmul.f32 %v53_v47, %v53_v47 }
  0xa4   :  { %v276_v63 = vld [vmem:[#allocation2 + $0x7f0] sm:$0xff]  ;;  %3556 = vst [vmem:[#allocation38_spill] sm:$0xff] %v2241_v24  ;;  %v2249_v43 = vmul.f32 %v268_v40, %v268_v40  ;;  %v673_v40 = vadd.f32 %v672_v19, %v3561_v23  ;;  %v77_v58 = vld [vmem:[#allocation2 + $0x1b8] sm:$0xff]  ;;  %v3563_v14 = vld [vmem:[#allocation10_spill] sm:$0xff] }
  0xa5   :  { %3557 = vst [vmem:[#allocation25_spill] sm:$0xff] %v2245_v45  ;;  %v2251_v30 = vmul.f32 %v276_v63, %v276_v63  ;;  %v702_v63 = vadd.f32 %v701_v6, %v3562_v7  ;;  %v643_v61 = vrot.slane %v642_v48, 1  ;;  %v729_v36 = vadd.f32 %v728_v22, %v3563_v14  ;;  %v85_v51 = vld [vmem:[#allocation2 + $0x1f8] sm:$0xff]  ;;  %v3564_v33 = vld [vmem:[#allocation42_spill] sm:$0xff]  ;;  %v3566_v47 = vld [vmem:[#allocation43_spill] sm:$0xff] }
  0xa6   :  { %3559 = vst [vmem:[#allocation39_spill] sm:$0xff] %v2249_v43  ;;  %v2265_v43 = vmul.f32 %v45_v31, %v45_v31  ;;  %v757_v21 = vadd.f32 %v756_v11, %v2153_v49  ;;  %v93_v37 = vld [vmem:[#allocation2 + $0x238] sm:$0xff]  ;;  %v674_v45 = vadd.f32 %v673_v40, %v3564_v33  ;;  %v3565_v24 = vld [vmem:[#allocation46_spill] sm:$0xff]  ;;  %v2273_v6 = vmul.f32 %v61_v60, %v61_v60  ;;  %v3567_v57 = vld [vmem:[#allocation47_spill] sm:$0xff] }
  0xa7   :  { %3560 = vst [vmem:[#allocation26_spill] sm:$0xff] %v2251_v30  ;;  %v2263_v30 = vmul.f32 %v37_v9, %v37_v9  ;;  %v703_v19 = vadd.f32 %v702_v63, %v3565_v24  ;;  %v101_v23 = vld [vmem:[#allocation2 + $0x278] sm:$0xff]  ;;  %v2275_v9 = vmul.f32 %v69_v16, %v69_v16  ;;  %v644_v31 = vadd.f32 %v643_v61, %v642_v48 }
  0xa8   :  { %v730_v7 = vadd.f32 %v729_v36, %v2086_v35  ;;  %v758_v22 = vadd.f32 %v757_v21, %v2159_v62  ;;  %v109_v14 = vld [vmem:[#allocation2 + $0x2b8] sm:$0xff]  ;;  %v2279_v11 = vmul.f32 %v77_v58, %v77_v58  ;;  %v675_v41 = vadd.f32 %v674_v45, %v3566_v47 }
  0xa9   :  { %v117_v49 = vld [vmem:[#allocation2 + $0x2f8] sm:$0xff]  ;;  %v704_v40 = vadd.f32 %v703_v19, %v3567_v57  ;;  %v2283_v63 = vmul.f32 %v85_v51, %v85_v51  ;;  %v2285_v60 = vmul.f32 %v93_v37, %v93_v37  ;;  %1362 = vrsqrt.f32 %v644_v31  ;;  %v3569_v37 = vld [vmem:[#allocation34_spill] sm:$0xff] }
  0xaa   :  { %v125_v33 = vld [vmem:[#allocation2 + $0x338] sm:$0xff]  ;;  %v731_v48 = vadd.f32 %v730_v7, %v2089_v10  ;;  %v759_v35 = vadd.f32 %v758_v22, %v2161_v5  ;;  %v2289_v61 = vmul.f32 %v101_v23, %v101_v23  ;;  %v676_v58 = vrot.slane %v675_v41, 4 }
  0xab   :  { %v133_v24 = vld [vmem:[#allocation2 + $0x378] sm:$0xff]  ;;  %v2292_v19 = vmul.f32 %v109_v14, %v109_v14  ;;  %v2294_v51 = vmul.f32 %v117_v49, %v117_v49  ;;  %v2298_v5 = vmul.f32 %v125_v33, %v125_v33  ;;  %v3573_v49 = vld [vmem:[#allocation7_spill] sm:$0xff] }
  0xac   :  { %v141_v62 = vld [vmem:[#allocation2 + $0x3b8] sm:$0xff]  ;;  %v732_v47 = vadd.f32 %v731_v48, %v3569_v37  ;;  %v760_v31 = vadd.f32 %v759_v35, %v2163_v53  ;;  %v2300_v22 = vmul.f32 %v133_v24, %v133_v24  ;;  %v677_v23 = vadd.f32 %v676_v58, %v675_v41  ;;  %v3576_v41 = vld [vmem:[#allocation5_spill] sm:$0xff] }
  0xad   :  { %v149_v16 = vld [vmem:[#allocation2 + $0x3f8] sm:$0xff]  ;;  %v2303_v55 = vmul.f32 %v141_v62, %v141_v62 }
  0xae   :  { %v3568_v36 = vld [vmem:[#allocation8_spill] sm:$0xff]  ;;  %3570 = vst [vmem:[#allocation27_spill] sm:$0xff] %v2300_v22  ;;  %v2305_v14 = vmul.f32 %v149_v16, %v149_v16  ;;  %v733_v18 = vadd.f32 %v732_v47, %v3573_v49  ;;  %v761_v48 = vadd.f32 %v760_v31, %v2171_v54  ;;  %v678_v24 = vrot.slane %v677_v23, 2 }
  0xaf   :  { %v705_v45 = vadd.f32 %v704_v40, %v3568_v36  ;;  %v157_v21 = vld [vmem:[#allocation2 + $0x438] sm:$0xff] }
  0xb0   :  { %v165_v57 = vld [vmem:[#allocation2 + $0x478] sm:$0xff]  ;;  %3572 = vst [vmem:[#allocation28_spill] sm:$0xff] %v2305_v14  ;;  %v2309_v37 = vmul.f32 %v157_v21, %v157_v21  ;;  %v734_v16 = vadd.f32 %v733_v18, %v2099_v0  ;;  %v762_v47 = vadd.f32 %v761_v48, %v2173_v50  ;;  %v3580_v48 = vld [vmem:[#allocation9_spill] sm:$0xff] }
  0xb1   :  { %v173_v10 = vld [vmem:[#allocation2 + $0x4b8] sm:$0xff]  ;;  %v2311_v33 = vmul.f32 %v165_v57, %v165_v57  ;;  %v679_v57 = vadd.f32 %v678_v24, %v677_v23 }
  0xb2   :  { %v181_v7 = vld [vmem:[#allocation2 + $0x4f8] sm:$0xff]  ;;  %3574 = vst [vmem:[#allocation29_spill] sm:$0xff] %v2309_v37  ;;  %v2314_v22 = vmul.f32 %v173_v10, %v173_v10  ;;  %v763_v0 = vadd.f32 %v762_v47, %v2175_v2 }
  0xb3   :  { %v3571_v42 = vld [vmem:[#allocation48_spill] sm:$0xff]  ;;  %3575 = vst [vmem:[#allocation30_spill] sm:$0xff] %v2311_v33  ;;  %v2316_v62 = vmul.f32 %v181_v7, %v181_v7  ;;  %v3578_v33 = vld [vmem:[#allocation17_spill] sm:$0xff]  ;;  %v3579_v7 = vld [vmem:[#allocation18_spill] sm:$0xff] }
  0xb4   :  { %v706_v32 = vadd.f32 %v705_v45, %v3571_v42  ;;  %v189_v40 = vld [vmem:[#allocation2 + $0x538] sm:$0xff] }
  0xb5   :  { %v197_v36 = vld [vmem:[#allocation2 + $0x578] sm:$0xff]  ;;  %3577 = vst [vmem:[#allocation31_spill] sm:$0xff] %v2316_v62  ;;  %v2320_v49 = vmul.f32 %v189_v40, %v189_v40  ;;  %v735_v62 = vadd.f32 %v734_v16, %v3579_v7  ;;  %v764_v16 = vadd.f32 %v763_v0, %v2182_v28  ;;  %v3584_v28 = vld [vmem:[#allocation6_spill] sm:$0xff]  ;;  %v3585_v0 = vld [vmem:[#allocation11_spill] sm:$0xff] }
  0xb6   :  { %v205_v53 = vld [vmem:[#allocation2 + $0x5b8] sm:$0xff]  ;;  %v707_v58 = vadd.f32 %v706_v32, %v3576_v41  ;;  %v2322_v21 = vmul.f32 %v197_v36, %v197_v36  ;;  %v680_v36 = vrot.slane %v679_v57, 1 }
  0xb7   :  { %v213_v35 = vld [vmem:[#allocation2 + $0x5f8] sm:$0xff]  ;;  %v2325_v14 = vmul.f32 %v205_v53, %v205_v53  ;;  %v2340_v53 = vpop.eup %1362 }
  0xb8   :  { %v221_v42 = vld [vmem:[#allocation2 + $0x638] sm:$0xff]  ;;  %v708_v37 = vadd.f32 %v707_v58, %v3578_v33  ;;  %v2327_v10 = vmul.f32 %v213_v35, %v213_v35  ;;  %v736_v35 = vadd.f32 %v735_v62, %v2106_v56  ;;  %v681_v7 = vadd.f32 %v680_v36, %v679_v57  ;;  %v1377_v57 = vld [vmem:[#allocation2 + $0x40] sm:$0xff] }
  0xb9   :  { %v229_v45 = vld [vmem:[#allocation2 + $0x678] sm:$0xff]  ;;  %v2331_v18 = vmul.f32 %v221_v42, %v221_v42  ;;  %v793_v56 = vadd.f32 %v2263_v30, %v2259_v20  ;;  %v1379_v30 = vld [vmem:[#allocation2 + $0x50] sm:$0xff] }
  0xba   :  { %v237_v54 = vld [vmem:[#allocation2 + $0x6b8] sm:$0xff]  ;;  %v2333_v40 = vmul.f32 %v229_v45, %v229_v45  ;;  %v709_v23 = vadd.f32 %v708_v37, %v3580_v48  ;;  %v1376_v45 = vld [vmem:[#allocation2 + $0x10] sm:$0xff]  ;;  %v3583_v37 = vld [vmem:[#allocation49_spill] sm:$0xff]  ;;  %1364 = vrsqrt.f32 %v681_v7  ;;  %v848_v20 = vmul.f32 %v1379_v30, %v2340_v53 }
  0xbb   :  { %v245_v31 = vld [vmem:[#allocation2 + $0x6f8] sm:$0xff]  ;;  %v2336_v33 = vmul.f32 %v237_v54, %v237_v54  ;;  %v840_v47 = vmul.f32 %v1376_v45, %v2340_v53  ;;  %v794_v36 = vadd.f32 %v793_v56, %v2265_v43  ;;  %v1381_v45 = vld [vmem:[#allocation2 + $0x88] sm:$0xff]  ;;  %v1382_v43 = vld [vmem:[#allocation2 + $0x90] sm:$0xff] }
  0xbc   :  { %v253_v32 = vld [vmem:[#allocation2 + $0x738] sm:$0xff]  ;;  %v2338_v58 = vmul.f32 %v245_v31, %v245_v31  ;;  %v710_v48 = vadd.f32 %v709_v23, %v3583_v37  ;;  %v737_v31 = vadd.f32 %v736_v35, %v2109_v4  ;;  %v3586_v23 = vld [vmem:[#allocation50_spill] sm:$0xff]  ;;  %v1380_v35 = vld [vmem:[#allocation2 + $0x80] sm:$0xff]  ;;  %1104 = vst [vmem:[%s3449_s1 + $0x50] sm:$0xff] %v848_v20 }
  0xbd   :  { %v261_v41 = vld [vmem:[#allocation2 + $0x778] sm:$0xff]  ;;  %3581 = vst [vmem:[#allocation32_spill] sm:$0xff] %v2336_v33  ;;  %v2344_v2 = vmul.f32 %v253_v32, %v253_v32  ;;  %1096 = vst [vmem:[%s3449_s1 + $0x10] sm:$0xff] %v840_v47  ;;  %v846_v32 = vmul.f32 %v1377_v57, %v2168_v3  ;;  %v3587_v47 = vld [vmem:[#allocation19_spill] sm:$0xff] }
  0xbe   :  { %v269_v50 = vld [vmem:[#allocation2 + $0x7b8] sm:$0xff]  ;;  %3582 = vst [vmem:[#allocation40_spill] sm:$0xff] %v2338_v58  ;;  %v2346_v42 = vmul.f32 %v261_v41, %v261_v41  ;;  %v765_v58 = vadd.f32 %v764_v16, %v2184_v52  ;;  %v711_v62 = vadd.f32 %v710_v48, %v3584_v28  ;;  %v1378_v41 = vld [vmem:[#allocation2 + $0x48] sm:$0xff]  ;;  %v738_v52 = vadd.f32 %v737_v31, %v3585_v0  ;;  %v1383_v31 = vld [vmem:[#allocation2 + $0xc0] sm:$0xff] }
  0xbf   :  { %v277_v24 = vld [vmem:[#allocation2 + $0x7f8] sm:$0xff]  ;;  %v2350_v54 = vmul.f32 %v269_v50, %v269_v50  ;;  %v847_v4 = vmul.f32 %v1378_v41, %v2235_v39  ;;  %1102 = vst [vmem:[%s3449_s1 + $0x40] sm:$0xff] %v846_v32  ;;  %v854_v16 = vmul.f32 %v1380_v35, %v2168_v3  ;;  %v795_v48 = vadd.f32 %v794_v36, %v2269_v59  ;;  %v1386_v32 = vld [vmem:[#allocation2 + $0x100] sm:$0xff] }
  0xc0   :  { %v2354_v33 = vmul.f32 %v277_v24, %v277_v24  ;;  %v766_v50 = vadd.f32 %v765_v58, %v2191_v25  ;;  %v712_v24 = vadd.f32 %v711_v62, %v3586_v23  ;;  %v855_v25 = vmul.f32 %v1381_v45, %v2235_v39  ;;  %v1385_v62 = vld [vmem:[#allocation2 + $0xd0] sm:$0xff]  ;;  %v1390_v23 = vld [vmem:[#allocation2 + $0x148] sm:$0xff] }
  0xc1   :  { %1103 = vst [vmem:[%s3449_s1 + $0x48] sm:$0xff] %v847_v4  ;;  %v856_v58 = vmul.f32 %v1382_v43, %v2340_v53  ;;  %v739_v7 = vadd.f32 %v738_v52, %v3587_v47  ;;  %v862_v56 = vmul.f32 %v1383_v31, %v2168_v3  ;;  %1110 = vst [vmem:[%s3449_s1 + $0x80] sm:$0xff] %v854_v16 }
  0xc2   :  { %v767_v37 = vadd.f32 %v766_v50, %v2193_v17  ;;  %v713_v28 = vrot.slane %v712_v24, 4  ;;  %1111 = vst [vmem:[%s3449_s1 + $0x88] sm:$0xff] %v855_v25  ;;  %v1384_v17 = vld [vmem:[#allocation2 + $0xc8] sm:$0xff]  ;;  %v864_v57 = vmul.f32 %v1385_v62, %v2340_v53  ;;  %v870_v41 = vmul.f32 %v1386_v32, %v2168_v3  ;;  %v1391_v25 = vld [vmem:[#allocation2 + $0x150] sm:$0xff] }
  0xc3   :  { %1112 = vst [vmem:[%s3449_s1 + $0x90] sm:$0xff] %v856_v58  ;;  %v863_v59 = vmul.f32 %v1384_v17, %v2235_v39  ;;  %v740_v4 = vadd.f32 %v739_v7, %v2118_v34  ;;  %v796_v52 = vadd.f32 %v795_v48, %v2273_v6  ;;  %1118 = vst [vmem:[%s3449_s1 + $0xc0] sm:$0xff] %v862_v56  ;;  %v1387_v50 = vld [vmem:[#allocation2 + $0x108] sm:$0xff]  ;;  %v1388_v34 = vld [vmem:[#allocation2 + $0x110] sm:$0xff] }
  0xc4   :  { %v768_v0 = vadd.f32 %v767_v37, %v2197_v15  ;;  %v871_v36 = vmul.f32 %v1387_v50, %v2235_v39  ;;  %v714_v30 = vadd.f32 %v713_v28, %v712_v24  ;;  %1120 = vst [vmem:[%s3449_s1 + $0xd0] sm:$0xff] %v864_v57  ;;  %1126 = vst [vmem:[%s3449_s1 + $0x100] sm:$0xff] %v870_v41  ;;  %v1389_v6 = vld [vmem:[#allocation2 + $0x140] sm:$0xff]  ;;  %v1394_v7 = vld [vmem:[#allocation2 + $0x190] sm:$0xff]  ;;  %v2442_v62 = vpop.eup %1364 }
  0xc5   :  { %1119 = vst [vmem:[%s3449_s1 + $0xc8] sm:$0xff] %v863_v59  ;;  %v872_v15 = vmul.f32 %v1388_v34, %v2340_v53  ;;  %v878_v20 = vmul.f32 %v1389_v6, %v2168_v3  ;;  %v879_v24 = vmul.f32 %v1390_v23, %v2235_v39  ;;  %v741_v35 = vadd.f32 %v740_v4, %v2120_v8  ;;  %v1392_v8 = vld [vmem:[#allocation2 + $0x180] sm:$0xff]  ;;  %v3588_v48 = vld [vmem:[#allocation12_spill] sm:$0xff]  ;;  %v1397_v32 = vld [vmem:[#allocation2 + $0x1d0] sm:$0xff] }
  0xc6   :  { %v769_v16 = vadd.f32 %v768_v0, %v2199_v12  ;;  %v797_v45 = vadd.f32 %v796_v52, %v2275_v9  ;;  %1127 = vst [vmem:[%s3449_s1 + $0x108] sm:$0xff] %v871_v36  ;;  %v880_v43 = vmul.f32 %v1391_v25, %v2340_v53  ;;  %v715_v58 = vrot.slane %v714_v30, 2  ;;  %v1393_v9 = vld [vmem:[#allocation2 + $0x188] sm:$0xff]  ;;  %v1395_v17 = vld [vmem:[#allocation2 + $0x1c0] sm:$0xff]  ;;  %v1399_v52 = vld [vmem:[#allocation2 + $0x18] sm:$0xff] }
  0xc7   :  { %1128 = vst [vmem:[%s3449_s1 + $0x110] sm:$0xff] %v872_v15  ;;  %1134 = vst [vmem:[%s3449_s1 + $0x140] sm:$0xff] %v878_v20  ;;  %v886_v12 = vmul.f32 %v1392_v8, %v2168_v3  ;;  %v887_v47 = vmul.f32 %v1393_v9, %v2235_v39  ;;  %v888_v37 = vmul.f32 %v1394_v7, %v2340_v53  ;;  %v1398_v4 = vld [vmem:[#allocation2 + $0x200] sm:$0xff]  ;;  %v1400_v6 = vld [vmem:[#allocation2 + $0x58] sm:$0xff] }
  0xc8   :  { %1135 = vst [vmem:[%s3449_s1 + $0x148] sm:$0xff] %v879_v24  ;;  %v742_v31 = vadd.f32 %v741_v35, %v3588_v48  ;;  %v770_v56 = vadd.f32 %v769_v16, %v2203_v44  ;;  %v798_v28 = vadd.f32 %v797_v45, %v2279_v11  ;;  %1136 = vst [vmem:[%s3449_s1 + $0x150] sm:$0xff] %v880_v43  ;;  %v1396_v44 = vld [vmem:[#allocation2 + $0x1c8] sm:$0xff]  ;;  %v1401_v23 = vld [vmem:[#allocation2 + $0x98] sm:$0xff] }
  0xc9   :  { %v894_v59 = vmul.f32 %v1395_v17, %v2168_v3  ;;  %v716_v57 = vadd.f32 %v715_v58, %v714_v30  ;;  %1142 = vst [vmem:[%s3449_s1 + $0x180] sm:$0xff] %v886_v12  ;;  %1143 = vst [vmem:[%s3449_s1 + $0x188] sm:$0xff] %v887_v47  ;;  %v895_v11 = vmul.f32 %v1396_v44, %v2235_v39  ;;  %v1402_v35 = vld [vmem:[#allocation2 + $0xd8] sm:$0xff]  ;;  %v3589_v17 = vld [vmem:[#allocation35_spill] sm:$0xff] }
  0xca   :  { %1144 = vst [vmem:[%s3449_s1 + $0x190] sm:$0xff] %v888_v37  ;;  %v896_v41 = vmul.f32 %v1397_v32, %v2340_v53  ;;  %v902_v0 = vmul.f32 %v1398_v4, %v2168_v3  ;;  %v841_v50 = vmul.f32 %v1399_v52, %v2442_v62  ;;  %v743_v36 = vadd.f32 %v742_v31, %v2127_v13  ;;  %v1403_v45 = vld [vmem:[#allocation2 + $0x118] sm:$0xff]  ;;  %v1407_v37 = vld [vmem:[#allocation2 + $0x208] sm:$0xff] }
  0xcb   :  { %v771_v30 = vadd.f32 %v770_v56, %v2205_v27  ;;  %v799_v34 = vadd.f32 %v798_v28, %v2283_v63  ;;  %1150 = vst [vmem:[%s3449_s1 + $0x1c0] sm:$0xff] %v894_v59  ;;  %v717_v15 = vrot.slane %v716_v57, 1  ;;  %v849_v20 = vmul.f32 %v1400_v6, %v2442_v62  ;;  %1151 = vst [vmem:[%s3449_s1 + $0x1c8] sm:$0xff] %v895_v11  ;;  %v1406_v8 = vld [vmem:[#allocation2 + $0x1d8] sm:$0xff]  ;;  %v1410_v56 = vld [vmem:[#allocation2 + $0x240] sm:$0xff] }
  0xcc   :  { %v857_v24 = vmul.f32 %v1401_v23, %v2442_v62  ;;  %v865_v16 = vmul.f32 %v1402_v35, %v2442_v62  ;;  %1152 = vst [vmem:[%s3449_s1 + $0x1d0] sm:$0xff] %v896_v41  ;;  %1158 = vst [vmem:[%s3449_s1 + $0x200] sm:$0xff] %v902_v0  ;;  %v744_v13 = vadd.f32 %v743_v36, %v2129_v29  ;;  %v1404_v29 = vld [vmem:[#allocation2 + $0x158] sm:$0xff]  ;;  %v1411_v11 = vld [vmem:[#allocation2 + $0x248] sm:$0xff] }
  0xcd   :  { %1097 = vst [vmem:[%s3449_s1 + $0x18] sm:$0xff] %v841_v50  ;;  %v772_v27 = vadd.f32 %v771_v30, %v2209_v1  ;;  %v800_v63 = vadd.f32 %v799_v34, %v2285_v60  ;;  %v873_v25 = vmul.f32 %v1403_v45, %v2442_v62  ;;  %v718_v43 = vadd.f32 %v717_v15, %v716_v57  ;;  %v1405_v60 = vld [vmem:[#allocation2 + $0x198] sm:$0xff]  ;;  %v1414_v0 = vld [vmem:[#allocation2 + $0x280] sm:$0xff]  ;;  %v1415_v50 = vld [vmem:[#allocation2 + $0x288] sm:$0xff] }
  0xce   :  { %1105 = vst [vmem:[%s3449_s1 + $0x58] sm:$0xff] %v849_v20  ;;  %1113 = vst [vmem:[%s3449_s1 + $0x98] sm:$0xff] %v857_v24  ;;  %v881_v1 = vmul.f32 %v1404_v29, %v2442_v62  ;;  %v889_v58 = vmul.f32 %v1405_v60, %v2442_v62  ;;  %v897_v12 = vmul.f32 %v1406_v8, %v2442_v62  ;;  %v1413_v41 = vld [vmem:[#allocation2 + $0x258] sm:$0xff]  ;;  %v3591_v15 = vld [vmem:[#allocation21_spill] sm:$0xff] }
  0xcf   :  { %1121 = vst [vmem:[%s3449_s1 + $0xd8] sm:$0xff] %v865_v16  ;;  %v745_v9 = vadd.f32 %v744_v13, %v2131_v38  ;;  %v773_v47 = vadd.f32 %v772_v27, %v2211_v26  ;;  %v801_v7 = vadd.f32 %v800_v63, %v2289_v61  ;;  %1129 = vst [vmem:[%s3449_s1 + $0x118] sm:$0xff] %v873_v25  ;;  %1366 = vrsqrt.f32 %v718_v43  ;;  %v1408_v38 = vld [vmem:[#allocation2 + $0x210] sm:$0xff]  ;;  %v1409_v61 = vld [vmem:[#allocation2 + $0x218] sm:$0xff] }
  0xd0   :  { %v903_v48 = vmul.f32 %v1407_v37, %v2235_v39  ;;  %1137 = vst [vmem:[%s3449_s1 + $0x158] sm:$0xff] %v881_v1  ;;  %1145 = vst [vmem:[%s3449_s1 + $0x198] sm:$0xff] %v889_v58  ;;  %v904_v26 = vmul.f32 %v1408_v38, %v2340_v53  ;;  %v905_v31 = vmul.f32 %v1409_v61, %v2442_v62  ;;  %v3590_v30 = vld [vmem:[#allocation20_spill] sm:$0xff]  ;;  %v1416_v23 = vld [vmem:[#allocation2 + $0x290] sm:$0xff] }
  0xd1   :  { %1153 = vst [vmem:[%s3449_s1 + $0x1d8] sm:$0xff] %v897_v12  ;;  %v910_v28 = vmul.f32 %v1410_v56, %v2168_v3  ;;  %v746_v59 = vadd.f32 %v745_v9, %v3589_v17  ;;  %v774_v57 = vadd.f32 %v773_v47, %v2215_v46  ;;  %v802_v44 = vadd.f32 %v801_v7, %v2292_v19  ;;  %v1412_v46 = vld [vmem:[#allocation2 + $0x250] sm:$0xff]  ;;  %v1418_v16 = vld [vmem:[#allocation2 + $0x2c0] sm:$0xff]  ;;  %v1419_v27 = vld [vmem:[#allocation2 + $0x2c8] sm:$0xff] }
  0xd2   :  { %1159 = vst [vmem:[%s3449_s1 + $0x208] sm:$0xff] %v903_v48  ;;  %v911_v32 = vmul.f32 %v1411_v11, %v2235_v39  ;;  %1160 = vst [vmem:[%s3449_s1 + $0x210] sm:$0xff] %v904_v26  ;;  %v912_v19 = vmul.f32 %v1412_v46, %v2340_v53  ;;  %v913_v4 = vmul.f32 %v1413_v41, %v2442_v62  ;;  %v1420_v45 = vld [vmem:[#allocation2 + $0x2d0] sm:$0xff]  ;;  %v3592_v43 = vld [vmem:[#allocation13_spill] sm:$0xff] }
  0xd3   :  { %1161 = vst [vmem:[%s3449_s1 + $0x218] sm:$0xff] %v905_v31  ;;  %1166 = vst [vmem:[%s3449_s1 + $0x240] sm:$0xff] %v910_v28  ;;  %v918_v52 = vmul.f32 %v1414_v0, %v2168_v3  ;;  %v919_v36 = vmul.f32 %v1415_v50, %v2235_v39  ;;  %v747_v34 = vadd.f32 %v746_v59, %v3590_v30  ;;  %v3593_v1 = vld [vmem:[#allocation14_spill] sm:$0xff]  ;;  %v1421_v8 = vld [vmem:[#allocation2 + $0x2d8] sm:$0xff] }
  0xd4   :  { %v775_v6 = vadd.f32 %v774_v57, %v3591_v15  ;;  %v803_v20 = vadd.f32 %v802_v44, %v2294_v51  ;;  %1167 = vst [vmem:[%s3449_s1 + $0x248] sm:$0xff] %v911_v32  ;;  %v920_v24 = vmul.f32 %v1416_v23, %v2340_v53  ;;  %1168 = vst [vmem:[%s3449_s1 + $0x250] sm:$0xff] %v912_v19  ;;  %v1417_v51 = vld [vmem:[#allocation2 + $0x298] sm:$0xff]  ;;  %v1423_v47 = vld [vmem:[#allocation2 + $0x308] sm:$0xff] }
  0xd5   :  { %1169 = vst [vmem:[%s3449_s1 + $0x258] sm:$0xff] %v913_v4  ;;  %1174 = vst [vmem:[%s3449_s1 + $0x280] sm:$0xff] %v918_v52  ;;  %v921_v35 = vmul.f32 %v1417_v51, %v2442_v62  ;;  %v926_v13 = vmul.f32 %v1418_v16, %v2168_v3  ;;  %v927_v63 = vmul.f32 %v1419_v27, %v2235_v39  ;;  %v1424_v37 = vld [vmem:[#allocation2 + $0x310] sm:$0xff]  ;;  %v1425_v38 = vld [vmem:[#allocation2 + $0x318] sm:$0xff] }
  0xd6   :  { %1175 = vst [vmem:[%s3449_s1 + $0x288] sm:$0xff] %v919_v36  ;;  %v928_v25 = vmul.f32 %v1420_v45, %v2340_v53  ;;  %v748_v29 = vadd.f32 %v747_v34, %v3592_v43  ;;  %v776_v60 = vadd.f32 %v775_v6, %v3593_v1  ;;  %v804_v58 = vadd.f32 %v803_v20, %v2298_v5  ;;  %v1422_v5 = vld [vmem:[#allocation2 + $0x300] sm:$0xff]  ;;  %v3594_v61 = vld [vmem:[#allocation36_spill] sm:$0xff]  ;;  %v3595_v56 = vld [vmem:[#allocation22_spill] sm:$0xff] }
  0xd7   :  { %1176 = vst [vmem:[%s3449_s1 + $0x290] sm:$0xff] %v920_v24  ;;  %v929_v12 = vmul.f32 %v1421_v8, %v2442_v62  ;;  %1177 = vst [vmem:[%s3449_s1 + $0x298] sm:$0xff] %v921_v35  ;;  %v934_v9 = vmul.f32 %v1422_v5, %v2168_v3  ;;  %v935_v7 = vmul.f32 %v1423_v47, %v2235_v39  ;;  %v3596_v17 = vld [vmem:[#allocation27_spill] sm:$0xff]  ;;  %v1426_v57 = vld [vmem:[#allocation2 + $0x340] sm:$0xff] }
  0xd8   :  { %1182 = vst [vmem:[%s3449_s1 + $0x2c0] sm:$0xff] %v926_v13  ;;  %1183 = vst [vmem:[%s3449_s1 + $0x2c8] sm:$0xff] %v927_v63  ;;  %v936_v48 = vmul.f32 %v1424_v37, %v2340_v53  ;;  %v937_v26 = vmul.f32 %v1425_v38, %v2442_v62  ;;  %v749_v31 = vadd.f32 %v748_v29, %v3594_v61  ;;  %v1427_v11 = vld [vmem:[#allocation2 + $0x348] sm:$0xff]  ;;  %v1428_v46 = vld [vmem:[#allocation2 + $0x350] sm:$0xff] }
  0xd9   :  { %1184 = vst [vmem:[%s3449_s1 + $0x2d0] sm:$0xff] %v928_v25  ;;  %v777_v28 = vadd.f32 %v776_v60, %v3595_v56  ;;  %v805_v59 = vadd.f32 %v804_v58, %v3596_v17  ;;  %1185 = vst [vmem:[%s3449_s1 + $0x2d8] sm:$0xff] %v929_v12  ;;  %v942_v44 = vmul.f32 %v1426_v57, %v2168_v3  ;;  %v1429_v41 = vld [vmem:[#allocation2 + $0x358] sm:$0xff]  ;;  %v1430_v0 = vld [vmem:[#allocation2 + $0x380] sm:$0xff]  ;;  %v2608_v20 = vpop.eup %1366 }
  0xda   :  { %1190 = vst [vmem:[%s3449_s1 + $0x300] sm:$0xff] %v934_v9  ;;  %1191 = vst [vmem:[%s3449_s1 + $0x308] sm:$0xff] %v935_v7  ;;  %v943_v32 = vmul.f32 %v1427_v11, %v2235_v39  ;;  %v944_v19 = vmul.f32 %v1428_v46, %v2340_v53  ;;  %v945_v4 = vmul.f32 %v1429_v41, %v2442_v62  ;;  %v750_v50 = vrot.slane %v749_v31, 4  ;;  %v3597_v36 = vld [vmem:[#allocation15_spill] sm:$0xff]  ;;  %v1431_v15 = vld [vmem:[#allocation2 + $0x388] sm:$0xff] }
  0xdb   :  { %1192 = vst [vmem:[%s3449_s1 + $0x310] sm:$0xff] %v936_v48  ;;  %1193 = vst [vmem:[%s3449_s1 + $0x318] sm:$0xff] %v937_v26  ;;  %v950_v52 = vmul.f32 %v1430_v0, %v2168_v3  ;;  %v778_v30 = vadd.f32 %v777_v28, %v3597_v36  ;;  %v806_v34 = vadd.f32 %v805_v59, %v2303_v55  ;;  %v1432_v55 = vld [vmem:[#allocation2 + $0x390] sm:$0xff]  ;;  %v1433_v24 = vld [vmem:[#allocation2 + $0x398] sm:$0xff] }
  0xdc   :  { %1198 = vst [vmem:[%s3449_s1 + $0x340] sm:$0xff] %v942_v44  ;;  %v951_v6 = vmul.f32 %v1431_v15, %v2235_v39  ;;  %1199 = vst [vmem:[%s3449_s1 + $0x348] sm:$0xff] %v943_v32  ;;  %v952_v23 = vmul.f32 %v1432_v55, %v2340_v53  ;;  %v953_v51 = vmul.f32 %v1433_v24, %v2442_v62  ;;  %v1434_v35 = vld [vmem:[#allocation2 + $0x3c0] sm:$0xff]  ;;  %v1435_v13 = vld [vmem:[#allocation2 + $0x3c8] sm:$0xff] }
  0xdd   :  { %1200 = vst [vmem:[%s3449_s1 + $0x350] sm:$0xff] %v944_v19  ;;  %1201 = vst [vmem:[%s3449_s1 + $0x358] sm:$0xff] %v945_v4  ;;  %v958_v16 = vmul.f32 %v1434_v35, %v2168_v3  ;;  %v959_v27 = vmul.f32 %v1435_v13, %v2235_v39  ;;  %v1436_v63 = vld [vmem:[#allocation2 + $0x20] sm:$0xff]  ;;  %v751_v25 = vadd.f32 %v750_v50, %v749_v31  ;;  %v3599_v1 = vld [vmem:[#allocation28_spill] sm:$0xff] }
  0xde   :  { %1206 = vst [vmem:[%s3449_s1 + $0x380] sm:$0xff] %v950_v52  ;;  %v842_v45 = vmul.f32 %v1436_v63, %v2608_v20  ;;  %v3598_v43 = vld [vmem:[#allocation37_spill] sm:$0xff]  ;;  %v807_v60 = vadd.f32 %v806_v34, %v3599_v1  ;;  %1207 = vst [vmem:[%s3449_s1 + $0x388] sm:$0xff] %v951_v6  ;;  %v3600_v38 = vld [vmem:[#allocation23_spill] sm:$0xff] }
  0xdf   :  { %v779_v29 = vadd.f32 %v778_v30, %v3598_v43  ;;  %v1437_v58 = vld [vmem:[#allocation2 + $0x60] sm:$0xff]  ;;  %1208 = vst [vmem:[%s3449_s1 + $0x390] sm:$0xff] %v952_v23  ;;  %1209 = vst [vmem:[%s3449_s1 + $0x398] sm:$0xff] %v953_v51  ;;  %v752_v48 = vrot.slane %v751_v25, 2  ;;  %v3602_v4 = vld [vmem:[#allocation16_spill] sm:$0xff] }
  0xe0   :  { %v850_v8 = vmul.f32 %v1437_v58, %v2608_v20  ;;  %v1438_v12 = vld [vmem:[#allocation2 + $0xa0] sm:$0xff]  ;;  %1214 = vst [vmem:[%s3449_s1 + $0x3c0] sm:$0xff] %v958_v16  ;;  %1215 = vst [vmem:[%s3449_s1 + $0x3c8] sm:$0xff] %v959_v27  ;;  %v3603_v52 = vld [vmem:[#allocation30_spill] sm:$0xff] }
  0xe1   :  { %v858_v5 = vmul.f32 %v1438_v12, %v2608_v20  ;;  %v1439_v9 = vld [vmem:[#allocation2 + $0xe0] sm:$0xff]  ;;  %1098 = vst [vmem:[%s3449_s1 + $0x20] sm:$0xff] %v842_v45  ;;  %v780_v26 = vadd.f32 %v779_v29, %v3600_v38  ;;  %v753_v41 = vadd.f32 %v752_v48, %v751_v25  ;;  %v3604_v13 = vld [vmem:[#allocation24_spill] sm:$0xff]  ;;  %v1451_v45 = vld [vmem:[#allocation2 + $0x3d0] sm:$0xff] }
  0xe2   :  { %v866_v47 = vmul.f32 %v1439_v9, %v2608_v20  ;;  %v1440_v7 = vld [vmem:[#allocation2 + $0x120] sm:$0xff]  ;;  %1106 = vst [vmem:[%s3449_s1 + $0x60] sm:$0xff] %v850_v8  ;;  %v960_v25 = vmul.f32 %v1451_v45, %v2340_v53  ;;  %v1455_v8 = vld [vmem:[#allocation2 + $0x408] sm:$0xff]  ;;  %v1456_v48 = vld [vmem:[#allocation2 + $0x410] sm:$0xff] }
  0xe3   :  { %v874_v37 = vmul.f32 %v1440_v7, %v2608_v20  ;;  %v3601_v61 = vld [vmem:[#allocation29_spill] sm:$0xff]  ;;  %1114 = vst [vmem:[%s3449_s1 + $0xa0] sm:$0xff] %v858_v5  ;;  %v781_v0 = vadd.f32 %v780_v26, %v3602_v4  ;;  %v754_v16 = vrot.slane %v753_v41, 1  ;;  %v967_v12 = vmul.f32 %v1455_v8, %v2235_v39  ;;  %v3605_v9 = vld [vmem:[#allocation38_spill] sm:$0xff]  ;;  %v3606_v7 = vld [vmem:[#allocation31_spill] sm:$0xff] }
  0xe4   :  { %v808_v31 = vadd.f32 %v807_v60, %v3601_v61  ;;  %v1441_v56 = vld [vmem:[#allocation2 + $0x160] sm:$0xff]  ;;  %1122 = vst [vmem:[%s3449_s1 + $0xe0] sm:$0xff] %v866_v47  ;;  %1216 = vst [vmem:[%s3449_s1 + $0x3d0] sm:$0xff] %v960_v25  ;;  %v968_v38 = vmul.f32 %v1456_v48, %v2340_v53  ;;  %v1457_v26 = vld [vmem:[#allocation2 + $0x418] sm:$0xff] }
  0xe5   :  { %v882_v28 = vmul.f32 %v1441_v56, %v2608_v20  ;;  %1130 = vst [vmem:[%s3449_s1 + $0x120] sm:$0xff] %v874_v37  ;;  %v1442_v17 = vld [vmem:[#allocation2 + $0x1a0] sm:$0xff]  ;;  %v782_v27 = vadd.f32 %v781_v0, %v3604_v13  ;;  %v755_v5 = vadd.f32 %v754_v16, %v753_v41  ;;  %1223 = vst [vmem:[%s3449_s1 + $0x408] sm:$0xff] %v967_v12  ;;  %v1471_v45 = vld [vmem:[#allocation2 + $0x4d0] sm:$0xff] }
  0xe6   :  { %v890_v59 = vmul.f32 %v1442_v17, %v2608_v20  ;;  %v1443_v57 = vld [vmem:[#allocation2 + $0x1e0] sm:$0xff]  ;;  %v809_v50 = vadd.f32 %v808_v31, %v3603_v52  ;;  %v969_v61 = vmul.f32 %v1457_v26, %v2442_v62  ;;  %1224 = vst [vmem:[%s3449_s1 + $0x410] sm:$0xff] %v968_v38  ;;  %v992_v25 = vmul.f32 %v1471_v45, %v2340_v53  ;;  %v1493_v45 = vld [vmem:[#allocation2 + $0x68] sm:$0xff] }
  0xe7   :  { %v898_v44 = vmul.f32 %v1443_v57, %v2608_v20  ;;  %v1444_v11 = vld [vmem:[#allocation2 + $0x220] sm:$0xff]  ;;  %1138 = vst [vmem:[%s3449_s1 + $0x160] sm:$0xff] %v882_v28  ;;  %v783_v47 = vadd.f32 %v782_v27, %v3605_v9  ;;  %1368 = vrsqrt.f32 %v755_v5  ;;  %v1470_v27 = vld [vmem:[#allocation2 + $0x4c8] sm:$0xff] }
  0xe8   :  { %v906_v32 = vmul.f32 %v1444_v11, %v2608_v20  ;;  %v1445_v46 = vld [vmem:[#allocation2 + $0x260] sm:$0xff]  ;;  %1146 = vst [vmem:[%s3449_s1 + $0x1a0] sm:$0xff] %v890_v59  ;;  %v810_v63 = vadd.f32 %v809_v50, %v2314_v22  ;;  %v1452_v22 = vld [vmem:[#allocation2 + $0x3d8] sm:$0xff]  ;;  %v1460_v59 = vld [vmem:[#allocation2 + $0x448] sm:$0xff] }
  0xe9   :  { %v914_v19 = vmul.f32 %v1445_v46, %v2608_v20  ;;  %v1446_v36 = vld [vmem:[#allocation2 + $0x2a0] sm:$0xff]  ;;  %1154 = vst [vmem:[%s3449_s1 + $0x1e0] sm:$0xff] %v898_v44  ;;  %v961_v43 = vmul.f32 %v1452_v22, %v2442_v62  ;;  %v975_v57 = vmul.f32 %v1460_v59, %v2235_v39  ;;  %v1461_v46 = vld [vmem:[#allocation2 + $0x450] sm:$0xff]  ;;  %1225 = vst [vmem:[%s3449_s1 + $0x418] sm:$0xff] %v969_v61 }
  0xea   :  { %v922_v30 = vmul.f32 %v1446_v36, %v2608_v20  ;;  %1162 = vst [vmem:[%s3449_s1 + $0x220] sm:$0xff] %v906_v32  ;;  %v1447_v34 = vld [vmem:[#allocation2 + $0x2e0] sm:$0xff]  ;;  %v811_v37 = vadd.f32 %v810_v63, %v3606_v7  ;;  %v1465_v36 = vld [vmem:[#allocation2 + $0x488] sm:$0xff]  ;;  %v991_v63 = vmul.f32 %v1470_v27, %v2235_v39  ;;  %1248 = vst [vmem:[%s3449_s1 + $0x4d0] sm:$0xff] %v992_v25 }
  0xeb   :  { %1170 = vst [vmem:[%s3449_s1 + $0x260] sm:$0xff] %v914_v19  ;;  %v930_v15 = vmul.f32 %v1447_v34, %v2608_v20  ;;  %v1448_v6 = vld [vmem:[#allocation2 + $0x320] sm:$0xff]  ;;  %1217 = vst [vmem:[%s3449_s1 + $0x3d8] sm:$0xff] %v961_v43  ;;  %v976_v19 = vmul.f32 %v1461_v46, %v2340_v53  ;;  %v3608_v34 = vld [vmem:[#allocation39_spill] sm:$0xff] }
  0xec   :  { %v938_v55 = vmul.f32 %v1448_v6, %v2608_v20  ;;  %v1449_v23 = vld [vmem:[#allocation2 + $0x360] sm:$0xff]  ;;  %1178 = vst [vmem:[%s3449_s1 + $0x2a0] sm:$0xff] %v922_v30  ;;  %v812_v32 = vadd.f32 %v811_v37, %v2320_v49  ;;  %1231 = vst [vmem:[%s3449_s1 + $0x448] sm:$0xff] %v975_v57  ;;  %v1462_v49 = vld [vmem:[#allocation2 + $0x458] sm:$0xff]  ;;  %v983_v30 = vmul.f32 %v1465_v36, %v2235_v39 }
  0xed   :  { %v946_v24 = vmul.f32 %v1449_v23, %v2608_v20  ;;  %v1450_v51 = vld [vmem:[#allocation2 + $0x3a0] sm:$0xff]  ;;  %1186 = vst [vmem:[%s3449_s1 + $0x2e0] sm:$0xff] %v930_v15  ;;  %v977_v41 = vmul.f32 %v1462_v49, %v2442_v62  ;;  %1232 = vst [vmem:[%s3449_s1 + $0x450] sm:$0xff] %v976_v19  ;;  %v3609_v22 = vld [vmem:[#allocation26_spill] sm:$0xff] }
  0xee   :  { %v954_v35 = vmul.f32 %v1450_v51, %v2608_v20  ;;  %1194 = vst [vmem:[%s3449_s1 + $0x320] sm:$0xff] %v938_v55  ;;  %v1453_v29 = vld [vmem:[#allocation2 + $0x3e0] sm:$0xff]  ;;  %v813_v6 = vadd.f32 %v812_v32, %v2322_v21  ;;  %v1466_v55 = vld [vmem:[#allocation2 + $0x490] sm:$0xff]  ;;  %1239 = vst [vmem:[%s3449_s1 + $0x488] sm:$0xff] %v983_v30 }
  0xef   :  { %1202 = vst [vmem:[%s3449_s1 + $0x360] sm:$0xff] %v946_v24  ;;  %v962_v1 = vmul.f32 %v1453_v29, %v2608_v20  ;;  %v1454_v60 = vld [vmem:[#allocation2 + $0x400] sm:$0xff]  ;;  %v984_v23 = vmul.f32 %v1466_v55, %v2340_v53  ;;  %v1467_v24 = vld [vmem:[#allocation2 + $0x498] sm:$0xff]  ;;  %1233 = vst [vmem:[%s3449_s1 + $0x458] sm:$0xff] %v977_v41 }
  0xf0   :  { %1210 = vst [vmem:[%s3449_s1 + $0x3a0] sm:$0xff] %v954_v35  ;;  %v966_v58 = vmul.f32 %v1454_v60, %v2168_v3  ;;  %v1458_v31 = vld [vmem:[#allocation2 + $0x420] sm:$0xff]  ;;  %v985_v51 = vmul.f32 %v1467_v24, %v2442_v62  ;;  %v814_v29 = vadd.f32 %v813_v6, %v2325_v14  ;;  %1247 = vst [vmem:[%s3449_s1 + $0x4c8] sm:$0xff] %v991_v63  ;;  %v1475_v5 = vld [vmem:[#allocation2 + $0x508] sm:$0xff] }
  0xf1   :  { %1218 = vst [vmem:[%s3449_s1 + $0x3e0] sm:$0xff] %v962_v1  ;;  %v970_v56 = vmul.f32 %v1458_v31, %v2608_v20  ;;  %v1459_v28 = vld [vmem:[#allocation2 + $0x440] sm:$0xff]  ;;  %1240 = vst [vmem:[%s3449_s1 + $0x490] sm:$0xff] %v984_v23  ;;  %v1472_v1 = vld [vmem:[#allocation2 + $0x4d8] sm:$0xff]  ;;  %v999_v9 = vmul.f32 %v1475_v5, %v2235_v39  ;;  %v2857_v23 = vpop.eup %1368 }
  0xf2   :  { %1222 = vst [vmem:[%s3449_s1 + $0x400] sm:$0xff] %v966_v58  ;;  %v974_v17 = vmul.f32 %v1459_v28, %v2168_v3  ;;  %v3607_v44 = vld [vmem:[#allocation25_spill] sm:$0xff]  ;;  %1241 = vst [vmem:[%s3449_s1 + $0x498] sm:$0xff] %v985_v51  ;;  %v993_v60 = vmul.f32 %v1472_v1, %v2442_v62  ;;  %v1477_v37 = vld [vmem:[#allocation2 + $0x518] sm:$0xff]  ;;  %v815_v26 = vadd.f32 %v814_v29, %v2327_v10 }
  0xf3   :  { %v784_v11 = vadd.f32 %v783_v47, %v3607_v44  ;;  %1226 = vst [vmem:[%s3449_s1 + $0x420] sm:$0xff] %v970_v56  ;;  %v1463_v4 = vld [vmem:[#allocation2 + $0x460] sm:$0xff]  ;;  %v1476_v47 = vld [vmem:[#allocation2 + $0x510] sm:$0xff]  ;;  %v1001_v48 = vmul.f32 %v1477_v37, %v2442_v62  ;;  %1255 = vst [vmem:[%s3449_s1 + $0x508] sm:$0xff] %v999_v9 }
  0xf4   :  { %1230 = vst [vmem:[%s3449_s1 + $0x440] sm:$0xff] %v974_v17  ;;  %v978_v0 = vmul.f32 %v1463_v4, %v2608_v20  ;;  %v1464_v52 = vld [vmem:[#allocation2 + $0x480] sm:$0xff]  ;;  %v1000_v7 = vmul.f32 %v1476_v47, %v2340_v53  ;;  %1249 = vst [vmem:[%s3449_s1 + $0x4d8] sm:$0xff] %v993_v60  ;;  %v1480_v10 = vld [vmem:[#allocation2 + $0x548] sm:$0xff]  ;;  %v816_v49 = vadd.f32 %v815_v26, %v2331_v18 }
  0xf5   :  { %v982_v50 = vmul.f32 %v1464_v52, %v2168_v3  ;;  %v785_v15 = vadd.f32 %v784_v11, %v3608_v34  ;;  %v1468_v21 = vld [vmem:[#allocation2 + $0x4a0] sm:$0xff]  ;;  %1257 = vst [vmem:[%s3449_s1 + $0x518] sm:$0xff] %v1001_v48  ;;  %v1007_v17 = vmul.f32 %v1480_v10, %v2235_v39  ;;  %v1481_v59 = vld [vmem:[#allocation2 + $0x550] sm:$0xff]  ;;  %v1482_v44 = vld [vmem:[#allocation2 + $0x558] sm:$0xff] }
  0xf6   :  { %1234 = vst [vmem:[%s3449_s1 + $0x460] sm:$0xff] %v978_v0  ;;  %v986_v35 = vmul.f32 %v1468_v21, %v2608_v20  ;;  %v1469_v16 = vld [vmem:[#allocation2 + $0x4c0] sm:$0xff]  ;;  %1256 = vst [vmem:[%s3449_s1 + $0x510] sm:$0xff] %v1000_v7  ;;  %v1008_v57 = vmul.f32 %v1481_v59, %v2340_v53  ;;  %v1009_v11 = vmul.f32 %v1482_v44, %v2442_v62  ;;  %v1485_v0 = vld [vmem:[#allocation2 + $0x588] sm:$0xff] }
  0xf7   :  { %1238 = vst [vmem:[%s3449_s1 + $0x480] sm:$0xff] %v982_v50  ;;  %v990_v13 = vmul.f32 %v1469_v16, %v2168_v3  ;;  %v786_v43 = vadd.f32 %v785_v15, %v3609_v22  ;;  %v1473_v58 = vld [vmem:[#allocation2 + $0x4e0] sm:$0xff]  ;;  %v1015_v52 = vmul.f32 %v1485_v0, %v2235_v39  ;;  %1263 = vst [vmem:[%s3449_s1 + $0x548] sm:$0xff] %v1007_v17  ;;  %v1486_v18 = vld [vmem:[#allocation2 + $0x590] sm:$0xff] }
  0xf8   :  { %v994_v8 = vmul.f32 %v1473_v58, %v2608_v20  ;;  %1242 = vst [vmem:[%s3449_s1 + $0x4a0] sm:$0xff] %v986_v35  ;;  %v1474_v14 = vld [vmem:[#allocation2 + $0x500] sm:$0xff]  ;;  %1264 = vst [vmem:[%s3449_s1 + $0x550] sm:$0xff] %v1008_v57  ;;  %v1016_v50 = vmul.f32 %v1486_v18, %v2340_v53  ;;  %v1487_v36 = vld [vmem:[#allocation2 + $0x598] sm:$0xff]  ;;  %v817_v51 = vadd.f32 %v816_v49, %v2333_v40 }
  0xf9   :  { %1246 = vst [vmem:[%s3449_s1 + $0x4c0] sm:$0xff] %v990_v13  ;;  %v998_v12 = vmul.f32 %v1474_v14, %v2168_v3  ;;  %v787_v38 = vrot.slane %v786_v43, 4  ;;  %v1478_v61 = vld [vmem:[#allocation2 + $0x520] sm:$0xff]  ;;  %1265 = vst [vmem:[%s3449_s1 + $0x558] sm:$0xff] %v1009_v11  ;;  %v1017_v30 = vmul.f32 %v1487_v36, %v2442_v62  ;;  %v1490_v21 = vld [vmem:[#allocation2 + $0x5c8] sm:$0xff]  ;;  %v851_v40 = vmul.f32 %v1493_v45, %v2857_v23 }
  0xfa   :  { %1250 = vst [vmem:[%s3449_s1 + $0x4e0] sm:$0xff] %v994_v8  ;;  %v1002_v31 = vmul.f32 %v1478_v61, %v2608_v20  ;;  %v1479_v56 = vld [vmem:[#allocation2 + $0x540] sm:$0xff]  ;;  %1271 = vst [vmem:[%s3449_s1 + $0x588] sm:$0xff] %v1015_v52  ;;  %v1023_v35 = vmul.f32 %v1490_v21, %v2235_v39  ;;  %v1491_v16 = vld [vmem:[#allocation2 + $0x5d0] sm:$0xff] }
  0xfb   :  { %v1006_v28 = vmul.f32 %v1479_v56, %v2168_v3  ;;  %1254 = vst [vmem:[%s3449_s1 + $0x500] sm:$0xff] %v998_v12  ;;  %v1483_v32 = vld [vmem:[#allocation2 + $0x560] sm:$0xff]  ;;  %v788_v19 = vadd.f32 %v787_v38, %v786_v43  ;;  %v1024_v13 = vmul.f32 %v1491_v16, %v2340_v53  ;;  %v1492_v27 = vld [vmem:[#allocation2 + $0x28] sm:$0xff]  ;;  %1272 = vst [vmem:[%s3449_s1 + $0x590] sm:$0xff] %v1016_v50 }
  0xfc   :  { %v1010_v46 = vmul.f32 %v1483_v32, %v2608_v20  ;;  %1258 = vst [vmem:[%s3449_s1 + $0x520] sm:$0xff] %v1002_v31  ;;  %v1484_v41 = vld [vmem:[#allocation2 + $0x580] sm:$0xff]  ;;  %v843_v63 = vmul.f32 %v1492_v27, %v2857_v23  ;;  %v1494_v25 = vld [vmem:[#allocation2 + $0xa8] sm:$0xff]  ;;  %1273 = vst [vmem:[%s3449_s1 + $0x598] sm:$0xff] %v1017_v30 }
  0xfd   :  { %1262 = vst [vmem:[%s3449_s1 + $0x540] sm:$0xff] %v1006_v28  ;;  %v1014_v4 = vmul.f32 %v1484_v41, %v2168_v3  ;;  %v1488_v34 = vld [vmem:[#allocation2 + $0x5a0] sm:$0xff]  ;;  %v789_v24 = vrot.slane %v788_v19, 2  ;;  %v859_v22 = vmul.f32 %v1494_v25, %v2857_v23  ;;  %v1495_v43 = vld [vmem:[#allocation2 + $0xe8] sm:$0xff]  ;;  %v3610_v60 = vld [vmem:[#allocation32_spill] sm:$0xff] }
  0xfe   :  { %1266 = vst [vmem:[%s3449_s1 + $0x560] sm:$0xff] %v1010_v46  ;;  %v1018_v15 = vmul.f32 %v1488_v34, %v2608_v20  ;;  %v1489_v6 = vld [vmem:[#allocation2 + $0x5c0] sm:$0xff]  ;;  %v867_v29 = vmul.f32 %v1495_v43, %v2857_v23  ;;  %v818_v58 = vadd.f32 %v817_v51, %v3610_v60  ;;  %v1496_v8 = vld [vmem:[#allocation2 + $0x128] sm:$0xff]  ;;  %1279 = vst [vmem:[%s3449_s1 + $0x5c8] sm:$0xff] %v1023_v35 }
  0xff   :  { %v1022_v55 = vmul.f32 %v1489_v6, %v2168_v3  ;;  %1270 = vst [vmem:[%s3449_s1 + $0x580] sm:$0xff] %v1014_v4  ;;  %v790_v1 = vadd.f32 %v789_v24, %v788_v19  ;;  %v875_v14 = vmul.f32 %v1496_v8, %v2857_v23  ;;  %v1497_v12 = vld [vmem:[#allocation2 + $0x168] sm:$0xff]  ;;  %1280 = vst [vmem:[%s3449_s1 + $0x5d0] sm:$0xff] %v1024_v13  ;;  %v3611_v56 = vld [vmem:[#allocation40_spill] sm:$0xff] }
 0x100   :  { %1274 = vst [vmem:[%s3449_s1 + $0x5a0] sm:$0xff] %v1018_v15  ;;  %v883_v5 = vmul.f32 %v1497_v12, %v2857_v23  ;;  %1099 = vst [vmem:[%s3449_s1 + $0x28] sm:$0xff] %v843_v63  ;;  %v1498_v9 = vld [vmem:[#allocation2 + $0x1a8] sm:$0xff]  ;;  %v819_v28 = vadd.f32 %v818_v58, %v3611_v56  ;;  %v1515_v27 = vld [vmem:[#allocation2 + $0x5d8] sm:$0xff] }
 0x101   :  { %1278 = vst [vmem:[%s3449_s1 + $0x5c0] sm:$0xff] %v1022_v55  ;;  %1107 = vst [vmem:[%s3449_s1 + $0x68] sm:$0xff] %v851_v40  ;;  %v891_v47 = vmul.f32 %v1498_v9, %v2857_v23  ;;  %v1499_v7 = vld [vmem:[#allocation2 + $0x1e8] sm:$0xff]  ;;  %v791_v31 = vrot.slane %v790_v1, 1  ;;  %v1025_v63 = vmul.f32 %v1515_v27, %v2442_v62  ;;  %v1520_v58 = vld [vmem:[#allocation2 + $0x610] sm:$0xff] }
 0x102   :  { %1115 = vst [vmem:[%s3449_s1 + $0xa8] sm:$0xff] %v859_v22  ;;  %1123 = vst [vmem:[%s3449_s1 + $0xe8] sm:$0xff] %v867_v29  ;;  %v899_v37 = vmul.f32 %v1499_v7, %v2857_v23  ;;  %v1500_v48 = vld [vmem:[#allocation2 + $0x228] sm:$0xff]  ;;  %v820_v52 = vadd.f32 %v819_v28, %v2344_v2  ;;  %v1518_v22 = vld [vmem:[#allocation2 + $0x600] sm:$0xff]  ;;  %v1032_v8 = vmul.f32 %v1520_v58, %v2340_v53 }
 0x103   :  { %v907_v38 = vmul.f32 %v1500_v48, %v2857_v23  ;;  %v1501_v26 = vld [vmem:[#allocation2 + $0x268] sm:$0xff]  ;;  %1131 = vst [vmem:[%s3449_s1 + $0x128] sm:$0xff] %v875_v14  ;;  %1139 = vst [vmem:[%s3449_s1 + $0x168] sm:$0xff] %v883_v5  ;;  %v792_v0 = vadd.f32 %v791_v31, %v790_v1  ;;  %v1030_v43 = vmul.f32 %v1518_v22, %v2168_v3  ;;  %v1521_v14 = vld [vmem:[#allocation2 + $0x618] sm:$0xff] }
 0x104   :  { %v915_v61 = vmul.f32 %v1501_v26, %v2857_v23  ;;  %v1502_v10 = vld [vmem:[#allocation2 + $0x2a8] sm:$0xff]  ;;  %1147 = vst [vmem:[%s3449_s1 + $0x1a8] sm:$0xff] %v891_v47  ;;  %1155 = vst [vmem:[%s3449_s1 + $0x1e8] sm:$0xff] %v899_v37  ;;  %v821_v35 = vadd.f32 %v820_v52, %v2346_v42  ;;  %v1516_v42 = vld [vmem:[#allocation2 + $0x5e0] sm:$0xff]  ;;  %v1033_v12 = vmul.f32 %v1521_v14, %v2442_v62 }
 0x105   :  { %v923_v17 = vmul.f32 %v1502_v10, %v2857_v23  ;;  %v1503_v59 = vld [vmem:[#allocation2 + $0x2e8] sm:$0xff]  ;;  %1163 = vst [vmem:[%s3449_s1 + $0x228] sm:$0xff] %v907_v38  ;;  %1370 = vrsqrt.f32 %v792_v0  ;;  %v1026_v45 = vmul.f32 %v1516_v42, %v2608_v20  ;;  %1281 = vst [vmem:[%s3449_s1 + $0x5d8] sm:$0xff] %v1025_v63  ;;  %v1522_v5 = vld [vmem:[#allocation2 + $0x620] sm:$0xff] }
 0x106   :  { %v931_v57 = vmul.f32 %v1503_v59, %v2857_v23  ;;  %1171 = vst [vmem:[%s3449_s1 + $0x268] sm:$0xff] %v915_v61  ;;  %v1504_v44 = vld [vmem:[#allocation2 + $0x328] sm:$0xff]  ;;  %v822_v60 = vadd.f32 %v821_v35, %v2350_v54  ;;  %v1034_v9 = vmul.f32 %v1522_v5, %v2608_v20  ;;  %1286 = vst [vmem:[%s3449_s1 + $0x600] sm:$0xff] %v1030_v43  ;;  %v1524_v7 = vld [vmem:[#allocation2 + $0x640] sm:$0xff] }
 0x107   :  { %v939_v11 = vmul.f32 %v1504_v44, %v2857_v23  ;;  %v1505_v32 = vld [vmem:[#allocation2 + $0x368] sm:$0xff]  ;;  %1179 = vst [vmem:[%s3449_s1 + $0x2a8] sm:$0xff] %v923_v17  ;;  %1282 = vst [vmem:[%s3449_s1 + $0x5e0] sm:$0xff] %v1026_v45  ;;  %v1038_v37 = vmul.f32 %v1524_v7, %v2168_v3  ;;  %v1526_v26 = vld [vmem:[#allocation2 + $0x650] sm:$0xff] }
 0x108   :  { %v947_v46 = vmul.f32 %v1505_v32, %v2857_v23  ;;  %v1506_v19 = vld [vmem:[#allocation2 + $0x3a8] sm:$0xff]  ;;  %1187 = vst [vmem:[%s3449_s1 + $0x2e8] sm:$0xff] %v931_v57  ;;  %v1040_v61 = vmul.f32 %v1526_v26, %v2340_v53  ;;  %v823_v31 = vadd.f32 %v822_v60, %v2354_v33  ;;  %1288 = vst [vmem:[%s3449_s1 + $0x610] sm:$0xff] %v1032_v8  ;;  %v1527_v56 = vld [vmem:[#allocation2 + $0x658] sm:$0xff] }
 0x109   :  { %v955_v49 = vmul.f32 %v1506_v19, %v2857_v23  ;;  %v1507_v41 = vld [vmem:[#allocation2 + $0x3e8] sm:$0xff]  ;;  %1195 = vst [vmem:[%s3449_s1 + $0x328] sm:$0xff] %v939_v11  ;;  %1289 = vst [vmem:[%s3449_s1 + $0x618] sm:$0xff] %v1033_v12  ;;  %v1041_v28 = vmul.f32 %v1527_v56, %v2442_v62  ;;  %v1528_v10 = vld [vmem:[#allocation2 + $0x660] sm:$0xff] }
 0x10a   :  { %v963_v4 = vmul.f32 %v1507_v41, %v2857_v23  ;;  %v1508_v18 = vld [vmem:[#allocation2 + $0x428] sm:$0xff]  ;;  %1203 = vst [vmem:[%s3449_s1 + $0x368] sm:$0xff] %v947_v46  ;;  %1290 = vst [vmem:[%s3449_s1 + $0x620] sm:$0xff] %v1034_v9  ;;  %v1042_v17 = vmul.f32 %v1528_v10, %v2608_v20  ;;  %v1530_v57 = vld [vmem:[#allocation2 + $0x680] sm:$0xff] }
 0x10b   :  { %v971_v50 = vmul.f32 %v1508_v18, %v2857_v23  ;;  %v1509_v36 = vld [vmem:[#allocation2 + $0x468] sm:$0xff]  ;;  %1211 = vst [vmem:[%s3449_s1 + $0x3a8] sm:$0xff] %v955_v49  ;;  %1294 = vst [vmem:[%s3449_s1 + $0x640] sm:$0xff] %v1038_v37  ;;  %v1046_v44 = vmul.f32 %v1530_v57, %v2168_v3  ;;  %v1532_v46 = vld [vmem:[#allocation2 + $0x690] sm:$0xff] }
 0x10c   :  { %v979_v30 = vmul.f32 %v1509_v36, %v2857_v23  ;;  %1219 = vst [vmem:[%s3449_s1 + $0x3e8] sm:$0xff] %v963_v4  ;;  %v1510_v2 = vld [vmem:[#allocation2 + $0x4a8] sm:$0xff]  ;;  %1296 = vst [vmem:[%s3449_s1 + $0x650] sm:$0xff] %v1040_v61  ;;  %v1048_v19 = vmul.f32 %v1532_v46, %v2340_v53  ;;  %v1533_v49 = vld [vmem:[#allocation2 + $0x698] sm:$0xff]  ;;  %v824_v4 = vrot.slane %v823_v31, 4 }
 0x10d   :  { %v987_v34 = vmul.f32 %v1510_v2, %v2857_v23  ;;  %v1511_v15 = vld [vmem:[#allocation2 + $0x4e8] sm:$0xff]  ;;  %1227 = vst [vmem:[%s3449_s1 + $0x428] sm:$0xff] %v971_v50  ;;  %v1049_v41 = vmul.f32 %v1533_v49, %v2442_v62  ;;  %1297 = vst [vmem:[%s3449_s1 + $0x658] sm:$0xff] %v1041_v28  ;;  %v1534_v0 = vld [vmem:[#allocation2 + $0x6a0] sm:$0xff] }
 0x10e   :  { %v995_v6 = vmul.f32 %v1511_v15, %v2857_v23  ;;  %v1512_v55 = vld [vmem:[#allocation2 + $0x528] sm:$0xff]  ;;  %1235 = vst [vmem:[%s3449_s1 + $0x468] sm:$0xff] %v979_v30  ;;  %1298 = vst [vmem:[%s3449_s1 + $0x660] sm:$0xff] %v1042_v17  ;;  %v1050_v52 = vmul.f32 %v1534_v0, %v2608_v20  ;;  %v1536_v36 = vld [vmem:[#allocation2 + $0x6c0] sm:$0xff]  ;;  %v825_v35 = vadd.f32 %v824_v4, %v823_v31 }
 0x10f   :  { %v1003_v24 = vmul.f32 %v1512_v55, %v2857_v23  ;;  %v1513_v51 = vld [vmem:[#allocation2 + $0x568] sm:$0xff]  ;;  %1243 = vst [vmem:[%s3449_s1 + $0x4a8] sm:$0xff] %v987_v34  ;;  %v1054_v30 = vmul.f32 %v1536_v36, %v2168_v3  ;;  %1302 = vst [vmem:[%s3449_s1 + $0x680] sm:$0xff] %v1046_v44  ;;  %v1538_v15 = vld [vmem:[#allocation2 + $0x6d0] sm:$0xff]  ;;  %v3095_v8 = vpop.eup %1370 }
 0x110   :  { %v1011_v21 = vmul.f32 %v1513_v51, %v2857_v23  ;;  %v1514_v16 = vld [vmem:[#allocation2 + $0x5a8] sm:$0xff]  ;;  %1251 = vst [vmem:[%s3449_s1 + $0x4e8] sm:$0xff] %v995_v6  ;;  %1304 = vst [vmem:[%s3449_s1 + $0x690] sm:$0xff] %v1048_v19  ;;  %v1056_v6 = vmul.f32 %v1538_v15, %v2340_v53  ;;  %v1539_v55 = vld [vmem:[#allocation2 + $0x6d8] sm:$0xff]  ;;  %v826_v14 = vrot.slane %v825_v35, 2 }
 0x111   :  { %v1019_v13 = vmul.f32 %v1514_v16, %v2857_v23  ;;  %1259 = vst [vmem:[%s3449_s1 + $0x528] sm:$0xff] %v1003_v24  ;;  %v1517_v40 = vld [vmem:[#allocation2 + $0x5e8] sm:$0xff]  ;;  %1305 = vst [vmem:[%s3449_s1 + $0x698] sm:$0xff] %v1049_v41  ;;  %v1057_v24 = vmul.f32 %v1539_v55, %v2442_v62  ;;  %v1540_v51 = vld [vmem:[#allocation2 + $0x6e0] sm:$0xff] }
 0x112   :  { %1267 = vst [vmem:[%s3449_s1 + $0x568] sm:$0xff] %v1011_v21  ;;  %v1027_v25 = vmul.f32 %v1517_v40, %v2857_v23  ;;  %v1519_v29 = vld [vmem:[#allocation2 + $0x608] sm:$0xff]  ;;  %v1058_v21 = vmul.f32 %v1540_v51, %v2608_v20  ;;  %1306 = vst [vmem:[%s3449_s1 + $0x6a0] sm:$0xff] %v1050_v52  ;;  %v1542_v27 = vld [vmem:[#allocation2 + $0x700] sm:$0xff]  ;;  %v827_v10 = vadd.f32 %v826_v14, %v825_v35 }
 0x113   :  { %v1031_v1 = vmul.f32 %v1519_v29, %v2235_v39  ;;  %1275 = vst [vmem:[%s3449_s1 + $0x5a8] sm:$0xff] %v1019_v13  ;;  %v1523_v54 = vld [vmem:[#allocation2 + $0x628] sm:$0xff]  ;;  %1310 = vst [vmem:[%s3449_s1 + $0x6c0] sm:$0xff] %v1054_v30  ;;  %v1062_v63 = vmul.f32 %v1542_v27, %v2168_v3  ;;  %v1544_v40 = vld [vmem:[#allocation2 + $0x710] sm:$0xff] }
 0x114   :  { %1283 = vst [vmem:[%s3449_s1 + $0x5e8] sm:$0xff] %v1027_v25  ;;  %v1035_v47 = vmul.f32 %v1523_v54, %v2857_v23  ;;  %v1525_v48 = vld [vmem:[#allocation2 + $0x648] sm:$0xff]  ;;  %1312 = vst [vmem:[%s3449_s1 + $0x6d0] sm:$0xff] %v1056_v6  ;;  %v1064_v25 = vmul.f32 %v1544_v40, %v2340_v53  ;;  %v1545_v22 = vld [vmem:[#allocation2 + $0x718] sm:$0xff] }
 0x115   :  { %1287 = vst [vmem:[%s3449_s1 + $0x608] sm:$0xff] %v1031_v1  ;;  %v1039_v38 = vmul.f32 %v1525_v48, %v2235_v39  ;;  %v1529_v59 = vld [vmem:[#allocation2 + $0x668] sm:$0xff]  ;;  %1313 = vst [vmem:[%s3449_s1 + $0x6d8] sm:$0xff] %v1057_v24  ;;  %v1065_v43 = vmul.f32 %v1545_v22, %v2442_v62  ;;  %v1546_v29 = vld [vmem:[#allocation2 + $0x720] sm:$0xff] }
 0x116   :  { %v1043_v33 = vmul.f32 %v1529_v59, %v2857_v23  ;;  %1291 = vst [vmem:[%s3449_s1 + $0x628] sm:$0xff] %v1035_v47  ;;  %v1531_v11 = vld [vmem:[#allocation2 + $0x688] sm:$0xff]  ;;  %1314 = vst [vmem:[%s3449_s1 + $0x6e0] sm:$0xff] %v1058_v21  ;;  %v1066_v1 = vmul.f32 %v1546_v29, %v2608_v20  ;;  %v1548_v12 = vld [vmem:[#allocation2 + $0x740] sm:$0xff] }
 0x117   :  { %1295 = vst [vmem:[%s3449_s1 + $0x648] sm:$0xff] %v1039_v38  ;;  %v1047_v32 = vmul.f32 %v1531_v11, %v2235_v39  ;;  %v1535_v18 = vld [vmem:[#allocation2 + $0x6a8] sm:$0xff]  ;;  %1318 = vst [vmem:[%s3449_s1 + $0x700] sm:$0xff] %v1062_v63  ;;  %v1070_v5 = vmul.f32 %v1548_v12, %v2168_v3  ;;  %v1550_v47 = vld [vmem:[#allocation2 + $0x750] sm:$0xff] }
 0x118   :  { %1299 = vst [vmem:[%s3449_s1 + $0x668] sm:$0xff] %v1043_v33  ;;  %v1051_v50 = vmul.f32 %v1535_v18, %v2857_v23  ;;  %v1537_v2 = vld [vmem:[#allocation2 + $0x6c8] sm:$0xff]  ;;  %v1072_v7 = vmul.f32 %v1550_v47, %v2340_v53  ;;  %v1551_v37 = vld [vmem:[#allocation2 + $0x30] sm:$0xff]  ;;  %1320 = vst [vmem:[%s3449_s1 + $0x710] sm:$0xff] %v1064_v25  ;;  %v828_v18 = vrot.slane %v827_v10, 1 }
 0x119   :  { %1303 = vst [vmem:[%s3449_s1 + $0x688] sm:$0xff] %v1047_v32  ;;  %v1055_v34 = vmul.f32 %v1537_v2, %v2235_v39  ;;  %v1541_v16 = vld [vmem:[#allocation2 + $0x6e8] sm:$0xff]  ;;  %v844_v48 = vmul.f32 %v1551_v37, %v3095_v8  ;;  %v1552_v38 = vld [vmem:[#allocation2 + $0x70] sm:$0xff]  ;;  %1321 = vst [vmem:[%s3449_s1 + $0x718] sm:$0xff] %v1065_v43 }
 0x11a   :  { %1307 = vst [vmem:[%s3449_s1 + $0x6a8] sm:$0xff] %v1051_v50  ;;  %v1059_v13 = vmul.f32 %v1541_v16, %v2857_v23  ;;  %v1543_v42 = vld [vmem:[#allocation2 + $0x708] sm:$0xff]  ;;  %v852_v26 = vmul.f32 %v1552_v38, %v3095_v8  ;;  %v1553_v61 = vld [vmem:[#allocation2 + $0xb0] sm:$0xff]  ;;  %1322 = vst [vmem:[%s3449_s1 + $0x720] sm:$0xff] %v1066_v1  ;;  %v829_v27 = vadd.f32 %v828_v18, %v827_v10 }
 0x11b   :  { %v1063_v45 = vmul.f32 %v1543_v42, %v2235_v39  ;;  %1311 = vst [vmem:[%s3449_s1 + $0x6c8] sm:$0xff] %v1055_v34  ;;  %v1547_v60 = vld [vmem:[#allocation2 + $0x728] sm:$0xff]  ;;  %v860_v31 = vmul.f32 %v1553_v61, %v3095_v8  ;;  %v1554_v56 = vld [vmem:[#allocation2 + $0xf0] sm:$0xff]  ;;  %1326 = vst [vmem:[%s3449_s1 + $0x740] sm:$0xff] %v1070_v5 }
 0x11c   :  { %v1067_v58 = vmul.f32 %v1547_v60, %v2857_v23  ;;  %1315 = vst [vmem:[%s3449_s1 + $0x6e8] sm:$0xff] %v1059_v13  ;;  %v1549_v9 = vld [vmem:[#allocation2 + $0x748] sm:$0xff]  ;;  %v868_v28 = vmul.f32 %v1554_v56, %v3095_v8  ;;  %v1555_v17 = vld [vmem:[#allocation2 + $0x130] sm:$0xff]  ;;  %1328 = vst [vmem:[%s3449_s1 + $0x750] sm:$0xff] %v1072_v7  ;;  %1372 = vrsqrt.f32 %v829_v27 }
 0x11d   :  { %1319 = vst [vmem:[%s3449_s1 + $0x708] sm:$0xff] %v1063_v45  ;;  %v1071_v54 = vmul.f32 %v1549_v9, %v2235_v39  ;;  %v876_v59 = vmul.f32 %v1555_v17, %v3095_v8  ;;  %v1556_v33 = vld [vmem:[#allocation2 + $0x170] sm:$0xff]  ;;  %1100 = vst [vmem:[%s3449_s1 + $0x30] sm:$0xff] %v844_v48  ;;  %v1580_v61 = vld [vmem:[#allocation2 + $0x758] sm:$0xff] }
 0x11e   :  { %1323 = vst [vmem:[%s3449_s1 + $0x728] sm:$0xff] %v1067_v58  ;;  %v884_v57 = vmul.f32 %v1556_v33, %v3095_v8  ;;  %v1557_v44 = vld [vmem:[#allocation2 + $0x1b0] sm:$0xff]  ;;  %1108 = vst [vmem:[%s3449_s1 + $0x70] sm:$0xff] %v852_v26  ;;  %v1581_v56 = vld [vmem:[#allocation2 + $0x760] sm:$0xff] }
 0x11f   :  { %v892_v11 = vmul.f32 %v1557_v44, %v3095_v8  ;;  %1327 = vst [vmem:[%s3449_s1 + $0x748] sm:$0xff] %v1071_v54  ;;  %1116 = vst [vmem:[%s3449_s1 + $0xb0] sm:$0xff] %v860_v31  ;;  %v1558_v32 = vld [vmem:[#allocation2 + $0x1f0] sm:$0xff]  ;;  %v1073_v31 = vmul.f32 %v1580_v61, %v2442_v62  ;;  %v1582_v10 = vld [vmem:[#allocation2 + $0x768] sm:$0xff] }
 0x120   :  { %1124 = vst [vmem:[%s3449_s1 + $0xf0] sm:$0xff] %v868_v28  ;;  %v900_v46 = vmul.f32 %v1558_v32, %v3095_v8  ;;  %v1559_v19 = vld [vmem:[#allocation2 + $0x230] sm:$0xff]  ;;  %1132 = vst [vmem:[%s3449_s1 + $0x130] sm:$0xff] %v876_v59  ;;  %v1074_v28 = vmul.f32 %v1581_v56, %v2608_v20  ;;  %v1075_v17 = vmul.f32 %v1582_v10, %v2857_v23  ;;  %v1600_v27 = vld [vmem:[#allocation2 + $0xb8] sm:$0xff] }
 0x121   :  { %v908_v49 = vmul.f32 %v1559_v19, %v3095_v8  ;;  %v1560_v41 = vld [vmem:[#allocation2 + $0x270] sm:$0xff]  ;;  %1140 = vst [vmem:[%s3449_s1 + $0x170] sm:$0xff] %v884_v57  ;;  %1148 = vst [vmem:[%s3449_s1 + $0x1b0] sm:$0xff] %v892_v11  ;;  %v1584_v57 = vld [vmem:[#allocation2 + $0x780] sm:$0xff] }
 0x122   :  { %v916_v4 = vmul.f32 %v1560_v41, %v3095_v8  ;;  %v1561_v0 = vld [vmem:[#allocation2 + $0x2b0] sm:$0xff]  ;;  %1156 = vst [vmem:[%s3449_s1 + $0x1f0] sm:$0xff] %v900_v46  ;;  %v1078_v44 = vmul.f32 %v1584_v57, %v2168_v3  ;;  %v1585_v11 = vld [vmem:[#allocation2 + $0x788] sm:$0xff]  ;;  %1329 = vst [vmem:[%s3449_s1 + $0x758] sm:$0xff] %v1073_v31 }
 0x123   :  { %v924_v52 = vmul.f32 %v1561_v0, %v3095_v8  ;;  %v1562_v50 = vld [vmem:[#allocation2 + $0x2f0] sm:$0xff]  ;;  %1164 = vst [vmem:[%s3449_s1 + $0x230] sm:$0xff] %v908_v49  ;;  %v1079_v32 = vmul.f32 %v1585_v11, %v2235_v39  ;;  %1330 = vst [vmem:[%s3449_s1 + $0x760] sm:$0xff] %v1074_v28  ;;  %v1587_v49 = vld [vmem:[#allocation2 + $0x798] sm:$0xff] }
 0x124   :  { %v932_v36 = vmul.f32 %v1562_v50, %v3095_v8  ;;  %v1563_v30 = vld [vmem:[#allocation2 + $0x330] sm:$0xff]  ;;  %1172 = vst [vmem:[%s3449_s1 + $0x270] sm:$0xff] %v916_v4  ;;  %1331 = vst [vmem:[%s3449_s1 + $0x768] sm:$0xff] %v1075_v17  ;;  %v1081_v41 = vmul.f32 %v1587_v49, %v2442_v62  ;;  %v1588_v4 = vld [vmem:[#allocation2 + $0x7a0] sm:$0xff] }
 0x125   :  { %v940_v2 = vmul.f32 %v1563_v30, %v3095_v8  ;;  %v1564_v34 = vld [vmem:[#allocation2 + $0x370] sm:$0xff]  ;;  %1180 = vst [vmem:[%s3449_s1 + $0x2b0] sm:$0xff] %v924_v52  ;;  %v1082_v0 = vmul.f32 %v1588_v4, %v2608_v20  ;;  %v1589_v52 = vld [vmem:[#allocation2 + $0x7a8] sm:$0xff]  ;;  %1334 = vst [vmem:[%s3449_s1 + $0x780] sm:$0xff] %v1078_v44 }
 0x126   :  { %v948_v15 = vmul.f32 %v1564_v34, %v3095_v8  ;;  %v1565_v6 = vld [vmem:[#allocation2 + $0x3b0] sm:$0xff]  ;;  %1188 = vst [vmem:[%s3449_s1 + $0x2f0] sm:$0xff] %v932_v36  ;;  %v1083_v18 = vmul.f32 %v1589_v52, %v2857_v23  ;;  %1335 = vst [vmem:[%s3449_s1 + $0x788] sm:$0xff] %v1079_v32  ;;  %v1591_v30 = vld [vmem:[#allocation2 + $0x7c0] sm:$0xff] }
 0x127   :  { %v956_v55 = vmul.f32 %v1565_v6, %v3095_v8  ;;  %v1566_v24 = vld [vmem:[#allocation2 + $0x3f0] sm:$0xff]  ;;  %1196 = vst [vmem:[%s3449_s1 + $0x330] sm:$0xff] %v940_v2  ;;  %v1086_v2 = vmul.f32 %v1591_v30, %v2168_v3  ;;  %v1592_v34 = vld [vmem:[#allocation2 + $0x7c8] sm:$0xff]  ;;  %1337 = vst [vmem:[%s3449_s1 + $0x798] sm:$0xff] %v1081_v41 }
 0x128   :  { %v964_v51 = vmul.f32 %v1566_v24, %v3095_v8  ;;  %v1567_v21 = vld [vmem:[#allocation2 + $0x430] sm:$0xff]  ;;  %1204 = vst [vmem:[%s3449_s1 + $0x370] sm:$0xff] %v948_v15  ;;  %v1087_v15 = vmul.f32 %v1592_v34, %v2235_v39  ;;  %v1594_v24 = vld [vmem:[#allocation2 + $0x7d8] sm:$0xff]  ;;  %1338 = vst [vmem:[%s3449_s1 + $0x7a0] sm:$0xff] %v1082_v0 }
 0x129   :  { %v972_v35 = vmul.f32 %v1567_v21, %v3095_v8  ;;  %v1568_v16 = vld [vmem:[#allocation2 + $0x470] sm:$0xff]  ;;  %1212 = vst [vmem:[%s3449_s1 + $0x3b0] sm:$0xff] %v956_v55  ;;  %1339 = vst [vmem:[%s3449_s1 + $0x7a8] sm:$0xff] %v1083_v18  ;;  %v1595_v3 = vld [vmem:[#allocation2 + $0x7e0] sm:$0xff] }
 0x12a   :  { %v980_v13 = vmul.f32 %v1568_v16, %v3095_v8  ;;  %v1569_v63 = vld [vmem:[#allocation2 + $0x4b0] sm:$0xff]  ;;  %1220 = vst [vmem:[%s3449_s1 + $0x3f0] sm:$0xff] %v964_v51  ;;  %v1089_v51 = vmul.f32 %v1594_v24, %v2442_v62  ;;  %v1090_v39 = vmul.f32 %v1595_v3, %v2608_v20  ;;  %1342 = vst [vmem:[%s3449_s1 + $0x7c0] sm:$0xff] %v1086_v2  ;;  %v3318_v20 = vpop.eup %1372  ;;  %v1599_v16 = vld [vmem:[#allocation2 + $0x78] sm:$0xff] }
 0x12b   :  { %v988_v42 = vmul.f32 %v1569_v63, %v3095_v8  ;;  %v1570_v45 = vld [vmem:[#allocation2 + $0x4f0] sm:$0xff]  ;;  %1228 = vst [vmem:[%s3449_s1 + $0x430] sm:$0xff] %v972_v35  ;;  %1343 = vst [vmem:[%s3449_s1 + $0x7c8] sm:$0xff] %v1087_v15  ;;  %v861_v63 = vmul.f32 %v1600_v27, %v3318_v20  ;;  %v1612_v31 = vld [vmem:[#allocation2 + $0x3b8] sm:$0xff] }
 0x12c   :  { %v996_v40 = vmul.f32 %v1570_v45, %v3095_v8  ;;  %v1571_v25 = vld [vmem:[#allocation2 + $0x530] sm:$0xff]  ;;  %1236 = vst [vmem:[%s3449_s1 + $0x470] sm:$0xff] %v980_v13  ;;  %1345 = vst [vmem:[%s3449_s1 + $0x7d8] sm:$0xff] %v1089_v51  ;;  %v853_v13 = vmul.f32 %v1599_v16, %v3318_v20  ;;  %v957_v56 = vmul.f32 %v1612_v31, %v3318_v20  ;;  %v1613_v28 = vld [vmem:[#allocation2 + $0x3f8] sm:$0xff] }
 0x12d   :  { %v1004_v22 = vmul.f32 %v1571_v25, %v3095_v8  ;;  %v1572_v43 = vld [vmem:[#allocation2 + $0x570] sm:$0xff]  ;;  %1244 = vst [vmem:[%s3449_s1 + $0x4b0] sm:$0xff] %v988_v42  ;;  %1346 = vst [vmem:[%s3449_s1 + $0x7e0] sm:$0xff] %v1090_v39  ;;  %v1601_v42 = vld [vmem:[#allocation2 + $0xf8] sm:$0xff]  ;;  %v965_v10 = vmul.f32 %v1613_v28, %v3318_v20 }
 0x12e   :  { %v1012_v29 = vmul.f32 %v1572_v43, %v3095_v8  ;;  %v1573_v1 = vld [vmem:[#allocation2 + $0x5b0] sm:$0xff]  ;;  %1252 = vst [vmem:[%s3449_s1 + $0x4f0] sm:$0xff] %v996_v40  ;;  %v869_v45 = vmul.f32 %v1601_v42, %v3318_v20  ;;  %v1602_v40 = vld [vmem:[#allocation2 + $0x138] sm:$0xff]  ;;  %1109 = vst [vmem:[%s3449_s1 + $0x78] sm:$0xff] %v853_v13 }
 0x12f   :  { %v1020_v60 = vmul.f32 %v1573_v1, %v3095_v8  ;;  %v1574_v58 = vld [vmem:[#allocation2 + $0x5f0] sm:$0xff]  ;;  %1260 = vst [vmem:[%s3449_s1 + $0x530] sm:$0xff] %v1004_v22  ;;  %v877_v25 = vmul.f32 %v1602_v40, %v3318_v20  ;;  %v1603_v22 = vld [vmem:[#allocation2 + $0x178] sm:$0xff]  ;;  %1117 = vst [vmem:[%s3449_s1 + $0xb8] sm:$0xff] %v861_v63 }
 0x130   :  { %v1028_v14 = vmul.f32 %v1574_v58, %v3095_v8  ;;  %v1575_v12 = vld [vmem:[#allocation2 + $0x630] sm:$0xff]  ;;  %1268 = vst [vmem:[%s3449_s1 + $0x570] sm:$0xff] %v1012_v29  ;;  %v885_v43 = vmul.f32 %v1603_v22, %v3318_v20  ;;  %v1604_v29 = vld [vmem:[#allocation2 + $0x1b8] sm:$0xff]  ;;  %1125 = vst [vmem:[%s3449_s1 + $0xf8] sm:$0xff] %v869_v45 }
 0x131   :  { %v1036_v5 = vmul.f32 %v1575_v12, %v3095_v8  ;;  %v1576_v9 = vld [vmem:[#allocation2 + $0x670] sm:$0xff]  ;;  %1276 = vst [vmem:[%s3449_s1 + $0x5b0] sm:$0xff] %v1020_v60  ;;  %v893_v1 = vmul.f32 %v1604_v29, %v3318_v20  ;;  %v1605_v60 = vld [vmem:[#allocation2 + $0x1f8] sm:$0xff]  ;;  %1133 = vst [vmem:[%s3449_s1 + $0x138] sm:$0xff] %v877_v25 }
 0x132   :  { %v1044_v54 = vmul.f32 %v1576_v9, %v3095_v8  ;;  %v1577_v47 = vld [vmem:[#allocation2 + $0x6b0] sm:$0xff]  ;;  %1284 = vst [vmem:[%s3449_s1 + $0x5f0] sm:$0xff] %v1028_v14  ;;  %v901_v58 = vmul.f32 %v1605_v60, %v3318_v20  ;;  %v1606_v14 = vld [vmem:[#allocation2 + $0x238] sm:$0xff]  ;;  %1141 = vst [vmem:[%s3449_s1 + $0x178] sm:$0xff] %v885_v43 }
 0x133   :  { %v1052_v7 = vmul.f32 %v1577_v47, %v3095_v8  ;;  %v1578_v37 = vld [vmem:[#allocation2 + $0x6f0] sm:$0xff]  ;;  %1292 = vst [vmem:[%s3449_s1 + $0x630] sm:$0xff] %v1036_v5  ;;  %v909_v12 = vmul.f32 %v1606_v14, %v3318_v20  ;;  %v1607_v5 = vld [vmem:[#allocation2 + $0x278] sm:$0xff]  ;;  %1149 = vst [vmem:[%s3449_s1 + $0x1b8] sm:$0xff] %v893_v1 }
 0x134   :  { %v1060_v48 = vmul.f32 %v1578_v37, %v3095_v8  ;;  %v1579_v38 = vld [vmem:[#allocation2 + $0x730] sm:$0xff]  ;;  %1300 = vst [vmem:[%s3449_s1 + $0x670] sm:$0xff] %v1044_v54  ;;  %v917_v9 = vmul.f32 %v1607_v5, %v3318_v20  ;;  %v1608_v54 = vld [vmem:[#allocation2 + $0x2b8] sm:$0xff]  ;;  %1157 = vst [vmem:[%s3449_s1 + $0x1f8] sm:$0xff] %v901_v58 }
 0x135   :  { %v1068_v26 = vmul.f32 %v1579_v38, %v3095_v8  ;;  %1308 = vst [vmem:[%s3449_s1 + $0x6b0] sm:$0xff] %v1052_v7  ;;  %v1583_v59 = vld [vmem:[#allocation2 + $0x770] sm:$0xff]  ;;  %v925_v47 = vmul.f32 %v1608_v54, %v3318_v20  ;;  %v1609_v7 = vld [vmem:[#allocation2 + $0x2f8] sm:$0xff]  ;;  %1165 = vst [vmem:[%s3449_s1 + $0x238] sm:$0xff] %v909_v12 }
 0x136   :  { %1316 = vst [vmem:[%s3449_s1 + $0x6f0] sm:$0xff] %v1060_v48  ;;  %v1076_v33 = vmul.f32 %v1583_v59, %v3095_v8  ;;  %v1586_v46 = vld [vmem:[#allocation2 + $0x790] sm:$0xff]  ;;  %v933_v37 = vmul.f32 %v1609_v7, %v3318_v20  ;;  %v1610_v48 = vld [vmem:[#allocation2 + $0x338] sm:$0xff]  ;;  %1173 = vst [vmem:[%s3449_s1 + $0x278] sm:$0xff] %v917_v9 }
 0x137   :  { %v1080_v19 = vmul.f32 %v1586_v46, %v2340_v53  ;;  %1324 = vst [vmem:[%s3449_s1 + $0x730] sm:$0xff] %v1068_v26  ;;  %v1590_v50 = vld [vmem:[#allocation2 + $0x7b0] sm:$0xff]  ;;  %v941_v38 = vmul.f32 %v1610_v48, %v3318_v20  ;;  %v1611_v26 = vld [vmem:[#allocation2 + $0x378] sm:$0xff]  ;;  %1181 = vst [vmem:[%s3449_s1 + $0x2b8] sm:$0xff] %v925_v47 }
 0x138   :  { %v1084_v36 = vmul.f32 %v1590_v50, %v3095_v8  ;;  %1332 = vst [vmem:[%s3449_s1 + $0x770] sm:$0xff] %v1076_v33  ;;  %v1593_v6 = vld [vmem:[#allocation2 + $0x7d0] sm:$0xff]  ;;  %v949_v61 = vmul.f32 %v1611_v26, %v3318_v20  ;;  %1189 = vst [vmem:[%s3449_s1 + $0x2f8] sm:$0xff] %v933_v37  ;;  %v1614_v17 = vld [vmem:[#allocation2 + $0x438] sm:$0xff] }
 0x139   :  { %1336 = vst [vmem:[%s3449_s1 + $0x790] sm:$0xff] %v1080_v19  ;;  %v1088_v55 = vmul.f32 %v1593_v6, %v2340_v53  ;;  %v1596_v53 = vld [vmem:[#allocation2 + $0x7e8] sm:$0xff]  ;;  %v1597_v21 = vld [vmem:[#allocation2 + $0x7f0] sm:$0xff]  ;;  %v973_v59 = vmul.f32 %v1614_v17, %v3318_v20  ;;  %v1615_v33 = vld [vmem:[#allocation2 + $0x478] sm:$0xff] }
 0x13a   :  { %1340 = vst [vmem:[%s3449_s1 + $0x7b0] sm:$0xff] %v1084_v36  ;;  %v1091_v62 = vmul.f32 %v1596_v53, %v2857_v23  ;;  %v1092_v35 = vmul.f32 %v1597_v21, %v3095_v8  ;;  %v1598_v23 = vld [vmem:[#allocation2 + $0x38] sm:$0xff]  ;;  %v981_v57 = vmul.f32 %v1615_v33, %v3318_v20  ;;  %1197 = vst [vmem:[%s3449_s1 + $0x338] sm:$0xff] %v941_v38 }
 0x13b   :  { %1344 = vst [vmem:[%s3449_s1 + $0x7d0] sm:$0xff] %v1088_v55  ;;  %v845_v8 = vmul.f32 %v1598_v23, %v3318_v20  ;;  %v1616_v44 = vld [vmem:[#allocation2 + $0x4b8] sm:$0xff]  ;;  %1205 = vst [vmem:[%s3449_s1 + $0x378] sm:$0xff] %v949_v61 }
 0x13c   :  { %1347 = vst [vmem:[%s3449_s1 + $0x7e8] sm:$0xff] %v1091_v62  ;;  %1348 = vst [vmem:[%s3449_s1 + $0x7f0] sm:$0xff] %v1092_v35  ;;  %v989_v11 = vmul.f32 %v1616_v44, %v3318_v20  ;;  %v1617_v32 = vld [vmem:[#allocation2 + $0x4f8] sm:$0xff] }
 0x13d   :  { %1101 = vst [vmem:[%s3449_s1 + $0x38] sm:$0xff] %v845_v8  ;;  %v997_v46 = vmul.f32 %v1617_v32, %v3318_v20  ;;  %1213 = vst [vmem:[%s3449_s1 + $0x3b8] sm:$0xff] %v957_v56  ;;  %v1618_v19 = vld [vmem:[#allocation2 + $0x538] sm:$0xff] }
 0x13e   :  { %1221 = vst [vmem:[%s3449_s1 + $0x3f8] sm:$0xff] %v965_v10  ;;  %v1005_v49 = vmul.f32 %v1618_v19, %v3318_v20  ;;  %v1619_v41 = vld [vmem:[#allocation2 + $0x578] sm:$0xff]  ;;  %1229 = vst [vmem:[%s3449_s1 + $0x438] sm:$0xff] %v973_v59 }
 0x13f   :  { %v1013_v4 = vmul.f32 %v1619_v41, %v3318_v20  ;;  %v1620_v0 = vld [vmem:[#allocation2 + $0x5b8] sm:$0xff]  ;;  %1237 = vst [vmem:[%s3449_s1 + $0x478] sm:$0xff] %v981_v57  ;;  %1245 = vst [vmem:[%s3449_s1 + $0x4b8] sm:$0xff] %v989_v11 }
 0x140   :  { %v1021_v52 = vmul.f32 %v1620_v0, %v3318_v20  ;;  %v1621_v18 = vld [vmem:[#allocation2 + $0x5f8] sm:$0xff]  ;;  %1253 = vst [vmem:[%s3449_s1 + $0x4f8] sm:$0xff] %v997_v46  ;;  %1261 = vst [vmem:[%s3449_s1 + $0x538] sm:$0xff] %v1005_v49 }
 0x141   :  { %v1029_v50 = vmul.f32 %v1621_v18, %v3318_v20  ;;  %v1622_v36 = vld [vmem:[#allocation2 + $0x638] sm:$0xff]  ;;  %1269 = vst [vmem:[%s3449_s1 + $0x578] sm:$0xff] %v1013_v4 }
 0x142   :  { %v1037_v30 = vmul.f32 %v1622_v36, %v3318_v20  ;;  %v1623_v2 = vld [vmem:[#allocation2 + $0x678] sm:$0xff]  ;;  %1277 = vst [vmem:[%s3449_s1 + $0x5b8] sm:$0xff] %v1021_v52 }
 0x143   :  { %v1045_v34 = vmul.f32 %v1623_v2, %v3318_v20  ;;  %v1624_v15 = vld [vmem:[#allocation2 + $0x6b8] sm:$0xff]  ;;  %1285 = vst [vmem:[%s3449_s1 + $0x5f8] sm:$0xff] %v1029_v50 }
 0x144   :  { %v1053_v6 = vmul.f32 %v1624_v15, %v3318_v20  ;;  %v1625_v55 = vld [vmem:[#allocation2 + $0x6f8] sm:$0xff]  ;;  %1293 = vst [vmem:[%s3449_s1 + $0x638] sm:$0xff] %v1037_v30 }
 0x145   :  { %v1061_v24 = vmul.f32 %v1625_v55, %v3318_v20  ;;  %v1626_v51 = vld [vmem:[#allocation2 + $0x738] sm:$0xff]  ;;  %1301 = vst [vmem:[%s3449_s1 + $0x678] sm:$0xff] %v1045_v34 }
 0x146   :  { %v1069_v3 = vmul.f32 %v1626_v51, %v3318_v20  ;;  %v1627_v39 = vld [vmem:[#allocation2 + $0x778] sm:$0xff]  ;;  %1309 = vst [vmem:[%s3449_s1 + $0x6b8] sm:$0xff] %v1053_v6 }
 0x147   :  { %v1077_v53 = vmul.f32 %v1627_v39, %v3318_v20  ;;  %v1628_v62 = vld [vmem:[#allocation2 + $0x7b8] sm:$0xff]  ;;  %1317 = vst [vmem:[%s3449_s1 + $0x6f8] sm:$0xff] %v1061_v24 }
 0x148   :  { %v1085_v21 = vmul.f32 %v1628_v62, %v3318_v20  ;;  %v1629_v35 = vld [vmem:[#allocation2 + $0x7f8] sm:$0xff]  ;;  %1325 = vst [vmem:[%s3449_s1 + $0x738] sm:$0xff] %v1069_v3 }
 0x149   :  { %v1093_v23 = vmul.f32 %v1629_v35, %v3318_v20  ;;  %1333 = vst [vmem:[%s3449_s1 + $0x778] sm:$0xff] %v1077_v53 }
 0x14a   :  { %1341 = vst [vmem:[%s3449_s1 + $0x7b8] sm:$0xff] %v1085_v21 }
 0x14b   :  { %1349 = vst [vmem:[%s3449_s1 + $0x7f8] sm:$0xff] %v1093_v23 }
 0x14c   :  { %1354 = vsyncpa [#allocation3], 1 }

// kernel: _dino_head_forward.3
= control target key start
LH: loop header
LB: loop body
LE: loop exit
PB: predicated region body
PF: predicated region fallthrough
CT: control target
= control target key end

     0   :  { %s10307_s0 = inlined_call_operand.hbm [shape: f32[256,384], index: 0, kind: input, shape index: {}]   ;;  %s10308_s1 = inlined_call_operand.vmem [shape: f32[384,512], index: 1, kind: input, shape index: {}]   ;;  %s10309_s2 = inlined_call_operand.vmem [shape: f32[1,512], index: 2, kind: input, shape index: {}]   ;;  %s10310_s3 = inlined_call_operand.vmem [shape: f32[512,512], index: 3, kind: input, shape index: {}]   ;;  %s10311_s4 = inlined_call_operand.vmem [shape: f32[1,512], index: 4, kind: input, shape index: {}]   ;;  %s10312_s5 = inlined_call_operand.hbm [shape: f32[512,256], index: 5, kind: input, shape index: {}]   ;;  %s10313_s6 = inlined_call_operand.vmem [shape: f32[1,256], index: 6, kind: input, shape index: {}]   ;;  %s10314_s7 = inlined_call_operand.vmem [shape: f32[256,1024], index: 7, kind: input, shape index: {}]   ;;  %s10315_s8 = inlined_call_operand.hbm [shape: f32[256,1024], index: 8, kind: output, shape index: {0}]   ;;  %s10316_s9 = inlined_call_operand.hbm [shape: f32[256,256], index: 9, kind: output, shape index: {1}]  }
   0x1   :  { %10374 = sst [smem:[#allocation57_spill]] %s10309_s2 }
   0x2   :  { %10375 = sst [smem:[#allocation58_spill]] %s10311_s4 }
   0x3   :  { %10376 = sst [smem:[#allocation59_spill]] %s10313_s6 }
   0x4   :  { %10377 = sst [smem:[#allocation60_spill]] %s10315_s8 }
   0x5   :  { %10378 = sst [smem:[#allocation61_spill]] %s10316_s9 }
   0x6   :  { %15 = vsyncpa [#allocation4], 0 }
   0x7   :  { %17 = vsyncpa [#allocation4 + $0x1], 0 }
   0x8   :  { %18 = vsyncpa [#allocation7], 0 }
   0x9   :  { %19 = vsyncpa [#allocation5], 0 }
   0xa   :  { %21 = vsyncpa [#allocation5 + $0x1], 0 }
   0xb   :  { %22 = vsyncpa [#allocation11], 0 }
   0xc   :  { %24 = vsyncpa [#allocation11 + $0x1], 0  ;;  %s6348_s30 = smov 0   ;;  %s6350_s10 = smov 0  }
   0xd   :  { %s6352_s11 = smov 0   ;;  %s6354_s12 = smov 0  }
   0xe   :  { %s6356_s13 = smov 0   ;;  %s6358_s14 = smov 0  }
   0xf   :  { %s6360_s15 = smov 0   ;;  %s6362_s16 = smov 0  }
  0x10   :  { %s6364_s17 = smov 0   ;;  %s6366_s18 = smov 0  }
  0x11   :  { %s6368_s19 = smov 0   ;;  %s6370_s20 = smov 0  }
  0x12   :  { %s6372_s21 = smov 0  }
  0x13 LB: > { %10379 = sst [smem:[#allocation16_spill]] %s6234_s30  ;;  %s10318_s22 = sadd.s32 4294967295, %s6282_s21   ;;  %s6282_s21 = sphi %s6372_s21, %s30_s21   ;;  %s6278_s20 = sphi %s6370_s20, %s10570_s20   ;;  %s6274_s19 = sphi %s6368_s19, %s10569_s19   ;;  %s6270_s18 = sphi %s6366_s18, %s10568_s18   ;;  %s6266_s17 = sphi %s6364_s17, %s10567_s17   ;;  %s6262_s16 = sphi %s6362_s16, %s10566_s16   ;;  %s6258_s15 = sphi %s6360_s15, %s10565_s15   ;;  %s6254_s14 = sphi %s6358_s14, %s10564_s14   ;;  %s6250_s13 = sphi %s6356_s13, %s10563_s13   ;;  %s6246_s12 = sphi %s6354_s12, %s10562_s12   ;;  %s6242_s11 = sphi %s6352_s11, %s10554_s11   ;;  %s6238_s10 = sphi %s6350_s10, %s10561_s10   ;;  %s6234_s30 = sphi %s6348_s30, %s10560_s30  }
  0x14   : > { %10380 = sst [smem:[#allocation17_spill]] %s6242_s11  ;;  %s39_s24 = sadd.s32 1, %s6274_s19 }
  0x15   : > { %10381 = sst [smem:[#allocation18_spill]] %s6254_s14  ;;  %s42_s25 = sadd.s32 1, %s6278_s20 }
  0x16   : > { %10382 = sst [smem:[#allocation19_spill]] %s6270_s18  ;;  %p40_p0 = scmp.ge.s32.totalorder %s39_s24, 2 }
  0x17   : > { %s49_s26 = sadd.s32 1, %s6262_s16  ;;  %p10325_p1 = scmp.ne.s32.totalorder %s6262_s16, %s6258_s15 }
  0x18   : > { %p57_p2 = scmp.eq.s32.totalorder %s6282_s21, 0  ;;  %s10572_s24 = smov (%p40_p0, %s39_s24), 0 }
  0x19   : > { %10383 = sst [smem:[#allocation20_spill]] %s10572_s24  ;;  %s10574_s25 = smov (!%p40_p0, %s42_s25), %s6278_s20 }
  0x1a   : > { %p6429_p3 = por %p57_p2, %p10325_p1  ;;  %p10324_p4 = scmp.ne.s32.totalorder %s6258_s15, %s6254_s14 }
  0x1b   : > { %p44_p5 = scmp.ge.s32.totalorder %s10574_s25, 2  ;;  %p6437_p6 = scmp.eq.s32.totalorder %s10318_s22, 0 }
  0x1c   : > { %s10384_s27 = scalar_select %p6429_p3, 1, 0 }
  0x1d   : > { %s10385_s28 = scalar_select %p6437_p6, 1, 0 }
  0x1e   : > { %s198_s29 = ssub.s32 %s6274_s19, %s10572_s24  ;;  %s201_s23 = sadd.s32 1, %s6250_s13 }
  0x1f   : > { %s10576_s25 = smov (%p44_p5, %s10574_s25), 0  ;;  %p6451_p7 = por %p6437_p6, %p10324_p4 }
  0x20   : > { %10386 = sst [smem:[#allocation21_spill]] %s10576_s25  ;;  %p199_p8 = scmp.eq.s32.totalorder %s198_s29, 0 }
  0x21   : > { %s10387_s8 = scalar_select %p6451_p7, 1, 0 }
  0x22   : > { %s46_s22 = ssub.s32 %s6278_s20, %s10576_s25  ;;  %p208_p9 = scmp.ne.s32.totalorder %s6250_s13, %s6246_s12 }
  0x23   : > { %p47_p10 = scmp.eq.s32.totalorder %s46_s22, 0  ;;  %s226_s24 = sor.u32 %s198_s29, %s46_s22 }
  0x24   : > { %s6460_s9 = scalar_select %p199_p8, %s6250_s13, %s201_s23  }
  0x25   : > { %s6463_s18 = scalar_select %p47_p10, %s6262_s16, %s49_s26  }
  0x26   : > { %10388 = sst [smem:[#allocation22_spill]] %s6460_s9  ;;  %p6467_p11 = por %p208_p9, %p57_p2 }
  0x27   : > { %10389 = sst [smem:[#allocation23_spill]] %s6463_s18  ;;  %p227_p12 = scmp.eq.s32.totalorder %s226_s24, 0 }
  0x28   : > { %s10390_s6 = scalar_select %p6467_p11, 1, 0 }
  0x29   : > { %s229_s4 = sadd.s32 1, %s6242_s11  ;;  %p239_p13 = scmp.ne.s32.totalorder %s6242_s11, %s6238_s10 }
  0x2a   : > { %s6475_s25 = scalar_select %p227_p12, %s6242_s11, %s229_s4  }
  0x2b   : > { %s10392_s2 = sadd.s32 4294967295, %s6282_s21   ;;  %p245_p5 = scmp.ne.s32.totalorder %s6238_s10, %s6234_s30 }
  0x2c   : > { %10391 = sst [smem:[#allocation24_spill]] %s6475_s25  ;;  %p240_p0 = scmp.eq.s32.totalorder %s10392_s2, 3 }
  0x2d   : > { %s10393_s22 = sadd.s32 4294967294, %s6282_s21   ;;  %p4567_p8 = scmp.ge.s32.totalorder %s6282_s21, 1 }
  0x2e   : > { %p246_p4 = scmp.eq.s32.totalorder %s10393_s22, 3  ;;  %p6484_p1 = por %p240_p0, %p239_p13 }
  0x2f   : > { %p10396_p2 = scmp.ne.s32.totalorder %s6262_s16, %s6258_s15  ;;  %p10401_p12 = scmp.ne.s32.totalorder %s6258_s15, %s6254_s14 }
  0x30   : > { %s10394_s23 = scalar_select %p6484_p1, 1, 0 }
  0x31   : > { %p6491_p9 = por %p240_p0, %p10396_p2  ;;  %p6495_p10 = por %p246_p4, %p245_p5 }
  0x32   : > { %10395 = sst [smem:[#allocation25_spill]] %s10394_s23  ;;  %p6502_p7 = por %p246_p4, %p10401_p12 }
  0x33   : > { %s10397_s26 = scalar_select %p6491_p9, 1, 0 }
  0x34   : > { %s10399_s24 = scalar_select %p6495_p10, 1, 0 }
  0x35   : > { %10398 = sst [smem:[#allocation26_spill]] %s10397_s26  ;;  %p279_p11 = scmp.lt.s32.totalorder %s6282_s21, 5 }
  0x36   : > { %10400 = sst [smem:[#allocation27_spill]] %s10399_s24  ;;  %s6284_s29 = smov [#allocation6]  }
  0x37   : > { %s10402_s2 = scalar_select %p6502_p7, 1, 0 }
  0x38   : > { %p6507_p3 = pnand %p4567_p8, %p279_p11  ;;  %s303_s22 = sshll.u32 %s6284_s29, 4  ;;  %s304_s22 = int_to_ptr.vmem [resolvable:$true] %s303_s22 }
  0x39   : > { %10403 = sst [smem:[#allocation28_spill]] %s10402_s2  ;;  %s6052_s11 = scalar_lea.hbm %s10312_s5, 16384 }
  0x3a   : > { %s10404_s4 = scalar_select %p6507_p3, 1, 0 }
  0x3b   : > { %p5634_p13 = pneg %p6507_p3  ;;  %p6053_p4 = scmp.ne.s32.totalorder %s10312_s5, %s6052_s11 }
  0x3c   : > { %p6059_p2 = scmp.lt.u32.totalorder %s6052_s11, %s10312_s5 }
  0x3d   : > { %p6515_p0 = pnand %p5634_p13, %p6437_p6 }
  0x3f   : > { %p6054_p11 = pneg %p6515_p0 }
  0x41   : > { %p6055_p5 = pnand %p6054_p11, %p6053_p4 }
  0x43   : > { %p6056_p8 = pneg %p6055_p5 }
  0x45   : > { %p6061_p12 = pnand %p6059_p2, %p6056_p8 }
  0x47   : > { %6064 = shalt.err (!%p6061_p12)
}
  0x48   : > { %s6065_s30 = scalar_lea.vmem %s304_s22, 16384  ;;  %p6073_p1 = scmp.lt.s32.totalorder %s304_s22, %s304_s22 }
  0x49   : > { %p6066_p13 = scmp.ne.s32.totalorder %s304_s22, %s6065_s30  ;;  %p6074_p9 = scmp.lt.s32.totalorder %s6065_s30, %s6065_s30 }
  0x4b   : > { %p6068_p7 = pnand %p6066_p13, %p6054_p11  ;;  %p6075_p6 = por %p6074_p9, %p6073_p1 }
  0x4d   : > { %p6069_p10 = pneg %p6068_p7 }
  0x4f   : > { %p6076_p3 = pnand %p6075_p6, %p6069_p10 }
  0x51   : > { %6079 = shalt.err (!%p6076_p3)
}
  0x52   : > { %s6285_s9 = smov 256   ;;  %s6286_s14 = smov 16  }
  0x53   : > { %5637 = dma.hbm_to_vmem [thread:$0]  (!%p6515_p0), %s10312_s5, 16384, %s304_s22, [#allocation7], %s6285_s9, %s6285_s9, %s6286_s14  }
  0x54   : > { %p4569_p4 = scmp.ge.s32.totalorder %s6282_s21, 4 }
  0x55   : > { %s320_s11 = sand.u32 (!%p4569_p4), 1, %s6262_s16   ;;  %s5622_s24 = smul.u32 (!%p4569_p4), 6144, %s6278_s20 }
  0x56   : > { %316 = sbr.rel (%p4569_p4) target bundleno = 182 (0xb6), region = 40  ;;  %s6545_s9 = scalar_lea.sflag (!%p4569_p4), [#allocation4], %s320_s11 }
  0x57   : > { %s5621_s30 = smul.u32 (!%p4569_p4), 384, %s320_s11  ;;  %s6541_s26 = scalar_lea.hbm (!%p4569_p4), %s10307_s0, %s5622_s24 }
  0x58   : > { %s6080_s14 = scalar_lea.hbm (!%p4569_p4), %s6541_s26, 6144  ;;  %p10406_p3 = scmp.ne.s32.totalorder (!%p4569_p4), %s10384_s27, 0 }
  0x59   : > { %s324_s18 = scalar_lea.vmem (!%p4569_p4), [#allocation3], %s5621_s30  ;;  %p6081_p1 = scmp.ne.s32.totalorder (!%p4569_p4), %s6541_s26, %s6080_s14 }
  0x5a   : > { %s332_s22 = sshll.u32 (!%p4569_p4), %s324_s18, 4  ;;  %s6084_s23 = scalar_lea.hbm (!%p4569_p4), %s10307_s0, 12288  ;;  %s6543_s22 = int_to_ptr.vmem [resolvable:$true] %s332_s22 }
  0x5b   : > { %p6082_p6 = pnand (!%p4569_p4), %p6081_p1, %p10406_p3  ;;  %p6085_p9 = scmp.lt.u32.totalorder (!%p4569_p4), %s6541_s26, %s10307_s0 }
  0x5c   : > { %p6086_p10 = scmp.lt.u32.totalorder (!%p4569_p4), %s6084_s23, %s6080_s14  ;;  %p6088_p11 = scmp.lt.u32.totalorder (!%p4569_p4), %s6080_s14, %s6541_s26 }
  0x5d   : > { %p6083_p7 = pneg %p6082_p6 }
  0x5e   : > { %p6087_p0 = por %p6086_p10, %p6085_p9 }
  0x60   : > { %p6089_p5 = por %p6088_p11, %p6087_p0 }
  0x62   : > { %p6090_p8 = pnand %p6089_p5, %p6083_p7 }
  0x64   : > { %6093 = shalt.err (!%p6090_p8)
}
  0x65   : > { %s6094_s11 = scalar_lea.vmem %s6543_s22, 6144  ;;  %s6287_s30 = smov [#allocation3]  }
  0x66   : > { %p6095_p2 = scmp.ne.s32.totalorder %s6543_s22, %s6094_s11  ;;  %s6098_s18 = sshll.u32 %s6287_s30, 4  ;;  %s6099_s18 = int_to_ptr.vmem [resolvable:$false] %s6098_s18 }
  0x67   : > { %s6100_s25 = scalar_lea.vmem %s6099_s18, 12288  ;;  %p6101_p4 = scmp.lt.s32.totalorder %s6543_s22, %s6099_s18 }
  0x68   : > { %p6096_p12 = pnand %p6095_p2, %p10406_p3  ;;  %p6102_p1 = scmp.lt.s32.totalorder %s6100_s25, %s6094_s11 }
  0x6a   : > { %p6097_p13 = pneg %p6096_p12  ;;  %p6103_p6 = por %p6102_p1, %p6101_p4 }
  0x6c   : > { %p6104_p9 = pnand %p6103_p6, %p6097_p13 }
  0x6e   : > { %6107 = shalt.err (!%p6104_p9)
}
  0x6f   : > { %s6288_s14 = smov 384   ;;  %s6289_s2 = smov 24  }
  0x70   : > { %5626 = dma.hbm_to_vmem [thread:$0]  (%p10406_p3), %s6541_s26, 6144, %s6543_s22, %s6545_s9, %s6288_s14, %s6288_s14, %s6289_s2  }
  0x71   : > { %p10407_p7 = scmp.ne.s32.totalorder %s10390_s6, 0 }
  0x72   : > { %s343_s23 = sand.u32 (%p10407_p7), 1, %s6250_s13   ;;  %s4593_s24 = sshll.u32 (%p10407_p7), %s6274_s19, 5 }
  0x73   : > { %341 = sbr.rel (!%p10407_p7) target bundleno = 182 (0xb6), region = 48  ;;  %s4573_s29 = sshll.u32 (%p10407_p7), %s343_s23, 10 }
  0x74   : > { %s6576_s18 = scalar_lea.vmem (%p10407_p7), %s10314_s7, %s4593_s24  ;;  %s6581_s6 = scalar_lea.vmem (%p10407_p7), [#allocation8], %s4573_s29 }
  0x75   : > { %v361_v0 = vld [vmem:[%s6576_s18] sm:$0xff] (%p10407_p7)  ;;  %v363_v1 = vld [vmem:[%s6576_s18 + $0x8] sm:$0xff] (%p10407_p7)  ;;  %v365_v2 = vld [vmem:[%s6576_s18 + $0x10] sm:$0xff] (%p10407_p7) }
  0x76   : > { %362 = vst [vmem:[%s6581_s6] sm:$0xff] (%p10407_p7), %v361_v0  ;;  %364 = vst [vmem:[%s6581_s6 + $0x8] sm:$0xff] (%p10407_p7), %v363_v1  ;;  %v367_v3 = vld [vmem:[%s6576_s18 + $0x18] sm:$0xff] (%p10407_p7)  ;;  %v369_v4 = vld [vmem:[%s6576_s18 + $0x40] sm:$0xff] (%p10407_p7) }
  0x77   : > { %366 = vst [vmem:[%s6581_s6 + $0x10] sm:$0xff] (%p10407_p7), %v365_v2  ;;  %v371_v5 = vld [vmem:[%s6576_s18 + $0x48] sm:$0xff] (%p10407_p7)  ;;  %368 = vst [vmem:[%s6581_s6 + $0x18] sm:$0xff] (%p10407_p7), %v367_v3  ;;  %v373_v6 = vld [vmem:[%s6576_s18 + $0x50] sm:$0xff] (%p10407_p7) }
  0x78   : > { %370 = vst [vmem:[%s6581_s6 + $0x20] sm:$0xff] (%p10407_p7), %v369_v4  ;;  %372 = vst [vmem:[%s6581_s6 + $0x28] sm:$0xff] (%p10407_p7), %v371_v5  ;;  %v375_v7 = vld [vmem:[%s6576_s18 + $0x58] sm:$0xff] (%p10407_p7)  ;;  %v377_v8 = vld [vmem:[%s6576_s18 + $0x80] sm:$0xff] (%p10407_p7) }
  0x79   : > { %374 = vst [vmem:[%s6581_s6 + $0x30] sm:$0xff] (%p10407_p7), %v373_v6  ;;  %376 = vst [vmem:[%s6581_s6 + $0x38] sm:$0xff] (%p10407_p7), %v375_v7  ;;  %v379_v9 = vld [vmem:[%s6576_s18 + $0x88] sm:$0xff] (%p10407_p7)  ;;  %v381_v10 = vld [vmem:[%s6576_s18 + $0x90] sm:$0xff] (%p10407_p7) }
  0x7a   : > { %378 = vst [vmem:[%s6581_s6 + $0x40] sm:$0xff] %v377_v8  ;;  %v383_v11 = vld [vmem:[%s6576_s18 + $0x98] sm:$0xff]  ;;  %380 = vst [vmem:[%s6581_s6 + $0x48] sm:$0xff] %v379_v9  ;;  %v385_v12 = vld [vmem:[%s6576_s18 + $0xc0] sm:$0xff] }
  0x7b   : > { %382 = vst [vmem:[%s6581_s6 + $0x50] sm:$0xff] %v381_v10  ;;  %384 = vst [vmem:[%s6581_s6 + $0x58] sm:$0xff] %v383_v11  ;;  %v387_v13 = vld [vmem:[%s6576_s18 + $0xc8] sm:$0xff]  ;;  %v389_v14 = vld [vmem:[%s6576_s18 + $0xd0] sm:$0xff] }
  0x7c   : > { %386 = vst [vmem:[%s6581_s6 + $0x60] sm:$0xff] %v385_v12  ;;  %388 = vst [vmem:[%s6581_s6 + $0x68] sm:$0xff] %v387_v13  ;;  %v391_v15 = vld [vmem:[%s6576_s18 + $0xd8] sm:$0xff]  ;;  %v393_v16 = vld [vmem:[%s6576_s18 + $0x100] sm:$0xff] }
  0x7d   : > { %390 = vst [vmem:[%s6581_s6 + $0x70] sm:$0xff] %v389_v14  ;;  %v395_v17 = vld [vmem:[%s6576_s18 + $0x108] sm:$0xff]  ;;  %392 = vst [vmem:[%s6581_s6 + $0x78] sm:$0xff] %v391_v15  ;;  %v397_v18 = vld [vmem:[%s6576_s18 + $0x110] sm:$0xff] }
  0x7e   : > { %394 = vst [vmem:[%s6581_s6 + $0x80] sm:$0xff] %v393_v16  ;;  %396 = vst [vmem:[%s6581_s6 + $0x88] sm:$0xff] %v395_v17  ;;  %v399_v19 = vld [vmem:[%s6576_s18 + $0x118] sm:$0xff]  ;;  %v401_v20 = vld [vmem:[%s6576_s18 + $0x140] sm:$0xff] }
  0x7f   : > { %398 = vst [vmem:[%s6581_s6 + $0x90] sm:$0xff] %v397_v18  ;;  %400 = vst [vmem:[%s6581_s6 + $0x98] sm:$0xff] %v399_v19  ;;  %v403_v21 = vld [vmem:[%s6576_s18 + $0x148] sm:$0xff]  ;;  %v405_v22 = vld [vmem:[%s6576_s18 + $0x150] sm:$0xff] }
  0x80   : > { %402 = vst [vmem:[%s6581_s6 + $0xa0] sm:$0xff] %v401_v20  ;;  %v407_v23 = vld [vmem:[%s6576_s18 + $0x158] sm:$0xff]  ;;  %404 = vst [vmem:[%s6581_s6 + $0xa8] sm:$0xff] %v403_v21  ;;  %v409_v24 = vld [vmem:[%s6576_s18 + $0x180] sm:$0xff] }
  0x81   : > { %406 = vst [vmem:[%s6581_s6 + $0xb0] sm:$0xff] %v405_v22  ;;  %408 = vst [vmem:[%s6581_s6 + $0xb8] sm:$0xff] %v407_v23  ;;  %v411_v25 = vld [vmem:[%s6576_s18 + $0x188] sm:$0xff]  ;;  %v413_v26 = vld [vmem:[%s6576_s18 + $0x190] sm:$0xff] }
  0x82   : > { %410 = vst [vmem:[%s6581_s6 + $0xc0] sm:$0xff] %v409_v24  ;;  %412 = vst [vmem:[%s6581_s6 + $0xc8] sm:$0xff] %v411_v25  ;;  %v415_v27 = vld [vmem:[%s6576_s18 + $0x198] sm:$0xff]  ;;  %v417_v28 = vld [vmem:[%s6576_s18 + $0x1c0] sm:$0xff] }
  0x83   : > { %414 = vst [vmem:[%s6581_s6 + $0xd0] sm:$0xff] %v413_v26  ;;  %v419_v29 = vld [vmem:[%s6576_s18 + $0x1c8] sm:$0xff]  ;;  %416 = vst [vmem:[%s6581_s6 + $0xd8] sm:$0xff] %v415_v27  ;;  %v421_v30 = vld [vmem:[%s6576_s18 + $0x1d0] sm:$0xff] }
  0x84   : > { %418 = vst [vmem:[%s6581_s6 + $0xe0] sm:$0xff] %v417_v28  ;;  %420 = vst [vmem:[%s6581_s6 + $0xe8] sm:$0xff] %v419_v29  ;;  %v423_v31 = vld [vmem:[%s6576_s18 + $0x1d8] sm:$0xff]  ;;  %v425_v32 = vld [vmem:[%s6576_s18 + $0x200] sm:$0xff] }
  0x85   : > { %422 = vst [vmem:[%s6581_s6 + $0xf0] sm:$0xff] %v421_v30  ;;  %424 = vst [vmem:[%s6581_s6 + $0xf8] sm:$0xff] %v423_v31  ;;  %v427_v33 = vld [vmem:[%s6576_s18 + $0x208] sm:$0xff]  ;;  %v429_v34 = vld [vmem:[%s6576_s18 + $0x210] sm:$0xff] }
  0x86   : > { %426 = vst [vmem:[%s6581_s6 + $0x100] sm:$0xff] %v425_v32  ;;  %v431_v35 = vld [vmem:[%s6576_s18 + $0x218] sm:$0xff]  ;;  %428 = vst [vmem:[%s6581_s6 + $0x108] sm:$0xff] %v427_v33  ;;  %v433_v36 = vld [vmem:[%s6576_s18 + $0x240] sm:$0xff] }
  0x87   : > { %430 = vst [vmem:[%s6581_s6 + $0x110] sm:$0xff] %v429_v34  ;;  %432 = vst [vmem:[%s6581_s6 + $0x118] sm:$0xff] %v431_v35  ;;  %v435_v37 = vld [vmem:[%s6576_s18 + $0x248] sm:$0xff]  ;;  %v437_v38 = vld [vmem:[%s6576_s18 + $0x250] sm:$0xff] }
  0x88   : > { %434 = vst [vmem:[%s6581_s6 + $0x120] sm:$0xff] %v433_v36  ;;  %436 = vst [vmem:[%s6581_s6 + $0x128] sm:$0xff] %v435_v37  ;;  %v439_v39 = vld [vmem:[%s6576_s18 + $0x258] sm:$0xff]  ;;  %v441_v40 = vld [vmem:[%s6576_s18 + $0x280] sm:$0xff] }
  0x89   : > { %438 = vst [vmem:[%s6581_s6 + $0x130] sm:$0xff] %v437_v38  ;;  %v443_v41 = vld [vmem:[%s6576_s18 + $0x288] sm:$0xff]  ;;  %440 = vst [vmem:[%s6581_s6 + $0x138] sm:$0xff] %v439_v39  ;;  %v445_v42 = vld [vmem:[%s6576_s18 + $0x290] sm:$0xff] }
  0x8a   : > { %442 = vst [vmem:[%s6581_s6 + $0x140] sm:$0xff] %v441_v40  ;;  %444 = vst [vmem:[%s6581_s6 + $0x148] sm:$0xff] %v443_v41  ;;  %v447_v43 = vld [vmem:[%s6576_s18 + $0x298] sm:$0xff]  ;;  %v449_v44 = vld [vmem:[%s6576_s18 + $0x2c0] sm:$0xff] }
  0x8b   : > { %446 = vst [vmem:[%s6581_s6 + $0x150] sm:$0xff] %v445_v42  ;;  %448 = vst [vmem:[%s6581_s6 + $0x158] sm:$0xff] %v447_v43  ;;  %v451_v45 = vld [vmem:[%s6576_s18 + $0x2c8] sm:$0xff]  ;;  %v453_v46 = vld [vmem:[%s6576_s18 + $0x2d0] sm:$0xff] }
  0x8c   : > { %450 = vst [vmem:[%s6581_s6 + $0x160] sm:$0xff] %v449_v44  ;;  %v455_v47 = vld [vmem:[%s6576_s18 + $0x2d8] sm:$0xff]  ;;  %452 = vst [vmem:[%s6581_s6 + $0x168] sm:$0xff] %v451_v45  ;;  %v457_v48 = vld [vmem:[%s6576_s18 + $0x300] sm:$0xff] }
  0x8d   : > { %454 = vst [vmem:[%s6581_s6 + $0x170] sm:$0xff] %v453_v46  ;;  %456 = vst [vmem:[%s6581_s6 + $0x178] sm:$0xff] %v455_v47  ;;  %v459_v49 = vld [vmem:[%s6576_s18 + $0x308] sm:$0xff]  ;;  %v461_v50 = vld [vmem:[%s6576_s18 + $0x310] sm:$0xff] }
  0x8e   : > { %458 = vst [vmem:[%s6581_s6 + $0x180] sm:$0xff] %v457_v48  ;;  %460 = vst [vmem:[%s6581_s6 + $0x188] sm:$0xff] %v459_v49  ;;  %v463_v51 = vld [vmem:[%s6576_s18 + $0x318] sm:$0xff]  ;;  %v465_v52 = vld [vmem:[%s6576_s18 + $0x340] sm:$0xff] }
  0x8f   : > { %462 = vst [vmem:[%s6581_s6 + $0x190] sm:$0xff] %v461_v50  ;;  %v467_v53 = vld [vmem:[%s6576_s18 + $0x348] sm:$0xff]  ;;  %464 = vst [vmem:[%s6581_s6 + $0x198] sm:$0xff] %v463_v51  ;;  %v469_v54 = vld [vmem:[%s6576_s18 + $0x350] sm:$0xff] }
  0x90   : > { %466 = vst [vmem:[%s6581_s6 + $0x1a0] sm:$0xff] %v465_v52  ;;  %468 = vst [vmem:[%s6581_s6 + $0x1a8] sm:$0xff] %v467_v53  ;;  %v471_v55 = vld [vmem:[%s6576_s18 + $0x358] sm:$0xff]  ;;  %v473_v56 = vld [vmem:[%s6576_s18 + $0x380] sm:$0xff] }
  0x91   : > { %470 = vst [vmem:[%s6581_s6 + $0x1b0] sm:$0xff] %v469_v54  ;;  %472 = vst [vmem:[%s6581_s6 + $0x1b8] sm:$0xff] %v471_v55  ;;  %v475_v57 = vld [vmem:[%s6576_s18 + $0x388] sm:$0xff]  ;;  %v477_v58 = vld [vmem:[%s6576_s18 + $0x390] sm:$0xff] }
  0x92   : > { %474 = vst [vmem:[%s6581_s6 + $0x1c0] sm:$0xff] %v473_v56  ;;  %v479_v59 = vld [vmem:[%s6576_s18 + $0x398] sm:$0xff]  ;;  %476 = vst [vmem:[%s6581_s6 + $0x1c8] sm:$0xff] %v475_v57  ;;  %v481_v60 = vld [vmem:[%s6576_s18 + $0x3c0] sm:$0xff] }
  0x93   : > { %478 = vst [vmem:[%s6581_s6 + $0x1d0] sm:$0xff] %v477_v58  ;;  %480 = vst [vmem:[%s6581_s6 + $0x1d8] sm:$0xff] %v479_v59  ;;  %v483_v61 = vld [vmem:[%s6576_s18 + $0x3c8] sm:$0xff]  ;;  %v485_v62 = vld [vmem:[%s6576_s18 + $0x3d0] sm:$0xff] }
  0x94   : > { %482 = vst [vmem:[%s6581_s6 + $0x1e0] sm:$0xff] %v481_v60  ;;  %484 = vst [vmem:[%s6581_s6 + $0x1e8] sm:$0xff] %v483_v61  ;;  %v487_v63 = vld [vmem:[%s6576_s18 + $0x3d8] sm:$0xff]  ;;  %v489_v0 = vld [vmem:[%s6576_s18 + $0x400] sm:$0xff] }
  0x95   : > { %486 = vst [vmem:[%s6581_s6 + $0x1f0] sm:$0xff] %v485_v62  ;;  %v491_v1 = vld [vmem:[%s6576_s18 + $0x408] sm:$0xff]  ;;  %488 = vst [vmem:[%s6581_s6 + $0x1f8] sm:$0xff] %v487_v63  ;;  %v493_v2 = vld [vmem:[%s6576_s18 + $0x410] sm:$0xff] }
  0x96   : > { %490 = vst [vmem:[%s6581_s6 + $0x200] sm:$0xff] %v489_v0  ;;  %492 = vst [vmem:[%s6581_s6 + $0x208] sm:$0xff] %v491_v1  ;;  %v495_v3 = vld [vmem:[%s6576_s18 + $0x418] sm:$0xff]  ;;  %v497_v4 = vld [vmem:[%s6576_s18 + $0x440] sm:$0xff] }
  0x97   : > { %494 = vst [vmem:[%s6581_s6 + $0x210] sm:$0xff] %v493_v2  ;;  %496 = vst [vmem:[%s6581_s6 + $0x218] sm:$0xff] %v495_v3  ;;  %v499_v5 = vld [vmem:[%s6576_s18 + $0x448] sm:$0xff]  ;;  %v501_v6 = vld [vmem:[%s6576_s18 + $0x450] sm:$0xff] }
  0x98   : > { %498 = vst [vmem:[%s6581_s6 + $0x220] sm:$0xff] %v497_v4  ;;  %v503_v7 = vld [vmem:[%s6576_s18 + $0x458] sm:$0xff]  ;;  %500 = vst [vmem:[%s6581_s6 + $0x228] sm:$0xff] %v499_v5  ;;  %v505_v8 = vld [vmem:[%s6576_s18 + $0x480] sm:$0xff] }
  0x99   : > { %502 = vst [vmem:[%s6581_s6 + $0x230] sm:$0xff] %v501_v6  ;;  %504 = vst [vmem:[%s6581_s6 + $0x238] sm:$0xff] %v503_v7  ;;  %v507_v9 = vld [vmem:[%s6576_s18 + $0x488] sm:$0xff]  ;;  %v509_v10 = vld [vmem:[%s6576_s18 + $0x490] sm:$0xff] }
  0x9a   : > { %506 = vst [vmem:[%s6581_s6 + $0x240] sm:$0xff] %v505_v8  ;;  %508 = vst [vmem:[%s6581_s6 + $0x248] sm:$0xff] %v507_v9  ;;  %v511_v11 = vld [vmem:[%s6576_s18 + $0x498] sm:$0xff]  ;;  %v513_v12 = vld [vmem:[%s6576_s18 + $0x4c0] sm:$0xff] }
  0x9b   : > { %510 = vst [vmem:[%s6581_s6 + $0x250] sm:$0xff] %v509_v10  ;;  %v515_v13 = vld [vmem:[%s6576_s18 + $0x4c8] sm:$0xff]  ;;  %512 = vst [vmem:[%s6581_s6 + $0x258] sm:$0xff] %v511_v11  ;;  %v517_v14 = vld [vmem:[%s6576_s18 + $0x4d0] sm:$0xff] }
  0x9c   : > { %514 = vst [vmem:[%s6581_s6 + $0x260] sm:$0xff] %v513_v12  ;;  %516 = vst [vmem:[%s6581_s6 + $0x268] sm:$0xff] %v515_v13  ;;  %v519_v15 = vld [vmem:[%s6576_s18 + $0x4d8] sm:$0xff]  ;;  %v521_v16 = vld [vmem:[%s6576_s18 + $0x500] sm:$0xff] }
  0x9d   : > { %518 = vst [vmem:[%s6581_s6 + $0x270] sm:$0xff] %v517_v14  ;;  %520 = vst [vmem:[%s6581_s6 + $0x278] sm:$0xff] %v519_v15  ;;  %v523_v17 = vld [vmem:[%s6576_s18 + $0x508] sm:$0xff]  ;;  %v525_v18 = vld [vmem:[%s6576_s18 + $0x510] sm:$0xff] }
  0x9e   : > { %522 = vst [vmem:[%s6581_s6 + $0x280] sm:$0xff] %v521_v16  ;;  %v527_v19 = vld [vmem:[%s6576_s18 + $0x518] sm:$0xff]  ;;  %524 = vst [vmem:[%s6581_s6 + $0x288] sm:$0xff] %v523_v17  ;;  %v529_v20 = vld [vmem:[%s6576_s18 + $0x540] sm:$0xff] }
  0x9f   : > { %526 = vst [vmem:[%s6581_s6 + $0x290] sm:$0xff] %v525_v18  ;;  %528 = vst [vmem:[%s6581_s6 + $0x298] sm:$0xff] %v527_v19  ;;  %v531_v21 = vld [vmem:[%s6576_s18 + $0x548] sm:$0xff]  ;;  %v533_v22 = vld [vmem:[%s6576_s18 + $0x550] sm:$0xff] }
  0xa0   : > { %530 = vst [vmem:[%s6581_s6 + $0x2a0] sm:$0xff] %v529_v20  ;;  %532 = vst [vmem:[%s6581_s6 + $0x2a8] sm:$0xff] %v531_v21  ;;  %v535_v23 = vld [vmem:[%s6576_s18 + $0x558] sm:$0xff]  ;;  %v537_v24 = vld [vmem:[%s6576_s18 + $0x580] sm:$0xff] }
  0xa1   : > { %534 = vst [vmem:[%s6581_s6 + $0x2b0] sm:$0xff] %v533_v22  ;;  %v539_v25 = vld [vmem:[%s6576_s18 + $0x588] sm:$0xff]  ;;  %536 = vst [vmem:[%s6581_s6 + $0x2b8] sm:$0xff] %v535_v23  ;;  %v541_v26 = vld [vmem:[%s6576_s18 + $0x590] sm:$0xff] }
  0xa2   : > { %538 = vst [vmem:[%s6581_s6 + $0x2c0] sm:$0xff] %v537_v24  ;;  %540 = vst [vmem:[%s6581_s6 + $0x2c8] sm:$0xff] %v539_v25  ;;  %v543_v27 = vld [vmem:[%s6576_s18 + $0x598] sm:$0xff]  ;;  %v545_v28 = vld [vmem:[%s6576_s18 + $0x5c0] sm:$0xff] }
  0xa3   : > { %542 = vst [vmem:[%s6581_s6 + $0x2d0] sm:$0xff] %v541_v26  ;;  %544 = vst [vmem:[%s6581_s6 + $0x2d8] sm:$0xff] %v543_v27  ;;  %v547_v29 = vld [vmem:[%s6576_s18 + $0x5c8] sm:$0xff]  ;;  %v549_v30 = vld [vmem:[%s6576_s18 + $0x5d0] sm:$0xff] }
  0xa4   : > { %546 = vst [vmem:[%s6581_s6 + $0x2e0] sm:$0xff] %v545_v28  ;;  %v551_v31 = vld [vmem:[%s6576_s18 + $0x5d8] sm:$0xff]  ;;  %548 = vst [vmem:[%s6581_s6 + $0x2e8] sm:$0xff] %v547_v29  ;;  %v553_v32 = vld [vmem:[%s6576_s18 + $0x600] sm:$0xff] }
  0xa5   : > { %550 = vst [vmem:[%s6581_s6 + $0x2f0] sm:$0xff] %v549_v30  ;;  %552 = vst [vmem:[%s6581_s6 + $0x2f8] sm:$0xff] %v551_v31  ;;  %v555_v33 = vld [vmem:[%s6576_s18 + $0x608] sm:$0xff]  ;;  %v557_v34 = vld [vmem:[%s6576_s18 + $0x610] sm:$0xff] }
  0xa6   : > { %554 = vst [vmem:[%s6581_s6 + $0x300] sm:$0xff] %v553_v32  ;;  %556 = vst [vmem:[%s6581_s6 + $0x308] sm:$0xff] %v555_v33  ;;  %v559_v35 = vld [vmem:[%s6576_s18 + $0x618] sm:$0xff]  ;;  %v561_v36 = vld [vmem:[%s6576_s18 + $0x640] sm:$0xff] }
  0xa7   : > { %558 = vst [vmem:[%s6581_s6 + $0x310] sm:$0xff] %v557_v34  ;;  %v563_v37 = vld [vmem:[%s6576_s18 + $0x648] sm:$0xff]  ;;  %560 = vst [vmem:[%s6581_s6 + $0x318] sm:$0xff] %v559_v35  ;;  %v565_v38 = vld [vmem:[%s6576_s18 + $0x650] sm:$0xff] }
  0xa8   : > { %562 = vst [vmem:[%s6581_s6 + $0x320] sm:$0xff] %v561_v36  ;;  %564 = vst [vmem:[%s6581_s6 + $0x328] sm:$0xff] %v563_v37  ;;  %v567_v39 = vld [vmem:[%s6576_s18 + $0x658] sm:$0xff]  ;;  %v569_v40 = vld [vmem:[%s6576_s18 + $0x680] sm:$0xff] }
  0xa9   : > { %566 = vst [vmem:[%s6581_s6 + $0x330] sm:$0xff] %v565_v38  ;;  %568 = vst [vmem:[%s6581_s6 + $0x338] sm:$0xff] %v567_v39  ;;  %v571_v41 = vld [vmem:[%s6576_s18 + $0x688] sm:$0xff]  ;;  %v573_v42 = vld [vmem:[%s6576_s18 + $0x690] sm:$0xff] }
  0xaa   : > { %570 = vst [vmem:[%s6581_s6 + $0x340] sm:$0xff] %v569_v40  ;;  %v575_v43 = vld [vmem:[%s6576_s18 + $0x698] sm:$0xff]  ;;  %572 = vst [vmem:[%s6581_s6 + $0x348] sm:$0xff] %v571_v41  ;;  %v577_v44 = vld [vmem:[%s6576_s18 + $0x6c0] sm:$0xff] }
  0xab   : > { %574 = vst [vmem:[%s6581_s6 + $0x350] sm:$0xff] %v573_v42  ;;  %576 = vst [vmem:[%s6581_s6 + $0x358] sm:$0xff] %v575_v43  ;;  %v579_v45 = vld [vmem:[%s6576_s18 + $0x6c8] sm:$0xff]  ;;  %v581_v46 = vld [vmem:[%s6576_s18 + $0x6d0] sm:$0xff] }
  0xac   : > { %578 = vst [vmem:[%s6581_s6 + $0x360] sm:$0xff] %v577_v44  ;;  %580 = vst [vmem:[%s6581_s6 + $0x368] sm:$0xff] %v579_v45  ;;  %v583_v47 = vld [vmem:[%s6576_s18 + $0x6d8] sm:$0xff]  ;;  %v585_v48 = vld [vmem:[%s6576_s18 + $0x700] sm:$0xff] }
  0xad   : > { %582 = vst [vmem:[%s6581_s6 + $0x370] sm:$0xff] %v581_v46  ;;  %v587_v49 = vld [vmem:[%s6576_s18 + $0x708] sm:$0xff]  ;;  %584 = vst [vmem:[%s6581_s6 + $0x378] sm:$0xff] %v583_v47  ;;  %v589_v50 = vld [vmem:[%s6576_s18 + $0x710] sm:$0xff] }
  0xae   : > { %586 = vst [vmem:[%s6581_s6 + $0x380] sm:$0xff] %v585_v48  ;;  %588 = vst [vmem:[%s6581_s6 + $0x388] sm:$0xff] %v587_v49  ;;  %v591_v51 = vld [vmem:[%s6576_s18 + $0x718] sm:$0xff]  ;;  %v593_v52 = vld [vmem:[%s6576_s18 + $0x740] sm:$0xff] }
  0xaf   : > { %590 = vst [vmem:[%s6581_s6 + $0x390] sm:$0xff] %v589_v50  ;;  %592 = vst [vmem:[%s6581_s6 + $0x398] sm:$0xff] %v591_v51  ;;  %v595_v53 = vld [vmem:[%s6576_s18 + $0x748] sm:$0xff]  ;;  %v597_v54 = vld [vmem:[%s6576_s18 + $0x750] sm:$0xff] }
  0xb0   : > { %594 = vst [vmem:[%s6581_s6 + $0x3a0] sm:$0xff] %v593_v52  ;;  %v599_v55 = vld [vmem:[%s6576_s18 + $0x758] sm:$0xff]  ;;  %596 = vst [vmem:[%s6581_s6 + $0x3a8] sm:$0xff] %v595_v53  ;;  %v601_v56 = vld [vmem:[%s6576_s18 + $0x780] sm:$0xff] }
  0xb1   : > { %598 = vst [vmem:[%s6581_s6 + $0x3b0] sm:$0xff] %v597_v54  ;;  %600 = vst [vmem:[%s6581_s6 + $0x3b8] sm:$0xff] %v599_v55  ;;  %v603_v57 = vld [vmem:[%s6576_s18 + $0x788] sm:$0xff]  ;;  %v605_v58 = vld [vmem:[%s6576_s18 + $0x790] sm:$0xff] }
  0xb2   : > { %602 = vst [vmem:[%s6581_s6 + $0x3c0] sm:$0xff] %v601_v56  ;;  %604 = vst [vmem:[%s6581_s6 + $0x3c8] sm:$0xff] %v603_v57  ;;  %v607_v59 = vld [vmem:[%s6576_s18 + $0x798] sm:$0xff]  ;;  %v609_v60 = vld [vmem:[%s6576_s18 + $0x7c0] sm:$0xff] }
  0xb3   : > { %606 = vst [vmem:[%s6581_s6 + $0x3d0] sm:$0xff] %v605_v58  ;;  %v611_v61 = vld [vmem:[%s6576_s18 + $0x7c8] sm:$0xff]  ;;  %608 = vst [vmem:[%s6581_s6 + $0x3d8] sm:$0xff] %v607_v59  ;;  %v613_v62 = vld [vmem:[%s6576_s18 + $0x7d0] sm:$0xff] }
  0xb4   : > { %610 = vst [vmem:[%s6581_s6 + $0x3e0] sm:$0xff] %v609_v60  ;;  %612 = vst [vmem:[%s6581_s6 + $0x3e8] sm:$0xff] %v611_v61  ;;  %v615_v63 = vld [vmem:[%s6576_s18 + $0x7d8] sm:$0xff] }
  0xb5   : > { %614 = vst [vmem:[%s6581_s6 + $0x3f0] sm:$0xff] %v613_v62  ;;  %616 = vst [vmem:[%s6581_s6 + $0x3f8] sm:$0xff] %v615_v63 }
  0xb6 PF: > { %p10408_p3 = scmp.ne.s32.totalorder %s10404_s4, 0 }
  0xb7   : > { %s6839_s27 = sand.u32 (!%p10408_p3), 1, %s6258_s15   ;;  %p10409_p10 = scmp.ne.s32.totalorder (!%p10408_p3), %s10387_s8, 0 }
  0xb8   : > { %625 = sbr.rel (%p10408_p3) target bundleno = 1745 (0x6d1), region = 71  ;;  %s628_s22 = scalar_lea.sflag (!%p10408_p3), [#allocation4], %s6839_s27 }
  0xb9   : > { %s5623_s26 = smul.u32 (!%p10408_p3), 384, %s6839_s27 }
  0xbb   : > { %s6843_s9 = scalar_lea.vmem (!%p10408_p3), [#allocation3], %s5623_s26 }
  0xbf   : > { %6217 = dma.done.wait (%p10409_p10), %s628_s22, 6144  }
  0xc0   : > { %6219 = vsyncadd (%p10409_p10), %s628_s22, 4294961152  ;;  %p10410_p0 = scmp.ne.s32.totalorder %s10385_s28, 0 }
  0xc2   : > { %6221 = dma.done.wait (%p10410_p0), [#allocation7], 16384  }
  0xc3   : > { %6223 = vsyncadd (%p10410_p0), [#allocation7], 4294950912  ;;  %s641_s4 = sand.u32 1, %s6246_s12   ;;  %s10373_s25 = sand.u32 1, %s6238_s10  }
  0xc4   : > { %s4578_s14 = sshll.u32 %s641_s4, 10  ;;  %s4579_s2 = sshll.u32 %s10373_s25, 9 }
  0xc5   : > { %s4580_s23 = sshll.u32 %s6839_s27, 8  ;;  %s6858_s24 = scalar_lea.vmem [#allocation8], %s4578_s14 }
  0xc6   : > { %s6860_s8 = scalar_lea.vmem [#allocation9], %s4579_s2  ;;  %s6862_s29 = scalar_lea.vmem [#allocation10], %s4580_s23 }
  0xc7   : > { %p4581_p11 = scmp.ne.s32.totalorder %s6266_s17, 0 }
  0xc9   : > { %694 = sbr.rel (%p4581_p11) target bundleno = 1387 (0x56b), region = 87 }
  0xd0   : > { %v744_v0 = vld [vmem:[%s10308_s1 + $0x8] sm:$0xff]  ;;  %v743_v2 = vld [vmem:[%s10308_s1] sm:$0xff]  ;;  %v6290_v7 = vmov 0.0   ;;  %s10413_s18 = sld [smem:[#allocation57_spill]]  ;;  %s10505_s26 = sld [smem:[#allocation58_spill]] }
  0xd1   : > { %v748_v1 = vld [vmem:[%s10308_s1 + $0x28] sm:$0xff]  ;;  %v747_v4 = vld [vmem:[%s10308_s1 + $0x20] sm:$0xff]  ;;  %1182 = vmatprep.mubr.f32.mxu0 %v6290_v7  ;;  %s10534_s4 = sld [smem:[#allocation59_spill]] }
  0xd2   : > { %v4597_v3 = vpack.c.bf16 %v748_v1, %v744_v0  ;;  %v752_v5 = vld [vmem:[%s10308_s1 + $0x48] sm:$0xff]  ;;  %v4599_v8 = vpack.c.bf16 %v747_v4, %v743_v2  ;;  %v751_v10 = vld [vmem:[%s10308_s1 + $0x40] sm:$0xff] }
  0xd3   : > { %v756_v6 = vld [vmem:[%s10308_s1 + $0x68] sm:$0xff]  ;;  %v755_v11 = vld [vmem:[%s10308_s1 + $0x60] sm:$0xff] }
  0xd4   : > { %v4601_v9 = vpack.c.bf16 %v756_v6, %v752_v5  ;;  %v760_v12 = vld [vmem:[%s10308_s1 + $0x88] sm:$0xff]  ;;  %4598 = vmatprep.subr.bf16.mxu1 %v4597_v3  ;;  %v4603_v14 = vpack.c.bf16 %v755_v11, %v751_v10  ;;  %v759_v16 = vld [vmem:[%s10308_s1 + $0x80] sm:$0xff] }
  0xd5   : > { %v764_v13 = vld [vmem:[%s10308_s1 + $0xa8] sm:$0xff]  ;;  %4600 = vmatpush1.bf16.msra.mxu1 %v4599_v8  ;;  %v763_v17 = vld [vmem:[%s10308_s1 + $0xa0] sm:$0xff] }
  0xd6   : > { %4602 = vmatprep.subr.bf16.mxu1 %v4601_v9  ;;  %v4605_v15 = vpack.c.bf16 %v764_v13, %v760_v12  ;;  %v768_v18 = vld [vmem:[%s10308_s1 + $0xc8] sm:$0xff]  ;;  %v4607_v20 = vpack.c.bf16 %v763_v17, %v759_v16  ;;  %v767_v22 = vld [vmem:[%s10308_s1 + $0xc0] sm:$0xff]  ;;  %s10414_s6 = smov %s10413_s18 }
  0xd7   : > { %v772_v19 = vld [vmem:[%s10308_s1 + $0xe8] sm:$0xff]  ;;  %v771_v23 = vld [vmem:[%s10308_s1 + $0xe0] sm:$0xff] }
  0xd8   : > { %v4609_v21 = vpack.c.bf16 %v772_v19, %v768_v18  ;;  %v776_v24 = vld [vmem:[%s10308_s1 + $0x108] sm:$0xff]  ;;  %v4611_v26 = vpack.c.bf16 %v771_v23, %v767_v22  ;;  %v871_v29 = vld [vmem:[%s10308_s1 + $0x400] sm:$0xff] }
  0xd9   : > { %4604 = vmatpush1.bf16.msra.mxu1 %v4603_v14  ;;  %v780_v25 = vld [vmem:[%s10308_s1 + $0x128] sm:$0xff]  ;;  %v775_v31 = vld [vmem:[%s10308_s1 + $0x100] sm:$0xff] }
  0xda   : > { %4606 = vmatprep.subr.bf16.mxu1 %v4605_v15  ;;  %v872_v27 = vld [vmem:[%s10308_s1 + $0x408] sm:$0xff]  ;;  %v4613_v30 = vpack.c.bf16 %v780_v25, %v776_v24  ;;  %v779_v32 = vld [vmem:[%s10308_s1 + $0x120] sm:$0xff] }
  0xdb   : > { %v876_v28 = vld [vmem:[%s10308_s1 + $0x428] sm:$0xff]  ;;  %v875_v34 = vld [vmem:[%s10308_s1 + $0x420] sm:$0xff]  ;;  %v4615_v42 = vpack.c.bf16 %v779_v32, %v775_v31 }
  0xdc   : > { %v4661_v33 = vpack.c.bf16 %v876_v28, %v872_v27  ;;  %v784_v35 = vld [vmem:[%s10308_s1 + $0x148] sm:$0xff]  ;;  %v4663_v37 = vpack.c.bf16 %v875_v34, %v871_v29  ;;  %v879_v40 = vld [vmem:[%s10308_s1 + $0x440] sm:$0xff] }
  0xdd   : > { %4608 = vmatpush1.bf16.msra.mxu1 %v4607_v20  ;;  %v788_v36 = vld [vmem:[%s10308_s1 + $0x168] sm:$0xff]  ;;  %v883_v41 = vld [vmem:[%s10308_s1 + $0x460] sm:$0xff] }
  0xde   : > { %4610 = vmatprep.subr.bf16.mxu1 %v4609_v21  ;;  %v880_v38 = vld [vmem:[%s10308_s1 + $0x448] sm:$0xff]  ;;  %4662 = vmatprep.subr.bf16.mxu0 %v4661_v33  ;;  %v783_v43 = vld [vmem:[%s10308_s1 + $0x140] sm:$0xff]  ;;  %v4667_v46 = vpack.c.bf16 %v883_v41, %v879_v40  ;;  %v4617_v47 = vpack.c.bf16 %v788_v36, %v784_v35 }
  0xdf   : > { %v884_v39 = vld [vmem:[%s10308_s1 + $0x468] sm:$0xff]  ;;  %v787_v44 = vld [vmem:[%s10308_s1 + $0x160] sm:$0xff]  ;;  %4664 = vmatpush1.bf16.msra.mxu0 %v4663_v37 }
  0xe0   : > { %v4665_v45 = vpack.c.bf16 %v884_v39, %v880_v38  ;;  %v792_v48 = vld [vmem:[%s10308_s1 + $0x188] sm:$0xff]  ;;  %v887_v53 = vld [vmem:[%s10308_s1 + $0x480] sm:$0xff]  ;;  %v4619_v55 = vpack.c.bf16 %v787_v44, %v783_v43 }
  0xe1   : > { %4612 = vmatpush1.bf16.msra.mxu1 %v4611_v26  ;;  %v888_v49 = vld [vmem:[%s10308_s1 + $0x488] sm:$0xff]  ;;  %v891_v54 = vld [vmem:[%s10308_s1 + $0x4a0] sm:$0xff] }
  0xe2   : > { %4614 = vmatprep.subr.bf16.mxu1 %v4613_v30  ;;  %v892_v50 = vld [vmem:[%s10308_s1 + $0x4a8] sm:$0xff]  ;;  %4666 = vmatprep.subr.bf16.mxu0 %v4665_v45  ;;  %v791_v56 = vld [vmem:[%s10308_s1 + $0x180] sm:$0xff]  ;;  %v4671_v57 = vpack.c.bf16 %v891_v54, %v887_v53 }
  0xe3   : > { %v796_v51 = vld [vmem:[%s10308_s1 + $0x1a8] sm:$0xff]  ;;  %v4669_v52 = vpack.c.bf16 %v892_v50, %v888_v49  ;;  %4668 = vmatpush1.bf16.msra.mxu0 %v4667_v46  ;;  %v795_v61 = vld [vmem:[%s10308_s1 + $0x1a0] sm:$0xff] }
  0xe4   : > { %v896_v58 = vld [vmem:[%s10308_s1 + $0x4c8] sm:$0xff]  ;;  %v4621_v60 = vpack.c.bf16 %v796_v51, %v792_v48  ;;  %v895_v63 = vld [vmem:[%s10308_s1 + $0x4c0] sm:$0xff]  ;;  %v4623_v5 = vpack.c.bf16 %v795_v61, %v791_v56  ;;  %v7117_v61 = vld [vmem:[%s6843_s9 + $0x10] sm:$0xff] }
  0xe5   : > { %4616 = vmatpush1.bf16.msra.mxu1 %v4615_v42  ;;  %v900_v59 = vld [vmem:[%s10308_s1 + $0x4e8] sm:$0xff]  ;;  %4670 = vmatprep.subr.bf16.mxu0 %v4669_v52  ;;  %v899_v0 = vld [vmem:[%s10308_s1 + $0x4e0] sm:$0xff] }
  0xe6   : > { %4618 = vmatprep.subr.bf16.mxu1 %v4617_v47  ;;  %v4673_v62 = vpack.c.bf16 %v900_v59, %v896_v58  ;;  %v800_v1 = vld [vmem:[%s10308_s1 + $0x1c8] sm:$0xff]  ;;  %v799_v6 = vld [vmem:[%s10308_s1 + $0x1c0] sm:$0xff]  ;;  %v4675_v9 = vpack.c.bf16 %v899_v0, %v895_v63 }
  0xe7   : > { %v804_v2 = vld [vmem:[%s10308_s1 + $0x1e8] sm:$0xff]  ;;  %v803_v8 = vld [vmem:[%s10308_s1 + $0x1e0] sm:$0xff]  ;;  %4672 = vmatpush1.bf16.msra.mxu0 %v4671_v57 }
  0xe8   : > { %v904_v3 = vld [vmem:[%s10308_s1 + $0x508] sm:$0xff]  ;;  %v4625_v10 = vpack.c.bf16 %v804_v2, %v800_v1  ;;  %4674 = vmatprep.subr.bf16.mxu0 %v4673_v62  ;;  %v903_v13 = vld [vmem:[%s10308_s1 + $0x500] sm:$0xff]  ;;  %v4627_v18 = vpack.c.bf16 %v803_v8, %v799_v6 }
  0xe9   : > { %v908_v4 = vld [vmem:[%s10308_s1 + $0x528] sm:$0xff]  ;;  %4620 = vmatpush1.bf16.msra.mxu1 %v4619_v55  ;;  %v907_v14 = vld [vmem:[%s10308_s1 + $0x520] sm:$0xff] }
  0xea   : > { %4622 = vmatprep.subr.bf16.mxu1 %v4621_v60  ;;  %v808_v11 = vld [vmem:[%s10308_s1 + $0x208] sm:$0xff]  ;;  %v4677_v12 = vpack.c.bf16 %v908_v4, %v904_v3  ;;  %v807_v19 = vld [vmem:[%s10308_s1 + $0x200] sm:$0xff]  ;;  %v4679_v21 = vpack.c.bf16 %v907_v14, %v903_v13 }
  0xeb   : > { %v812_v15 = vld [vmem:[%s10308_s1 + $0x228] sm:$0xff]  ;;  %v811_v20 = vld [vmem:[%s10308_s1 + $0x220] sm:$0xff]  ;;  %4676 = vmatpush1.bf16.msra.mxu0 %v4675_v9 }
  0xec   : > { %v912_v16 = vld [vmem:[%s10308_s1 + $0x548] sm:$0xff]  ;;  %v4629_v22 = vpack.c.bf16 %v812_v15, %v808_v11  ;;  %4678 = vmatprep.subr.bf16.mxu0 %v4677_v12  ;;  %v911_v25 = vld [vmem:[%s10308_s1 + $0x540] sm:$0xff]  ;;  %v4631_v31 = vpack.c.bf16 %v811_v20, %v807_v19  ;;  %v7168_v19 = vld [vmem:[%s6843_s9 + $0x58] sm:$0xff] }
  0xed   : > { %v916_v17 = vld [vmem:[%s10308_s1 + $0x568] sm:$0xff]  ;;  %4624 = vmatpush1.bf16.msra.mxu1 %v4623_v5  ;;  %v915_v26 = vld [vmem:[%s10308_s1 + $0x560] sm:$0xff] }
  0xee   : > { %4626 = vmatprep.subr.bf16.mxu1 %v4625_v10  ;;  %v816_v23 = vld [vmem:[%s10308_s1 + $0x248] sm:$0xff]  ;;  %v4681_v24 = vpack.c.bf16 %v916_v17, %v912_v16  ;;  %v815_v32 = vld [vmem:[%s10308_s1 + $0x240] sm:$0xff]  ;;  %v4683_v34 = vpack.c.bf16 %v915_v26, %v911_v25  ;;  %v7185_v26 = vld [vmem:[%s6843_s9 + $0x70] sm:$0xff] }
  0xef   : > { %v820_v27 = vld [vmem:[%s10308_s1 + $0x268] sm:$0xff]  ;;  %v819_v33 = vld [vmem:[%s10308_s1 + $0x260] sm:$0xff]  ;;  %4680 = vmatpush1.bf16.msra.mxu0 %v4679_v21 }
  0xf0   : > { %v920_v28 = vld [vmem:[%s10308_s1 + $0x588] sm:$0xff]  ;;  %v4633_v35 = vpack.c.bf16 %v820_v27, %v816_v23  ;;  %4682 = vmatprep.subr.bf16.mxu0 %v4681_v24  ;;  %v919_v38 = vld [vmem:[%s10308_s1 + $0x580] sm:$0xff]  ;;  %v4635_v43 = vpack.c.bf16 %v819_v33, %v815_v32  ;;  %v746_v23 = vld [vmem:[%s10308_s1 + $0x18] sm:$0xff] }
  0xf1   : > { %v924_v29 = vld [vmem:[%s10308_s1 + $0x5a8] sm:$0xff]  ;;  %4628 = vmatpush1.bf16.msra.mxu1 %v4627_v18  ;;  %v923_v39 = vld [vmem:[%s10308_s1 + $0x5a0] sm:$0xff]  ;;  %v750_v24 = vld [vmem:[%s10308_s1 + $0x38] sm:$0xff] }
  0xf2   : > { %v7059_v30 = vld [vmem:[%s6843_s9 + $0x8] sm:$0xff]  ;;  %4630 = vmatprep.subr.bf16.mxu1 %v4629_v22  ;;  %v4685_v37 = vpack.c.bf16 %v924_v29, %v920_v28  ;;  %v823_v44 = vld [vmem:[%s10308_s1 + $0x280] sm:$0xff]  ;;  %v4687_v45 = vpack.c.bf16 %v923_v39, %v919_v38  ;;  %v4693_v27 = vpack.c.bf16 %v750_v24, %v746_v23  ;;  %v745_v28 = vld [vmem:[%s10308_s1 + $0x10] sm:$0xff] }
  0xf3   : > { %v824_v36 = vld [vmem:[%s10308_s1 + $0x288] sm:$0xff]  ;;  %1021 = vmatprep.mubr.f32.mxu1 %v7059_v30  ;;  %4684 = vmatpush1.bf16.msra.mxu0 %v4683_v34  ;;  %v827_v47 = vld [vmem:[%s10308_s1 + $0x2a0] sm:$0xff]  ;;  %v749_v29 = vld [vmem:[%s10308_s1 + $0x30] sm:$0xff] }
  0xf4   : > { %v828_v40 = vld [vmem:[%s10308_s1 + $0x2a8] sm:$0xff]  ;;  %4686 = vmatprep.subr.bf16.mxu0 %v4685_v37  ;;  %v927_v49 = vld [vmem:[%s10308_s1 + $0x5c0] sm:$0xff]  ;;  %v4639_v53 = vpack.c.bf16 %v827_v47, %v823_v44  ;;  %v758_v32 = vld [vmem:[%s10308_s1 + $0x78] sm:$0xff]  ;;  %v4695_v34 = vpack.c.bf16 %v749_v29, %v745_v28 }
  0xf5   : > { %v928_v41 = vld [vmem:[%s10308_s1 + $0x5c8] sm:$0xff]  ;;  %4632 = vmatpush1.bf16.msra.mxu1 %v4631_v31  ;;  %v4637_v46 = vpack.c.bf16 %v828_v40, %v824_v36  ;;  %v931_v50 = vld [vmem:[%s10308_s1 + $0x5e0] sm:$0xff]  ;;  %v754_v31 = vld [vmem:[%s10308_s1 + $0x58] sm:$0xff] }
  0xf6   : > { %v932_v42 = vld [vmem:[%s10308_s1 + $0x5e8] sm:$0xff]  ;;  %4634 = vmatprep.subr.bf16.mxu1 %v4633_v35  ;;  %v4691_v54 = vpack.c.bf16 %v931_v50, %v927_v49  ;;  %v831_v56 = vld [vmem:[%s10308_s1 + $0x2c0] sm:$0xff]  ;;  %v4697_v37 = vpack.c.bf16 %v758_v32, %v754_v31  ;;  %v753_v38 = vld [vmem:[%s10308_s1 + $0x50] sm:$0xff] }
  0xf7   : > { %v4689_v48 = vpack.c.bf16 %v932_v42, %v928_v41  ;;  %v832_v51 = vld [vmem:[%s10308_s1 + $0x2c8] sm:$0xff]  ;;  %4688 = vmatpush1.bf16.msra.mxu0 %v4687_v45  ;;  %v835_v57 = vld [vmem:[%s10308_s1 + $0x2e0] sm:$0xff]  ;;  %v757_v39 = vld [vmem:[%s10308_s1 + $0x70] sm:$0xff] }
  0xf8   : > { %v836_v52 = vld [vmem:[%s10308_s1 + $0x2e8] sm:$0xff]  ;;  %v4643_v60 = vpack.c.bf16 %v835_v57, %v831_v56  ;;  %v839_v63 = vld [vmem:[%s10308_s1 + $0x300] sm:$0xff]  ;;  %v762_v40 = vld [vmem:[%s10308_s1 + $0x98] sm:$0xff] }
  0xf9   : > { %4636 = vmatpush1.bf16.msra.mxu1 %v4635_v43  ;;  %v4641_v55 = vpack.c.bf16 %v836_v52, %v832_v51  ;;  %4690 = vmatprep.subr.bf16.mxu0 %v4689_v48  ;;  %v840_v58 = vld [vmem:[%s10308_s1 + $0x308] sm:$0xff]  ;;  %v843_v0 = vld [vmem:[%s10308_s1 + $0x320] sm:$0xff]  ;;  %v766_v41 = vld [vmem:[%s10308_s1 + $0xb8] sm:$0xff]  ;;  %v4699_v43 = vpack.c.bf16 %v757_v39, %v753_v38 }
  0xfa   : > { %4638 = vmatprep.subr.bf16.mxu1 %v4637_v46  ;;  %v844_v59 = vld [vmem:[%s10308_s1 + $0x328] sm:$0xff]  ;;  %v4647_v3 = vpack.c.bf16 %v843_v0, %v839_v63  ;;  %v847_v6 = vld [vmem:[%s10308_s1 + $0x340] sm:$0xff]  ;;  %v7226_v42 = vld [vmem:[%s6843_s9 + $0x18] sm:$0xff]  ;;  %v4701_v46 = vpack.c.bf16 %v766_v41, %v762_v40 }
  0xfb   : > { %4692 = vmatpush1.bf16.msra.mxu0 %v4691_v54  ;;  %v4645_v62 = vpack.c.bf16 %v844_v59, %v840_v58  ;;  %v848_v1 = vld [vmem:[%s10308_s1 + $0x348] sm:$0xff]  ;;  %v851_v8 = vld [vmem:[%s10308_s1 + $0x360] sm:$0xff]  ;;  %v7232_v45 = vld [vmem:[%s6843_s9 + $0x38] sm:$0xff] }
  0xfc   : > { %v852_v2 = vld [vmem:[%s10308_s1 + $0x368] sm:$0xff]  ;;  %v4651_v11 = vpack.c.bf16 %v851_v8, %v847_v6  ;;  %v7151_v12 = vld [vmem:[%s6843_s9 + $0x40] sm:$0xff]  ;;  %v761_v47 = vld [vmem:[%s10308_s1 + $0x90] sm:$0xff] }
  0xfd   : > { %4640 = vmatpush1.bf16.msra.mxu1 %v4639_v53  ;;  %v7134_v4 = vld [vmem:[%s6843_s9 + $0x28] sm:$0xff]  ;;  %v4649_v5 = vpack.c.bf16 %v852_v2, %v848_v1  ;;  %v855_v14 = vld [vmem:[%s10308_s1 + $0x380] sm:$0xff]  ;;  %v765_v48 = vld [vmem:[%s10308_s1 + $0xb0] sm:$0xff] }
  0xfe   : > { %4642 = vmatprep.subr.bf16.mxu1 %v4641_v55  ;;  %1183 = vmatmul.mubr.f32.vlgmr.msra.gmra.mrb[0].mxu0 %v7117_v61  ;;  %v856_v9 = vld [vmem:[%s10308_s1 + $0x388] sm:$0xff]  ;;  %v859_v15 = vld [vmem:[%s10308_s1 + $0x3a0] sm:$0xff]  ;;  %v770_v49 = vld [vmem:[%s10308_s1 + $0xd8] sm:$0xff]  ;;  %v4703_v52 = vpack.c.bf16 %v765_v48, %v761_v47 }
  0xff   : > { %1188 = vmatprep.mubr.f32.mxu0 %v6290_v7  ;;  %v860_v10 = vld [vmem:[%s10308_s1 + $0x3a8] sm:$0xff]  ;;  %v4655_v18 = vpack.c.bf16 %v859_v15, %v855_v14  ;;  %v863_v21 = vld [vmem:[%s10308_s1 + $0x3c0] sm:$0xff]  ;;  %v774_v50 = vld [vmem:[%s10308_s1 + $0xf8] sm:$0xff] }
 0x100   : > { %v4653_v13 = vpack.c.bf16 %v860_v10, %v856_v9  ;;  %v864_v16 = vld [vmem:[%s10308_s1 + $0x3c8] sm:$0xff]  ;;  %v867_v22 = vld [vmem:[%s10308_s1 + $0x3e0] sm:$0xff]  ;;  %v7251_v51 = vld [vmem:[%s6843_s9 + $0x30] sm:$0xff]  ;;  %v4705_v55 = vpack.c.bf16 %v774_v50, %v770_v49 }
 0x101   : > { %4644 = vmatpush1.bf16.msra.mxu1 %v4643_v60  ;;  %v868_v17 = vld [vmem:[%s10308_s1 + $0x3e8] sm:$0xff]  ;;  %v4659_v25 = vpack.c.bf16 %v867_v22, %v863_v21  ;;  %v7201_v33 = vld [vmem:[%s6843_s9] sm:$0xff]  ;;  %v7254_v53 = vld [vmem:[%s6843_s9 + $0xb8] sm:$0xff] }
 0x102   : > { %4646 = vmatprep.subr.bf16.mxu1 %v4645_v62  ;;  %1189 = vmatmul.mubr.f32.gmra.mrb[2].mxu0 %v7134_v4  ;;  %v4657_v20 = vpack.c.bf16 %v868_v17, %v864_v16  ;;  %v7205_v35 = vld [vmem:[%s6843_s9 + $0x88] sm:$0xff]  ;;  %v7208_v36 = vld [vmem:[%s6843_s9 + $0x20] sm:$0xff]  ;;  %v7257_v54 = vld [vmem:[%s6843_s9 + $0x50] sm:$0xff] }
 0x103   : > { %1194 = vmatprep.mubr.f32.mxu0 %v6290_v7  ;;  %v7229_v44 = vld [vmem:[%s6843_s9 + $0xa0] sm:$0xff]  ;;  %v769_v56 = vld [vmem:[%s10308_s1 + $0xd0] sm:$0xff]  ;;  %v778_v58 = vld [vmem:[%s10308_s1 + $0x118] sm:$0xff] }
 0x104   : > { %v773_v57 = vld [vmem:[%s10308_s1 + $0xf0] sm:$0xff]  ;;  %v782_v59 = vld [vmem:[%s10308_s1 + $0x138] sm:$0xff]  ;;  %v7276_v60 = vld [vmem:[%s6843_s9 + $0x48] sm:$0xff] }
 0x105   : > { %4648 = vmatpush1.bf16.msra.mxu1 %v4647_v3  ;;  %v4707_v62 = vpack.c.bf16 %v773_v57, %v769_v56  ;;  %v7279_v63 = vld [vmem:[%s6843_s9 + $0xd0] sm:$0xff]  ;;  %v7282_v0 = vld [vmem:[%s6843_s9 + $0x68] sm:$0xff]  ;;  %v4709_v1 = vpack.c.bf16 %v782_v59, %v778_v58  ;;  %v790_v6 = vld [vmem:[%s10308_s1 + $0x178] sm:$0xff] }
 0x106   : > { %4650 = vmatprep.subr.bf16.mxu1 %v4649_v5  ;;  %1195 = vmatmul.mubr.f32.gmra.mrb[4].mxu0 %v7151_v12  ;;  %v777_v2 = vld [vmem:[%s10308_s1 + $0x110] sm:$0xff]  ;;  %v786_v5 = vld [vmem:[%s10308_s1 + $0x158] sm:$0xff]  ;;  %v7301_v8 = vld [vmem:[%s6843_s9 + $0x60] sm:$0xff] }
 0x107   : > { %1200 = vmatprep.mubr.f32.mxu0 %v6290_v7  ;;  %v781_v3 = vld [vmem:[%s10308_s1 + $0x130] sm:$0xff]  ;;  %v7304_v10 = vld [vmem:[%s6843_s9 + $0xe8] sm:$0xff]  ;;  %v794_v16 = vld [vmem:[%s10308_s1 + $0x198] sm:$0xff] }
 0x108   : > { %v4711_v9 = vpack.c.bf16 %v781_v3, %v777_v2  ;;  %v785_v14 = vld [vmem:[%s10308_s1 + $0x150] sm:$0xff]  ;;  %v798_v17 = vld [vmem:[%s10308_s1 + $0x1b8] sm:$0xff]  ;;  %v7329_v21 = vld [vmem:[%s6843_s9 + $0x100] sm:$0xff] }
 0x109   : > { %4652 = vmatpush1.bf16.msra.mxu1 %v4651_v11  ;;  %v7307_v11 = vld [vmem:[%s6843_s9 + $0x80] sm:$0xff]  ;;  %v789_v15 = vld [vmem:[%s10308_s1 + $0x170] sm:$0xff]  ;;  %v7332_v22 = vld [vmem:[%s6843_s9 + $0x98] sm:$0xff]  ;;  %v4717_v23 = vpack.c.bf16 %v798_v17, %v794_v16 }
 0x10a   : > { %4654 = vmatprep.subr.bf16.mxu1 %v4653_v13  ;;  %1201 = vmatmul.mubr.f32.gmra.mrb[6].mxu0 %v7168_v19  ;;  %v4713_v13 = vpack.c.bf16 %v790_v6, %v786_v5  ;;  %v793_v24 = vld [vmem:[%s10308_s1 + $0x190] sm:$0xff]  ;;  %v806_v28 = vld [vmem:[%s10308_s1 + $0x1f8] sm:$0xff]  ;;  %v7382_v48 = vld [vmem:[%s6843_s9 + $0xc8] sm:$0xff] }
 0x10b   : > { %1206 = vmatprep.mubr.f32.mxu0 %v6290_v7  ;;  %v7351_v29 = vld [vmem:[%s6843_s9 + $0x90] sm:$0xff]  ;;  %v7354_v32 = vld [vmem:[%s6843_s9 + $0x118] sm:$0xff]  ;;  %v7401_v57 = vld [vmem:[%s6843_s9 + $0xc0] sm:$0xff] }
 0x10c   : > { %v801_v38 = vld [vmem:[%s10308_s1 + $0x1d0] sm:$0xff]  ;;  %v810_v40 = vld [vmem:[%s10308_s1 + $0x218] sm:$0xff]  ;;  %v7404_v59 = vld [vmem:[%s6843_s9 + $0x148] sm:$0xff] }
 0x10d   : > { %4656 = vmatpush1.bf16.msra.mxu1 %v4655_v18  ;;  %v7326_v18 = vld [vmem:[%s6843_s9 + $0x78] sm:$0xff]  ;;  %v805_v39 = vld [vmem:[%s10308_s1 + $0x1f0] sm:$0xff] }
 0x10e   : > { %4658 = vmatprep.subr.bf16.mxu1 %v4657_v20  ;;  %1207 = vmatmul.mubr.f32.gmra.mrb[8].mxu0 %v7185_v26  ;;  %v4715_v20 = vpack.c.bf16 %v789_v15, %v785_v14  ;;  %v814_v41 = vld [vmem:[%s10308_s1 + $0x238] sm:$0xff]  ;;  %v7379_v47 = vld [vmem:[%s6843_s9 + $0x130] sm:$0xff]  ;;  %v7429_v14 = vld [vmem:[%s6843_s9 + $0x160] sm:$0xff] }
 0x10f   : > { %1212 = vmatprep.mubr.f32.mxu0 %v6290_v7  ;;  %v4725_v49 = vpack.c.bf16 %v814_v41, %v810_v40  ;;  %v809_v50 = vld [vmem:[%s10308_s1 + $0x210] sm:$0xff]  ;;  %v822_v56 = vld [vmem:[%s10308_s1 + $0x278] sm:$0xff] }
 0x110   : > { %v817_v2 = vld [vmem:[%s10308_s1 + $0x250] sm:$0xff]  ;;  %v826_v5 = vld [vmem:[%s10308_s1 + $0x298] sm:$0xff] }
 0x111   : > { %4660 = vmatpush1.bf16.msra.mxu1 %v4659_v25  ;;  %v797_v25 = vld [vmem:[%s10308_s1 + $0x1b0] sm:$0xff]  ;;  %v830_v6 = vld [vmem:[%s10308_s1 + $0x2b8] sm:$0xff] }
 0x112   : > { %4694 = vmatprep.subr.bf16.mxu1 %v4693_v27  ;;  %1213 = vmatmul.mubr.f32.gmra.mrb[10].mxu0 %v7205_v35  ;;  %v802_v27 = vld [vmem:[%s10308_s1 + $0x1d8] sm:$0xff]  ;;  %v4719_v31 = vpack.c.bf16 %v797_v25, %v793_v24  ;;  %v821_v3 = vld [vmem:[%s10308_s1 + $0x270] sm:$0xff]  ;;  %v4733_v16 = vpack.c.bf16 %v830_v6, %v826_v5 }
 0x113   : > { %1218 = vmatprep.mubr.f32.mxu0 %v6290_v7  ;;  %v7432_v15 = vld [vmem:[%s6843_s9 + $0xf8] sm:$0xff]  ;;  %v825_v17 = vld [vmem:[%s10308_s1 + $0x290] sm:$0xff] }
 0x114   : > { %1022 = vmatmul.mubr.f32.vlgmr.msra.gmra.mrb[0].mxu1 %v7201_v33  ;;  %v838_v24 = vld [vmem:[%s10308_s1 + $0x2f8] sm:$0xff]  ;;  %v7451_v25 = vld [vmem:[%s6843_s9 + $0xf0] sm:$0xff] }
 0x115   : > { %4696 = vmatpush1.bf16.msra.mxu1 %v4695_v34  ;;  %1027 = vmatprep.mubr.f32.mxu1 %v7208_v36  ;;  %v7357_v34 = vld [vmem:[%s6843_s9 + $0xb0] sm:$0xff]  ;;  %v842_v40 = vld [vmem:[%s10308_s1 + $0x318] sm:$0xff] }
 0x116   : > { %4698 = vmatprep.subr.bf16.mxu1 %v4697_v37  ;;  %1219 = vmatmul.mubr.f32.gmra.mrb[12].mxu0 %v7229_v44  ;;  %v4721_v37 = vpack.c.bf16 %v806_v28, %v802_v27  ;;  %v7454_v28 = vld [vmem:[%s6843_s9 + $0x178] sm:$0xff]  ;;  %v845_v5 = vld [vmem:[%s10308_s1 + $0x330] sm:$0xff] }
 0x117   : > { %1224 = vmatprep.mubr.f32.mxu0 %v6290_v7  ;;  %v846_v41 = vld [vmem:[%s10308_s1 + $0x338] sm:$0xff] }
 0x118   : > { %1028 = vmatmul.mubr.f32.gmra.mrb[2].mxu1 %v7226_v42 }
 0x119   : > { %4700 = vmatpush1.bf16.msra.mxu1 %v4699_v43  ;;  %1033 = vmatprep.mubr.f32.mxu1 %v7232_v45  ;;  %v7376_v43 = vld [vmem:[%s6843_s9 + $0xa8] sm:$0xff] }
 0x11a   : > { %4702 = vmatprep.subr.bf16.mxu1 %v4701_v46  ;;  %1225 = vmatmul.mubr.f32.gmra.mrb[14].mxu0 %v7254_v53  ;;  %v4723_v46 = vpack.c.bf16 %v805_v39, %v801_v38  ;;  %v833_v38 = vld [vmem:[%s10308_s1 + $0x2d0] sm:$0xff] }
 0x11b   : > { %1230 = vmatprep.mubr.f32.mxu0 %v6290_v7  ;;  %v837_v39 = vld [vmem:[%s10308_s1 + $0x2f0] sm:$0xff] }
 0x11c   : > { %1034 = vmatmul.mubr.f32.gmra.mrb[4].mxu1 %v7251_v51 }
 0x11d   : > { %4704 = vmatpush1.bf16.msra.mxu1 %v4703_v52  ;;  %1039 = vmatprep.mubr.f32.mxu1 %v7257_v54  ;;  %v813_v52 = vld [vmem:[%s10308_s1 + $0x230] sm:$0xff] }
 0x11e   : > { %4706 = vmatprep.subr.bf16.mxu1 %v4705_v55  ;;  %1231 = vmatmul.mubr.f32.gmra.mrb[16].mxu0 %v7279_v63  ;;  %v818_v55 = vld [vmem:[%s10308_s1 + $0x258] sm:$0xff]  ;;  %v4727_v58 = vpack.c.bf16 %v813_v52, %v809_v50  ;;  %v7482_v50 = vld [vmem:[%s6843_s9 + $0x108] sm:$0xff]  ;;  %v4739_v52 = vpack.c.bf16 %v837_v39, %v833_v38  ;;  %v1933_v38 = vld [vmem:[%s10310_s3 + $0x60] sm:$0xff] }
 0x11f   : > { %1236 = vmatprep.mubr.f32.mxu0 %v6290_v7  ;;  %v7523_v39 = vld [vmem:[%s6843_s9 + $0x140] sm:$0xff] }
 0x120   : > { %1040 = vmatmul.mubr.f32.gmra.mrb[6].mxu1 %v7276_v60 }
 0x121   : > { %4708 = vmatpush1.bf16.msra.mxu1 %v4707_v62  ;;  %1045 = vmatprep.mubr.f32.mxu1 %v7282_v0  ;;  %v7407_v62 = vld [vmem:[%s6843_s9 + $0xe0] sm:$0xff] }
 0x122   : > { %4710 = vmatprep.subr.bf16.mxu1 %v4709_v1  ;;  %1237 = vmatmul.mubr.f32.gmra.mrb[18].mxu0 %v7304_v10  ;;  %v4729_v1 = vpack.c.bf16 %v822_v56, %v818_v55  ;;  %v1921_v56 = vld [vmem:[%s10310_s3] sm:$0xff] }
 0x123   : > { %1242 = vmatprep.mubr.f32.mxu0 %v6290_v7 }
 0x124   : > { %1046 = vmatmul.mubr.f32.gmra.mrb[8].mxu1 %v7301_v8 }
 0x125   : > { %4712 = vmatpush1.bf16.msra.mxu1 %v4711_v9  ;;  %1051 = vmatprep.mubr.f32.mxu1 %v7307_v11  ;;  %v7426_v9 = vld [vmem:[%s6843_s9 + $0xd8] sm:$0xff] }
 0x126   : > { %4714 = vmatprep.subr.bf16.mxu1 %v4713_v13  ;;  %1243 = vmatmul.mubr.f32.gmra.mrb[20].mxu0 %v7329_v21  ;;  %v4731_v13 = vpack.c.bf16 %v821_v3, %v817_v2  ;;  %v4741_v2 = vpack.c.bf16 %v846_v41, %v842_v40  ;;  %v841_v3 = vld [vmem:[%s10308_s1 + $0x310] sm:$0xff] }
 0x127   : > { %1248 = vmatprep.mubr.f32.mxu0 %v6290_v7  ;;  %v849_v41 = vld [vmem:[%s10308_s1 + $0x350] sm:$0xff] }
 0x128   : > { %1052 = vmatmul.mubr.f32.gmra.mrb[10].mxu1 %v7326_v18 }
 0x129   : > { %4716 = vmatpush1.bf16.msra.mxu1 %v4715_v20  ;;  %1057 = vmatprep.mubr.f32.mxu1 %v7332_v22  ;;  %v829_v20 = vld [vmem:[%s10308_s1 + $0x2b0] sm:$0xff] }
 0x12a   : > { %4718 = vmatprep.subr.bf16.mxu1 %v4717_v23  ;;  %1249 = vmatmul.mubr.f32.gmra.mrb[22].mxu0 %v7354_v32  ;;  %v834_v23 = vld [vmem:[%s10308_s1 + $0x2d8] sm:$0xff]  ;;  %v4735_v27 = vpack.c.bf16 %v829_v20, %v825_v17  ;;  %v1930_v17 = vld [vmem:[%s10310_s3 + $0x48] sm:$0xff] }
 0x12b   : > { %1254 = vmatprep.mubr.f32.mxu0 %v6290_v7  ;;  %v1934_v20 = vld [vmem:[%s10310_s3 + $0x68] sm:$0xff] }
 0x12c   : > { %1058 = vmatmul.mubr.f32.gmra.mrb[12].mxu1 %v7351_v29 }
 0x12d   : > { %4720 = vmatpush1.bf16.msra.mxu1 %v4719_v31  ;;  %1063 = vmatprep.mubr.f32.mxu1 %v7357_v34  ;;  %v7457_v31 = vld [vmem:[%s6843_s9 + $0x110] sm:$0xff] }
 0x12e   : > { %4722 = vmatprep.subr.bf16.mxu1 %v4721_v37  ;;  %1255 = vmatmul.mubr.f32.gmra.mrb[24].mxu0 %v7379_v47  ;;  %v4737_v37 = vpack.c.bf16 %v838_v24, %v834_v23  ;;  %v7514_v23 = vld [vmem:[%s6843_s9 + $0x120] sm:$0xff]  ;;  %v4743_v24 = vpack.c.bf16 %v845_v5, %v841_v3 }
 0x12f   : > { %1260 = vmatprep.mubr.f32.mxu0 %v6290_v7 }
 0x130   : > { %1064 = vmatmul.mubr.f32.gmra.mrb[14].mxu1 %v7376_v43 }
 0x131   : > { %4724 = vmatpush1.bf16.msra.mxu1 %v4723_v46  ;;  %1069 = vmatprep.mubr.f32.mxu1 %v7382_v48  ;;  %v1922_v46 = vld [vmem:[%s10310_s3 + $0x8] sm:$0xff] }
 0x132   : > { %4726 = vmatprep.subr.bf16.mxu1 %v4725_v49  ;;  %1261 = vmatmul.mubr.f32.gmra.mrb[26].mxu0 %v7404_v59  ;;  %v1926_v49 = vld [vmem:[%s10310_s3 + $0x28] sm:$0xff] }
 0x133   : > { %1266 = vmatprep.mubr.f32.mxu0 %v6290_v7  ;;  %v4789_v55 = vpack.c.bf16 %v1926_v49, %v1922_v46  ;;  %v853_v46 = vld [vmem:[%s10308_s1 + $0x370] sm:$0xff] }
 0x134   : > { %1070 = vmatmul.mubr.f32.gmra.mrb[16].mxu1 %v7401_v57  ;;  %v4747_v3 = vpack.c.bf16 %v853_v46, %v849_v41  ;;  %v1950_v41 = vld [vmem:[%s10310_s3 + $0xe8] sm:$0xff]  ;;  %v7578_v46 = vld [vmem:[%s6843_s9 + $0x150] sm:$0xff] }
 0x135   : > { %4728 = vmatpush1.bf16.msra.mxu1 %v4727_v58  ;;  %1075 = vmatprep.mubr.f32.mxu1 %v7407_v62  ;;  %v1925_v58 = vld [vmem:[%s10310_s3 + $0x20] sm:$0xff] }
 0x136   : > { %4730 = vmatprep.subr.bf16.mxu1 %v4729_v1  ;;  %1267 = vmatmul.mubr.f32.gmra.mrb[28].mxu0 %v7429_v14  ;;  %v7491_v1 = vld [vmem:[%s6843_s9 + $0x128] sm:$0xff]  ;;  %v4791_v6 = vpack.c.bf16 %v1925_v58, %v1921_v56 }
 0x137   : > { %1272 = vmatprep.mubr.f32.mxu0 %v6290_v7  ;;  %4790 = vmatprep.subr.bf16.mxu0 %v4789_v55  ;;  %v862_v55 = vld [vmem:[%s10308_s1 + $0x3b8] sm:$0xff]  ;;  %v1938_v56 = vld [vmem:[%s10310_s3 + $0x88] sm:$0xff] }
 0x138   : > { %1076 = vmatmul.mubr.f32.gmra.mrb[18].mxu1 %v7426_v9  ;;  %4792 = vmatpush1.bf16.msra.mxu0 %v4791_v6  ;;  %v1942_v58 = vld [vmem:[%s10310_s3 + $0xa8] sm:$0xff]  ;;  %v1937_v6 = vld [vmem:[%s10310_s3 + $0x80] sm:$0xff] }
 0x139   : > { %4732 = vmatpush1.bf16.msra.mxu1 %v4731_v13  ;;  %1081 = vmatprep.mubr.f32.mxu1 %v7432_v15  ;;  %v850_v13 = vld [vmem:[%s10308_s1 + $0x358] sm:$0xff]  ;;  %v4797_v5 = vpack.c.bf16 %v1942_v58, %v1938_v56  ;;  %v1949_v56 = vld [vmem:[%s10310_s3 + $0xe0] sm:$0xff]  ;;  %v7587_v58 = vld [vmem:[%s6843_s9 + $0x170] sm:$0xff] }
 0x13a   : > { %4734 = vmatprep.subr.bf16.mxu1 %v4733_v16  ;;  %1273 = vmatmul.mubr.f32.gmra.mrb[30].mxu0 %v7454_v28  ;;  %v854_v16 = vld [vmem:[%s10308_s1 + $0x378] sm:$0xff] }
 0x13b   : > { %v4745_v40 = vpack.c.bf16 %v854_v16, %v850_v13  ;;  %v1941_v13 = vld [vmem:[%s10310_s3 + $0xa0] sm:$0xff]  ;;  %v7555_v16 = vld [vmem:[%s6843_s9 + $0x158] sm:$0xff] }
 0x13c   : > { %1082 = vmatmul.mubr.f32.gmra.mrb[20].mxu1 %v7451_v25 }
 0x13d   : > { %4736 = vmatpush1.bf16.msra.mxu1 %v4735_v27  ;;  %1087 = vmatprep.mubr.f32.mxu1 %v7457_v31  ;;  %v4793_v27 = vpack.c.bf16 %v1934_v20, %v1930_v17  ;;  %v857_v20 = vld [vmem:[%s10308_s1 + $0x390] sm:$0xff] }
 0x13e   : > { %4738 = vmatprep.subr.bf16.mxu1 %v4737_v37  ;;  %v1929_v37 = vld [vmem:[%s10310_s3 + $0x40] sm:$0xff] }
 0x13f   : > { %v4795_v49 = vpack.c.bf16 %v1933_v38, %v1929_v37  ;;  %4794 = vmatprep.subr.bf16.mxu0 %v4793_v27  ;;  %v4799_v27 = vpack.c.bf16 %v1941_v13, %v1937_v6  ;;  %v866_v37 = vld [vmem:[%s10308_s1 + $0x3d8] sm:$0xff]  ;;  %v869_v6 = vld [vmem:[%s10308_s1 + $0x3f0] sm:$0xff] }
 0x140   : > { %1088 = vmatmul.mubr.f32.gmra.mrb[22].mxu1 %v7482_v50  ;;  %v870_v38 = vld [vmem:[%s10308_s1 + $0x3f8] sm:$0xff] }
 0x141   : > { %4740 = vmatpush1.bf16.msra.mxu1 %v4739_v52  ;;  %1093 = vmatprep.mubr.f32.mxu1 %v7491_v1  ;;  %v858_v52 = vld [vmem:[%s10308_s1 + $0x398] sm:$0xff] }
 0x142   : > { %4742 = vmatprep.subr.bf16.mxu1 %v4741_v2  ;;  %4796 = vmatpush1.bf16.msra.mxu0 %v4795_v49  ;;  %v7546_v2 = vld [vmem:[%s6843_s9 + $0x138] sm:$0xff]  ;;  %v4749_v17 = vpack.c.bf16 %v862_v55, %v858_v52  ;;  %v1945_v55 = vld [vmem:[%s10310_s3 + $0xc0] sm:$0xff] }
 0x143   : > { %4798 = vmatprep.subr.bf16.mxu0 %v4797_v5  ;;  %v4753_v5 = vpack.c.bf16 %v870_v38, %v866_v37  ;;  %v4803_v13 = vpack.c.bf16 %v1949_v56, %v1945_v55  ;;  %v7610_v37 = vld [vmem:[%s6843_s9 + $0x168] sm:$0xff]  ;;  %v877_v56 = vld [vmem:[%s10308_s1 + $0x430] sm:$0xff] }
 0x144   : > { %1094 = vmatmul.mubr.f32.gmra.mrb[24].mxu1 %v7514_v23 }
 0x145   : > { %4744 = vmatpush1.bf16.msra.mxu1 %v4743_v24  ;;  %1099 = vmatprep.mubr.f32.mxu1 %v7523_v39  ;;  %v861_v24 = vld [vmem:[%s10308_s1 + $0x3b0] sm:$0xff] }
 0x146   : > { %4746 = vmatprep.subr.bf16.mxu1 %v4745_v40  ;;  %4800 = vmatpush1.bf16.msra.mxu0 %v4799_v27  ;;  %v1946_v40 = vld [vmem:[%s10310_s3 + $0xc8] sm:$0xff]  ;;  %v4751_v49 = vpack.c.bf16 %v861_v24, %v857_v20  ;;  %v874_v20 = vld [vmem:[%s10308_s1 + $0x418] sm:$0xff] }
 0x147   : > { %v4801_v52 = vpack.c.bf16 %v1950_v41, %v1946_v40  ;;  %v1954_v24 = vld [vmem:[%s10310_s3 + $0x108] sm:$0xff]  ;;  %v1953_v41 = vld [vmem:[%s10310_s3 + $0x100] sm:$0xff] }
 0x148   : > { %1100 = vmatmul.mubr.f32.gmra.mrb[26].mxu1 %v7546_v2  ;;  %v1958_v27 = vld [vmem:[%s10310_s3 + $0x128] sm:$0xff] }
 0x149   : > { %4748 = vmatpush1.bf16.msra.mxu1 %v4747_v3  ;;  %1105 = vmatprep.mubr.f32.mxu1 %v7555_v16  ;;  %v865_v3 = vld [vmem:[%s10308_s1 + $0x3d0] sm:$0xff]  ;;  %v4805_v40 = vpack.c.bf16 %v1958_v27, %v1954_v24  ;;  %v1961_v27 = vld [vmem:[%s10310_s3 + $0x140] sm:$0xff] }
 0x14a   : > { %4750 = vmatprep.subr.bf16.mxu1 %v4749_v17  ;;  %v878_v17 = vld [vmem:[%s10308_s1 + $0x438] sm:$0xff]  ;;  %4802 = vmatprep.subr.bf16.mxu0 %v4801_v52  ;;  %v4755_v38 = vpack.c.bf16 %v869_v6, %v865_v3  ;;  %v1957_v52 = vld [vmem:[%s10310_s3 + $0x120] sm:$0xff] }
 0x14b   : > { %4804 = vmatpush1.bf16.msra.mxu0 %v4803_v13  ;;  %v4757_v55 = vpack.c.bf16 %v878_v17, %v874_v20  ;;  %v4807_v3 = vpack.c.bf16 %v1957_v52, %v1953_v41  ;;  %v882_v6 = vld [vmem:[%s10308_s1 + $0x458] sm:$0xff]  ;;  %v1966_v20 = vld [vmem:[%s10310_s3 + $0x168] sm:$0xff]  ;;  %v881_v52 = vld [vmem:[%s10308_s1 + $0x450] sm:$0xff] }
 0x14c   : > { %1106 = vmatmul.mubr.f32.gmra.mrb[28].mxu1 %v7578_v46  ;;  %v886_v13 = vld [vmem:[%s10308_s1 + $0x478] sm:$0xff]  ;;  %4806 = vmatprep.subr.bf16.mxu0 %v4805_v40  ;;  %v1965_v40 = vld [vmem:[%s10310_s3 + $0x160] sm:$0xff] }
 0x14d   : > { %4752 = vmatpush1.bf16.msra.mxu1 %v4751_v49  ;;  %1111 = vmatprep.mubr.f32.mxu1 %v7587_v58  ;;  %v873_v49 = vld [vmem:[%s10308_s1 + $0x410] sm:$0xff]  ;;  %v4761_v41 = vpack.c.bf16 %v886_v13, %v882_v6  ;;  %v1969_v13 = vld [vmem:[%s10310_s3 + $0x180] sm:$0xff] }
 0x14e   : > { %4754 = vmatprep.subr.bf16.mxu1 %v4753_v5  ;;  %v1962_v5 = vld [vmem:[%s10310_s3 + $0x148] sm:$0xff]  ;;  %v4759_v17 = vpack.c.bf16 %v877_v56, %v873_v49  ;;  %v890_v56 = vld [vmem:[%s10308_s1 + $0x498] sm:$0xff] }
 0x14f   : > { %4808 = vmatpush1.bf16.msra.mxu0 %v4807_v3  ;;  %v4809_v24 = vpack.c.bf16 %v1966_v20, %v1962_v5  ;;  %v1970_v49 = vld [vmem:[%s10310_s3 + $0x188] sm:$0xff]  ;;  %v1973_v5 = vld [vmem:[%s10310_s3 + $0x1a0] sm:$0xff] }
 0x150   : > { %1112 = vmatmul.mubr.f32.gmra.mrb[30].mxu1 %v7610_v37  ;;  %v1974_v3 = vld [vmem:[%s10310_s3 + $0x1a8] sm:$0xff] }
 0x151   : > { %4756 = vmatpush1.bf16.msra.mxu1 %v4755_v38  ;;  %1343 = vmatprep.mubr.f32.mxu1 %v7059_v30  ;;  %v885_v30 = vld [vmem:[%s10308_s1 + $0x470] sm:$0xff]  ;;  %v4811_v38 = vpack.c.bf16 %v1965_v40, %v1961_v27  ;;  %v4813_v6 = vpack.c.bf16 %v1974_v3, %v1970_v49  ;;  %v1978_v27 = vld [vmem:[%s10310_s3 + $0x1c8] sm:$0xff]  ;;  %v1981_v49 = vld [vmem:[%s10310_s3 + $0x1e0] sm:$0xff] }
 0x152   : > { %4758 = vmatprep.subr.bf16.mxu1 %v4757_v55  ;;  %v894_v55 = vld [vmem:[%s10308_s1 + $0x4b8] sm:$0xff]  ;;  %4810 = vmatprep.subr.bf16.mxu0 %v4809_v24  ;;  %v4763_v20 = vpack.c.bf16 %v885_v30, %v881_v52  ;;  %v4815_v24 = vpack.c.bf16 %v1973_v5, %v1969_v13  ;;  %v1977_v52 = vld [vmem:[%s10310_s3 + $0x1c0] sm:$0xff]  ;;  %v1990_v3 = vld [vmem:[%s10310_s3 + $0x228] sm:$0xff] }
 0x153   : > { %4812 = vmatpush1.bf16.msra.mxu0 %v4811_v38  ;;  %v4765_v40 = vpack.c.bf16 %v894_v55, %v890_v56  ;;  %v889_v38 = vld [vmem:[%s10308_s1 + $0x490] sm:$0xff]  ;;  %v898_v30 = vld [vmem:[%s10308_s1 + $0x4d8] sm:$0xff]  ;;  %v4819_v56 = vpack.c.bf16 %v1981_v49, %v1977_v52  ;;  %v1986_v55 = vld [vmem:[%s10310_s3 + $0x208] sm:$0xff] }
 0x154   : > { %1344 = vmatmul.mubr.f32.vlgmr.msra.gmra.mrb[32].mxu1 %v7201_v33  ;;  %v1982_v33 = vld [vmem:[%s10310_s3 + $0x1e8] sm:$0xff]  ;;  %4814 = vmatprep.subr.bf16.mxu0 %v4813_v6  ;;  %v1985_v13 = vld [vmem:[%s10310_s3 + $0x200] sm:$0xff] }
 0x155   : > { %4760 = vmatpush1.bf16.msra.mxu1 %v4759_v17  ;;  %1349 = vmatprep.mubr.f32.mxu1 %v7208_v36  ;;  %v893_v36 = vld [vmem:[%s10308_s1 + $0x4b0] sm:$0xff]  ;;  %v4817_v17 = vpack.c.bf16 %v1982_v33, %v1978_v27  ;;  %v4821_v27 = vpack.c.bf16 %v1990_v3, %v1986_v55  ;;  %v910_v33 = vld [vmem:[%s10308_s1 + $0x538] sm:$0xff]  ;;  %v1993_v52 = vld [vmem:[%s10310_s3 + $0x240] sm:$0xff] }
 0x156   : > { %4762 = vmatprep.subr.bf16.mxu1 %v4761_v41  ;;  %v902_v41 = vld [vmem:[%s10308_s1 + $0x4f8] sm:$0xff]  ;;  %v4767_v6 = vpack.c.bf16 %v893_v36, %v889_v38  ;;  %v1998_v38 = vld [vmem:[%s10310_s3 + $0x268] sm:$0xff] }
 0x157   : > { %4816 = vmatpush1.bf16.msra.mxu0 %v4815_v24  ;;  %v4769_v5 = vpack.c.bf16 %v902_v41, %v898_v30  ;;  %v897_v24 = vld [vmem:[%s10308_s1 + $0x4d0] sm:$0xff]  ;;  %v1997_v30 = vld [vmem:[%s10310_s3 + $0x260] sm:$0xff]  ;;  %v918_v55 = vld [vmem:[%s10308_s1 + $0x578] sm:$0xff] }
 0x158   : > { %1350 = vmatmul.mubr.f32.gmra.mrb[34].mxu1 %v7226_v42  ;;  %v1989_v42 = vld [vmem:[%s10310_s3 + $0x220] sm:$0xff]  ;;  %4818 = vmatprep.subr.bf16.mxu0 %v4817_v17  ;;  %v4827_v3 = vpack.c.bf16 %v1997_v30, %v1993_v52  ;;  %v934_v52 = vld [vmem:[%s10308_s1 + $0x5f8] sm:$0xff]  ;;  %v2010_v30 = vld [vmem:[%s10310_s3 + $0x2c8] sm:$0xff] }
 0x159   : > { %1355 = vmatprep.mubr.f32.mxu1 %v7232_v45  ;;  %4764 = vmatpush1.bf16.msra.mxu1 %v4763_v20  ;;  %v901_v45 = vld [vmem:[%s10308_s1 + $0x4f0] sm:$0xff]  ;;  %v906_v20 = vld [vmem:[%s10308_s1 + $0x518] sm:$0xff]  ;;  %v4823_v36 = vpack.c.bf16 %v1989_v42, %v1985_v13 }
 0x15a   : > { %4766 = vmatprep.subr.bf16.mxu1 %v4765_v40  ;;  %v1994_v40 = vld [vmem:[%s10310_s3 + $0x248] sm:$0xff]  ;;  %v4771_v17 = vpack.c.bf16 %v901_v45, %v897_v24  ;;  %v4773_v41 = vpack.c.bf16 %v910_v33, %v906_v20  ;;  %v913_v42 = vld [vmem:[%s10308_s1 + $0x550] sm:$0xff]  ;;  %v2001_v33 = vld [vmem:[%s10310_s3 + $0x280] sm:$0xff] }
 0x15b   : > { %4820 = vmatpush1.bf16.msra.mxu0 %v4819_v56  ;;  %v4825_v49 = vpack.c.bf16 %v1998_v38, %v1994_v40  ;;  %v914_v56 = vld [vmem:[%s10308_s1 + $0x558] sm:$0xff]  ;;  %v2002_v24 = vld [vmem:[%s10310_s3 + $0x288] sm:$0xff]  ;;  %v921_v38 = vld [vmem:[%s10308_s1 + $0x590] sm:$0xff] }
 0x15c   : > { %1356 = vmatmul.mubr.f32.gmra.mrb[36].mxu1 %v7251_v51  ;;  %v905_v51 = vld [vmem:[%s10308_s1 + $0x510] sm:$0xff]  ;;  %4822 = vmatprep.subr.bf16.mxu0 %v4821_v27  ;;  %v4777_v13 = vpack.c.bf16 %v918_v55, %v914_v56  ;;  %v2006_v45 = vld [vmem:[%s10310_s3 + $0x2a8] sm:$0xff] }
 0x15d   : > { %1361 = vmatprep.mubr.f32.mxu1 %v7257_v54  ;;  %4768 = vmatpush1.bf16.msra.mxu1 %v4767_v6  ;;  %v909_v54 = vld [vmem:[%s10308_s1 + $0x530] sm:$0xff]  ;;  %v4829_v27 = vpack.c.bf16 %v2006_v45, %v2002_v24  ;;  %v2017_v24 = vld [vmem:[%s10310_s3 + $0x300] sm:$0xff] }
 0x15e   : > { %4770 = vmatprep.subr.bf16.mxu1 %v4769_v5  ;;  %v4775_v6 = vpack.c.bf16 %v909_v54, %v905_v51  ;;  %v917_v5 = vld [vmem:[%s10308_s1 + $0x570] sm:$0xff] }
 0x15f   : > { %4824 = vmatpush1.bf16.msra.mxu0 %v4823_v36  ;;  %v4779_v20 = vpack.c.bf16 %v917_v5, %v913_v42  ;;  %v929_v55 = vld [vmem:[%s10308_s1 + $0x5d0] sm:$0xff]  ;;  %v2018_v42 = vld [vmem:[%s10310_s3 + $0x308] sm:$0xff] }
 0x160   : > { %1362 = vmatmul.mubr.f32.gmra.mrb[38].mxu1 %v7276_v60  ;;  %4826 = vmatprep.subr.bf16.mxu0 %v4825_v49  ;;  %v922_v60 = vld [vmem:[%s10308_s1 + $0x598] sm:$0xff]  ;;  %v2009_v49 = vld [vmem:[%s10310_s3 + $0x2c0] sm:$0xff]  ;;  %v2022_v5 = vld [vmem:[%s10310_s3 + $0x328] sm:$0xff] }
 0x161   : > { %1367 = vmatprep.mubr.f32.mxu1 %v7282_v0  ;;  %4772 = vmatpush1.bf16.msra.mxu1 %v4771_v17  ;;  %v926_v0 = vld [vmem:[%s10308_s1 + $0x5b8] sm:$0xff] }
 0x162   : > { %4774 = vmatprep.subr.bf16.mxu1 %v4773_v41  ;;  %v4781_v40 = vpack.c.bf16 %v926_v0, %v922_v60  ;;  %v930_v17 = vld [vmem:[%s10308_s1 + $0x5d8] sm:$0xff]  ;;  %v2014_v41 = vld [vmem:[%s10310_s3 + $0x2e8] sm:$0xff]  ;;  %v4837_v0 = vpack.c.bf16 %v2022_v5, %v2018_v42  ;;  %v1955_v5 = vld [vmem:[%s10310_s3 + $0x110] sm:$0xff] }
 0x163   : > { %4828 = vmatpush1.bf16.msra.mxu0 %v4827_v3  ;;  %v4833_v54 = vpack.c.bf16 %v2014_v41, %v2010_v30  ;;  %v4785_v56 = vpack.c.bf16 %v934_v52, %v930_v17  ;;  %v2042_v52 = vld [vmem:[%s10310_s3 + $0x3c8] sm:$0xff]  ;;  %v2041_v41 = vld [vmem:[%s10310_s3 + $0x3c0] sm:$0xff] }
 0x164   : > { %1368 = vmatmul.mubr.f32.gmra.mrb[40].mxu1 %v7301_v8  ;;  %v2005_v8 = vld [vmem:[%s10310_s3 + $0x2a0] sm:$0xff]  ;;  %4830 = vmatprep.subr.bf16.mxu0 %v4829_v27  ;;  %v2030_v27 = vld [vmem:[%s10310_s3 + $0x368] sm:$0xff] }
 0x165   : > { %1373 = vmatprep.mubr.f32.mxu1 %v7307_v11  ;;  %4776 = vmatpush1.bf16.msra.mxu1 %v4775_v6  ;;  %v925_v11 = vld [vmem:[%s10308_s1 + $0x5b0] sm:$0xff]  ;;  %v4831_v36 = vpack.c.bf16 %v2005_v8, %v2001_v33  ;;  %v1924_v6 = vld [vmem:[%s10310_s3 + $0x18] sm:$0xff]  ;;  %v2025_v8 = vld [vmem:[%s10310_s3 + $0x340] sm:$0xff] }
 0x166   : > { %4778 = vmatprep.subr.bf16.mxu1 %v4777_v13  ;;  %v4783_v51 = vpack.c.bf16 %v925_v11, %v921_v38  ;;  %v1928_v13 = vld [vmem:[%s10310_s3 + $0x38] sm:$0xff]  ;;  %v2038_v38 = vld [vmem:[%s10310_s3 + $0x3a8] sm:$0xff] }
 0x167   : > { %4832 = vmatpush1.bf16.msra.mxu0 %v4831_v36  ;;  %v4917_v45 = vpack.c.bf16 %v1928_v13, %v1924_v6  ;;  %v2033_v36 = vld [vmem:[%s10310_s3 + $0x380] sm:$0xff]  ;;  %v1956_v6 = vld [vmem:[%s10310_s3 + $0x118] sm:$0xff] }
 0x168   : > { %1374 = vmatmul.mubr.f32.gmra.mrb[42].mxu1 %v7326_v18  ;;  %v2013_v18 = vld [vmem:[%s10310_s3 + $0x2e0] sm:$0xff]  ;;  %4834 = vmatprep.subr.bf16.mxu0 %v4833_v54  ;;  %v1939_v54 = vld [vmem:[%s10310_s3 + $0x90] sm:$0xff] }
 0x169   : > { %1379 = vmatprep.mubr.f32.mxu1 %v7332_v22  ;;  %4780 = vmatpush1.bf16.msra.mxu1 %v4779_v20  ;;  %v933_v22 = vld [vmem:[%s10308_s1 + $0x5f0] sm:$0xff]  ;;  %v4835_v3 = vpack.c.bf16 %v2013_v18, %v2009_v49  ;;  %v1948_v18 = vld [vmem:[%s10310_s3 + $0xd8] sm:$0xff] }
 0x16a   : > { %4782 = vmatprep.subr.bf16.mxu1 %v4781_v40  ;;  %v4787_v60 = vpack.c.bf16 %v933_v22, %v929_v55  ;;  %v1943_v49 = vld [vmem:[%s10310_s3 + $0xb0] sm:$0xff] }
 0x16b   : > { %4836 = vmatpush1.bf16.msra.mxu0 %v4835_v3  ;;  %v1947_v22 = vld [vmem:[%s10310_s3 + $0xd0] sm:$0xff] }
 0x16c   : > { %1380 = vmatmul.mubr.f32.gmra.mrb[44].mxu1 %v7351_v29  ;;  %v2021_v29 = vld [vmem:[%s10310_s3 + $0x320] sm:$0xff]  ;;  %4838 = vmatprep.subr.bf16.mxu0 %v4837_v0  ;;  %v1951_v3 = vld [vmem:[%s10310_s3 + $0xf0] sm:$0xff]  ;;  %v1964_v0 = vld [vmem:[%s10310_s3 + $0x158] sm:$0xff] }
 0x16d   : > { %1385 = vmatprep.mubr.f32.mxu1 %v7357_v34  ;;  %4784 = vmatpush1.bf16.msra.mxu1 %v4783_v51  ;;  %v4839_v20 = vpack.c.bf16 %v2021_v29, %v2017_v24  ;;  %v2026_v34 = vld [vmem:[%s10310_s3 + $0x348] sm:$0xff]  ;;  %v4931_v13 = vpack.c.bf16 %v1951_v3, %v1947_v22  ;;  %v2019_v22 = vld [vmem:[%s10310_s3 + $0x310] sm:$0xff] }
 0x16e   : > { %4786 = vmatprep.subr.bf16.mxu1 %v4785_v56  ;;  %v4841_v33 = vpack.c.bf16 %v2030_v27, %v2026_v34  ;;  %v4927_v56 = vpack.c.bf16 %v1943_v49, %v1939_v54  ;;  %v1972_v34 = vld [vmem:[%s10310_s3 + $0x198] sm:$0xff]  ;;  %v2050_v54 = vld [vmem:[%s10310_s3 + $0x408] sm:$0xff]  ;;  %v2023_v3 = vld [vmem:[%s10310_s3 + $0x330] sm:$0xff] }
 0x16f   : > { %4840 = vmatpush1.bf16.msra.mxu0 %v4839_v20  ;;  %v1967_v20 = vld [vmem:[%s10310_s3 + $0x170] sm:$0xff]  ;;  %v2020_v49 = vld [vmem:[%s10310_s3 + $0x318] sm:$0xff] }
 0x170   : > { %1386 = vmatmul.mubr.f32.gmra.mrb[46].mxu1 %v7376_v43  ;;  %v2029_v43 = vld [vmem:[%s10310_s3 + $0x360] sm:$0xff]  ;;  %4842 = vmatprep.subr.bf16.mxu0 %v4841_v33 }
 0x171   : > { %1391 = vmatprep.mubr.f32.mxu1 %v7382_v48  ;;  %4788 = vmatpush1.bf16.msra.mxu1 %v4787_v60  ;;  %v4843_v40 = vpack.c.bf16 %v2029_v43, %v2025_v8  ;;  %v2034_v48 = vld [vmem:[%s10310_s3 + $0x388] sm:$0xff]  ;;  %v1959_v60 = vld [vmem:[%s10310_s3 + $0x130] sm:$0xff] }
 0x172   : > { %4918 = vmatprep.subr.bf16.mxu1 %v4917_v45  ;;  %v4845_v11 = vpack.c.bf16 %v2038_v38, %v2034_v48  ;;  %v4935_v24 = vpack.c.bf16 %v1959_v60, %v1955_v5  ;;  %v1963_v45 = vld [vmem:[%s10310_s3 + $0x150] sm:$0xff]  ;;  %v2036_v60 = vld [vmem:[%s10310_s3 + $0x398] sm:$0xff] }
 0x173   : > { %4844 = vmatpush1.bf16.msra.mxu0 %v4843_v40  ;;  %v4939_v27 = vpack.c.bf16 %v1967_v20, %v1963_v45  ;;  %v1971_v8 = vld [vmem:[%s10310_s3 + $0x190] sm:$0xff]  ;;  %v1980_v40 = vld [vmem:[%s10310_s3 + $0x1d8] sm:$0xff] }
 0x174   : > { %1392 = vmatmul.mubr.f32.gmra.mrb[48].mxu1 %v7401_v57  ;;  %v2037_v57 = vld [vmem:[%s10310_s3 + $0x3a0] sm:$0xff]  ;;  %4846 = vmatprep.subr.bf16.mxu0 %v4845_v11  ;;  %v1975_v43 = vld [vmem:[%s10310_s3 + $0x1b0] sm:$0xff]  ;;  %v2044_v45 = vld [vmem:[%s10310_s3 + $0x3d8] sm:$0xff] }
 0x175   : > { %1397 = vmatprep.mubr.f32.mxu1 %v7407_v62  ;;  %v4847_v17 = vpack.c.bf16 %v2037_v57, %v2033_v36  ;;  %v2046_v62 = vld [vmem:[%s10310_s3 + $0x3e8] sm:$0xff]  ;;  %v4943_v48 = vpack.c.bf16 %v1975_v43, %v1971_v8  ;;  %v1979_v11 = vld [vmem:[%s10310_s3 + $0x1d0] sm:$0xff]  ;;  %v1988_v57 = vld [vmem:[%s10310_s3 + $0x218] sm:$0xff] }
 0x176   : > { %v4849_v30 = vpack.c.bf16 %v2046_v62, %v2042_v52  ;;  %v1983_v36 = vld [vmem:[%s10310_s3 + $0x1f0] sm:$0xff] }
 0x177   : > { %4848 = vmatpush1.bf16.msra.mxu0 %v4847_v17  ;;  %v4947_v17 = vpack.c.bf16 %v1983_v36, %v1979_v11  ;;  %v1987_v62 = vld [vmem:[%s10310_s3 + $0x210] sm:$0xff] }
 0x178   : > { %1398 = vmatmul.mubr.f32.gmra.mrb[50].mxu1 %v7426_v9  ;;  %v2045_v9 = vld [vmem:[%s10310_s3 + $0x3e0] sm:$0xff]  ;;  %4850 = vmatprep.subr.bf16.mxu0 %v4849_v30  ;;  %v1991_v30 = vld [vmem:[%s10310_s3 + $0x230] sm:$0xff] }
 0x179   : > { %1403 = vmatprep.mubr.f32.mxu1 %v7432_v15  ;;  %v4851_v51 = vpack.c.bf16 %v2045_v9, %v2041_v41  ;;  %v1923_v15 = vld [vmem:[%s10310_s3 + $0x10] sm:$0xff]  ;;  %v1996_v41 = vld [vmem:[%s10310_s3 + $0x258] sm:$0xff]  ;;  %v4951_v9 = vpack.c.bf16 %v1991_v30, %v1987_v62 }
 0x17a   : > { %v2031_v5 = vld [vmem:[%s10310_s3 + $0x370] sm:$0xff] }
 0x17b   : > { %4852 = vmatpush1.bf16.msra.mxu0 %v4851_v51 }
 0x17c   : > { %1404 = vmatmul.mubr.f32.gmra.mrb[52].mxu1 %v7451_v25  ;;  %v1927_v25 = vld [vmem:[%s10310_s3 + $0x30] sm:$0xff] }
 0x17d   : > { %1409 = vmatprep.mubr.f32.mxu1 %v7457_v31  ;;  %v1932_v31 = vld [vmem:[%s10310_s3 + $0x58] sm:$0xff] }
 0x180   : > { %1410 = vmatmul.mubr.f32.gmra.mrb[54].mxu1 %v7482_v50  ;;  %v1936_v50 = vld [vmem:[%s10310_s3 + $0x78] sm:$0xff] }
 0x181   : > { %1415 = vmatprep.mubr.f32.mxu1 %v7491_v1  ;;  %v4919_v1 = vpack.c.bf16 %v1927_v25, %v1923_v15  ;;  %v1995_v15 = vld [vmem:[%s10310_s3 + $0x250] sm:$0xff] }
 0x182   : > { %v1999_v25 = vld [vmem:[%s10310_s3 + $0x270] sm:$0xff] }
 0x184   : > { %1416 = vmatmul.mubr.f32.gmra.mrb[56].mxu1 %v7514_v23  ;;  %v4921_v23 = vpack.c.bf16 %v1936_v50, %v1932_v31  ;;  %v2004_v31 = vld [vmem:[%s10310_s3 + $0x298] sm:$0xff]  ;;  %v4955_v50 = vpack.c.bf16 %v1999_v25, %v1995_v15 }
 0x185   : > { %1421 = vmatprep.mubr.f32.mxu1 %v7523_v39  ;;  %v1931_v39 = vld [vmem:[%s10310_s3 + $0x50] sm:$0xff] }
 0x188   : > { %1422 = vmatmul.mubr.f32.gmra.mrb[58].mxu1 %v7546_v2  ;;  %v1935_v2 = vld [vmem:[%s10310_s3 + $0x70] sm:$0xff] }
 0x189   : > { %1427 = vmatprep.mubr.f32.mxu1 %v7555_v16  ;;  %v1940_v16 = vld [vmem:[%s10310_s3 + $0x98] sm:$0xff] }
 0x18c   : > { %1428 = vmatmul.mubr.f32.gmra.mrb[60].mxu1 %v7578_v46  ;;  %v1944_v46 = vld [vmem:[%s10310_s3 + $0xb8] sm:$0xff] }
 0x18d   : > { %1433 = vmatprep.mubr.f32.mxu1 %v7587_v58  ;;  %v4923_v58 = vpack.c.bf16 %v1935_v2, %v1931_v39  ;;  %v2007_v39 = vld [vmem:[%s10310_s3 + $0x2b0] sm:$0xff]  ;;  %v2012_v2 = vld [vmem:[%s10310_s3 + $0x2d8] sm:$0xff] }
 0x190   : > { %1434 = vmatmul.mubr.f32.gmra.mrb[62].mxu1 %v7610_v37  ;;  %v4925_v37 = vpack.c.bf16 %v1944_v46, %v1940_v16  ;;  %v2011_v46 = vld [vmem:[%s10310_s3 + $0x2d0] sm:$0xff] }
 0x191   : > { %1504 = vmatprep.mubr.f32.mxu1 %v6290_v7 }
 0x194   : > { %1505 = vmatmul.mubr.f32.vlgmr.msra.gmra.mrb[32].mxu1 %v7117_v61  ;;  %v1952_v61 = vld [vmem:[%s10310_s3 + $0xf8] sm:$0xff] }
 0x195   : > { %1510 = vmatprep.mubr.f32.mxu1 %v6290_v7  ;;  %4920 = vmatpush1.bf16.msra.mxu1 %v4919_v1  ;;  %v4929_v55 = vpack.c.bf16 %v1952_v61, %v1948_v18  ;;  %v2024_v18 = vld [vmem:[%s10310_s3 + $0x338] sm:$0xff] }
 0x196   : > { %4922 = vmatprep.subr.bf16.mxu1 %v4921_v23  ;;  %v2003_v23 = vld [vmem:[%s10310_s3 + $0x290] sm:$0xff] }
 0x197   : > { %v4959_v16 = vpack.c.bf16 %v2007_v39, %v2003_v23  ;;  %v8159_v39 = vld [vmem:[%s10310_s3 + $0x410] sm:$0xff] }
 0x198   : > { %1511 = vmatmul.mubr.f32.gmra.mrb[34].mxu1 %v7134_v4  ;;  %v1960_v4 = vld [vmem:[%s10310_s3 + $0x138] sm:$0xff] }
 0x199   : > { %1516 = vmatprep.mubr.f32.mxu1 %v6290_v7  ;;  %4924 = vmatpush1.bf16.msra.mxu1 %v4923_v58  ;;  %v4933_v42 = vpack.c.bf16 %v1960_v4, %v1956_v6  ;;  %v2028_v6 = vld [vmem:[%s10310_s3 + $0x358] sm:$0xff]  ;;  %v4967_v4 = vpack.c.bf16 %v2023_v3, %v2019_v22  ;;  %v8207_v3 = vld [vmem:[%s10310_s3 + $0x450] sm:$0xff] }
 0x19a   : > { %4926 = vmatprep.subr.bf16.mxu1 %v4925_v37  ;;  %v2015_v37 = vld [vmem:[%s10310_s3 + $0x2f0] sm:$0xff] }
 0x19c   : > { %1517 = vmatmul.mubr.f32.gmra.mrb[36].mxu1 %v7151_v12  ;;  %v1968_v12 = vld [vmem:[%s10310_s3 + $0x178] sm:$0xff] }
 0x19d   : > { %1522 = vmatprep.mubr.f32.mxu1 %v6290_v7  ;;  %4928 = vmatpush1.bf16.msra.mxu1 %v4927_v56  ;;  %v4937_v29 = vpack.c.bf16 %v1968_v12, %v1964_v0  ;;  %v4963_v56 = vpack.c.bf16 %v2015_v37, %v2011_v46 }
 0x19e   : > { %4930 = vmatprep.subr.bf16.mxu1 %v4929_v55  ;;  %v4965_v55 = vpack.c.bf16 %v2024_v18, %v2020_v49  ;;  %v8193_v49 = vld [vmem:[%s10310_s3 + $0x440] sm:$0xff] }
 0x19f   : > { %v8198_v18 = vld [vmem:[%s10310_s3 + $0x460] sm:$0xff] }
 0x1a0   : > { %1523 = vmatmul.mubr.f32.gmra.mrb[38].mxu1 %v7168_v19  ;;  %v1976_v19 = vld [vmem:[%s10310_s3 + $0x1b8] sm:$0xff] }
 0x1a1   : > { %1528 = vmatprep.mubr.f32.mxu1 %v6290_v7  ;;  %4932 = vmatpush1.bf16.msra.mxu1 %v4931_v13  ;;  %v4941_v33 = vpack.c.bf16 %v1976_v19, %v1972_v34  ;;  %v2043_v19 = vld [vmem:[%s10310_s3 + $0x3d0] sm:$0xff] }
 0x1a2   : > { %4934 = vmatprep.subr.bf16.mxu1 %v4933_v42  ;;  %v2027_v42 = vld [vmem:[%s10310_s3 + $0x350] sm:$0xff] }
 0x1a3   : > { %v4971_v0 = vpack.c.bf16 %v2031_v5, %v2027_v42  ;;  %v8229_v5 = vld [vmem:[%s10310_s3 + $0x498] sm:$0xff] }
 0x1a4   : > { %1529 = vmatmul.mubr.f32.gmra.mrb[40].mxu1 %v7185_v26  ;;  %v1984_v26 = vld [vmem:[%s10310_s3 + $0x1f8] sm:$0xff] }
 0x1a5   : > { %1534 = vmatprep.mubr.f32.mxu1 %v6290_v7  ;;  %4936 = vmatpush1.bf16.msra.mxu1 %v4935_v24  ;;  %v4945_v38 = vpack.c.bf16 %v1984_v26, %v1980_v40  ;;  %v2035_v24 = vld [vmem:[%s10310_s3 + $0x390] sm:$0xff] }
 0x1a6   : > { %4938 = vmatprep.subr.bf16.mxu1 %v4937_v29  ;;  %v2039_v29 = vld [vmem:[%s10310_s3 + $0x3b0] sm:$0xff] }
 0x1a7   : > { %v4975_v20 = vpack.c.bf16 %v2039_v29, %v2035_v24  ;;  %v8253_v29 = vld [vmem:[%s10310_s3 + $0x490] sm:$0xff] }
 0x1a8   : > { %1535 = vmatmul.mubr.f32.gmra.mrb[42].mxu1 %v7205_v35  ;;  %v1992_v35 = vld [vmem:[%s10310_s3 + $0x238] sm:$0xff] }
 0x1a9   : > { %1540 = vmatprep.mubr.f32.mxu1 %v6290_v7  ;;  %4940 = vmatpush1.bf16.msra.mxu1 %v4939_v27  ;;  %v4949_v52 = vpack.c.bf16 %v1992_v35, %v1988_v57  ;;  %v2047_v27 = vld [vmem:[%s10310_s3 + $0x3f0] sm:$0xff] }
 0x1aa   : > { %4942 = vmatprep.subr.bf16.mxu1 %v4941_v33  ;;  %v2052_v33 = vld [vmem:[%s10310_s3 + $0x418] sm:$0xff]  ;;  %v4979_v8 = vpack.c.bf16 %v2047_v27, %v2043_v19 }
 0x1ac   : > { %1541 = vmatmul.mubr.f32.gmra.mrb[44].mxu1 %v7229_v44  ;;  %v2000_v44 = vld [vmem:[%s10310_s3 + $0x278] sm:$0xff] }
 0x1ad   : > { %1546 = vmatprep.mubr.f32.mxu1 %v6290_v7  ;;  %4944 = vmatpush1.bf16.msra.mxu1 %v4943_v48  ;;  %v4953_v51 = vpack.c.bf16 %v2000_v44, %v1996_v41 }
 0x1ae   : > { %4946 = vmatprep.subr.bf16.mxu1 %v4945_v38  ;;  %v937_v38 = vlaneseq }
 0x1b0   : > { %1547 = vmatmul.mubr.f32.gmra.mrb[46].mxu1 %v7254_v53  ;;  %v2008_v53 = vld [vmem:[%s10310_s3 + $0x2b8] sm:$0xff]  ;;  %v8111_v57 = vshrl.u32 %v937_v38, 7 }
 0x1b1   : > { %1552 = vmatprep.mubr.f32.mxu1 %v6290_v7  ;;  %4948 = vmatpush1.bf16.msra.mxu1 %v4947_v17  ;;  %v4957_v1 = vpack.c.bf16 %v2008_v53, %v2004_v31 }
 0x1b2   : > { %4950 = vmatprep.subr.bf16.mxu1 %v4949_v52  ;;  %10411 = vst [vmem:[#allocation29_spill] sm:$0xff] %v8111_v57  ;;  %v8118_v35 = vsub.s32 0, %v8111_v57  ;;  %v8126_v52 = vsub.s32 1, %v8111_v57  ;;  %v8394_v57 = vld [vmem:[%s10310_s3 + $0x568] sm:$0xff] }
 0x1b3   : > { %10430 = vst [vmem:[#allocation46_spill] sm:$0xff] %v8394_v57 }
 0x1b4   : > { %1553 = vmatmul.mubr.f32.gmra.mrb[48].mxu1 %v7279_v63  ;;  %v2016_v63 = vld [vmem:[%s10310_s3 + $0x2f8] sm:$0xff]  ;;  %10412 = vst [vmem:[#allocation30_spill] sm:$0xff] %v8118_v35  ;;  %10415 = vst [vmem:[#allocation31_spill] sm:$0xff] %v8126_v52 }
 0x1b5   : > { %1558 = vmatprep.mubr.f32.mxu1 %v6290_v7  ;;  %4952 = vmatpush1.bf16.msra.mxu1 %v4951_v9  ;;  %v4961_v58 = vpack.c.bf16 %v2016_v63, %v2012_v2  ;;  %v8164_v2 = vld [vmem:[%s10310_s3 + $0x430] sm:$0xff]  ;;  %v8169_v63 = vld [vmem:[%s10310_s3 + $0x448] sm:$0xff] }
 0x1b6   : > { %4954 = vmatprep.subr.bf16.mxu1 %v4953_v51 }
 0x1b8   : > { %1559 = vmatmul.mubr.f32.gmra.mrb[50].mxu1 %v7304_v10  ;;  %v2054_v10 = vld [vmem:[%s10310_s3 + $0x428] sm:$0xff] }
 0x1b9   : > { %1564 = vmatprep.mubr.f32.mxu1 %v6290_v7  ;;  %4956 = vmatpush1.bf16.msra.mxu1 %v4955_v50  ;;  %v4853_v61 = vpack.c.bf16 %v2054_v10, %v2050_v54  ;;  %v8147_v50 = vld [vmem:[%s10310_s3 + $0x400] sm:$0xff]  ;;  %v8183_v54 = vld [vmem:[%s10310_s3 + $0x458] sm:$0xff] }
 0x1ba   : > { %4958 = vmatprep.subr.bf16.mxu1 %v4957_v1  ;;  %v8152_v1 = vld [vmem:[%s10310_s3 + $0x420] sm:$0xff]  ;;  %v8188_v10 = vld [vmem:[%s10310_s3 + $0x478] sm:$0xff] }
 0x1bb   : > { %4854 = vmatprep.subr.bf16.mxu0 %v4853_v61 }
 0x1bc   : > { %1565 = vmatmul.mubr.f32.gmra.mrb[52].mxu1 %v7329_v21  ;;  %v2032_v21 = vld [vmem:[%s10310_s3 + $0x378] sm:$0xff] }
 0x1bd   : > { %1570 = vmatprep.mubr.f32.mxu1 %v6290_v7  ;;  %4960 = vmatpush1.bf16.msra.mxu1 %v4959_v16  ;;  %v4969_v13 = vpack.c.bf16 %v2032_v21, %v2028_v6  ;;  %v8174_v16 = vld [vmem:[%s10310_s3 + $0x468] sm:$0xff]  ;;  %v8212_v6 = vld [vmem:[%s10310_s3 + $0x470] sm:$0xff] }
 0x1be   : > { %4962 = vmatprep.subr.bf16.mxu1 %v4961_v58  ;;  %v8217_v21 = vld [vmem:[%s10310_s3 + $0x488] sm:$0xff] }
 0x1c0   : > { %1571 = vmatmul.mubr.f32.gmra.mrb[54].mxu1 %v7354_v32  ;;  %v2040_v32 = vld [vmem:[%s10310_s3 + $0x3b8] sm:$0xff] }
 0x1c1   : > { %1576 = vmatprep.mubr.f32.mxu1 %v6290_v7  ;;  %4964 = vmatpush1.bf16.msra.mxu1 %v4963_v56  ;;  %v4973_v12 = vpack.c.bf16 %v2040_v32, %v2036_v60  ;;  %v8234_v60 = vld [vmem:[%s10310_s3 + $0x4b8] sm:$0xff]  ;;  %v8239_v32 = vld [vmem:[%s10310_s3 + $0x480] sm:$0xff] }
 0x1c2   : > { %4966 = vmatprep.subr.bf16.mxu1 %v4965_v55 }
 0x1c4   : > { %1577 = vmatmul.mubr.f32.gmra.mrb[56].mxu1 %v7379_v47  ;;  %v2048_v47 = vld [vmem:[%s10310_s3 + $0x3f8] sm:$0xff] }
 0x1c5   : > { %1582 = vmatprep.mubr.f32.mxu1 %v6290_v7  ;;  %4968 = vmatpush1.bf16.msra.mxu1 %v4967_v4  ;;  %v4977_v34 = vpack.c.bf16 %v2048_v47, %v2044_v45  ;;  %v8222_v4 = vld [vmem:[%s10310_s3 + $0x4a8] sm:$0xff]  ;;  %v8258_v45 = vld [vmem:[%s10310_s3 + $0x4b0] sm:$0xff] }
 0x1c6   : > { %4970 = vmatprep.subr.bf16.mxu1 %v4969_v13  ;;  %v8263_v47 = vld [vmem:[%s10310_s3 + $0x4c8] sm:$0xff] }
 0x1c8   : > { %1583 = vmatmul.mubr.f32.gmra.mrb[58].mxu1 %v7404_v59  ;;  %v2056_v59 = vld [vmem:[%s10310_s3 + $0x438] sm:$0xff] }
 0x1c9   : > { %1588 = vmatprep.mubr.f32.mxu1 %v6290_v7  ;;  %4972 = vmatpush1.bf16.msra.mxu1 %v4971_v0  ;;  %v4981_v43 = vpack.c.bf16 %v2056_v59, %v2052_v33  ;;  %v8244_v0 = vld [vmem:[%s10310_s3 + $0x4a0] sm:$0xff]  ;;  %v8371_v33 = vld [vmem:[%s10310_s3 + $0x510] sm:$0xff] }
 0x1ca   : > { %4974 = vmatprep.subr.bf16.mxu1 %v4973_v12  ;;  %10427 = vst [vmem:[#allocation43_spill] sm:$0xff] %v8371_v33 }
 0x1cc   : > { %1589 = vmatmul.mubr.f32.gmra.mrb[60].mxu1 %v7429_v14 }
 0x1cd   : > { %1594 = vmatprep.mubr.f32.mxu1 %v6290_v7  ;;  %4976 = vmatpush1.bf16.msra.mxu1 %v4975_v20  ;;  %v8268_v20 = vld [vmem:[%s10310_s3 + $0x4e8] sm:$0xff] }
 0x1ce   : > { %4978 = vmatprep.subr.bf16.mxu1 %v4977_v34 }
 0x1d0   : > { %1595 = vmatmul.mubr.f32.gmra.mrb[62].mxu1 %v7454_v28  ;;  %v935_v28 = vld [vmem:[%s10413_s18] sm:$0xf] }
 0x1d1   : > { %4980 = vmatpush1.bf16.msra.mxu1 %v4979_v8  ;;  %v1184_v40 = vpop.f32.mrb[0].mxu0  ;;  %v8131_v30 = vrot.slane %v935_v28, %v8118_v35  ;;  %v8136_v44 = vrot.slane %v935_v28, %v8126_v52  ;;  %v8281_v8 = vld [vmem:[%s10310_s3 + $0x4d8] sm:$0xff]  ;;  %v8464_v52 = vld [vmem:[%s10310_s3 + $0x5a8] sm:$0xff] }
 0x1d2   : > { %4982 = vmatprep.subr.bf16.mxu1 %v4981_v43  ;;  %v1186_v26 = vpop.f32.mrb[1].mxu0  ;;  %v8286_v43 = vld [vmem:[%s10310_s3 + $0x4f8] sm:$0xff]  ;;  %10438 = vst [vmem:[#allocation54_spill] sm:$0xff] %v8464_v52 }
 0x1d5   : > { %v1190_v48 = vpop.f32.mrb[2].mxu0 }
 0x1d6   : > { %v1192_v11 = vpop.f32.mrb[3].mxu0 }
 0x1d9   : > { %v8109_v36 = vpop.f32.mrb[4].mxu0 }
 0x1da   : > { %v8113_v14 = vpop.f32.mrb[5].mxu0 }
 0x1dd   : > { %v8115_v7 = vpop.f32.mrb[6].mxu0 }
 0x1de   : > { %v8120_v17 = vpop.f32.mrb[7].mxu0 }
 0x1e1   : > { %v8128_v62 = vpop.f32.mrb[8].mxu0 }
 0x1e2   : > { %v8133_v41 = vpop.f32.mrb[9].mxu0 }
 0x1e5   : > { %v8138_v51 = vpop.f32.mrb[10].mxu0 }
 0x1e6   : > { %v8141_v31 = vpop.f32.mrb[11].mxu0 }
 0x1e7   : > { %v1023_v9 = vpop.f32.mrb[0].mxu1 }
 0x1e8   : > { %v1024_v15 = vadd.f32 %v1023_v9, %v8131_v30  ;;  %v1025_v25 = vpop.f32.mrb[1].mxu1  ;;  %v8352_v9 = vld [vmem:[%s10310_s3 + $0x500] sm:$0xff] }
 0x1e9   : > { %v1026_v53 = vadd.f32 %v1025_v25, %v8136_v44  ;;  %v8178_v37 = vpop.f32.mrb[12].mxu0  ;;  %v8309_v25 = vld [vmem:[%s10310_s3 + $0x4d0] sm:$0xff]  ;;  %10424 = vst [vmem:[#allocation40_spill] sm:$0xff] %v8352_v9 }
 0x1ea   : > { %v8154_v23 = vadd.f32 %v1184_v40, %v1024_v15  ;;  %v8202_v22 = vpop.f32.mrb[13].mxu0  ;;  %v8291_v40 = vld [vmem:[%s10310_s3 + $0x4c0] sm:$0xff]  ;;  %10418 = vst [vmem:[#allocation34_spill] sm:$0xff] %v8309_v25  ;;  %v8347_v15 = vld [vmem:[%s10310_s3 + $0x538] sm:$0xff]  ;;  %v8437_v25 = vld [vmem:[%s10310_s3 + $0x570] sm:$0xff] }
 0x1eb   : > { %v8176_v46 = vadd.f32 %v1186_v26, %v1026_v53  ;;  %v1029_v58 = vpop.f32.mrb[2].mxu1  ;;  %10416 = vst [vmem:[#allocation32_spill] sm:$0xff] %v8291_v40  ;;  %v8296_v26 = vld [vmem:[%s10310_s3 + $0x4e0] sm:$0xff]  ;;  %v8314_v53 = vld [vmem:[%s10310_s3 + $0x4f0] sm:$0xff]  ;;  %10423 = vst [vmem:[#allocation39_spill] sm:$0xff] %v8347_v15 }
 0x1ec   : > { %v1665_v61 = vmul.f32 0.70710677, %v8154_v23  ;;  %v1030_v56 = vadd.f32 %v1029_v58, %v8131_v30  ;;  %v1031_v55 = vpop.f32.mrb[3].mxu1  ;;  %10417 = vst [vmem:[#allocation33_spill] sm:$0xff] %v8296_v26  ;;  %10419 = vst [vmem:[#allocation35_spill] sm:$0xff] %v8314_v53  ;;  %v8410_v40 = vld [vmem:[%s10310_s3 + $0x578] sm:$0xff] }
 0x1ed   : > { %v1666_v13 = vmul.f32 0.70710677, %v8176_v46  ;;  %v1032_v42 = vadd.f32 %v1031_v55, %v8136_v44  ;;  %v8272_v27 = vpop.f32.mrb[14].mxu0  ;;  %10432 = vst [vmem:[#allocation48_spill] sm:$0xff] %v8410_v40  ;;  %v8415_v26 = vld [vmem:[%s10310_s3 + $0x540] sm:$0xff]  ;;  %10436 = vst [vmem:[#allocation52_spill] sm:$0xff] %v8437_v25 }
 0x1ee   : > { %5763 = verf.f32 %v1665_v61  ;;  %v8246_v12 = vadd.f32 %v1190_v48, %v1030_v56  ;;  %v8300_v28 = vpop.f32.mrb[15].mxu0  ;;  %10433 = vst [vmem:[#allocation49_spill] sm:$0xff] %v8415_v26  ;;  %v8478_v26 = vld [vmem:[%s10310_s3 + $0x5b8] sm:$0xff] }
 0x1ef   : > { %5765 = verf.f32 %v1666_v13  ;;  %v8270_v34 = vadd.f32 %v1192_v11, %v1032_v42  ;;  %v1035_v19 = vpop.f32.mrb[4].mxu1  ;;  %v8325_v13 = vld [vmem:[%s10310_s3 + $0x508] sm:$0xff]  ;;  %10440 = vst [vmem:[#allocation56_spill] sm:$0xff] %v8478_v26 }
 0x1f0   : > { %v1669_v48 = vmul.f32 0.70710677, %v8246_v12  ;;  %v1036_v38 = vadd.f32 %v1035_v19, %v8131_v30  ;;  %v1037_v11 = vpop.f32.mrb[5].mxu1  ;;  %10420 = vst [vmem:[#allocation36_spill] sm:$0xff] %v8325_v13  ;;  %v8330_v42 = vld [vmem:[%s10310_s3 + $0x528] sm:$0xff]  ;;  %v8335_v19 = vld [vmem:[%s10310_s3 + $0x518] sm:$0xff] }
 0x1f1   : > { %v1670_v58 = vmul.f32 0.70710677, %v8270_v34  ;;  %v1038_v61 = vadd.f32 %v1037_v11, %v8136_v44  ;;  %10421 = vst [vmem:[#allocation37_spill] sm:$0xff] %v8330_v42  ;;  %10422 = vst [vmem:[#allocation38_spill] sm:$0xff] %v8335_v19  ;;  %v8362_v56 = vpop.f32.mrb[16].mxu0  ;;  %v8432_v42 = vld [vmem:[%s10310_s3 + $0x550] sm:$0xff] }
 0x1f2   : > { %5767 = verf.f32 %v1669_v48  ;;  %v8338_v11 = vadd.f32 %v8109_v36, %v1036_v38  ;;  %v8357_v36 = vld [vmem:[%s10310_s3 + $0x520] sm:$0xff]  ;;  %10426 = vst [vmem:[#allocation42_spill] sm:$0xff] %v8362_v56  ;;  %v8385_v24 = vpop.f32.mrb[17].mxu0  ;;  %v8399_v56 = vld [vmem:[%s10310_s3 + $0x558] sm:$0xff]  ;;  %10435 = vst [vmem:[#allocation51_spill] sm:$0xff] %v8432_v42  ;;  %v1606_v26 = vmul.f32 0.5, %v8270_v34 }
 0x1f3   : > { %10425 = vst [vmem:[#allocation41_spill] sm:$0xff] %v8357_v36  ;;  %5769 = verf.f32 %v1670_v58  ;;  %v8360_v48 = vadd.f32 %v8113_v14, %v1038_v61  ;;  %v1041_v38 = vpop.f32.mrb[6].mxu1  ;;  %v8376_v58 = vld [vmem:[%s10310_s3 + $0x530] sm:$0xff]  ;;  %v8381_v14 = vld [vmem:[%s10310_s3 + $0x548] sm:$0xff]  ;;  %10429 = vst [vmem:[#allocation45_spill] sm:$0xff] %v8385_v24 }
 0x1f4   : > { %10428 = vst [vmem:[#allocation44_spill] sm:$0xff] %v8381_v14  ;;  %v1673_v61 = vmul.f32 0.70710677, %v8338_v11  ;;  %v1042_v55 = vadd.f32 %v1041_v38, %v8131_v30  ;;  %v1043_v59 = vpop.f32.mrb[7].mxu1  ;;  %10431 = vst [vmem:[#allocation47_spill] sm:$0xff] %v8399_v56 }
 0x1f5   : > { %v1674_v38 = vmul.f32 0.70710677, %v8360_v48  ;;  %v1044_v24 = vadd.f32 %v1043_v59, %v8136_v44  ;;  %v8420_v59 = vld [vmem:[%s10310_s3 + $0x560] sm:$0xff] }
 0x1f6   : > { %10434 = vst [vmem:[#allocation50_spill] sm:$0xff] %v8420_v59  ;;  %5771 = verf.f32 %v1673_v61  ;;  %v8423_v35 = vadd.f32 %v8115_v7, %v1042_v55  ;;  %v8442_v61 = vpop.f32.mrb[18].mxu0  ;;  %v1602_v59 = vmul.f32 0.5, %v8176_v46 }
 0x1f7   : > { %5773 = verf.f32 %v1674_v38  ;;  %v8440_v7 = vadd.f32 %v8120_v17, %v1044_v24  ;;  %v1047_v55 = vpop.f32.mrb[8].mxu1  ;;  %v8450_v53 = vpop.f32.mrb[19].mxu0  ;;  %v8459_v38 = vld [vmem:[%s10310_s3 + $0x588] sm:$0xff]  ;;  %v8473_v24 = vld [vmem:[%s10310_s3 + $0x598] sm:$0xff] }
 0x1f8   : > { %v5764_v9 = vpop.eup %5763  ;;  %v1677_v36 = vmul.f32 0.70710677, %v8423_v35  ;;  %v1048_v19 = vadd.f32 %v1047_v55, %v8131_v30  ;;  %v1049_v15 = vpop.f32.mrb[9].mxu1  ;;  %10437 = vst [vmem:[#allocation53_spill] sm:$0xff] %v8459_v38  ;;  %10439 = vst [vmem:[#allocation55_spill] sm:$0xff] %v8473_v24  ;;  %v8518_v24 = vld [vmem:[%s10310_s3 + $0x5b0] sm:$0xff] }
 0x1f9   : > { %v5766_v55 = vpop.eup %5765  ;;  %v1793_v13 = vadd.f32 1.0, %v5764_v9  ;;  %v1678_v14 = vmul.f32 0.70710677, %v8440_v7  ;;  %v1050_v57 = vadd.f32 %v1049_v15, %v8136_v44  ;;  %v1601_v15 = vmul.f32 0.5, %v8154_v23  ;;  %v8488_v25 = vpop.f32.mrb[20].mxu0  ;;  %v8513_v23 = vld [vmem:[%s10310_s3 + $0x590] sm:$0xff] }
 0x1fa   : > { %v1794_v9 = vadd.f32 1.0, %v5766_v55  ;;  %5775 = verf.f32 %v1677_v36  ;;  %v8482_v56 = vadd.f32 %v8128_v62, %v1048_v19  ;;  %v8494_v19 = vpop.f32.mrb[21].mxu0 }
 0x1fb   : > { %5777 = verf.f32 %v1678_v14  ;;  %v8486_v17 = vadd.f32 %v8133_v41, %v1050_v57  ;;  %v1053_v42 = vpop.f32.mrb[10].mxu1  ;;  %v8501_v57 = vld [vmem:[%s10310_s3 + $0x580] sm:$0xff]  ;;  %v1857_v40 = vmul.f32 %v1793_v13, %v1601_v15  ;;  %v1605_v13 = vmul.f32 0.5, %v8246_v12 }
 0x1fc   : > { %v5768_v33 = vpop.eup %5767  ;;  %v1681_v46 = vmul.f32 0.70710677, %v8482_v56  ;;  %v1054_v36 = vadd.f32 %v1053_v42, %v8131_v30  ;;  %v1055_v55 = vpop.f32.mrb[11].mxu1  ;;  %v1858_v62 = vmul.f32 %v1794_v9, %v1602_v59  ;;  %v8506_v41 = vld [vmem:[%s10310_s3 + $0x5a0] sm:$0xff] }
 0x1fd   : > { %v5770_v14 = vpop.eup %5769  ;;  %v1797_v42 = vadd.f32 1.0, %v5768_v33  ;;  %v1682_v59 = vmul.f32 0.70710677, %v8486_v17  ;;  %v1056_v9 = vadd.f32 %v1055_v55, %v8136_v44  ;;  %v8528_v52 = vpop.f32.mrb[22].mxu0 }
 0x1fe   : > { %v1798_v38 = vadd.f32 1.0, %v5770_v14  ;;  %5779 = verf.f32 %v1681_v46  ;;  %v8522_v33 = vadd.f32 %v8138_v51, %v1054_v36  ;;  %2263 = vmatprep.mubr.f32.mxu0 %v1858_v62  ;;  %2585 = vmatprep.mubr.f32.mxu1 %v1858_v62  ;;  %v8534_v12 = vpop.f32.mrb[23].mxu0 }
 0x1ff   : > { %5781 = verf.f32 %v1682_v59  ;;  %v8526_v15 = vadd.f32 %v8141_v31, %v1056_v9  ;;  %v1059_v55 = vpop.f32.mrb[12].mxu1  ;;  %2264 = vmatmul.mubr.f32.vlgmr.msra.gmra.mrb[32].mxu0 %v1857_v40  ;;  %2586 = vmatmul.mubr.f32.vlgmr.msra.gmra.mrb[64].mxu1 %v1857_v40  ;;  %v10441_v31 = vpack.c.bf16 %v8152_v1, %v8147_v50  ;;  %v10442_v40 = vpack.c.bf16 %v8164_v2, %v8159_v39  ;;  %v8547_v9 = vld [vmem:[%s10310_s3 + $0x5c8] sm:$0xff]  ;;  %v8773_v59 = vld [vmem:[%s10310_s3 + $0x658] sm:$0xff] }
 0x200   : > { %v5772_v46 = vpop.eup %5771  ;;  %v1685_v51 = vmul.f32 0.70710677, %v8522_v33  ;;  %v1060_v36 = vadd.f32 %v1059_v55, %v8131_v30  ;;  %v1061_v62 = vpop.f32.mrb[13].mxu1  ;;  %v1862_v14 = vmul.f32 %v1798_v38, %v1606_v26  ;;  %v8552_v26 = vld [vmem:[%s10310_s3 + $0x5e8] sm:$0xff]  ;;  %v1861_v2 = vmul.f32 %v1797_v42, %v1605_v13 }
 0x201   : > { %4856 = vmatpush1.bf16.msra.mxu0 %v10441_v31  ;;  %4984 = vmatpush1.bf16.msra.mxu1 %v10442_v40  ;;  %v5774_v38 = vpop.eup %5773  ;;  %v1801_v50 = vadd.f32 1.0, %v5772_v46  ;;  %v1686_v1 = vmul.f32 0.70710677, %v8526_v15  ;;  %v1062_v39 = vadd.f32 %v1061_v62, %v8136_v44  ;;  %v10443_v55 = vpack.c.bf16 %v8174_v16, %v8169_v63  ;;  %v8565_v40 = vld [vmem:[%s10310_s3 + $0x5d8] sm:$0xff]  ;;  %v8580_v62 = vpop.f32.mrb[24].mxu0 }
 0x202   : > { %v10444_v31 = vpack.c.bf16 %v8188_v10, %v8183_v54  ;;  %v8570_v46 = vld [vmem:[%s10310_s3 + $0x5f8] sm:$0xff]  ;;  %v1610_v42 = vmul.f32 0.5, %v8360_v48  ;;  %v1802_v13 = vadd.f32 1.0, %v5774_v38  ;;  %5783 = verf.f32 %v1685_v51  ;;  %2269 = vmatprep.mubr.f32.mxu0 %v1862_v14  ;;  %2591 = vmatprep.mubr.f32.mxu1 %v1862_v14 }
 0x203   : > { %4858 = vmatprep.subr.bf16.mxu0 %v10443_v55  ;;  %v8574_v63 = vadd.f32 %v8178_v37, %v1060_v36  ;;  %v1609_v16 = vmul.f32 0.5, %v8338_v11  ;;  %5785 = verf.f32 %v1686_v1  ;;  %v8578_v54 = vadd.f32 %v8202_v22, %v1062_v39  ;;  %v1065_v10 = vpop.f32.mrb[14].mxu1  ;;  %2270 = vmatmul.mubr.f32.gmra.mrb[34].mxu0 %v1861_v2  ;;  %v8586_v11 = vpop.f32.mrb[25].mxu0  ;;  %v8604_v55 = vld [vmem:[%s10310_s3 + $0x5e0] sm:$0xff]  ;;  %v10477_v39 = vld [vmem:[#allocation47_spill] sm:$0xff] }
 0x204   : > { %4986 = vmatprep.subr.bf16.mxu1 %v10444_v31  ;;  %2592 = vmatmul.mubr.f32.gmra.mrb[66].mxu1 %v1861_v2  ;;  %v5776_v51 = vpop.eup %5775  ;;  %v1066_v36 = vadd.f32 %v1065_v10, %v8131_v30  ;;  %v1067_v14 = vpop.f32.mrb[15].mxu1  ;;  %v1866_v38 = vmul.f32 %v1802_v13, %v1610_v42  ;;  %v10445_v22 = vpack.c.bf16 %v8198_v18, %v8193_v49  ;;  %v8599_v2 = vld [vmem:[%s10310_s3 + $0x5c0] sm:$0xff]  ;;  %v8617_v10 = vld [vmem:[%s10310_s3 + $0x5d0] sm:$0xff] }
 0x205   : > { %v1689_v37 = vmul.f32 0.70710677, %v8574_v63  ;;  %v10446_v1 = vpack.c.bf16 %v8212_v6, %v8207_v3  ;;  %v5778_v31 = vpop.eup %5777  ;;  %v1805_v49 = vadd.f32 1.0, %v5776_v51  ;;  %v1690_v18 = vmul.f32 0.70710677, %v8578_v54  ;;  %v8622_v51 = vld [vmem:[%s10310_s3 + $0x5f0] sm:$0xff] }
 0x206   : > { %4860 = vmatpush1.bf16.msra.mxu0 %v10445_v22  ;;  %v1068_v3 = vadd.f32 %v1067_v14, %v8136_v44  ;;  %v1865_v6 = vmul.f32 %v1801_v50, %v1609_v16  ;;  %v10447_v42 = vpack.c.bf16 %v8222_v4, %v8217_v21  ;;  %v10448_v13 = vpack.c.bf16 %v8234_v60, %v8229_v5  ;;  %v8632_v14 = vpop.f32.mrb[26].mxu0 }
 0x207   : > { %4988 = vmatpush1.bf16.msra.mxu1 %v10446_v1  ;;  %v1614_v50 = vmul.f32 0.5, %v8440_v7  ;;  %v1806_v16 = vadd.f32 1.0, %v5778_v31  ;;  %5787 = verf.f32 %v1689_v37  ;;  %v8626_v21 = vadd.f32 %v8272_v27, %v1066_v36  ;;  %2275 = vmatprep.mubr.f32.mxu0 %v1866_v38  ;;  %v1071_v60 = vpop.f32.mrb[16].mxu1  ;;  %v8721_v7 = vld [vmem:[%s10310_s3 + $0x610] sm:$0xff] }
 0x208   : > { %4862 = vmatprep.subr.bf16.mxu0 %v10447_v42  ;;  %4990 = vmatprep.subr.bf16.mxu1 %v10448_v13  ;;  %v1613_v4 = vmul.f32 0.5, %v8423_v35  ;;  %5789 = verf.f32 %v1690_v18  ;;  %v8630_v5 = vadd.f32 %v8300_v28, %v1068_v3  ;;  %v5780_v37 = vpop.eup %5779  ;;  %v1072_v36 = vadd.f32 %v1071_v60, %v8131_v30  ;;  %v8638_v35 = vpop.f32.mrb[27].mxu0  ;;  %v8651_v18 = vld [vmem:[%s10310_s3 + $0x608] sm:$0xff] }
 0x209   : > { %2597 = vmatprep.mubr.f32.mxu1 %v1866_v38  ;;  %2276 = vmatmul.mubr.f32.gmra.mrb[36].mxu0 %v1865_v6  ;;  %v1693_v27 = vmul.f32 0.70710677, %v8626_v21  ;;  %v1073_v38 = vpop.f32.mrb[17].mxu1  ;;  %v1870_v22 = vmul.f32 %v1806_v16, %v1614_v50  ;;  %v10449_v28 = vpack.c.bf16 %v8244_v0, %v8239_v32  ;;  %v10450_v1 = vpack.c.bf16 %v8258_v45, %v8253_v29  ;;  %v8656_v3 = vld [vmem:[%s10310_s3 + $0x628] sm:$0xff]  ;;  %v8669_v50 = vld [vmem:[%s10310_s3 + $0x618] sm:$0xff] }
 0x20a   : > { %2598 = vmatmul.mubr.f32.gmra.mrb[68].mxu1 %v1865_v6  ;;  %v5782_v6 = vpop.eup %5781  ;;  %v1809_v32 = vadd.f32 1.0, %v5780_v37  ;;  %v1694_v0 = vmul.f32 0.70710677, %v8630_v5  ;;  %v1074_v29 = vadd.f32 %v1073_v38, %v8136_v44  ;;  %v1869_v45 = vmul.f32 %v1805_v49, %v1613_v4  ;;  %v8674_v16 = vld [vmem:[%s10310_s3 + $0x638] sm:$0xff]  ;;  %v8684_v38 = vpop.f32.mrb[28].mxu0 }
 0x20b   : > { %4864 = vmatpush1.bf16.msra.mxu0 %v10449_v28  ;;  %4992 = vmatpush1.bf16.msra.mxu1 %v10450_v1  ;;  %v10451_v42 = vpack.c.bf16 %v8268_v20, %v8263_v47  ;;  %v10452_v13 = vpack.c.bf16 %v8286_v43, %v8281_v8  ;;  %v1618_v49 = vmul.f32 0.5, %v8486_v17  ;;  %v1810_v4 = vadd.f32 1.0, %v5782_v6  ;;  %v10453_v47 = vld [vmem:[#allocation42_spill] sm:$0xff]  ;;  %v10454_v43 = vld [vmem:[#allocation45_spill] sm:$0xff]  ;;  %v1077_v37 = vpop.f32.mrb[18].mxu1 }
 0x20c   : > { %5791 = verf.f32 %v1693_v27  ;;  %v8678_v20 = vadd.f32 %v10453_v47, %v1072_v36  ;;  %2281 = vmatprep.mubr.f32.mxu0 %v1870_v22  ;;  %2603 = vmatprep.mubr.f32.mxu1 %v1870_v22  ;;  %v1617_v8 = vmul.f32 0.5, %v8482_v56  ;;  %v8682_v60 = vadd.f32 %v10454_v43, %v1074_v29  ;;  %v5784_v27 = vpop.eup %5783  ;;  %v1079_v22 = vpop.f32.mrb[19].mxu1  ;;  %v10455_v6 = vld [vmem:[#allocation33_spill] sm:$0xff]  ;;  %v10464_v47 = vld [vmem:[#allocation39_spill] sm:$0xff]  ;;  %v10465_v17 = vld [vmem:[#allocation38_spill] sm:$0xff] }
 0x20d   : > { %4866 = vmatprep.subr.bf16.mxu0 %v10451_v42  ;;  %4994 = vmatprep.subr.bf16.mxu1 %v10452_v13  ;;  %5793 = verf.f32 %v1694_v0  ;;  %v1078_v28 = vadd.f32 %v1077_v37, %v8131_v30  ;;  %v1874_v1 = vmul.f32 %v1810_v4, %v1618_v49  ;;  %v8690_v56 = vpop.f32.mrb[29].mxu0  ;;  %v10456_v0 = vld [vmem:[#allocation32_spill] sm:$0xff]  ;;  %v10458_v42 = vld [vmem:[#allocation35_spill] sm:$0xff]  ;;  %v8703_v43 = vld [vmem:[%s10310_s3 + $0x600] sm:$0xff]  ;;  %v5786_v4 = vpop.eup %5785  ;;  %v1813_v37 = vadd.f32 1.0, %v5784_v27 }
 0x20e   : > { %2282 = vmatmul.mubr.f32.gmra.mrb[38].mxu0 %v1869_v45  ;;  %2604 = vmatmul.mubr.f32.gmra.mrb[70].mxu1 %v1869_v45  ;;  %v1697_v36 = vmul.f32 0.70710677, %v8678_v20  ;;  %v10457_v29 = vpack.c.bf16 %v10455_v6, %v10456_v0  ;;  %v10459_v45 = vld [vmem:[#allocation34_spill] sm:$0xff]  ;;  %v8708_v49 = vld [vmem:[%s10310_s3 + $0x620] sm:$0xff]  ;;  %v1698_v6 = vmul.f32 0.70710677, %v8682_v60  ;;  %v1080_v0 = vadd.f32 %v1079_v22, %v8136_v44 }
 0x20f   : > { %v10460_v13 = vpack.c.bf16 %v10458_v42, %v10459_v45  ;;  %v10461_v42 = vld [vmem:[#allocation37_spill] sm:$0xff]  ;;  %v10462_v45 = vld [vmem:[#allocation36_spill] sm:$0xff]  ;;  %v10466_v31 = vpack.c.bf16 %v10464_v47, %v10465_v17  ;;  %v8726_v27 = vld [vmem:[%s10310_s3 + $0x630] sm:$0xff]  ;;  %v8730_v22 = vadd.f32 %v8442_v61, %v1078_v28  ;;  %2287 = vmatprep.mubr.f32.mxu0 %v1874_v1  ;;  %2609 = vmatprep.mubr.f32.mxu1 %v1874_v1  ;;  %v1083_v47 = vpop.f32.mrb[20].mxu1 }
 0x210   : > { %4868 = vmatpush1.bf16.msra.mxu0 %v10457_v29  ;;  %v1873_v29 = vmul.f32 %v1809_v32, %v1617_v8  ;;  %v1622_v32 = vmul.f32 0.5, %v8526_v15  ;;  %v1814_v8 = vadd.f32 1.0, %v5786_v4  ;;  %5795 = verf.f32 %v1697_v36  ;;  %v1085_v1 = vpop.f32.mrb[21].mxu1  ;;  %v8755_v15 = vld [vmem:[%s10310_s3 + $0x648] sm:$0xff] }
 0x211   : > { %4996 = vmatpush1.bf16.msra.mxu1 %v10460_v13  ;;  %v10463_v13 = vpack.c.bf16 %v10461_v42, %v10462_v45  ;;  %5797 = verf.f32 %v1698_v6  ;;  %v8734_v17 = vadd.f32 %v8450_v53, %v1080_v0  ;;  %v8736_v42 = vpop.f32.mrb[30].mxu0  ;;  %v5788_v36 = vpop.eup %5787  ;;  %v1701_v61 = vmul.f32 0.70710677, %v8730_v22  ;;  %v10468_v6 = vld [vmem:[#allocation41_spill] sm:$0xff]  ;;  %v10469_v53 = vld [vmem:[#allocation40_spill] sm:$0xff] }
 0x212   : > { %4998 = vmatprep.subr.bf16.mxu1 %v10466_v31  ;;  %v1621_v31 = vmul.f32 0.5, %v8522_v33  ;;  %2288 = vmatmul.mubr.f32.gmra.mrb[40].mxu0 %v1873_v29  ;;  %v1084_v28 = vadd.f32 %v1083_v47, %v8131_v30  ;;  %v1878_v4 = vmul.f32 %v1814_v8, %v1622_v32  ;;  %v8742_v33 = vpop.f32.mrb[31].mxu0  ;;  %v10470_v0 = vpack.c.bf16 %v10468_v6, %v10469_v53  ;;  %v8760_v32 = vld [vmem:[%s10310_s3 + $0x668] sm:$0xff]  ;;  %v5790_v8 = vpop.eup %5789 }
 0x213   : > { %4870 = vmatprep.subr.bf16.mxu0 %v10463_v13  ;;  %2610 = vmatmul.mubr.f32.gmra.mrb[72].mxu1 %v1873_v29  ;;  %10467 = vst [vmem:[#allocation42_spill] sm:$0xff] %v8742_v33  ;;  %v10471_v29 = vld [vmem:[#allocation43_spill] sm:$0xff]  ;;  %v1817_v47 = vadd.f32 1.0, %v5788_v36  ;;  %v1702_v6 = vmul.f32 0.70710677, %v8734_v17  ;;  %v10476_v13 = vld [vmem:[#allocation48_spill] sm:$0xff]  ;;  %5799 = verf.f32 %v1701_v61 }
 0x214   : > { %4872 = vmatpush1.bf16.msra.mxu0 %v10470_v0  ;;  %v10472_v45 = vpack.c.bf16 %v8376_v58, %v10471_v29  ;;  %v1086_v58 = vadd.f32 %v1085_v1, %v8136_v44  ;;  %v1877_v53 = vmul.f32 %v1813_v37, %v1621_v31  ;;  %v10473_v0 = vld [vmem:[#allocation46_spill] sm:$0xff]  ;;  %v10474_v29 = vld [vmem:[#allocation44_spill] sm:$0xff]  ;;  %v10478_v48 = vpack.c.bf16 %v10476_v13, %v10477_v39  ;;  %v1089_v13 = vpop.f32.mrb[22].mxu1  ;;  %v8821_v33 = vld [vmem:[%s10310_s3 + $0x650] sm:$0xff] }
 0x215   : > { %v8778_v36 = vld [vmem:[%s10310_s3 + $0x678] sm:$0xff]  ;;  %v1626_v37 = vmul.f32 0.5, %v8578_v54  ;;  %v1818_v31 = vadd.f32 1.0, %v5790_v8  ;;  %v8782_v1 = vadd.f32 %v8488_v25, %v1084_v28  ;;  %2293 = vmatprep.mubr.f32.mxu0 %v1878_v4  ;;  %2615 = vmatprep.mubr.f32.mxu1 %v1878_v4  ;;  %5801 = verf.f32 %v1702_v6  ;;  %v1091_v28 = vpop.f32.mrb[23].mxu1  ;;  %v10479_v4 = vld [vmem:[#allocation50_spill] sm:$0xff] }
 0x216   : > { %5000 = vmatpush1.bf16.msra.mxu1 %v10472_v45  ;;  %v10475_v45 = vpack.c.bf16 %v10473_v0, %v10474_v29  ;;  %v8786_v39 = vadd.f32 %v8494_v19, %v1086_v58  ;;  %2294 = vmatmul.mubr.f32.gmra.mrb[42].mxu0 %v1877_v53  ;;  %v5792_v54 = vpop.eup %5791  ;;  %v1090_v25 = vadd.f32 %v1089_v13, %v8131_v30  ;;  %v10480_v29 = vld [vmem:[#allocation49_spill] sm:$0xff]  ;;  %v10482_v6 = vld [vmem:[#allocation52_spill] sm:$0xff]  ;;  %v10483_v19 = vld [vmem:[#allocation51_spill] sm:$0xff] }
 0x217   : > { %5002 = vmatprep.subr.bf16.mxu1 %v10478_v48  ;;  %v1625_v48 = vmul.f32 0.5, %v8574_v63  ;;  %2616 = vmatmul.mubr.f32.gmra.mrb[74].mxu1 %v1877_v53  ;;  %v1705_v61 = vmul.f32 0.70710677, %v8782_v1  ;;  %v1882_v8 = vmul.f32 %v1818_v31, %v1626_v37  ;;  %v10481_v63 = vpack.c.bf16 %v10479_v4, %v10480_v29  ;;  %v8808_v37 = vld [vmem:[%s10310_s3 + $0x660] sm:$0xff]  ;;  %v5794_v31 = vpop.eup %5793  ;;  %v10488_v53 = vld [vmem:[#allocation56_spill] sm:$0xff]  ;;  %v10489_v0 = vld [vmem:[#allocation55_spill] sm:$0xff] }
 0x218   : > { %4874 = vmatprep.subr.bf16.mxu0 %v10475_v45  ;;  %v10484_v58 = vpack.c.bf16 %v10482_v6, %v10483_v19  ;;  %v8803_v45 = vld [vmem:[%s10310_s3 + $0x640] sm:$0xff]  ;;  %v1821_v13 = vadd.f32 1.0, %v5792_v54  ;;  %v1706_v4 = vmul.f32 0.70710677, %v8786_v39  ;;  %v1092_v29 = vadd.f32 %v1091_v28, %v8136_v44  ;;  %v10485_v6 = vld [vmem:[#allocation54_spill] sm:$0xff]  ;;  %v8826_v54 = vld [vmem:[%s10310_s3 + $0x670] sm:$0xff] }
 0x219   : > { %4876 = vmatpush1.bf16.msra.mxu0 %v10481_v63  ;;  %v1881_v63 = vmul.f32 %v1817_v47, %v1625_v48  ;;  %v10486_v19 = vld [vmem:[#allocation53_spill] sm:$0xff]  ;;  %v10490_v34 = vpack.c.bf16 %v10488_v53, %v10489_v0  ;;  %v1630_v47 = vmul.f32 0.5, %v8630_v5  ;;  %v1822_v48 = vadd.f32 1.0, %v5794_v31  ;;  %2299 = vmatprep.mubr.f32.mxu0 %v1882_v8  ;;  %v1095_v53 = vpop.f32.mrb[24].mxu1 }
 0x21a   : > { %5004 = vmatpush1.bf16.msra.mxu1 %v10484_v58  ;;  %v10487_v58 = vpack.c.bf16 %v10485_v6, %v10486_v19  ;;  %5803 = verf.f32 %v1705_v61  ;;  %v8830_v28 = vadd.f32 %v8528_v52, %v1090_v25  ;;  %2621 = vmatprep.mubr.f32.mxu1 %v1882_v8  ;;  %v8834_v0 = vadd.f32 %v8534_v12, %v1092_v29  ;;  %v5796_v5 = vpop.eup %5795  ;;  %v1097_v25 = vpop.f32.mrb[25].mxu1  ;;  %v8856_v29 = vld [vmem:[%s10310_s3 + $0x6a8] sm:$0xff] }
 0x21b   : > { %5006 = vmatprep.subr.bf16.mxu1 %v10490_v34  ;;  %v1629_v34 = vmul.f32 0.5, %v8626_v21  ;;  %5805 = verf.f32 %v1706_v4  ;;  %2300 = vmatmul.mubr.f32.gmra.mrb[44].mxu0 %v1881_v63  ;;  %v4891_v6 = vpack.c.bf16 %v8808_v37, %v8803_v45  ;;  %v1096_v52 = vadd.f32 %v1095_v53, %v8131_v30  ;;  %v8851_v4 = vld [vmem:[%s10310_s3 + $0x688] sm:$0xff]  ;;  %v2139_v45 = vld [vmem:[%s10310_s3 + $0x6d0] sm:$0xff] }
 0x21c   : > { %4878 = vmatprep.subr.bf16.mxu0 %v10487_v58  ;;  %2622 = vmatmul.mubr.f32.gmra.mrb[76].mxu1 %v1881_v63  ;;  %v1709_v61 = vmul.f32 0.70710677, %v8830_v28  ;;  %v1886_v31 = vmul.f32 %v1822_v48, %v1630_v47  ;;  %v10491_v21 = vpack.c.bf16 %v8506_v41, %v8501_v57  ;;  %v10492_v12 = vpack.c.bf16 %v8518_v24, %v8513_v23  ;;  %v5798_v63 = vpop.eup %5797  ;;  %v8869_v47 = vld [vmem:[%s10310_s3 + $0x698] sm:$0xff] }
 0x21d   : > { %v5019_v8 = vpack.c.bf16 %v8826_v54, %v8821_v33  ;;  %v1825_v57 = vadd.f32 1.0, %v5796_v5  ;;  %v1710_v41 = vmul.f32 0.70710677, %v8834_v0  ;;  %v1098_v24 = vadd.f32 %v1097_v25, %v8136_v44  ;;  %v8874_v48 = vld [vmem:[%s10310_s3 + $0x6b8] sm:$0xff] }
 0x21e   : > { %4880 = vmatpush1.bf16.msra.mxu0 %v10491_v21  ;;  %5008 = vmatpush1.bf16.msra.mxu1 %v10492_v12  ;;  %v1885_v23 = vmul.f32 %v1821_v13, %v1629_v34  ;;  %v10493_v19 = vpack.c.bf16 %v8552_v26, %v8547_v9  ;;  %v10494_v58 = vpack.c.bf16 %v8570_v46, %v8565_v40  ;;  %v1634_v13 = vmul.f32 0.5, %v8682_v60  ;;  %v1101_v46 = vpop.f32.mrb[26].mxu1  ;;  %v5800_v60 = vpop.eup %5799  ;;  %v8904_v21 = vld [vmem:[%s10310_s3 + $0x6a0] sm:$0xff] }
 0x21f   : > { %v1826_v34 = vadd.f32 1.0, %v5798_v63  ;;  %5807 = verf.f32 %v1709_v61  ;;  %v8878_v9 = vadd.f32 %v8580_v62, %v1096_v52  ;;  %2305 = vmatprep.mubr.f32.mxu0 %v1886_v31  ;;  %2627 = vmatprep.mubr.f32.mxu1 %v1886_v31  ;;  %v1633_v26 = vmul.f32 0.5, %v8678_v20  ;;  %v1103_v61 = vpop.f32.mrb[27].mxu1  ;;  %v8899_v31 = vld [vmem:[%s10310_s3 + $0x680] sm:$0xff]  ;;  %v5802_v12 = vpop.eup %5801 }
 0x220   : > { %4882 = vmatprep.subr.bf16.mxu0 %v10493_v19  ;;  %5010 = vmatprep.subr.bf16.mxu1 %v10494_v58  ;;  %5809 = verf.f32 %v1710_v41  ;;  %v8882_v40 = vadd.f32 %v8586_v11, %v1098_v24  ;;  %v4893_v53 = vpack.c.bf16 %v8856_v29, %v8851_v4  ;;  %v1102_v62 = vadd.f32 %v1101_v46, %v8131_v30  ;;  %v8917_v24 = vld [vmem:[%s10310_s3 + $0x690] sm:$0xff] }
 0x221   : > { %2306 = vmatmul.mubr.f32.gmra.mrb[46].mxu0 %v1885_v23  ;;  %2628 = vmatmul.mubr.f32.gmra.mrb[78].mxu1 %v1885_v23  ;;  %v1713_v5 = vmul.f32 0.70710677, %v8878_v9  ;;  %v1890_v52 = vmul.f32 %v1826_v34, %v1634_v13  ;;  %v10495_v20 = vpack.c.bf16 %v8604_v55, %v8599_v2  ;;  %v10496_v11 = vpack.c.bf16 %v8622_v51, %v8617_v10  ;;  %v8922_v23 = vld [vmem:[%s10310_s3 + $0x6b0] sm:$0xff] }
 0x222   : > { %v5021_v25 = vpack.c.bf16 %v8874_v48, %v8869_v47  ;;  %v1829_v2 = vadd.f32 1.0, %v5800_v60  ;;  %v1714_v55 = vmul.f32 0.70710677, %v8882_v40  ;;  %v1104_v10 = vadd.f32 %v1103_v61, %v8136_v44  ;;  %v8947_v60 = vld [vmem:[%s10310_s3 + $0x6c8] sm:$0xff]  ;;  %v2148_v47 = vld [vmem:[%s10310_s3 + $0x718] sm:$0xff] }
 0x223   : > { %4884 = vmatpush1.bf16.msra.mxu0 %v10495_v20  ;;  %5012 = vmatpush1.bf16.msra.mxu1 %v10496_v11  ;;  %v1889_v51 = vmul.f32 %v1825_v57, %v1633_v26  ;;  %v10497_v63 = vpack.c.bf16 %v8656_v3, %v8651_v18  ;;  %v10498_v41 = vpack.c.bf16 %v8674_v16, %v8669_v50  ;;  %v1638_v57 = vmul.f32 0.5, %v8734_v17  ;;  %v1107_v16 = vpop.f32.mrb[28].mxu1  ;;  %v8965_v20 = vld [vmem:[%s10310_s3 + $0x6d8] sm:$0xff] }
 0x224   : > { %v1830_v19 = vadd.f32 1.0, %v5802_v12  ;;  %5811 = verf.f32 %v1713_v5  ;;  %v8926_v18 = vadd.f32 %v8632_v14, %v1102_v62  ;;  %2311 = vmatprep.mubr.f32.mxu0 %v1890_v52  ;;  %2633 = vmatprep.mubr.f32.mxu1 %v1890_v52  ;;  %v1637_v3 = vmul.f32 0.5, %v8730_v22  ;;  %v5804_v17 = vpop.eup %5803  ;;  %v1109_v34 = vpop.f32.mrb[29].mxu1  ;;  %v8952_v5 = vld [vmem:[%s10310_s3 + $0x6e8] sm:$0xff]  ;;  %v8970_v11 = vld [vmem:[%s10310_s3 + $0x6f8] sm:$0xff] }
 0x225   : > { %4886 = vmatprep.subr.bf16.mxu0 %v10497_v63  ;;  %5014 = vmatprep.subr.bf16.mxu1 %v10498_v41  ;;  %5813 = verf.f32 %v1714_v55  ;;  %v8930_v50 = vadd.f32 %v8638_v35, %v1104_v10  ;;  %v4895_v58 = vpack.c.bf16 %v8904_v21, %v8899_v31  ;;  %v1108_v14 = vadd.f32 %v1107_v16, %v8131_v30  ;;  %v5806_v62 = vpop.eup %5805  ;;  %v2143_v41 = vld [vmem:[%s10310_s3 + $0x6f0] sm:$0xff]  ;;  %v2152_v48 = vld [vmem:[%s10310_s3 + $0x738] sm:$0xff] }
 0x226   : > { %2312 = vmatmul.mubr.f32.gmra.mrb[48].mxu0 %v1889_v51  ;;  %2634 = vmatmul.mubr.f32.gmra.mrb[80].mxu1 %v1889_v51  ;;  %v1717_v13 = vmul.f32 0.70710677, %v8926_v18  ;;  %v1894_v26 = vmul.f32 %v1830_v19, %v1638_v57  ;;  %v10499_v22 = vpack.c.bf16 %v8708_v49, %v8703_v43  ;;  %v10500_v35 = vpack.c.bf16 %v8726_v27, %v8721_v7  ;;  %v2146_v57 = vld [vmem:[%s10310_s3 + $0x708] sm:$0xff] }
 0x227   : > { %v5023_v46 = vpack.c.bf16 %v8922_v23, %v8917_v24  ;;  %v1833_v43 = vadd.f32 1.0, %v5804_v17  ;;  %v1718_v49 = vmul.f32 0.70710677, %v8930_v50  ;;  %v1110_v7 = vadd.f32 %v1109_v34, %v8136_v44  ;;  %v2149_v34 = vld [vmem:[%s10310_s3 + $0x720] sm:$0xff]  ;;  %v2147_v24 = vld [vmem:[%s10310_s3 + $0x710] sm:$0xff] }
 0x228   : > { %4888 = vmatpush1.bf16.msra.mxu0 %v10499_v22  ;;  %5016 = vmatpush1.bf16.msra.mxu1 %v10500_v35  ;;  %v1893_v27 = vmul.f32 %v1829_v2, %v1637_v3  ;;  %v10501_v61 = vpack.c.bf16 %v8760_v32, %v8755_v15  ;;  %v10502_v52 = vpack.c.bf16 %v8778_v36, %v8773_v59  ;;  %v1642_v12 = vmul.f32 0.5, %v8786_v39  ;;  %v1113_v36 = vpop.f32.mrb[30].mxu1  ;;  %v2151_v23 = vld [vmem:[%s10310_s3 + $0x730] sm:$0xff] }
 0x229   : > { %v1834_v2 = vadd.f32 1.0, %v5806_v62  ;;  %5815 = verf.f32 %v1717_v13  ;;  %v8974_v15 = vadd.f32 %v8684_v38, %v1108_v14  ;;  %2317 = vmatprep.mubr.f32.mxu0 %v1894_v26  ;;  %2639 = vmatprep.mubr.f32.mxu1 %v1894_v26  ;;  %v1641_v59 = vmul.f32 0.5, %v8782_v1  ;;  %v5808_v39 = vpop.eup %5807  ;;  %v1115_v51 = vpop.f32.mrb[31].mxu1  ;;  %v2137_v1 = vld [vmem:[%s10310_s3 + $0x6c0] sm:$0xff]  ;;  %v2156_v62 = vld [vmem:[%s10310_s3 + $0x758] sm:$0xff] }
 0x22a   : > { %4890 = vmatprep.subr.bf16.mxu0 %v10501_v61  ;;  %5018 = vmatprep.subr.bf16.mxu1 %v10502_v52  ;;  %5817 = verf.f32 %v1718_v49  ;;  %v8978_v32 = vadd.f32 %v8690_v56, %v1110_v7  ;;  %v4897_v55 = vpack.c.bf16 %v8952_v5, %v8947_v60  ;;  %v1114_v38 = vadd.f32 %v1113_v36, %v8131_v30  ;;  %v2141_v30 = vld [vmem:[%s10310_s3 + $0x6e0] sm:$0xff]  ;;  %v5810_v37 = vpop.eup %5809  ;;  %v2158_v5 = vld [vmem:[%s10310_s3 + $0x768] sm:$0xff]  ;;  %v2155_v36 = vld [vmem:[%s10310_s3 + $0x750] sm:$0xff] }
 0x22b   : > { %2318 = vmatmul.mubr.f32.gmra.mrb[50].mxu0 %v1893_v27  ;;  %2640 = vmatmul.mubr.f32.gmra.mrb[82].mxu1 %v1893_v27  ;;  %v1721_v10 = vmul.f32 0.70710677, %v8974_v15  ;;  %v1898_v63 = vmul.f32 %v1834_v2, %v1642_v12  ;;  %v5025_v56 = vpack.c.bf16 %v8970_v11, %v8965_v20  ;;  %v1116_v54 = vadd.f32 %v1115_v51, %v8136_v44  ;;  %v2150_v44 = vld [vmem:[%s10310_s3 + $0x728] sm:$0xff]  ;;  %v2145_v14 = vld [vmem:[%s10310_s3 + $0x700] sm:$0xff] }
 0x22c   : > { %4892 = vmatpush1.bf16.msra.mxu0 %v4891_v6  ;;  %5020 = vmatpush1.bf16.msra.mxu1 %v5019_v8  ;;  %v1837_v6 = vadd.f32 1.0, %v5808_v39  ;;  %v1722_v33 = vmul.f32 0.70710677, %v8978_v32  ;;  %v1897_v8 = vmul.f32 %v1833_v43, %v1641_v59  ;;  %v1646_v19 = vmul.f32 0.5, %v8834_v0  ;;  %v2160_v43 = vld [vmem:[%s10310_s3 + $0x778] sm:$0xff]  ;;  %v2153_v52 = vld [vmem:[%s10310_s3 + $0x740] sm:$0xff] }
 0x22d   : > { %4894 = vmatprep.subr.bf16.mxu0 %v4893_v53  ;;  %5022 = vmatprep.subr.bf16.mxu1 %v5021_v25  ;;  %v1838_v4 = vadd.f32 1.0, %v5810_v37  ;;  %5819 = verf.f32 %v1721_v10  ;;  %v9020_v29 = vadd.f32 %v8736_v42, %v1114_v38  ;;  %v1645_v53 = vmul.f32 0.5, %v8830_v28  ;;  %v10503_v25 = vld [vmem:[#allocation42_spill] sm:$0xff]  ;;  %v2157_v20 = vld [vmem:[%s10310_s3 + $0x760] sm:$0xff] }
 0x22e   : > { %2323 = vmatprep.mubr.f32.mxu0 %v1898_v63  ;;  %2645 = vmatprep.mubr.f32.mxu1 %v1898_v63  ;;  %5821 = verf.f32 %v1722_v33  ;;  %v9030_v0 = vadd.f32 %v10503_v25, %v1116_v54  ;;  %v4899_v42 = vpack.c.bf16 %v2141_v30, %v2137_v1  ;;  %v5812_v3 = vpop.eup %5811  ;;  %v5027_v28 = vpack.c.bf16 %v2143_v41, %v2139_v45  ;;  %v2162_v39 = vld [vmem:[%s10310_s3 + $0x788] sm:$0xff]  ;;  %v2164_v63 = vld [vmem:[%s10310_s3 + $0x798] sm:$0xff]  ;;  %v2165_v33 = vld [vmem:[%s10310_s3 + $0x7a0] sm:$0xff] }
 0x22f   : > { %2324 = vmatmul.mubr.f32.gmra.mrb[52].mxu0 %v1897_v8  ;;  %2646 = vmatmul.mubr.f32.gmra.mrb[84].mxu1 %v1897_v8  ;;  %v1725_v16 = vmul.f32 0.70710677, %v9020_v29  ;;  %v1902_v17 = vmul.f32 %v1838_v4, %v1646_v19  ;;  %v4901_v13 = vpack.c.bf16 %v2150_v44, %v2146_v57  ;;  %v5814_v26 = vpop.eup %5813  ;;  %v1841_v22 = vadd.f32 1.0, %v5812_v3  ;;  %v2166_v51 = vld [vmem:[%s10310_s3 + $0x7a8] sm:$0xff]  ;;  %v2163_v44 = vld [vmem:[%s10310_s3 + $0x790] sm:$0xff]  ;;  %v2172_v25 = vld [vmem:[%s10310_s3 + $0x7d8] sm:$0xff] }
 0x230   : > { %4896 = vmatpush1.bf16.msra.mxu0 %v4895_v58  ;;  %5024 = vmatpush1.bf16.msra.mxu1 %v5023_v46  ;;  %v1726_v35 = vmul.f32 0.70710677, %v9030_v0  ;;  %v1901_v31 = vmul.f32 %v1837_v6, %v1645_v53  ;;  %v5029_v21 = vpack.c.bf16 %v2152_v48, %v2148_v47  ;;  %v2154_v58 = vld [vmem:[%s10310_s3 + $0x748] sm:$0xff]  ;;  %v1650_v46 = vmul.f32 0.5, %v8882_v40  ;;  %v2161_v6 = vld [vmem:[%s10310_s3 + $0x780] sm:$0xff]  ;;  %v2167_v19 = vld [vmem:[%s10310_s3 + $0x7b0] sm:$0xff] }
 0x231   : > { %4898 = vmatprep.subr.bf16.mxu0 %v4897_v55  ;;  %5026 = vmatprep.subr.bf16.mxu1 %v5025_v56  ;;  %v1842_v60 = vadd.f32 1.0, %v5814_v26  ;;  %5823 = verf.f32 %v1725_v16  ;;  %v1649_v49 = vmul.f32 0.5, %v8878_v9  ;;  %v4903_v27 = vpack.c.bf16 %v2149_v34, %v2145_v14  ;;  %v2159_v55 = vld [vmem:[%s10310_s3 + $0x770] sm:$0xff]  ;;  %v2168_v56 = vld [vmem:[%s10310_s3 + $0x7b8] sm:$0xff]  ;;  %v2170_v4 = vld [vmem:[%s10310_s3 + $0x7c8] sm:$0xff] }
 0x232   : > { %2329 = vmatprep.mubr.f32.mxu0 %v1902_v17  ;;  %2651 = vmatprep.mubr.f32.mxu1 %v1902_v17  ;;  %5825 = verf.f32 %v1726_v35  ;;  %v5031_v61 = vpack.c.bf16 %v2151_v23, %v2147_v24  ;;  %v4905_v2 = vpack.c.bf16 %v2158_v5, %v2154_v58  ;;  %v5033_v59 = vpack.c.bf16 %v2160_v43, %v2156_v62  ;;  %v2174_v53 = vld [vmem:[%s10310_s3 + $0x7e8] sm:$0xff] }
 0x233   : > { %2330 = vmatmul.mubr.f32.gmra.mrb[54].mxu0 %v1901_v31  ;;  %2652 = vmatmul.mubr.f32.gmra.mrb[86].mxu1 %v1901_v31  ;;  %v5816_v40 = vpop.eup %5815  ;;  %v1906_v7 = vmul.f32 %v1842_v60, %v1650_v46  ;;  %v1905_v9 = vmul.f32 %v1841_v22, %v1649_v49  ;;  %v1654_v10 = vmul.f32 0.5, %v8930_v50  ;;  %v1653_v1 = vmul.f32 0.5, %v8926_v18  ;;  %v2171_v31 = vld [vmem:[%s10310_s3 + $0x7d0] sm:$0xff]  ;;  %v3164_v43 = vld [vmem:[#allocation6 + $0x8] sm:$0xff]  ;;  %v3166_v49 = vld [vmem:[#allocation6 + $0x18] sm:$0xff] }
 0x234   : > { %4900 = vmatpush1.bf16.msra.mxu0 %v4899_v42  ;;  %5028 = vmatpush1.bf16.msra.mxu1 %v5027_v28  ;;  %v5818_v11 = vpop.eup %5817  ;;  %v1845_v12 = vadd.f32 1.0, %v5816_v40  ;;  %v4907_v45 = vpack.c.bf16 %v2157_v20, %v2153_v52  ;;  %v5035_v37 = vpack.c.bf16 %v2159_v55, %v2155_v36  ;;  %v4909_v18 = vpack.c.bf16 %v2166_v51, %v2162_v39  ;;  %v2176_v42 = vld [vmem:[%s10310_s3 + $0x7f8] sm:$0xff] }
 0x235   : > { %4902 = vmatprep.subr.bf16.mxu0 %v4901_v13  ;;  %5030 = vmatprep.subr.bf16.mxu1 %v5029_v21  ;;  %v1846_v38 = vadd.f32 1.0, %v5818_v11  ;;  %v5037_v57 = vpack.c.bf16 %v2168_v56, %v2164_v63  ;;  %v1658_v47 = vmul.f32 0.5, %v8978_v32  ;;  %v1657_v3 = vmul.f32 0.5, %v8974_v15  ;;  %v2169_v13 = vld [vmem:[%s10310_s3 + $0x7c0] sm:$0xff]  ;;  %v2175_v21 = vld [vmem:[%s10310_s3 + $0x7f0] sm:$0xff] }
 0x236   : > { %2335 = vmatprep.mubr.f32.mxu0 %v1906_v7  ;;  %2657 = vmatprep.mubr.f32.mxu1 %v1906_v7  ;;  %v1909_v41 = vmul.f32 %v1845_v12, %v1653_v1  ;;  %v4911_v17 = vpack.c.bf16 %v2165_v33, %v2161_v6  ;;  %v5039_v28 = vpack.c.bf16 %v2167_v19, %v2163_v44  ;;  %v2173_v15 = vld [vmem:[%s10310_s3 + $0x7e0] sm:$0xff]  ;;  %v1662_v24 = vmul.f32 0.5, %v9030_v0 }
 0x237   : > { %2336 = vmatmul.mubr.f32.gmra.mrb[56].mxu0 %v1905_v9  ;;  %2658 = vmatmul.mubr.f32.gmra.mrb[88].mxu1 %v1905_v9  ;;  %v5820_v50 = vpop.eup %5819  ;;  %v1910_v30 = vmul.f32 %v1846_v38, %v1654_v10  ;;  %v4913_v22 = vpack.c.bf16 %v2174_v53, %v2170_v4  ;;  %v5041_v35 = vpack.c.bf16 %v2176_v42, %v2172_v25  ;;  %v1661_v58 = vmul.f32 0.5, %v9020_v29  ;;  %v10504_v29 = vld [vmem:[#allocation29_spill] sm:$0xff] }
 0x238   : > { %4904 = vmatpush1.bf16.msra.mxu0 %v4903_v27  ;;  %5032 = vmatpush1.bf16.msra.mxu1 %v5031_v61  ;;  %v5822_v54 = vpop.eup %5821  ;;  %v1849_v8 = vadd.f32 1.0, %v5820_v50  ;;  %v4915_v60 = vpack.c.bf16 %v2173_v15, %v2169_v13  ;;  %v5043_v5 = vpack.c.bf16 %v2175_v21, %v2171_v31  ;;  %v5045_v0 = vpack.c.bf16 %v3166_v49, %v3164_v43  ;;  %v6051_v27 = vld [vmem:[%s10414_s6] sm:$0xf]  ;;  %v3174_v43 = vld [vmem:[#allocation6 + $0x58] sm:$0xff] }
 0x239   : > { %4906 = vmatprep.subr.bf16.mxu0 %v4905_v2  ;;  %5034 = vmatprep.subr.bf16.mxu1 %v5033_v59  ;;  %v1850_v48 = vadd.f32 1.0, %v5822_v54  ;;  %v10371_v40 = vsub.s32 2, %v10504_v29  ;;  %v10372_v7 = vsub.s32 3, %v10504_v29  ;;  %v3163_v4 = vld [vmem:[#allocation6] sm:$0xff] }
 0x23a   : > { %2341 = vmatprep.mubr.f32.mxu0 %v1910_v30  ;;  %2663 = vmatprep.mubr.f32.mxu1 %v1910_v30  ;;  %v1913_v26 = vmul.f32 %v1849_v8, %v1657_v3  ;;  %v3168_v3 = vld [vmem:[#allocation6 + $0x28] sm:$0xff] }
 0x23b   : > { %2342 = vmatmul.mubr.f32.gmra.mrb[58].mxu0 %v1909_v41  ;;  %2664 = vmatmul.mubr.f32.gmra.mrb[90].mxu1 %v1909_v41  ;;  %v5824_v32 = vpop.eup %5823  ;;  %v1914_v16 = vmul.f32 %v1850_v48, %v1658_v47  ;;  %v9139_v61 = vrot.slane %v6051_v27, %v10371_v40  ;;  %v9143_v52 = vrot.slane %v6051_v27, %v10372_v7  ;;  %v3165_v47 = vld [vmem:[#allocation6 + $0x10] sm:$0xff] }
 0x23c   : > { %4908 = vmatpush1.bf16.msra.mxu0 %v4907_v45  ;;  %5036 = vmatpush1.bf16.msra.mxu1 %v5035_v37  ;;  %v5826_v14 = vpop.eup %5825  ;;  %v1853_v34 = vadd.f32 1.0, %v5824_v32  ;;  %v3170_v32 = vld [vmem:[#allocation6 + $0x38] sm:$0xff] }
 0x23d   : > { %4910 = vmatprep.subr.bf16.mxu0 %v4909_v18  ;;  %5038 = vmatprep.subr.bf16.mxu1 %v5037_v57  ;;  %v1854_v23 = vadd.f32 1.0, %v5826_v14  ;;  %v5049_v21 = vpack.c.bf16 %v3170_v32, %v3168_v3 }
 0x23e   : > { %2347 = vmatprep.mubr.f32.mxu0 %v1914_v16  ;;  %2669 = vmatprep.mubr.f32.mxu1 %v1914_v16  ;;  %v1917_v62 = vmul.f32 %v1853_v34, %v1661_v58  ;;  %v5047_v34 = vpack.c.bf16 %v3165_v47, %v3163_v4 }
 0x23f   : > { %2348 = vmatmul.mubr.f32.gmra.mrb[60].mxu0 %v1913_v26  ;;  %2670 = vmatmul.mubr.f32.gmra.mrb[92].mxu1 %v1913_v26  ;;  %v1918_v46 = vmul.f32 %v1854_v23, %v1662_v24  ;;  %v3167_v24 = vld [vmem:[#allocation6 + $0x20] sm:$0xff]  ;;  %v3169_v23 = vld [vmem:[#allocation6 + $0x30] sm:$0xff] }
 0x240   : > { %4912 = vmatpush1.bf16.msra.mxu0 %v4911_v17  ;;  %5040 = vmatpush1.bf16.msra.mxu1 %v5039_v28 }
 0x241   : > { %4914 = vmatprep.subr.bf16.mxu0 %v4913_v22  ;;  %5042 = vmatprep.subr.bf16.mxu1 %v5041_v35 }
 0x242   : > { %2353 = vmatprep.mubr.f32.mxu0 %v1918_v46  ;;  %2675 = vmatprep.mubr.f32.mxu1 %v1918_v46 }
 0x243   : > { %2354 = vmatmul.mubr.f32.gmra.mrb[62].mxu0 %v1917_v62  ;;  %2676 = vmatmul.mubr.f32.gmra.mrb[94].mxu1 %v1917_v62  ;;  %v3172_v62 = vld [vmem:[#allocation6 + $0x48] sm:$0xff] }
 0x244   : > { %4916 = vmatpush1.bf16.msra.mxu0 %v4915_v60  ;;  %5044 = vmatpush1.bf16.msra.mxu1 %v5043_v5 }
 0x245   : > { %5046 = vmatprep.subr.bf16.mxu0 %v5045_v0 }
 0x267   : > { %v1506_v20 = vpop.f32.mrb[32].mxu1 }
 0x268   : > { %v5365_v11 = vadd.f32 %v1506_v20, %v9139_v61  ;;  %v1508_v12 = vpop.f32.mrb[33].mxu1 }
 0x269   : > { %v5366_v9 = vadd.f32 %v1508_v12, %v9143_v52  ;;  %v5051_v12 = vpack.c.bf16 %v3169_v23, %v3167_v24 }
 0x26a   : > { %v1667_v2 = vmul.f32 0.70710677, %v5365_v11  ;;  %v1603_v16 = vmul.f32 0.5, %v5365_v11 }
 0x26b   : > { %v1668_v59 = vmul.f32 0.70710677, %v5366_v9  ;;  %v1512_v36 = vpop.f32.mrb[34].mxu1  ;;  %v1604_v48 = vmul.f32 0.5, %v5366_v9 }
 0x26c   : > { %5827 = verf.f32 %v1667_v2  ;;  %v5367_v55 = vadd.f32 %v1512_v36, %v9139_v61  ;;  %v1514_v39 = vpop.f32.mrb[35].mxu1 }
 0x26d   : > { %5829 = verf.f32 %v1668_v59  ;;  %v5368_v10 = vadd.f32 %v1514_v39, %v9143_v52 }
 0x26e   : > { %v1671_v38 = vmul.f32 0.70710677, %v5367_v55  ;;  %v1607_v49 = vmul.f32 0.5, %v5367_v55  ;;  %v5053_v55 = vpack.c.bf16 %v3174_v43, %v3172_v62 }
 0x26f   : > { %v1672_v51 = vmul.f32 0.70710677, %v5368_v10  ;;  %v1518_v63 = vpop.f32.mrb[36].mxu1  ;;  %v1608_v58 = vmul.f32 0.5, %v5368_v10  ;;  %v3171_v10 = vld [vmem:[#allocation6 + $0x40] sm:$0xff] }
 0x270   : > { %5831 = verf.f32 %v1671_v38  ;;  %v9150_v56 = vadd.f32 %v1518_v63, %v9139_v61  ;;  %v1520_v1 = vpop.f32.mrb[37].mxu1  ;;  %v3173_v38 = vld [vmem:[#allocation6 + $0x50] sm:$0xff] }
 0x271   : > { %5833 = verf.f32 %v1672_v51  ;;  %v9153_v50 = vadd.f32 %v1520_v1, %v9143_v52 }
 0x272   : > { %v1675_v30 = vmul.f32 0.70710677, %v9150_v56 }
 0x273   : > { %v1676_v45 = vmul.f32 0.70710677, %v9153_v50  ;;  %v1524_v37 = vpop.f32.mrb[38].mxu1  ;;  %v1612_v51 = vmul.f32 0.5, %v9153_v50 }
 0x274   : > { %5835 = verf.f32 %v1675_v30  ;;  %v9158_v6 = vadd.f32 %v1524_v37, %v9139_v61  ;;  %v1526_v33 = vpop.f32.mrb[39].mxu1  ;;  %v3178_v37 = vld [vmem:[#allocation6 + $0x78] sm:$0xff] }
 0x275   : > { %5837 = verf.f32 %v1676_v45  ;;  %v9161_v54 = vadd.f32 %v1526_v33, %v9143_v52  ;;  %v3176_v45 = vld [vmem:[#allocation6 + $0x68] sm:$0xff]  ;;  %v1611_v33 = vmul.f32 0.5, %v9150_v56 }
 0x276   : > { %v5828_v8 = vpop.eup %5827  ;;  %v1679_v41 = vmul.f32 0.70710677, %v9158_v6  ;;  %v5057_v56 = vpack.c.bf16 %v3178_v37, %v3176_v45 }
 0x277   : > { %v5830_v18 = vpop.eup %5829  ;;  %v1795_v57 = vadd.f32 1.0, %v5828_v8  ;;  %v1680_v44 = vmul.f32 0.70710677, %v9161_v54  ;;  %v1530_v19 = vpop.f32.mrb[40].mxu1  ;;  %v1616_v3 = vmul.f32 0.5, %v9161_v54 }
 0x278   : > { %v1796_v53 = vadd.f32 1.0, %v5830_v18  ;;  %5839 = verf.f32 %v1679_v41  ;;  %v9166_v25 = vadd.f32 %v1530_v19, %v9139_v61  ;;  %v1532_v42 = vpop.f32.mrb[41].mxu1 }
 0x279   : > { %5841 = verf.f32 %v1680_v44  ;;  %v9169_v17 = vadd.f32 %v1532_v42, %v9143_v52  ;;  %v1859_v22 = vmul.f32 %v1795_v57, %v1603_v16  ;;  %v5055_v57 = vpack.c.bf16 %v3173_v38, %v3171_v10  ;;  %v3177_v42 = vld [vmem:[#allocation6 + $0x70] sm:$0xff] }
 0x27a   : > { %v5832_v28 = vpop.eup %5831  ;;  %v1683_v13 = vmul.f32 0.70710677, %v9166_v25  ;;  %v1860_v14 = vmul.f32 %v1796_v53, %v1604_v48  ;;  %v3175_v53 = vld [vmem:[#allocation6 + $0x60] sm:$0xff] }
 0x27b   : > { %v5834_v26 = vpop.eup %5833  ;;  %v1799_v35 = vadd.f32 1.0, %v5832_v28  ;;  %v1684_v15 = vmul.f32 0.70710677, %v9169_v17  ;;  %v1536_v31 = vpop.f32.mrb[42].mxu1  ;;  %v1620_v62 = vmul.f32 0.5, %v9169_v17 }
 0x27c   : > { %v1800_v46 = vadd.f32 1.0, %v5834_v26  ;;  %5843 = verf.f32 %v1683_v13  ;;  %v9174_v60 = vadd.f32 %v1536_v31, %v9139_v61  ;;  %v1538_v5 = vpop.f32.mrb[43].mxu1  ;;  %2424 = vmatprep.mubr.f32.mxu0 %v1860_v14  ;;  %2746 = vmatprep.mubr.f32.mxu1 %v1860_v14  ;;  %v3180_v13 = vld [vmem:[#allocation6 + $0x88] sm:$0xff]  ;;  %v3182_v14 = vld [vmem:[#allocation6 + $0x98] sm:$0xff] }
 0x27d   : > { %5845 = verf.f32 %v1684_v15  ;;  %v9177_v0 = vadd.f32 %v1538_v5, %v9143_v52  ;;  %2425 = vmatmul.mubr.f32.vlgmr.msra.gmra.mrb[32].mxu0 %v1859_v22  ;;  %2747 = vmatmul.mubr.f32.vlgmr.msra.gmra.mrb[64].mxu1 %v1859_v22  ;;  %v1863_v39 = vmul.f32 %v1799_v35, %v1607_v49  ;;  %v5059_v15 = vpack.c.bf16 %v3177_v42, %v3175_v53  ;;  %v3181_v5 = vld [vmem:[#allocation6 + $0x90] sm:$0xff] }
 0x27e   : > { %v5836_v27 = vpop.eup %5835  ;;  %v1687_v20 = vmul.f32 0.70710677, %v9174_v60  ;;  %v1864_v11 = vmul.f32 %v1800_v46, %v1608_v58  ;;  %5048 = vmatpush1.bf16.msra.mxu0 %v5047_v34  ;;  %v1615_v34 = vmul.f32 0.5, %v9158_v6  ;;  %v5061_v6 = vpack.c.bf16 %v3182_v14, %v3180_v13  ;;  %v3179_v46 = vld [vmem:[#allocation6 + $0x80] sm:$0xff] }
 0x27f   : > { %v5838_v9 = vpop.eup %5837  ;;  %v1803_v2 = vadd.f32 1.0, %v5836_v27  ;;  %v1688_v59 = vmul.f32 0.70710677, %v9177_v0  ;;  %v1542_v36 = vpop.f32.mrb[44].mxu1  ;;  %5050 = vmatprep.subr.bf16.mxu0 %v5049_v21  ;;  %v1624_v45 = vmul.f32 0.5, %v9177_v0 }
 0x280   : > { %v1804_v63 = vadd.f32 1.0, %v5838_v9  ;;  %5847 = verf.f32 %v1687_v20  ;;  %v9183_v1 = vadd.f32 %v1542_v36, %v9139_v61  ;;  %v1544_v30 = vpop.f32.mrb[45].mxu1  ;;  %2430 = vmatprep.mubr.f32.mxu0 %v1864_v11  ;;  %2752 = vmatprep.mubr.f32.mxu1 %v1864_v11  ;;  %v3184_v20 = vld [vmem:[#allocation6 + $0xa8] sm:$0xff]  ;;  %v3186_v11 = vld [vmem:[#allocation6 + $0xb8] sm:$0xff]  ;;  %v5063_v36 = vpack.c.bf16 %v3181_v5, %v3179_v46 }
 0x281   : > { %5849 = verf.f32 %v1688_v59  ;;  %v9187_v8 = vadd.f32 %v1544_v30, %v9143_v52  ;;  %2431 = vmatmul.mubr.f32.gmra.mrb[34].mxu0 %v1863_v39  ;;  %2753 = vmatmul.mubr.f32.gmra.mrb[66].mxu1 %v1863_v39  ;;  %v1867_v48 = vmul.f32 %v1803_v2, %v1611_v33  ;;  %v3185_v30 = vld [vmem:[#allocation6 + $0xb0] sm:$0xff] }
 0x282   : > { %v5840_v41 = vpop.eup %5839  ;;  %v1691_v50 = vmul.f32 0.70710677, %v9183_v1  ;;  %v1868_v18 = vmul.f32 %v1804_v63, %v1612_v51  ;;  %5052 = vmatpush1.bf16.msra.mxu0 %v5051_v12  ;;  %v1619_v12 = vmul.f32 0.5, %v9166_v25  ;;  %v5065_v25 = vpack.c.bf16 %v3186_v11, %v3184_v20  ;;  %v3183_v63 = vld [vmem:[#allocation6 + $0xa0] sm:$0xff] }
 0x283   : > { %v5842_v44 = vpop.eup %5841  ;;  %v1807_v19 = vadd.f32 1.0, %v5840_v41  ;;  %v1692_v4 = vmul.f32 0.70710677, %v9187_v8  ;;  %v1548_v47 = vpop.f32.mrb[46].mxu1  ;;  %5054 = vmatprep.subr.bf16.mxu0 %v5053_v55  ;;  %v1628_v13 = vmul.f32 0.5, %v9187_v8 }
 0x284   : > { %v1808_v32 = vadd.f32 1.0, %v5842_v44  ;;  %5851 = verf.f32 %v1691_v50  ;;  %v9193_v16 = vadd.f32 %v1548_v47, %v9139_v61  ;;  %v1550_v28 = vpop.f32.mrb[47].mxu1  ;;  %2436 = vmatprep.mubr.f32.mxu0 %v1868_v18  ;;  %2758 = vmatprep.mubr.f32.mxu1 %v1868_v18  ;;  %v3188_v50 = vld [vmem:[#allocation6 + $0xc8] sm:$0xff]  ;;  %v3190_v18 = vld [vmem:[#allocation6 + $0xd8] sm:$0xff]  ;;  %v5067_v47 = vpack.c.bf16 %v3185_v30, %v3183_v63 }
 0x285   : > { %5853 = verf.f32 %v1692_v4  ;;  %v9197_v26 = vadd.f32 %v1550_v28, %v9143_v52  ;;  %2437 = vmatmul.mubr.f32.gmra.mrb[36].mxu0 %v1867_v48  ;;  %2759 = vmatmul.mubr.f32.gmra.mrb[68].mxu1 %v1867_v48  ;;  %v1871_v58 = vmul.f32 %v1807_v19, %v1615_v34  ;;  %v3189_v28 = vld [vmem:[#allocation6 + $0xd0] sm:$0xff] }
 0x286   : > { %v5844_v22 = vpop.eup %5843  ;;  %v1695_v54 = vmul.f32 0.70710677, %v9193_v16  ;;  %v1872_v35 = vmul.f32 %v1808_v32, %v1616_v3  ;;  %5056 = vmatpush1.bf16.msra.mxu0 %v5055_v57  ;;  %v1623_v57 = vmul.f32 0.5, %v9174_v60  ;;  %v5069_v60 = vpack.c.bf16 %v3190_v18, %v3188_v50  ;;  %v3187_v32 = vld [vmem:[#allocation6 + $0xc0] sm:$0xff] }
 0x287   : > { %v5846_v31 = vpop.eup %5845  ;;  %v1811_v21 = vadd.f32 1.0, %v5844_v22  ;;  %v1696_v24 = vmul.f32 0.70710677, %v9197_v26  ;;  %v1554_v23 = vpop.f32.mrb[48].mxu1  ;;  %5058 = vmatprep.subr.bf16.mxu0 %v5057_v56  ;;  %v1632_v20 = vmul.f32 0.5, %v9197_v26 }
 0x288   : > { %v1812_v43 = vadd.f32 1.0, %v5846_v31  ;;  %5855 = verf.f32 %v1695_v54  ;;  %v9203_v49 = vadd.f32 %v1554_v23, %v9139_v61  ;;  %v1556_v27 = vpop.f32.mrb[49].mxu1  ;;  %2442 = vmatprep.mubr.f32.mxu0 %v1872_v35  ;;  %2764 = vmatprep.mubr.f32.mxu1 %v1872_v35  ;;  %v3192_v54 = vld [vmem:[#allocation6 + $0xe8] sm:$0xff]  ;;  %v3194_v35 = vld [vmem:[#allocation6 + $0xf8] sm:$0xff]  ;;  %v5071_v23 = vpack.c.bf16 %v3189_v28, %v3187_v32 }
 0x289   : > { %5857 = verf.f32 %v1696_v24  ;;  %v9207_v9 = vadd.f32 %v1556_v27, %v9143_v52  ;;  %2443 = vmatmul.mubr.f32.gmra.mrb[38].mxu0 %v1871_v58  ;;  %2765 = vmatmul.mubr.f32.gmra.mrb[70].mxu1 %v1871_v58  ;;  %v1875_v51 = vmul.f32 %v1811_v21, %v1619_v12  ;;  %v3193_v27 = vld [vmem:[#allocation6 + $0xf0] sm:$0xff] }
 0x28a   : > { %v5848_v2 = vpop.eup %5847  ;;  %v1699_v17 = vmul.f32 0.70710677, %v9203_v49  ;;  %v1876_v59 = vmul.f32 %v1812_v43, %v1620_v62  ;;  %5060 = vmatpush1.bf16.msra.mxu0 %v5059_v15  ;;  %v1627_v15 = vmul.f32 0.5, %v9183_v1  ;;  %v5073_v1 = vpack.c.bf16 %v3194_v35, %v3192_v54  ;;  %v3191_v43 = vld [vmem:[#allocation6 + $0xe0] sm:$0xff] }
 0x28b   : > { %v5850_v39 = vpop.eup %5849  ;;  %v1815_v55 = vadd.f32 1.0, %v5848_v2  ;;  %v1700_v10 = vmul.f32 0.70710677, %v9207_v9  ;;  %v1560_v38 = vpop.f32.mrb[50].mxu1  ;;  %5062 = vmatprep.subr.bf16.mxu0 %v5061_v6  ;;  %v1636_v50 = vmul.f32 0.5, %v9207_v9 }
 0x28c   : > { %v1816_v37 = vadd.f32 1.0, %v5850_v39  ;;  %5859 = verf.f32 %v1699_v17  ;;  %v9213_v33 = vadd.f32 %v1560_v38, %v9139_v61  ;;  %v1562_v41 = vpop.f32.mrb[51].mxu1  ;;  %2448 = vmatprep.mubr.f32.mxu0 %v1876_v59  ;;  %2770 = vmatprep.mubr.f32.mxu1 %v1876_v59  ;;  %v3196_v17 = vld [vmem:[#allocation6 + $0x108] sm:$0xff]  ;;  %v3198_v59 = vld [vmem:[#allocation6 + $0x118] sm:$0xff]  ;;  %v5075_v38 = vpack.c.bf16 %v3193_v27, %v3191_v43 }
 0x28d   : > { %5861 = verf.f32 %v1700_v10  ;;  %v9217_v44 = vadd.f32 %v1562_v41, %v9143_v52  ;;  %2449 = vmatmul.mubr.f32.gmra.mrb[40].mxu0 %v1875_v51  ;;  %2771 = vmatmul.mubr.f32.gmra.mrb[72].mxu1 %v1875_v51  ;;  %v1879_v3 = vmul.f32 %v1815_v55, %v1623_v57  ;;  %v3197_v41 = vld [vmem:[#allocation6 + $0x110] sm:$0xff] }
 0x28e   : > { %v5852_v19 = vpop.eup %5851  ;;  %v1703_v0 = vmul.f32 0.70710677, %v9213_v33  ;;  %v1880_v4 = vmul.f32 %v1816_v37, %v1624_v45  ;;  %5064 = vmatpush1.bf16.msra.mxu0 %v5063_v36  ;;  %v1631_v36 = vmul.f32 0.5, %v9193_v16  ;;  %v5077_v16 = vpack.c.bf16 %v3198_v59, %v3196_v17  ;;  %v3195_v37 = vld [vmem:[#allocation6 + $0x100] sm:$0xff] }
 0x28f   : > { %v5854_v48 = vpop.eup %5853  ;;  %v1819_v56 = vadd.f32 1.0, %v5852_v19  ;;  %v1704_v53 = vmul.f32 0.70710677, %v9217_v44  ;;  %v1566_v42 = vpop.f32.mrb[52].mxu1  ;;  %5066 = vmatprep.subr.bf16.mxu0 %v5065_v25  ;;  %v1640_v54 = vmul.f32 0.5, %v9217_v44 }
 0x290   : > { %v1820_v14 = vadd.f32 1.0, %v5854_v48  ;;  %5863 = verf.f32 %v1703_v0  ;;  %v9223_v34 = vadd.f32 %v1566_v42, %v9139_v61  ;;  %v1568_v22 = vpop.f32.mrb[53].mxu1  ;;  %2454 = vmatprep.mubr.f32.mxu0 %v1880_v4  ;;  %2776 = vmatprep.mubr.f32.mxu1 %v1880_v4  ;;  %v3200_v0 = vld [vmem:[#allocation6 + $0x128] sm:$0xff]  ;;  %v3202_v4 = vld [vmem:[#allocation6 + $0x138] sm:$0xff]  ;;  %v5079_v42 = vpack.c.bf16 %v3197_v41, %v3195_v37 }
 0x291   : > { %5865 = verf.f32 %v1704_v53  ;;  %v9227_v31 = vadd.f32 %v1568_v22, %v9143_v52  ;;  %2455 = vmatmul.mubr.f32.gmra.mrb[42].mxu0 %v1879_v3  ;;  %2777 = vmatmul.mubr.f32.gmra.mrb[74].mxu1 %v1879_v3  ;;  %v1883_v62 = vmul.f32 %v1819_v56, %v1627_v15  ;;  %v3201_v22 = vld [vmem:[#allocation6 + $0x130] sm:$0xff] }
 0x292   : > { %v5856_v21 = vpop.eup %5855  ;;  %v1707_v8 = vmul.f32 0.70710677, %v9223_v34  ;;  %v1884_v24 = vmul.f32 %v1820_v14, %v1628_v13  ;;  %5068 = vmatpush1.bf16.msra.mxu0 %v5067_v47  ;;  %v1635_v47 = vmul.f32 0.5, %v9203_v49  ;;  %v5081_v49 = vpack.c.bf16 %v3202_v4, %v3200_v0  ;;  %v3199_v14 = vld [vmem:[#allocation6 + $0x120] sm:$0xff] }
 0x293   : > { %v5858_v58 = vpop.eup %5857  ;;  %v1823_v6 = vadd.f32 1.0, %v5856_v21  ;;  %v1708_v46 = vmul.f32 0.70710677, %v9227_v31  ;;  %v1572_v5 = vpop.f32.mrb[54].mxu1  ;;  %5070 = vmatprep.subr.bf16.mxu0 %v5069_v60  ;;  %v1644_v17 = vmul.f32 0.5, %v9227_v31 }
 0x294   : > { %v1824_v11 = vadd.f32 1.0, %v5858_v58  ;;  %5867 = verf.f32 %v1707_v8  ;;  %v9233_v12 = vadd.f32 %v1572_v5, %v9139_v61  ;;  %v1574_v2 = vpop.f32.mrb[55].mxu1  ;;  %2460 = vmatprep.mubr.f32.mxu0 %v1884_v24  ;;  %2782 = vmatprep.mubr.f32.mxu1 %v1884_v24  ;;  %v3204_v8 = vld [vmem:[#allocation6 + $0x148] sm:$0xff]  ;;  %v3206_v24 = vld [vmem:[#allocation6 + $0x158] sm:$0xff]  ;;  %v5083_v5 = vpack.c.bf16 %v3201_v22, %v3199_v14 }
 0x295   : > { %5869 = verf.f32 %v1708_v46  ;;  %v9237_v39 = vadd.f32 %v1574_v2, %v9143_v52  ;;  %2461 = vmatmul.mubr.f32.gmra.mrb[44].mxu0 %v1883_v62  ;;  %2783 = vmatmul.mubr.f32.gmra.mrb[76].mxu1 %v1883_v62  ;;  %v1887_v45 = vmul.f32 %v1823_v6, %v1631_v36  ;;  %v3205_v2 = vld [vmem:[#allocation6 + $0x150] sm:$0xff] }
 0x296   : > { %v5860_v55 = vpop.eup %5859  ;;  %v1711_v26 = vmul.f32 0.70710677, %v9233_v12  ;;  %v1888_v10 = vmul.f32 %v1824_v11, %v1632_v20  ;;  %5072 = vmatpush1.bf16.msra.mxu0 %v5071_v23  ;;  %v1639_v23 = vmul.f32 0.5, %v9213_v33  ;;  %v5085_v33 = vpack.c.bf16 %v3206_v24, %v3204_v8  ;;  %v3203_v11 = vld [vmem:[#allocation6 + $0x140] sm:$0xff] }
 0x297   : > { %v5862_v51 = vpop.eup %5861  ;;  %v1827_v25 = vadd.f32 1.0, %v5860_v55  ;;  %v1712_v63 = vmul.f32 0.70710677, %v9237_v39  ;;  %v1578_v30 = vpop.f32.mrb[56].mxu1  ;;  %5074 = vmatprep.subr.bf16.mxu0 %v5073_v1  ;;  %v5087_v31 = vpack.c.bf16 %v3205_v2, %v3203_v11  ;;  %v1648_v41 = vmul.f32 0.5, %v9237_v39  ;;  %v3207_v2 = vld [vmem:[#allocation6 + $0x160] sm:$0xff] }
 0x298   : > { %v1828_v18 = vadd.f32 1.0, %v5862_v51  ;;  %5871 = verf.f32 %v1711_v26  ;;  %v9243_v57 = vadd.f32 %v1578_v30, %v9139_v61  ;;  %v1580_v19 = vpop.f32.mrb[57].mxu1  ;;  %2466 = vmatprep.mubr.f32.mxu0 %v1888_v10  ;;  %2788 = vmatprep.mubr.f32.mxu1 %v1888_v10  ;;  %v1643_v26 = vmul.f32 0.5, %v9223_v34 }
 0x299   : > { %5873 = verf.f32 %v1712_v63  ;;  %v9247_v48 = vadd.f32 %v1580_v19, %v9143_v52  ;;  %2467 = vmatmul.mubr.f32.gmra.mrb[46].mxu0 %v1887_v45  ;;  %2789 = vmatmul.mubr.f32.gmra.mrb[78].mxu1 %v1887_v45  ;;  %v1891_v13 = vmul.f32 %v1827_v25, %v1635_v47  ;;  %v1647_v19 = vmul.f32 0.5, %v9233_v12 }
 0x29a   : > { %v5864_v56 = vpop.eup %5863  ;;  %v1715_v9 = vmul.f32 0.70710677, %v9243_v57  ;;  %v1892_v53 = vmul.f32 %v1828_v18, %v1636_v50  ;;  %5076 = vmatpush1.bf16.msra.mxu0 %v5075_v38  ;;  %v1651_v12 = vmul.f32 0.5, %v9243_v57 }
 0x29b   : > { %v5866_v3 = vpop.eup %5865  ;;  %v1831_v60 = vadd.f32 1.0, %v5864_v56  ;;  %v1716_v32 = vmul.f32 0.70710677, %v9247_v48  ;;  %v1584_v28 = vpop.f32.mrb[58].mxu1  ;;  %5078 = vmatprep.subr.bf16.mxu0 %v5077_v16 }
 0x29c   : > { %v1832_v35 = vadd.f32 1.0, %v5866_v3  ;;  %5875 = verf.f32 %v1715_v9  ;;  %v9253_v15 = vadd.f32 %v1584_v28, %v9139_v61  ;;  %v1586_v21 = vpop.f32.mrb[59].mxu1  ;;  %2472 = vmatprep.mubr.f32.mxu0 %v1892_v53  ;;  %2794 = vmatprep.mubr.f32.mxu1 %v1892_v53 }
 0x29d   : > { %5877 = verf.f32 %v1716_v32  ;;  %v9257_v58 = vadd.f32 %v1586_v21, %v9143_v52  ;;  %2473 = vmatmul.mubr.f32.gmra.mrb[48].mxu0 %v1891_v13  ;;  %2795 = vmatmul.mubr.f32.gmra.mrb[80].mxu1 %v1891_v13  ;;  %v1895_v20 = vmul.f32 %v1831_v60, %v1639_v23 }
 0x29e   : > { %v5868_v6 = vpop.eup %5867  ;;  %v1719_v44 = vmul.f32 0.70710677, %v9253_v15  ;;  %v1896_v46 = vmul.f32 %v1832_v35, %v1640_v54  ;;  %5080 = vmatpush1.bf16.msra.mxu0 %v5079_v42 }
 0x29f   : > { %v5870_v62 = vpop.eup %5869  ;;  %v1835_v1 = vadd.f32 1.0, %v5868_v6  ;;  %v1720_v43 = vmul.f32 0.70710677, %v9257_v58  ;;  %v1590_v27 = vpop.f32.mrb[60].mxu1  ;;  %5082 = vmatprep.subr.bf16.mxu0 %v5081_v49  ;;  %v1656_v49 = vmul.f32 0.5, %v9257_v58 }
 0x2a0   : > { %v1836_v59 = vadd.f32 1.0, %v5870_v62  ;;  %5879 = verf.f32 %v1719_v44  ;;  %v9263_v36 = vadd.f32 %v1590_v27, %v9139_v61  ;;  %v1592_v55 = vpop.f32.mrb[61].mxu1  ;;  %2478 = vmatprep.mubr.f32.mxu0 %v1896_v46  ;;  %2800 = vmatprep.mubr.f32.mxu1 %v1896_v46 }
 0x2a1   : > { %5881 = verf.f32 %v1720_v43  ;;  %v5394_v10 = vadd.f32 %v1592_v55, %v9143_v52  ;;  %2479 = vmatmul.mubr.f32.gmra.mrb[50].mxu0 %v1895_v20  ;;  %2801 = vmatmul.mubr.f32.gmra.mrb[82].mxu1 %v1895_v20  ;;  %v1899_v37 = vmul.f32 %v1835_v1, %v1643_v26  ;;  %v3208_v20 = vld [vmem:[#allocation6 + $0x168] sm:$0xff]  ;;  %v3214_v55 = vld [vmem:[#allocation6 + $0x198] sm:$0xff] }
 0x2a2   : > { %v5872_v38 = vpop.eup %5871  ;;  %v1723_v51 = vmul.f32 0.70710677, %v9263_v36  ;;  %v1900_v25 = vmul.f32 %v1836_v59, %v1644_v17  ;;  %5084 = vmatpush1.bf16.msra.mxu0 %v5083_v5  ;;  %v1659_v23 = vmul.f32 0.5, %v9263_v36  ;;  %v3209_v17 = vld [vmem:[#allocation6 + $0x170] sm:$0xff]  ;;  %v3212_v36 = vld [vmem:[#allocation6 + $0x188] sm:$0xff] }
 0x2a3   : > { %v5874_v63 = vpop.eup %5873  ;;  %v1839_v30 = vadd.f32 1.0, %v5872_v38  ;;  %v1724_v45 = vmul.f32 0.70710677, %v5394_v10  ;;  %v1596_v16 = vpop.f32.mrb[62].mxu1  ;;  %5086 = vmatprep.subr.bf16.mxu0 %v5085_v33  ;;  %v1660_v8 = vmul.f32 0.5, %v5394_v10  ;;  %v3210_v33 = vld [vmem:[#allocation6 + $0x178] sm:$0xff]  ;;  %v5091_v59 = vpack.c.bf16 %v3209_v17, %v3207_v2 }
 0x2a4   : > { %v1840_v34 = vadd.f32 1.0, %v5874_v63  ;;  %5883 = verf.f32 %v1723_v51  ;;  %v5395_v50 = vadd.f32 %v1596_v16, %v9139_v61  ;;  %v1598_v18 = vpop.f32.mrb[63].mxu1  ;;  %2484 = vmatprep.mubr.f32.mxu0 %v1900_v25  ;;  %2806 = vmatprep.mubr.f32.mxu1 %v1900_v25  ;;  %v1652_v61 = vmul.f32 0.5, %v9247_v48  ;;  %v3211_v10 = vld [vmem:[#allocation6 + $0x180] sm:$0xff]  ;;  %v3213_v38 = vld [vmem:[#allocation6 + $0x190] sm:$0xff]  ;;  %v3216_v25 = vld [vmem:[#allocation6 + $0x1a8] sm:$0xff] }
 0x2a5   : > { %5885 = verf.f32 %v1724_v45  ;;  %v5396_v0 = vadd.f32 %v1598_v18, %v9143_v52  ;;  %2485 = vmatmul.mubr.f32.gmra.mrb[52].mxu0 %v1899_v37  ;;  %2807 = vmatmul.mubr.f32.gmra.mrb[84].mxu1 %v1899_v37  ;;  %v1903_v42 = vmul.f32 %v1839_v30, %v1647_v19  ;;  %v1655_v48 = vmul.f32 0.5, %v9253_v15  ;;  %v3215_v30 = vld [vmem:[#allocation6 + $0x1a0] sm:$0xff]  ;;  %v3217_v45 = vld [vmem:[#allocation6 + $0x1b0] sm:$0xff]  ;;  %v3220_v37 = vld [vmem:[#allocation6 + $0x1c8] sm:$0xff] }
 0x2a6   : > { %v5876_v4 = vpop.eup %5875  ;;  %v1727_v47 = vmul.f32 0.70710677, %v5395_v50  ;;  %v1904_v56 = vmul.f32 %v1840_v34, %v1648_v41  ;;  %5088 = vmatpush1.bf16.msra.mxu0 %v5087_v31  ;;  %v1663_v1 = vmul.f32 0.5, %v5395_v50  ;;  %v5089_v11 = vpack.c.bf16 %v3210_v33, %v3208_v20  ;;  %v3218_v31 = vld [vmem:[#allocation6 + $0x1b8] sm:$0xff]  ;;  %v3219_v50 = vld [vmem:[#allocation6 + $0x1c0] sm:$0xff]  ;;  %v3221_v18 = vld [vmem:[#allocation6 + $0x1d0] sm:$0xff] }
 0x2a7   : > { %v5878_v9 = vpop.eup %5877  ;;  %v1843_v39 = vadd.f32 1.0, %v5876_v4  ;;  %v1728_v53 = vmul.f32 0.70710677, %v5396_v0  ;;  %v1664_v5 = vmul.f32 0.5, %v5396_v0  ;;  %v5093_v26 = vpack.c.bf16 %v3214_v55, %v3212_v36  ;;  %v3222_v41 = vld [vmem:[#allocation6 + $0x1d8] sm:$0xff]  ;;  %v3224_v0 = vld [vmem:[#allocation6 + $0x1e8] sm:$0xff] }
 0x2a8   : > { %v1844_v3 = vadd.f32 1.0, %v5878_v9  ;;  %5887 = verf.f32 %v1727_v47  ;;  %2490 = vmatprep.mubr.f32.mxu0 %v1904_v56  ;;  %2812 = vmatprep.mubr.f32.mxu1 %v1904_v56  ;;  %v5095_v51 = vpack.c.bf16 %v3213_v38, %v3211_v10  ;;  %v5097_v63 = vpack.c.bf16 %v3218_v31, %v3216_v25  ;;  %v3226_v4 = vld [vmem:[#allocation6 + $0x1f8] sm:$0xff]  ;;  %v3223_v56 = vld [vmem:[#allocation6 + $0x1e0] sm:$0xff]  ;;  %v3225_v9 = vld [vmem:[#allocation6 + $0x1f0] sm:$0xff] }
 0x2a9   : > { %5889 = verf.f32 %v1728_v53  ;;  %2491 = vmatmul.mubr.f32.gmra.mrb[54].mxu0 %v1903_v42  ;;  %2813 = vmatmul.mubr.f32.gmra.mrb[86].mxu1 %v1903_v42  ;;  %v1907_v13 = vmul.f32 %v1843_v39, %v1651_v12  ;;  %v5099_v16 = vpack.c.bf16 %v3217_v45, %v3215_v30  ;;  %v5101_v34 = vpack.c.bf16 %v3222_v41, %v3220_v37  ;;  %v3228_v53 = vld [vmem:[#allocation6 + $0x208] sm:$0xff]  ;;  %v3230_v42 = vld [vmem:[#allocation6 + $0x218] sm:$0xff] }
 0x2aa   : > { %v5880_v52 = vpop.eup %5879  ;;  %v1908_v60 = vmul.f32 %v1844_v3, %v1652_v61  ;;  %5090 = vmatprep.subr.bf16.mxu0 %v5089_v11  ;;  %v5103_v19 = vpack.c.bf16 %v3221_v18, %v3219_v50  ;;  %v5105_v47 = vpack.c.bf16 %v3226_v4, %v3224_v0  ;;  %v5107_v39 = vpack.c.bf16 %v3225_v9, %v3223_v56  ;;  %v9280_v3 = vld [vmem:[%s10505_s26] sm:$0xf]  ;;  %v3229_v9 = vld [vmem:[#allocation6 + $0x210] sm:$0xff] }
 0x2ab   : > { %v5882_v32 = vpop.eup %5881  ;;  %v1847_v28 = vadd.f32 1.0, %v5880_v52  ;;  %5092 = vmatpush1.bf16.msra.mxu0 %v5091_v59  ;;  %v5109_v61 = vpack.c.bf16 %v3230_v42, %v3228_v53  ;;  %v3227_v56 = vld [vmem:[#allocation6 + $0x200] sm:$0xff] }
 0x2ac   : > { %v1848_v14 = vadd.f32 1.0, %v5882_v32  ;;  %2496 = vmatprep.mubr.f32.mxu0 %v1908_v60  ;;  %2818 = vmatprep.mubr.f32.mxu1 %v1908_v60  ;;  %v10506_v60 = vld [vmem:[#allocation31_spill] sm:$0xff] }
 0x2ad   : > { %2497 = vmatmul.mubr.f32.gmra.mrb[56].mxu0 %v1907_v13  ;;  %2819 = vmatmul.mubr.f32.gmra.mrb[88].mxu1 %v1907_v13  ;;  %v1911_v21 = vmul.f32 %v1847_v28, %v1655_v48  ;;  %v9286_v32 = vrot.slane %v9280_v3, %v10506_v60  ;;  %v3243_v60 = vld [vmem:[#allocation6 + $0x280] sm:$0xff] }
 0x2ae   : > { %v5884_v22 = vpop.eup %5883  ;;  %v1912_v54 = vmul.f32 %v1848_v14, %v1656_v49  ;;  %5094 = vmatprep.subr.bf16.mxu0 %v5093_v26  ;;  %v10507_v49 = vld [vmem:[#allocation30_spill] sm:$0xff] }
 0x2af   : > { %v5886_v57 = vpop.eup %5885  ;;  %v1851_v35 = vadd.f32 1.0, %v5884_v22  ;;  %5096 = vmatpush1.bf16.msra.mxu0 %v5095_v51  ;;  %v9292_v14 = vrot.slane %v9280_v3, %v10507_v49 }
 0x2b0   : > { %v1852_v24 = vadd.f32 1.0, %v5886_v57  ;;  %2502 = vmatprep.mubr.f32.mxu0 %v1912_v54  ;;  %2824 = vmatprep.mubr.f32.mxu1 %v1912_v54 }
 0x2b1   : > { %2503 = vmatmul.mubr.f32.gmra.mrb[58].mxu0 %v1911_v21  ;;  %2825 = vmatmul.mubr.f32.gmra.mrb[90].mxu1 %v1911_v21  ;;  %v1915_v15 = vmul.f32 %v1851_v35, %v1659_v23 }
 0x2b2   : > { %v5888_v58 = vpop.eup %5887  ;;  %v1916_v6 = vmul.f32 %v1852_v24, %v1660_v8  ;;  %5098 = vmatprep.subr.bf16.mxu0 %v5097_v63 }
 0x2b3   : > { %v5890_v44 = vpop.eup %5889  ;;  %v1855_v46 = vadd.f32 1.0, %v5888_v58  ;;  %5100 = vmatpush1.bf16.msra.mxu0 %v5099_v16 }
 0x2b4   : > { %v1856_v62 = vadd.f32 1.0, %v5890_v44  ;;  %2508 = vmatprep.mubr.f32.mxu0 %v1916_v6  ;;  %2830 = vmatprep.mubr.f32.mxu1 %v1916_v6 }
 0x2b5   : > { %2509 = vmatmul.mubr.f32.gmra.mrb[60].mxu0 %v1915_v15  ;;  %2831 = vmatmul.mubr.f32.gmra.mrb[92].mxu1 %v1915_v15  ;;  %v1919_v27 = vmul.f32 %v1855_v46, %v1663_v1 }
 0x2b6   : > { %v1920_v43 = vmul.f32 %v1856_v62, %v1664_v5  ;;  %5102 = vmatprep.subr.bf16.mxu0 %v5101_v34 }
 0x2b7   : > { %5104 = vmatpush1.bf16.msra.mxu0 %v5103_v19 }
 0x2b8   : > { %2514 = vmatprep.mubr.f32.mxu0 %v1920_v43  ;;  %2836 = vmatprep.mubr.f32.mxu1 %v1920_v43 }
 0x2b9   : > { %2515 = vmatmul.mubr.f32.gmra.mrb[62].mxu0 %v1919_v27  ;;  %2837 = vmatmul.mubr.f32.gmra.mrb[94].mxu1 %v1919_v27 }
 0x2ba   : > { %5106 = vmatprep.subr.bf16.mxu0 %v5105_v47 }
 0x2bb   : > { %5108 = vmatpush1.bf16.msra.mxu0 %v5107_v39 }
 0x2bc   : > { %5110 = vmatprep.subr.bf16.mxu0 %v5109_v61  ;;  %v3232_v61 = vld [vmem:[#allocation6 + $0x228] sm:$0xff] }
 0x350   : > { %v2426_v12 = vpop.f32.mrb[32].mxu0  ;;  %v9282_v52 = vpop.f32.mrb[64].mxu1 }
 0x351   : > { %v2428_v28 = vpop.f32.mrb[33].mxu0  ;;  %v9288_v13 = vpop.f32.mrb[65].mxu1  ;;  %v5397_v57 = vadd.f32 %v2426_v12, %v9292_v14  ;;  %v3234_v12 = vld [vmem:[#allocation6 + $0x238] sm:$0xff] }
 0x352   : > { %v5398_v48 = vadd.f32 %v2428_v28, %v9286_v32 }
 0x353   : > { %v2907_v58 = vmul.f32 0.70710677, %v5397_v57 }
 0x354   : > { %v2432_v22 = vpop.f32.mrb[34].mxu0  ;;  %v9295_v54 = vpop.f32.mrb[66].mxu1  ;;  %v2908_v23 = vmul.f32 0.70710677, %v5398_v48  ;;  %v2844_v53 = vmul.f32 0.5, %v5398_v48 }
 0x355   : > { %v2434_v35 = vpop.f32.mrb[35].mxu0  ;;  %v9298_v21 = vpop.f32.mrb[67].mxu1  ;;  %v9308_v15 = vadd.f32 %v2432_v22, %v9292_v14 }
 0x356   : > { %v9303_v6 = vadd.f32 %v2434_v35, %v9286_v32  ;;  %5891 = verf.f32 %v2908_v23  ;;  %v2843_v35 = vmul.f32 0.5, %v5397_v57  ;;  %v3231_v57 = vld [vmem:[#allocation6 + $0x220] sm:$0xff] }
 0x357   : > { %5893 = verf.f32 %v2907_v58  ;;  %v2911_v33 = vmul.f32 0.70710677, %v9308_v15 }
 0x358   : > { %v2438_v8 = vpop.f32.mrb[36].mxu0  ;;  %v9300_v24 = vpop.f32.mrb[68].mxu1  ;;  %v2912_v27 = vmul.f32 0.70710677, %v9303_v6 }
 0x359   : > { %v2440_v44 = vpop.f32.mrb[37].mxu0  ;;  %v9305_v46 = vpop.f32.mrb[69].mxu1  ;;  %v9320_v11 = vadd.f32 %v2438_v8, %v9292_v14 }
 0x35a   : > { %v9313_v1 = vadd.f32 %v2440_v44, %v9286_v32  ;;  %5895 = verf.f32 %v2912_v27  ;;  %v5111_v44 = vpack.c.bf16 %v3229_v9, %v3227_v56 }
 0x35b   : > { %5897 = verf.f32 %v2911_v33  ;;  %v2915_v10 = vmul.f32 0.70710677, %v9320_v11 }
 0x35c   : > { %v2444_v5 = vpop.f32.mrb[38].mxu0  ;;  %v9310_v62 = vpop.f32.mrb[70].mxu1  ;;  %v2916_v59 = vmul.f32 0.70710677, %v9313_v1 }
 0x35d   : > { %v2446_v43 = vpop.f32.mrb[39].mxu0  ;;  %v9316_v20 = vpop.f32.mrb[71].mxu1  ;;  %v9336_v63 = vadd.f32 %v2444_v5, %v9292_v14 }
 0x35e   : > { %v9328_v26 = vadd.f32 %v2446_v43, %v9286_v32  ;;  %5899 = verf.f32 %v2916_v59 }
 0x35f   : > { %5901 = verf.f32 %v2915_v10  ;;  %v2919_v0 = vmul.f32 0.70710677, %v9336_v63  ;;  %v3233_v10 = vld [vmem:[#allocation6 + $0x230] sm:$0xff] }
 0x360   : > { %v2450_v2 = vpop.f32.mrb[40].mxu0  ;;  %v9322_v17 = vpop.f32.mrb[72].mxu1  ;;  %v2920_v30 = vmul.f32 0.70710677, %v9328_v26 }
 0x361   : > { %v2452_v36 = vpop.f32.mrb[41].mxu0  ;;  %v9325_v55 = vpop.f32.mrb[73].mxu1  ;;  %v9350_v47 = vadd.f32 %v2450_v2, %v9292_v14  ;;  %v5113_v2 = vpack.c.bf16 %v3234_v12, %v3232_v61  ;;  %v2852_v12 = vmul.f32 0.5, %v9313_v1 }
 0x362   : > { %v5892_v45 = vpop.eup %5891  ;;  %v9340_v37 = vadd.f32 %v2452_v36, %v9286_v32  ;;  %5903 = verf.f32 %v2920_v30 }
 0x363   : > { %v5894_v16 = vpop.eup %5893  ;;  %v3036_v19 = vadd.f32 1.0, %v5892_v45  ;;  %5905 = verf.f32 %v2919_v0  ;;  %v2923_v33 = vmul.f32 0.70710677, %v9350_v47  ;;  %v3236_v0 = vld [vmem:[#allocation6 + $0x248] sm:$0xff] }
 0x364   : > { %v2456_v38 = vpop.f32.mrb[42].mxu0  ;;  %v9331_v51 = vpop.f32.mrb[74].mxu1  ;;  %v3035_v4 = vadd.f32 1.0, %v5894_v16  ;;  %v2924_v42 = vmul.f32 0.70710677, %v9340_v37  ;;  %v2848_v16 = vmul.f32 0.5, %v9303_v6 }
 0x365   : > { %v2458_v25 = vpop.f32.mrb[43].mxu0  ;;  %v9333_v31 = vpop.f32.mrb[75].mxu1  ;;  %v3100_v58 = vmul.f32 %v3036_v19, %v2844_v53  ;;  %v9371_v19 = vadd.f32 %v2456_v38, %v9292_v14  ;;  %v5115_v38 = vpack.c.bf16 %v3233_v10, %v3231_v57  ;;  %v3242_v57 = vld [vmem:[#allocation6 + $0x278] sm:$0xff]  ;;  %v2851_v10 = vmul.f32 0.5, %v9320_v11 }
 0x366   : > { %v5896_v39 = vpop.eup %5895  ;;  %v3099_v27 = vmul.f32 %v3035_v4, %v2843_v35  ;;  %5907 = verf.f32 %v2924_v42  ;;  %v9363_v36 = vadd.f32 %v2458_v25, %v9286_v32  ;;  %v3238_v4 = vld [vmem:[#allocation6 + $0x258] sm:$0xff] }
 0x367   : > { %v5898_v22 = vpop.eup %5897  ;;  %v3040_v48 = vadd.f32 1.0, %v5896_v39  ;;  %3367 = vmatprep.mubr.f32.mxu0 %v3100_v58  ;;  %v2847_v39 = vmul.f32 0.5, %v9308_v15  ;;  %5909 = verf.f32 %v2923_v33  ;;  %v5117_v58 = vpack.c.bf16 %v3238_v4, %v3236_v0 }
 0x368   : > { %v9342_v41 = vpop.f32.mrb[44].mxu0  ;;  %v9344_v34 = vpop.f32.mrb[76].mxu1  ;;  %v3039_v59 = vadd.f32 1.0, %v5898_v22  ;;  %3368 = vmatmul.mubr.f32.vlgmr.msra.gmra.mrb[64].mxu0 %v3099_v27  ;;  %v2928_v22 = vmul.f32 0.70710677, %v9363_v36  ;;  %v3235_v27 = vld [vmem:[#allocation6 + $0x240] sm:$0xff] }
 0x369   : > { %v2464_v50 = vpop.f32.mrb[45].mxu0  ;;  %v9346_v18 = vpop.f32.mrb[77].mxu1  ;;  %5112 = vmatpush1.bf16.msra.mxu0 %v5111_v44  ;;  %v3104_v6 = vmul.f32 %v3040_v48, %v2848_v16  ;;  %v9394_v1 = vadd.f32 %v9342_v41, %v9292_v14  ;;  %v2856_v41 = vmul.f32 0.5, %v9328_v26 }
 0x36a   : > { %v5900_v43 = vpop.eup %5899  ;;  %v9379_v42 = vadd.f32 %v2464_v50, %v9286_v32  ;;  %5114 = vmatprep.subr.bf16.mxu0 %v5113_v2  ;;  %v3103_v35 = vmul.f32 %v3039_v59, %v2847_v39  ;;  %v3237_v50 = vld [vmem:[#allocation6 + $0x250] sm:$0xff]  ;;  %v3240_v59 = vld [vmem:[#allocation6 + $0x268] sm:$0xff]  ;;  %5911 = verf.f32 %v2928_v22 }
 0x36b   : > { %v5902_v25 = vpop.eup %5901  ;;  %v3044_v53 = vadd.f32 1.0, %v5900_v43  ;;  %v2927_v43 = vmul.f32 0.70710677, %v9371_v19  ;;  %3373 = vmatprep.mubr.f32.mxu0 %v3104_v6  ;;  %v3244_v22 = vld [vmem:[#allocation6 + $0x288] sm:$0xff] }
 0x36c   : > { %v9353_v28 = vpop.f32.mrb[46].mxu0  ;;  %v9355_v8 = vpop.f32.mrb[78].mxu1  ;;  %v3043_v44 = vadd.f32 1.0, %v5902_v25  ;;  %3374 = vmatmul.mubr.f32.gmra.mrb[66].mxu0 %v3103_v35  ;;  %v2932_v0 = vmul.f32 0.70710677, %v9379_v42  ;;  %v5119_v25 = vpack.c.bf16 %v3237_v50, %v3235_v27  ;;  %v3241_v35 = vld [vmem:[#allocation6 + $0x270] sm:$0xff] }
 0x36d   : > { %v9357_v23 = vpop.f32.mrb[47].mxu0  ;;  %v9359_v5 = vpop.f32.mrb[79].mxu1  ;;  %v3108_v2 = vmul.f32 %v3044_v53, %v2852_v12  ;;  %5116 = vmatpush1.bf16.msra.mxu0 %v5115_v38  ;;  %5913 = verf.f32 %v2927_v43  ;;  %v5121_v53 = vpack.c.bf16 %v3242_v57, %v3240_v59  ;;  %v3239_v12 = vld [vmem:[#allocation6 + $0x260] sm:$0xff]  ;;  %v2931_v38 = vmul.f32 0.70710677, %v9394_v1 }
 0x36e   : > { %v5904_v61 = vpop.eup %5903  ;;  %5118 = vmatprep.subr.bf16.mxu0 %v5117_v58  ;;  %v3107_v6 = vmul.f32 %v3043_v44, %v2851_v10  ;;  %5915 = verf.f32 %v2932_v0  ;;  %v9410_v26 = vadd.f32 %v9357_v23, %v9286_v32  ;;  %v9414_v43 = vadd.f32 %v9353_v28, %v9292_v14  ;;  %v3248_v28 = vld [vmem:[#allocation6 + $0x2a8] sm:$0xff] }
 0x36f   : > { %v3048_v16 = vadd.f32 1.0, %v5904_v61  ;;  %v5906_v4 = vpop.eup %5905  ;;  %3379 = vmatprep.mubr.f32.mxu0 %v3108_v2  ;;  %v3246_v2 = vld [vmem:[#allocation6 + $0x298] sm:$0xff]  ;;  %v5123_v50 = vpack.c.bf16 %v3241_v35, %v3239_v12  ;;  %5917 = verf.f32 %v2931_v38  ;;  %v2860_v12 = vmul.f32 0.5, %v9340_v37 }
 0x370   : > { %v9365_v30 = vpop.f32.mrb[48].mxu0  ;;  %v9367_v45 = vpop.f32.mrb[80].mxu1  ;;  %v3047_v27 = vadd.f32 1.0, %v5906_v4  ;;  %3380 = vmatmul.mubr.f32.gmra.mrb[68].mxu0 %v3107_v6  ;;  %v2855_v4 = vmul.f32 0.5, %v9336_v63  ;;  %v5125_v23 = vpack.c.bf16 %v3246_v2, %v3244_v22  ;;  %v3245_v6 = vld [vmem:[#allocation6 + $0x290] sm:$0xff] }
 0x371   : > { %v9373_v56 = vpop.f32.mrb[49].mxu0  ;;  %v9375_v9 = vpop.f32.mrb[81].mxu1  ;;  %v3112_v44 = vmul.f32 %v3048_v16, %v2856_v41  ;;  %5120 = vmatpush1.bf16.msra.mxu0 %v5119_v25  ;;  %v3250_v41 = vld [vmem:[#allocation6 + $0x2b8] sm:$0xff]  ;;  %v2936_v35 = vmul.f32 0.70710677, %v9410_v26 }
 0x372   : > { %v5908_v61 = vpop.eup %5907  ;;  %5122 = vmatprep.subr.bf16.mxu0 %v5121_v53  ;;  %v3111_v49 = vmul.f32 %v3047_v27, %v2855_v4  ;;  %v2935_v63 = vmul.f32 0.70710677, %v9414_v43  ;;  %v5127_v53 = vpack.c.bf16 %v3245_v6, %v3243_v60  ;;  %v9434_v38 = vadd.f32 %v9373_v56, %v9286_v32  ;;  %v3252_v6 = vld [vmem:[#allocation6 + $0x2c8] sm:$0xff]  ;;  %v3254_v56 = vld [vmem:[#allocation6 + $0x2d8] sm:$0xff] }
 0x373   : > { %v5910_v10 = vpop.eup %5909  ;;  %v3052_v0 = vadd.f32 1.0, %v5908_v61  ;;  %3385 = vmatprep.mubr.f32.mxu0 %v3112_v44  ;;  %v5129_v37 = vpack.c.bf16 %v3250_v41, %v3248_v28  ;;  %v3247_v44 = vld [vmem:[#allocation6 + $0x2a0] sm:$0xff]  ;;  %v2859_v60 = vmul.f32 0.5, %v9350_v47  ;;  %v9443_v4 = vadd.f32 %v9365_v30, %v9292_v14 }
 0x374   : > { %v9383_v40 = vpop.f32.mrb[50].mxu0  ;;  %v9385_v15 = vpop.f32.mrb[82].mxu1  ;;  %3386 = vmatmul.mubr.f32.gmra.mrb[70].mxu0 %v3111_v49  ;;  %5919 = verf.f32 %v2936_v35  ;;  %v5133_v30 = vpack.c.bf16 %v3254_v56, %v3252_v6 }
 0x375   : > { %10508 = vst [vmem:[#allocation45_spill] sm:$0xff] %v9385_v15  ;;  %v9388_v48 = vpop.f32.mrb[51].mxu0  ;;  %v9390_v33 = vpop.f32.mrb[83].mxu1  ;;  %5124 = vmatpush1.bf16.msra.mxu0 %v5123_v50  ;;  %v3116_v2 = vmul.f32 %v3052_v0, %v2860_v12  ;;  %5921 = verf.f32 %v2935_v63  ;;  %v9463_v6 = vadd.f32 %v9383_v40, %v9292_v14  ;;  %v2868_v40 = vmul.f32 0.5, %v9379_v42 }
 0x376   : > { %5126 = vmatprep.subr.bf16.mxu0 %v5125_v23  ;;  %v5912_v50 = vpop.eup %5911  ;;  %v3251_v23 = vld [vmem:[#allocation6 + $0x2c0] sm:$0xff] }
 0x377   : > { %3391 = vmatprep.mubr.f32.mxu0 %v3116_v2  ;;  %v3056_v47 = vadd.f32 1.0, %v5912_v50  ;;  %v3258_v2 = vld [vmem:[#allocation6 + $0x2f8] sm:$0xff] }
 0x378   : > { %v9398_v39 = vpop.f32.mrb[52].mxu0  ;;  %v9401_v7 = vpop.f32.mrb[84].mxu1 }
 0x379   : > { %10509 = vst [vmem:[#allocation33_spill] sm:$0xff] %v9401_v7  ;;  %v9403_v11 = vpop.f32.mrb[53].mxu0  ;;  %v9406_v58 = vpop.f32.mrb[85].mxu1  ;;  %5128 = vmatpush1.bf16.msra.mxu0 %v5127_v53  ;;  %v3253_v7 = vld [vmem:[#allocation6 + $0x2d0] sm:$0xff]  ;;  %v3256_v53 = vld [vmem:[#allocation6 + $0x2e8] sm:$0xff] }
 0x37a   : > { %10510 = vst [vmem:[#allocation32_spill] sm:$0xff] %v9406_v58  ;;  %5130 = vmatprep.subr.bf16.mxu0 %v5129_v37  ;;  %v2863_v37 = vmul.f32 0.5, %v9371_v19 }
 0x37c   : > { %v9416_v59 = vpop.f32.mrb[54].mxu0  ;;  %v9418_v57 = vpop.f32.mrb[86].mxu1 }
 0x37d   : > { %10511 = vst [vmem:[#allocation35_spill] sm:$0xff] %v9418_v57  ;;  %v9421_v16 = vpop.f32.mrb[55].mxu0  ;;  %v9423_v25 = vpop.f32.mrb[87].mxu1  ;;  %v3051_v57 = vadd.f32 1.0, %v5910_v10 }
 0x37e   : > { %10512 = vst [vmem:[#allocation34_spill] sm:$0xff] %v9423_v25  ;;  %v3249_v25 = vld [vmem:[#allocation6 + $0x2b0] sm:$0xff] }
 0x37f   : > { %v3115_v49 = vmul.f32 %v3051_v57, %v2859_v60  ;;  %v5131_v0 = vpack.c.bf16 %v3249_v25, %v3247_v44  ;;  %v2939_v57 = vmul.f32 0.70710677, %v9443_v4  ;;  %v9457_v25 = vadd.f32 %v9388_v48, %v9286_v32 }
 0x380   : > { %v9428_v61 = vpop.f32.mrb[56].mxu0  ;;  %v9430_v22 = vpop.f32.mrb[88].mxu1  ;;  %v2864_v44 = vmul.f32 0.5, %v9363_v36  ;;  %v9471_v48 = vadd.f32 %v9403_v11, %v9286_v32  ;;  %v3255_v11 = vld [vmem:[#allocation6 + $0x2e0] sm:$0xff] }
 0x381   : > { %10513 = vst [vmem:[#allocation37_spill] sm:$0xff] %v9430_v22  ;;  %v9436_v27 = vpop.f32.mrb[57].mxu0  ;;  %v9438_v10 = vpop.f32.mrb[89].mxu1  ;;  %3392 = vmatmul.mubr.f32.gmra.mrb[72].mxu0 %v3115_v49  ;;  %v5137_v49 = vpack.c.bf16 %v3258_v2, %v3256_v53  ;;  %v3260_v2 = vld [vmem:[#allocation6 + $0x308] sm:$0xff] }
 0x382   : > { %10514 = vst [vmem:[#allocation36_spill] sm:$0xff] %v9438_v10  ;;  %v5914_v22 = vpop.eup %5913  ;;  %v2940_v10 = vmul.f32 0.70710677, %v9434_v38  ;;  %5132 = vmatpush1.bf16.msra.mxu0 %v5131_v0  ;;  %v3120_v36 = vmul.f32 %v3056_v47, %v2864_v44  ;;  %v3257_v47 = vld [vmem:[#allocation6 + $0x2f0] sm:$0xff]  ;;  %v3262_v44 = vld [vmem:[#allocation6 + $0x318] sm:$0xff] }
 0x383   : > { %v5916_v12 = vpop.eup %5915  ;;  %v3055_v63 = vadd.f32 1.0, %v5914_v22  ;;  %v5135_v22 = vpack.c.bf16 %v3253_v7, %v3251_v23  ;;  %5134 = vmatprep.subr.bf16.mxu0 %v5133_v30  ;;  %v2944_v7 = vmul.f32 0.70710677, %v9457_v25  ;;  %v2943_v30 = vmul.f32 0.70710677, %v9463_v6 }
 0x384   : > { %v9445_v28 = vpop.f32.mrb[58].mxu0  ;;  %v9447_v41 = vpop.f32.mrb[90].mxu1  ;;  %v3060_v60 = vadd.f32 1.0, %v5916_v12  ;;  %5923 = verf.f32 %v2940_v10  ;;  %v9481_v10 = vadd.f32 %v9398_v39, %v9292_v14  ;;  %3397 = vmatprep.mubr.f32.mxu0 %v3120_v36  ;;  %v9492_v39 = vadd.f32 %v9421_v16, %v9286_v32 }
 0x385   : > { %10515 = vst [vmem:[#allocation39_spill] sm:$0xff] %v9447_v41  ;;  %v9450_v58 = vpop.f32.mrb[59].mxu0  ;;  %v9452_v35 = vpop.f32.mrb[91].mxu1  ;;  %5925 = verf.f32 %v2939_v57  ;;  %v3119_v0 = vmul.f32 %v3055_v63, %v2863_v37  ;;  %v2867_v63 = vmul.f32 0.5, %v9394_v1  ;;  %v9501_v16 = vadd.f32 %v9416_v59, %v9292_v14 }
 0x386   : > { %10516 = vst [vmem:[#allocation38_spill] sm:$0xff] %v9452_v35  ;;  %v5918_v50 = vpop.eup %5917  ;;  %v3124_v53 = vmul.f32 %v3060_v60, %v2868_v40  ;;  %5136 = vmatpush1.bf16.msra.mxu0 %v5135_v22  ;;  %5927 = verf.f32 %v2944_v7  ;;  %v5139_v60 = vpack.c.bf16 %v3257_v47, %v3255_v11  ;;  %v2947_v36 = vmul.f32 0.70710677, %v9481_v10  ;;  %v3266_v7 = vld [vmem:[#allocation6 + $0x338] sm:$0xff] }
 0x387   : > { %v3059_v23 = vadd.f32 1.0, %v5918_v50  ;;  %3398 = vmatmul.mubr.f32.gmra.mrb[74].mxu0 %v3119_v0  ;;  %v5920_v57 = vpop.eup %5919  ;;  %v2948_v50 = vmul.f32 0.70710677, %v9471_v48  ;;  %5138 = vmatprep.subr.bf16.mxu0 %v5137_v49  ;;  %v5141_v0 = vpack.c.bf16 %v3262_v44, %v3260_v2  ;;  %5929 = verf.f32 %v2943_v30  ;;  %v3264_v49 = vld [vmem:[#allocation6 + $0x328] sm:$0xff]  ;;  %v3263_v44 = vld [vmem:[#allocation6 + $0x320] sm:$0xff] }
 0x388   : > { %v9465_v56 = vpop.f32.mrb[60].mxu0  ;;  %v9467_v41 = vpop.f32.mrb[92].mxu1  ;;  %3403 = vmatprep.mubr.f32.mxu0 %v3124_v53  ;;  %v3064_v15 = vadd.f32 1.0, %v5920_v57  ;;  %v9505_v22 = vadd.f32 %v9436_v27, %v9286_v32  ;;  %v2952_v11 = vmul.f32 0.70710677, %v9492_v39  ;;  %v2872_v47 = vmul.f32 0.5, %v9410_v26 }
 0x389   : > { %10517 = vst [vmem:[#allocation41_spill] sm:$0xff] %v9467_v41  ;;  %v9473_v19 = vpop.f32.mrb[61].mxu0  ;;  %v9475_v12 = vpop.f32.mrb[93].mxu1  ;;  %v3123_v40 = vmul.f32 %v3059_v23, %v2867_v63  ;;  %5931 = verf.f32 %v2948_v50  ;;  %v2871_v2 = vmul.f32 0.5, %v9414_v43  ;;  %v5145_v27 = vpack.c.bf16 %v3266_v7, %v3264_v49  ;;  %v3265_v57 = vld [vmem:[#allocation6 + $0x330] sm:$0xff] }
 0x38a   : > { %10518 = vst [vmem:[#allocation40_spill] sm:$0xff] %v9475_v12  ;;  %v5922_v37 = vpop.eup %5921  ;;  %v3261_v12 = vld [vmem:[#allocation6 + $0x310] sm:$0xff]  ;;  %5140 = vmatpush1.bf16.msra.mxu0 %v5139_v60  ;;  %5933 = verf.f32 %v2947_v36  ;;  %v2956_v59 = vmul.f32 0.70710677, %v9505_v22  ;;  %v2951_v50 = vmul.f32 0.70710677, %v9501_v16  ;;  %v3128_v26 = vmul.f32 %v3064_v15, %v2872_v47 }
 0x38b   : > { %v3063_v23 = vadd.f32 1.0, %v5922_v37  ;;  %3404 = vmatmul.mubr.f32.gmra.mrb[76].mxu0 %v3123_v40  ;;  %5142 = vmatprep.subr.bf16.mxu0 %v5141_v0  ;;  %v9514_v37 = vadd.f32 %v9428_v61, %v9292_v14  ;;  %v3268_v60 = vld [vmem:[#allocation6 + $0x348] sm:$0xff]  ;;  %5935 = verf.f32 %v2952_v11  ;;  %v9518_v36 = vadd.f32 %v9450_v58, %v9286_v32  ;;  %v3267_v61 = vld [vmem:[#allocation6 + $0x340] sm:$0xff]  ;;  %v3269_v7 = vld [vmem:[#allocation6 + $0x350] sm:$0xff] }
 0x38c   : > { %v9484_v41 = vpop.f32.mrb[62].mxu0  ;;  %v9486_v42 = vpop.f32.mrb[94].mxu1  ;;  %3409 = vmatprep.mubr.f32.mxu0 %v3128_v26  ;;  %v5147_v40 = vpack.c.bf16 %v3265_v57, %v3263_v44  ;;  %5937 = verf.f32 %v2956_v59  ;;  %v2876_v47 = vmul.f32 0.5, %v9434_v38  ;;  %v9524_v11 = vadd.f32 %v9445_v28, %v9292_v14  ;;  %v3272_v58 = vld [vmem:[#allocation6 + $0x368] sm:$0xff] }
 0x38d   : > { %10519 = vst [vmem:[#allocation43_spill] sm:$0xff] %v9486_v42  ;;  %v3259_v42 = vld [vmem:[#allocation6 + $0x300] sm:$0xff]  ;;  %v9495_v35 = vpop.f32.mrb[63].mxu0  ;;  %v9497_v1 = vpop.f32.mrb[95].mxu1  ;;  %5939 = verf.f32 %v2951_v50  ;;  %v5151_v57 = vpack.c.bf16 %v3269_v7, %v3267_v61  ;;  %v3273_v50 = vld [vmem:[#allocation6 + $0x370] sm:$0xff]  ;;  %v3278_v61 = vld [vmem:[#allocation6 + $0x398] sm:$0xff] }
 0x38e   : > { %v5143_v53 = vpack.c.bf16 %v3261_v12, %v3259_v42  ;;  %v5924_v30 = vpop.eup %5923  ;;  %v3270_v12 = vld [vmem:[#allocation6 + $0x358] sm:$0xff]  ;;  %v3127_v42 = vmul.f32 %v3063_v23, %v2871_v2  ;;  %v2955_v23 = vmul.f32 0.70710677, %v9514_v37  ;;  %v2960_v2 = vmul.f32 0.70710677, %v9518_v36 }
 0x38f   : > { %v5926_v63 = vpop.eup %5925  ;;  %v3068_v43 = vadd.f32 1.0, %v5924_v30  ;;  %v5149_v49 = vpack.c.bf16 %v3270_v12, %v3268_v60  ;;  %v2875_v30 = vmul.f32 0.5, %v9443_v4  ;;  %v2959_v4 = vmul.f32 0.70710677, %v9524_v11 }
 0x390   : > { %5144 = vmatpush1.bf16.msra.mxu0 %v5143_v53  ;;  %v3067_v0 = vadd.f32 1.0, %v5926_v63  ;;  %v5928_v15 = vpop.eup %5927  ;;  %v3274_v53 = vld [vmem:[#allocation6 + $0x378] sm:$0xff]  ;;  %v3271_v63 = vld [vmem:[#allocation6 + $0x360] sm:$0xff]  ;;  %5941 = verf.f32 %v2960_v2  ;;  %v2884_v2 = vmul.f32 0.5, %v9471_v48 }
 0x391   : > { %3410 = vmatmul.mubr.f32.gmra.mrb[78].mxu0 %v3127_v42  ;;  %5146 = vmatprep.subr.bf16.mxu0 %v5145_v27  ;;  %v5930_v59 = vpop.eup %5929  ;;  %v10520_v27 = vsub.s32 3, %v10504_v29  ;;  %v3132_v38 = vmul.f32 %v3068_v43, %v2876_v47  ;;  %v3072_v28 = vadd.f32 1.0, %v5928_v15  ;;  %v5153_v12 = vpack.c.bf16 %v3274_v53, %v3272_v58 }
 0x392   : > { %v3131_v60 = vmul.f32 %v3067_v0, %v2875_v30  ;;  %5943 = verf.f32 %v2955_v23  ;;  %v9536_v42 = vadd.f32 %v9465_v56, %v9292_v14  ;;  %v9540_v43 = vadd.f32 %v9473_v19, %v9286_v32 }
 0x393   : > { %v9531_v44 = vrot.slane %v9280_v3, %v10520_v27  ;;  %v5932_v26 = vpop.eup %5931  ;;  %3415 = vmatprep.mubr.f32.mxu0 %v3132_v38  ;;  %v3071_v15 = vadd.f32 1.0, %v5930_v59  ;;  %v5155_v0 = vpack.c.bf16 %v3273_v50, %v3271_v63  ;;  %v2880_v47 = vmul.f32 0.5, %v9457_v25  ;;  %v3277_v27 = vld [vmem:[#allocation6 + $0x390] sm:$0xff]  ;;  %v3282_v50 = vld [vmem:[#allocation6 + $0x3b8] sm:$0xff] }
 0x394   : > { %5148 = vmatpush1.bf16.msra.mxu0 %v5147_v40  ;;  %v3276_v40 = vld [vmem:[#allocation6 + $0x388] sm:$0xff]  ;;  %v5934_v7 = vpop.eup %5933  ;;  %v3076_v23 = vadd.f32 1.0, %v5932_v26  ;;  %v2964_v56 = vmul.f32 0.70710677, %v9540_v43  ;;  %v10521_v19 = vsub.s32 2, %v10504_v29  ;;  %v2879_v30 = vmul.f32 0.5, %v9463_v6 }
 0x395   : > { %5150 = vmatprep.subr.bf16.mxu0 %v5149_v49  ;;  %3416 = vmatmul.mubr.f32.gmra.mrb[80].mxu0 %v3131_v60  ;;  %v9544_v49 = vadd.f32 %v9288_v13, %v9531_v44  ;;  %v5936_v58 = vpop.eup %5935  ;;  %v5157_v59 = vpack.c.bf16 %v3278_v61, %v3276_v40  ;;  %v3275_v13 = vld [vmem:[#allocation6 + $0x380] sm:$0xff]  ;;  %v3075_v38 = vadd.f32 1.0, %v5934_v7  ;;  %5945 = verf.f32 %v2959_v4  ;;  %v3284_v7 = vld [vmem:[#allocation6 + $0x3c8] sm:$0xff] }
 0x396   : > { %v9551_v53 = vrot.slane %v9280_v3, %v10521_v19  ;;  %v2963_v25 = vmul.f32 0.70710677, %v9536_v42  ;;  %v3136_v63 = vmul.f32 %v3072_v28, %v2880_v47  ;;  %v5938_v26 = vpop.eup %5937  ;;  %5947 = verf.f32 %v2964_v56 }
 0x397   : > { %v3135_v29 = vmul.f32 %v3071_v15, %v2879_v30  ;;  %v9558_v3 = vadd.f32 %v9484_v41, %v9292_v14  ;;  %v9562_v6 = vadd.f32 %v9495_v35, %v9286_v32  ;;  %v5940_v48 = vpop.eup %5939  ;;  %v2910_v60 = vmul.f32 0.70710677, %v9544_v49  ;;  %v3279_v41 = vld [vmem:[#allocation6 + $0x3a0] sm:$0xff]  ;;  %v3281_v35 = vld [vmem:[#allocation6 + $0x3b0] sm:$0xff] }
 0x398   : > { %5152 = vmatpush1.bf16.msra.mxu0 %v5151_v57  ;;  %v3280_v57 = vld [vmem:[#allocation6 + $0x3a8] sm:$0xff]  ;;  %3421 = vmatprep.mubr.f32.mxu0 %v3136_v63  ;;  %v3140_v4 = vmul.f32 %v3076_v23, %v2884_v2  ;;  %v5159_v28 = vpack.c.bf16 %v3277_v27, %v3275_v13  ;;  %v9567_v40 = vadd.f32 %v9282_v52, %v9551_v53  ;;  %v2883_v61 = vmul.f32 0.5, %v9481_v10  ;;  %v3286_v23 = vld [vmem:[#allocation6 + $0x3d8] sm:$0xff] }
 0x399   : > { %5154 = vmatprep.subr.bf16.mxu0 %v5153_v12  ;;  %v3080_v12 = vadd.f32 1.0, %v5936_v58  ;;  %v2888_v14 = vmul.f32 0.5, %v9492_v39  ;;  %3422 = vmatmul.mubr.f32.gmra.mrb[82].mxu0 %v3135_v29  ;;  %v5161_v32 = vpack.c.bf16 %v3282_v50, %v3280_v57  ;;  %v3084_v15 = vadd.f32 1.0, %v5938_v26  ;;  %v3288_v57 = vld [vmem:[#allocation6 + $0x3e8] sm:$0xff]  ;;  %v3290_v50 = vld [vmem:[#allocation6 + $0x3f8] sm:$0xff] }
 0x39a   : > { %5949 = verf.f32 %v2963_v25  ;;  %v2967_v47 = vmul.f32 0.70710677, %v9558_v3  ;;  %3427 = vmatprep.mubr.f32.mxu0 %v3140_v4  ;;  %v5942_v52 = vpop.eup %5941  ;;  %v9575_v10 = vadd.f32 %v9298_v21, %v9531_v44  ;;  %v3079_v39 = vadd.f32 1.0, %v5940_v48  ;;  %v3283_v25 = vld [vmem:[#allocation6 + $0x3c0] sm:$0xff]  ;;  %v3285_v21 = vld [vmem:[#allocation6 + $0x3d0] sm:$0xff] }
 0x39b   : > { %v3139_v56 = vmul.f32 %v3075_v38, %v2883_v61  ;;  %5951 = verf.f32 %v2910_v60  ;;  %v2892_v19 = vmul.f32 0.5, %v9505_v22  ;;  %v3144_v30 = vmul.f32 %v3080_v12, %v2888_v14 }
 0x39c   : > { %5156 = vmatpush1.bf16.msra.mxu0 %v5155_v0  ;;  %v2968_v0 = vmul.f32 0.70710677, %v9562_v6  ;;  %v5944_v58 = vpop.eup %5943  ;;  %v5163_v2 = vpack.c.bf16 %v3281_v35, %v3279_v41  ;;  %v2887_v13 = vmul.f32 0.5, %v9501_v16  ;;  %v5165_v27 = vpack.c.bf16 %v3286_v23, %v3284_v7 }
 0x39d   : > { %5158 = vmatprep.subr.bf16.mxu0 %v5157_v59  ;;  %v2909_v59 = vmul.f32 0.70710677, %v9567_v40  ;;  %3428 = vmatmul.mubr.f32.gmra.mrb[84].mxu0 %v3139_v56  ;;  %v9582_v38 = vadd.f32 %v9295_v54, %v9551_v53  ;;  %v3088_v63 = vadd.f32 1.0, %v5942_v52  ;;  %v3148_v22 = vmul.f32 %v3084_v15, %v2892_v19 }
 0x39e   : > { %5953 = verf.f32 %v2968_v0  ;;  %3433 = vmatprep.mubr.f32.mxu0 %v3144_v30  ;;  %v2914_v26 = vmul.f32 0.70710677, %v9575_v10  ;;  %v9587_v16 = vadd.f32 %v9305_v46, %v9531_v44  ;;  %v3083_v29 = vadd.f32 1.0, %v5944_v58  ;;  %v3287_v46 = vld [vmem:[#allocation6 + $0x3e0] sm:$0xff] }
 0x39f   : > { %5955 = verf.f32 %v2967_v47  ;;  %v3143_v48 = vmul.f32 %v3079_v39, %v2887_v13  ;;  %v5946_v60 = vpop.eup %5945  ;;  %v2896_v12 = vmul.f32 0.5, %v9518_v36  ;;  %v5167_v54 = vpack.c.bf16 %v3285_v21, %v3283_v25 }
 0x3a0   : > { %5160 = vmatpush1.bf16.msra.mxu0 %v5159_v28  ;;  %v5948_v4 = vpop.eup %5947  ;;  %5957 = verf.f32 %v2909_v59  ;;  %v9592_v28 = vadd.f32 %v9300_v24, %v9551_v53  ;;  %v2891_v61 = vmul.f32 0.5, %v9514_v37  ;;  %v5169_v14 = vpack.c.bf16 %v3290_v50, %v3288_v57 }
 0x3a1   : > { %5162 = vmatprep.subr.bf16.mxu0 %v5161_v32  ;;  %3434 = vmatmul.mubr.f32.gmra.mrb[86].mxu0 %v3143_v48  ;;  %v3289_v32 = vld [vmem:[#allocation6 + $0x3f0] sm:$0xff]  ;;  %v2913_v41 = vmul.f32 0.70710677, %v9582_v38  ;;  %v9598_v36 = vadd.f32 %v9316_v20, %v9531_v44  ;;  %v3092_v35 = vadd.f32 1.0, %v5948_v4  ;;  %v3152_v7 = vmul.f32 %v3088_v63, %v2896_v12 }
 0x3a2   : > { %3439 = vmatprep.mubr.f32.mxu0 %v3148_v22  ;;  %5959 = verf.f32 %v2914_v26  ;;  %v2918_v24 = vmul.f32 0.70710677, %v9587_v16  ;;  %v3087_v15 = vadd.f32 1.0, %v5946_v60  ;;  %v3147_v47 = vmul.f32 %v3083_v29, %v2891_v61 }
 0x3a3   : > { %v2900_v0 = vmul.f32 0.5, %v9540_v43  ;;  %v5171_v23 = vpack.c.bf16 %v3289_v32, %v3287_v46  ;;  %v2917_v52 = vmul.f32 0.70710677, %v9592_v28  ;;  %v9605_v39 = vadd.f32 %v9310_v62, %v9551_v53 }
 0x3a4   : > { %5164 = vmatpush1.bf16.msra.mxu0 %v5163_v2  ;;  %v5950_v37 = vpop.eup %5949  ;;  %v2895_v20 = vmul.f32 0.5, %v9524_v11  ;;  %5961 = verf.f32 %v2913_v41  ;;  %v2922_v58 = vmul.f32 0.70710677, %v9598_v36  ;;  %v9611_v43 = vadd.f32 %v9325_v55, %v9531_v44 }
 0x3a5   : > { %5166 = vmatprep.subr.bf16.mxu0 %v5165_v27  ;;  %3440 = vmatmul.mubr.f32.gmra.mrb[88].mxu0 %v3147_v47  ;;  %v5952_v56 = vpop.eup %5951  ;;  %v3156_v19 = vmul.f32 %v3092_v35, %v2900_v0  ;;  %5963 = verf.f32 %v2918_v24  ;;  %v3091_v2 = vadd.f32 1.0, %v5950_v37  ;;  %v2904_v13 = vmul.f32 0.5, %v9562_v6 }
 0x3a6   : > { %3445 = vmatprep.mubr.f32.mxu0 %v3152_v7  ;;  %v3151_v59 = vmul.f32 %v3087_v15, %v2895_v20  ;;  %5965 = verf.f32 %v2917_v52  ;;  %v2921_v27 = vmul.f32 0.70710677, %v9605_v39  ;;  %v9617_v25 = vadd.f32 %v9322_v17, %v9551_v53 }
 0x3a7   : > { %v2899_v21 = vmul.f32 0.5, %v9536_v42  ;;  %5967 = verf.f32 %v2922_v58  ;;  %v2926_v22 = vmul.f32 0.70710677, %v9611_v43  ;;  %v9623_v6 = vadd.f32 %v9333_v31, %v9531_v44 }
 0x3a8   : > { %5168 = vmatpush1.bf16.msra.mxu0 %v5167_v54  ;;  %v5954_v30 = vpop.eup %5953  ;;  %v3038_v26 = vadd.f32 1.0, %v5952_v56  ;;  %5969 = verf.f32 %v2921_v27  ;;  %v2925_v17 = vmul.f32 0.70710677, %v9617_v25  ;;  %v9628_v42 = vadd.f32 %v9331_v51, %v9551_v53 }
 0x3a9   : > { %5170 = vmatprep.subr.bf16.mxu0 %v5169_v14  ;;  %v5956_v62 = vpop.eup %5955  ;;  %v3096_v11 = vadd.f32 1.0, %v5954_v30  ;;  %3446 = vmatmul.mubr.f32.gmra.mrb[90].mxu0 %v3151_v59  ;;  %v3155_v50 = vmul.f32 %v3091_v2, %v2899_v21  ;;  %v2903_v48 = vmul.f32 0.5, %v9558_v3  ;;  %v2846_v12 = vmul.f32 0.5, %v9544_v49 }
 0x3aa   : > { %3451 = vmatprep.mubr.f32.mxu0 %v3156_v19  ;;  %v5958_v63 = vpop.eup %5957  ;;  %v3095_v57 = vadd.f32 1.0, %v5956_v62  ;;  %5971 = verf.f32 %v2926_v22  ;;  %v2930_v31 = vmul.f32 0.70710677, %v9623_v6  ;;  %v9635_v54 = vadd.f32 %v9346_v18, %v9531_v44 }
 0x3ab   : > { %v3160_v55 = vmul.f32 %v3096_v11, %v2904_v13  ;;  %v3037_v60 = vadd.f32 1.0, %v5958_v63  ;;  %v2845_v14 = vmul.f32 0.5, %v9567_v40  ;;  %v3102_v46 = vmul.f32 %v3038_v26, %v2846_v12 }
 0x3ac   : > { %5172 = vmatpush1.bf16.msra.mxu0 %v5171_v23  ;;  %v5960_v29 = vpop.eup %5959  ;;  %v3159_v4 = vmul.f32 %v3095_v57, %v2903_v48  ;;  %5973 = verf.f32 %v2925_v17  ;;  %v2929_v3 = vmul.f32 0.70710677, %v9628_v42  ;;  %v9641_v49 = vadd.f32 %v9344_v34, %v9551_v53 }
 0x3ad   : > { %3452 = vmatmul.mubr.f32.gmra.mrb[92].mxu0 %v3155_v50  ;;  %v3042_v51 = vadd.f32 1.0, %v5960_v29  ;;  %v3101_v41 = vmul.f32 %v3037_v60, %v2845_v14  ;;  %v2850_v35 = vmul.f32 0.5, %v9575_v10  ;;  %5975 = verf.f32 %v2930_v31  ;;  %v10523_v29 = vld [vmem:[#allocation32_spill] sm:$0xff]  ;;  %v10524_v14 = vld [vmem:[#allocation33_spill] sm:$0xff] }
 0x3ae   : > { %3457 = vmatprep.mubr.f32.mxu0 %v3160_v55  ;;  %v5962_v61 = vpop.eup %5961  ;;  %v2934_v40 = vmul.f32 0.70710677, %v9635_v54  ;;  %v9647_v24 = vadd.f32 %v9359_v5, %v9531_v44  ;;  %v2849_v34 = vmul.f32 0.5, %v9582_v38  ;;  %5977 = verf.f32 %v2929_v3  ;;  %v10525_v3 = vld [vmem:[#allocation34_spill] sm:$0xff] }
 0x3af   : > { %v5964_v32 = vpop.eup %5963  ;;  %v3041_v7 = vadd.f32 1.0, %v5962_v61  ;;  %v3106_v37 = vmul.f32 %v3042_v51, %v2850_v35  ;;  %v2933_v0 = vmul.f32 0.70710677, %v9641_v49  ;;  %v9653_v10 = vadd.f32 %v9355_v8, %v9551_v53 }
 0x3b0   : > { %v5966_v18 = vpop.eup %5965  ;;  %v3046_v47 = vadd.f32 1.0, %v5964_v32  ;;  %v2854_v52 = vmul.f32 0.5, %v9587_v16  ;;  %5979 = verf.f32 %v2934_v40  ;;  %v2938_v5 = vmul.f32 0.70710677, %v9647_v24 }
 0x3b1   : > { %3458 = vmatmul.mubr.f32.gmra.mrb[94].mxu0 %v3159_v4  ;;  %v5968_v15 = vpop.eup %5967  ;;  %v3045_v23 = vadd.f32 1.0, %v5966_v18  ;;  %v9659_v56 = vadd.f32 %v9375_v9, %v9531_v44  ;;  %v3105_v38 = vmul.f32 %v3041_v7, %v2849_v34  ;;  %v2853_v8 = vmul.f32 0.5, %v9592_v28 }
 0x3b2   : > { %3528 = vmatprep.mubr.f32.mxu0 %v3102_v46  ;;  %v5970_v20 = vpop.eup %5969  ;;  %v3050_v58 = vadd.f32 1.0, %v5968_v15  ;;  %v3110_v19 = vmul.f32 %v3046_v47, %v2854_v52  ;;  %5981 = verf.f32 %v2933_v0  ;;  %v2937_v2 = vmul.f32 0.70710677, %v9653_v10  ;;  %v10527_v52 = vld [vmem:[#allocation36_spill] sm:$0xff] }
 0x3b3   : > { %v9665_v16 = vadd.f32 %v9367_v45, %v9551_v53  ;;  %v3049_v59 = vadd.f32 1.0, %v5970_v20  ;;  %v2858_v62 = vmul.f32 0.5, %v9598_v36  ;;  %5983 = verf.f32 %v2938_v5  ;;  %v10522_v36 = vld [vmem:[#allocation45_spill] sm:$0xff] }
 0x3b4   : > { %v5972_v30 = vpop.eup %5971  ;;  %v2942_v13 = vmul.f32 0.70710677, %v9659_v56  ;;  %v9671_v11 = vadd.f32 %v9390_v33, %v9531_v44  ;;  %v3109_v28 = vmul.f32 %v3045_v23, %v2853_v8  ;;  %v2857_v45 = vmul.f32 0.5, %v9605_v39 }
 0x3b5   : > { %3529 = vmatmul.mubr.f32.vlgmr.msra.gmra.mrb[64].mxu0 %v3101_v41  ;;  %v3054_v27 = vadd.f32 1.0, %v5972_v30  ;;  %v3114_v21 = vmul.f32 %v3050_v58, %v2858_v62  ;;  %5985 = verf.f32 %v2937_v2  ;;  %v2941_v63 = vmul.f32 0.70710677, %v9665_v16  ;;  %v10528_v2 = vld [vmem:[#allocation37_spill] sm:$0xff] }
 0x3b6   : > { %3534 = vmatprep.mubr.f32.mxu0 %v3106_v37  ;;  %v5974_v9 = vpop.eup %5973  ;;  %v9677_v22 = vadd.f32 %v10522_v36, %v9551_v53  ;;  %v2862_v50 = vmul.f32 0.5, %v9611_v43  ;;  %5987 = verf.f32 %v2942_v13  ;;  %v2946_v26 = vmul.f32 0.70710677, %v9671_v11  ;;  %v10526_v37 = vld [vmem:[#allocation35_spill] sm:$0xff]  ;;  %v10529_v13 = vld [vmem:[#allocation38_spill] sm:$0xff] }
 0x3b7   : > { %v5976_v55 = vpop.eup %5975  ;;  %v3053_v57 = vadd.f32 1.0, %v5974_v9  ;;  %v9683_v17 = vadd.f32 %v10523_v29, %v9531_v44  ;;  %v3113_v39 = vmul.f32 %v3049_v59, %v2857_v45  ;;  %v2861_v31 = vmul.f32 0.5, %v9617_v25  ;;  %v10531_v29 = vld [vmem:[#allocation40_spill] sm:$0xff] }
 0x3b8   : > { %v5978_v33 = vpop.eup %5977  ;;  %v3058_v48 = vadd.f32 1.0, %v5976_v55  ;;  %v3118_v60 = vmul.f32 %v3054_v27, %v2862_v50  ;;  %5989 = verf.f32 %v2941_v63  ;;  %v2945_v4 = vmul.f32 0.70710677, %v9677_v22 }
 0x3b9   : > { %3535 = vmatmul.mubr.f32.gmra.mrb[66].mxu0 %v3105_v38  ;;  %v3057_v43 = vadd.f32 1.0, %v5978_v33  ;;  %v2866_v61 = vmul.f32 0.5, %v9623_v6  ;;  %v9690_v51 = vadd.f32 %v10524_v14, %v9551_v53  ;;  %5991 = verf.f32 %v2946_v26 }
 0x3ba   : > { %3540 = vmatprep.mubr.f32.mxu0 %v3110_v19  ;;  %v5980_v12 = vpop.eup %5979  ;;  %v2950_v32 = vmul.f32 0.70710677, %v9683_v17  ;;  %v9695_v41 = vadd.f32 %v10525_v3, %v9531_v44  ;;  %v3117_v25 = vmul.f32 %v3053_v57, %v2861_v31  ;;  %v2865_v40 = vmul.f32 0.5, %v9628_v42  ;;  %v10530_v57 = vld [vmem:[#allocation39_spill] sm:$0xff] }
 0x3bb   : > { %v3062_v35 = vadd.f32 1.0, %v5980_v12  ;;  %v3122_v18 = vmul.f32 %v3058_v48, %v2866_v61  ;;  %5993 = verf.f32 %v2945_v4  ;;  %v2870_v15 = vmul.f32 0.5, %v9635_v54  ;;  %v10532_v61 = vld [vmem:[#allocation41_spill] sm:$0xff] }
 0x3bc   : > { %v5982_v46 = vpop.eup %5981  ;;  %v2949_v47 = vmul.f32 0.70710677, %v9690_v51  ;;  %v9702_v34 = vadd.f32 %v10526_v37, %v9551_v53  ;;  %5995 = verf.f32 %v2950_v32  ;;  %v2954_v23 = vmul.f32 0.70710677, %v9695_v41 }
 0x3bd   : > { %3541 = vmatmul.mubr.f32.gmra.mrb[68].mxu0 %v3109_v28  ;;  %v5984_v7 = vpop.eup %5983  ;;  %v3061_v6 = vadd.f32 1.0, %v5982_v46  ;;  %v9707_v20 = vadd.f32 %v10527_v52, %v9531_v44  ;;  %v3121_v42 = vmul.f32 %v3057_v43, %v2865_v40  ;;  %v3126_v38 = vmul.f32 %v3062_v35, %v2870_v15 }
 0x3be   : > { %3546 = vmatprep.mubr.f32.mxu0 %v3114_v21  ;;  %v3066_v5 = vadd.f32 1.0, %v5984_v7  ;;  %v2869_v54 = vmul.f32 0.5, %v9641_v49  ;;  %v2874_v19 = vmul.f32 0.5, %v9647_v24  ;;  %5997 = verf.f32 %v2949_v47 }
 0x3bf   : > { %v5986_v0 = vpop.eup %5985  ;;  %v2953_v8 = vmul.f32 0.70710677, %v9702_v34  ;;  %v9714_v59 = vadd.f32 %v10528_v2, %v9551_v53  ;;  %5999 = verf.f32 %v2954_v23  ;;  %v2958_v9 = vmul.f32 0.70710677, %v9707_v20 }
 0x3c0   : > { %v5988_v58 = vpop.eup %5987  ;;  %v3065_v30 = vadd.f32 1.0, %v5986_v0  ;;  %v9719_v28 = vadd.f32 %v10529_v13, %v9531_v44  ;;  %v3125_v49 = vmul.f32 %v3061_v6, %v2869_v54  ;;  %v3130_v27 = vmul.f32 %v3066_v5, %v2874_v19  ;;  %v10533_v6 = vld [vmem:[#allocation43_spill] sm:$0xff] }
 0x3c1   : > { %3547 = vmatmul.mubr.f32.gmra.mrb[70].mxu0 %v3113_v39  ;;  %v3070_v24 = vadd.f32 1.0, %v5988_v58  ;;  %v2873_v55 = vmul.f32 0.5, %v9653_v10  ;;  %v2878_v45 = vmul.f32 0.5, %v9659_v56  ;;  %6001 = verf.f32 %v2953_v8 }
 0x3c2   : > { %3552 = vmatprep.mubr.f32.mxu0 %v3118_v60  ;;  %v5990_v62 = vpop.eup %5989  ;;  %v2957_v36 = vmul.f32 0.70710677, %v9714_v59  ;;  %v9726_v50 = vadd.f32 %v10530_v57, %v9551_v53  ;;  %6003 = verf.f32 %v2958_v9  ;;  %v2962_v26 = vmul.f32 0.70710677, %v9719_v28 }
 0x3c3   : > { %v5992_v21 = vpop.eup %5991  ;;  %v3069_v63 = vadd.f32 1.0, %v5990_v62  ;;  %v9731_v39 = vadd.f32 %v10531_v29, %v9531_v44  ;;  %v3129_v10 = vmul.f32 %v3065_v30, %v2873_v55  ;;  %v3134_v48 = vmul.f32 %v3070_v24, %v2878_v45 }
 0x3c4   : > { %v3074_v56 = vadd.f32 1.0, %v5992_v21  ;;  %v2877_v12 = vmul.f32 0.5, %v9665_v16  ;;  %v2882_v31 = vmul.f32 0.5, %v9671_v11  ;;  %6005 = verf.f32 %v2957_v36 }
 0x3c5   : > { %3553 = vmatmul.mubr.f32.gmra.mrb[72].mxu0 %v3117_v25  ;;  %v5994_v33 = vpop.eup %5993  ;;  %v2961_v43 = vmul.f32 0.70710677, %v9726_v50  ;;  %v9738_v14 = vadd.f32 %v10532_v61, %v9551_v53  ;;  %6007 = verf.f32 %v2962_v26  ;;  %v2966_v46 = vmul.f32 0.70710677, %v9731_v39 }
 0x3c6   : > { %3558 = vmatprep.mubr.f32.mxu0 %v3122_v18  ;;  %v5996_v60 = vpop.eup %5995  ;;  %v3073_v4 = vadd.f32 1.0, %v5994_v33  ;;  %v9743_v32 = vadd.f32 %v9497_v1, %v9531_v44  ;;  %v3133_v16 = vmul.f32 %v3069_v63, %v2877_v12  ;;  %v3138_v25 = vmul.f32 %v3074_v56, %v2882_v31  ;;  %v10535_v31 = vld [vmem:[#allocation30_spill] sm:$0xff] }
 0x3c7   : > { %v3078_v11 = vadd.f32 1.0, %v5996_v60  ;;  %v2881_v18 = vmul.f32 0.5, %v9677_v22  ;;  %v2886_v7 = vmul.f32 0.5, %v9683_v17  ;;  %6009 = verf.f32 %v2961_v43  ;;  %v10536_v43 = vld [vmem:[#allocation31_spill] sm:$0xff] }
 0x3c8   : > { %v5998_v3 = vpop.eup %5997  ;;  %v2965_v40 = vmul.f32 0.70710677, %v9738_v14  ;;  %v5459_v15 = vadd.f32 %v10533_v6, %v9551_v53  ;;  %6011 = verf.f32 %v2966_v46  ;;  %v2970_v1 = vmul.f32 0.70710677, %v9743_v32 }
 0x3c9   : > { %3559 = vmatmul.mubr.f32.gmra.mrb[74].mxu0 %v3121_v42  ;;  %v6000_v35 = vpop.eup %5999  ;;  %v3077_v47 = vadd.f32 1.0, %v5998_v3  ;;  %v3137_v44 = vmul.f32 %v3073_v4, %v2881_v18  ;;  %v3142_v23 = vmul.f32 %v3078_v11, %v2886_v7  ;;  %v2885_v22 = vmul.f32 0.5, %v9690_v51 }
 0x3ca   : > { %3564 = vmatprep.mubr.f32.mxu0 %v3126_v38  ;;  %v3082_v0 = vadd.f32 1.0, %v6000_v35  ;;  %v2890_v17 = vmul.f32 0.5, %v9695_v41  ;;  %6013 = verf.f32 %v2965_v40  ;;  %v2969_v42 = vmul.f32 0.70710677, %v5459_v15 }
 0x3cb   : > { %v6002_v37 = vpop.eup %6001  ;;  %6015 = verf.f32 %v2970_v1  ;;  %v3141_v53 = vmul.f32 %v3077_v47, %v2885_v22  ;;  %v2889_v30 = vmul.f32 0.5, %v9702_v34  ;;  %v2894_v8 = vmul.f32 0.5, %v9707_v20 }
 0x3cc   : > { %v6004_v52 = vpop.eup %6003  ;;  %v3081_v5 = vadd.f32 1.0, %v6002_v37  ;;  %v3146_v54 = vmul.f32 %v3082_v0, %v2890_v17  ;;  %6017 = verf.f32 %v2969_v42  ;;  %v2898_v24 = vmul.f32 0.5, %v9719_v28 }
 0x3cd   : > { %3565 = vmatmul.mubr.f32.gmra.mrb[76].mxu0 %v3125_v49  ;;  %v3086_v58 = vadd.f32 1.0, %v6004_v52  ;;  %v2893_v49 = vmul.f32 0.5, %v9714_v59  ;;  %v2897_v63 = vmul.f32 0.5, %v9726_v50  ;;  %v2902_v36 = vmul.f32 0.5, %v9731_v39  ;;  %v3291_v39 = vld [vmem:[%s10534_s4] sm:$0x3] }
 0x3ce   : > { %3570 = vmatprep.mubr.f32.mxu0 %v3130_v27  ;;  %v6006_v38 = vpop.eup %6005  ;;  %v3145_v2 = vmul.f32 %v3081_v5, %v2889_v30  ;;  %v2901_v28 = vmul.f32 0.5, %v9738_v14  ;;  %v2905_v12 = vmul.f32 0.5, %v5459_v15  ;;  %v9765_v4 = vrot.slane %v3291_v39, %v10535_v31 }
 0x3cf   : > { %v6008_v19 = vpop.eup %6007  ;;  %v3085_v51 = vadd.f32 1.0, %v6006_v38  ;;  %v3150_v9 = vmul.f32 %v3086_v58, %v2894_v8  ;;  %v9768_v61 = vrot.slane %v3291_v39, %v10536_v43 }
 0x3d0   : > { %v3090_v62 = vadd.f32 1.0, %v6008_v19 }
 0x3d1   : > { %3571 = vmatmul.mubr.f32.gmra.mrb[78].mxu0 %v3129_v10  ;;  %v6010_v41 = vpop.eup %6009  ;;  %v3149_v21 = vmul.f32 %v3085_v51, %v2893_v49  ;;  %v2906_v10 = vmul.f32 0.5, %v9743_v32 }
 0x3d2   : > { %3576 = vmatprep.mubr.f32.mxu0 %v3134_v48  ;;  %v6012_v13 = vpop.eup %6011  ;;  %v3089_v27 = vadd.f32 1.0, %v6010_v41  ;;  %v3154_v45 = vmul.f32 %v3090_v62, %v2898_v24 }
 0x3d3   : > { %v3094_v55 = vadd.f32 1.0, %v6012_v13 }
 0x3d4   : > { %v6014_v34 = vpop.eup %6013  ;;  %v3153_v33 = vmul.f32 %v3089_v27, %v2897_v63 }
 0x3d5   : > { %3577 = vmatmul.mubr.f32.gmra.mrb[80].mxu0 %v3133_v16  ;;  %v6016_v20 = vpop.eup %6015  ;;  %v3093_v57 = vadd.f32 1.0, %v6014_v34  ;;  %v3158_v29 = vmul.f32 %v3094_v55, %v2902_v36 }
 0x3d6   : > { %3582 = vmatprep.mubr.f32.mxu0 %v3138_v25  ;;  %v6018_v26 = vpop.eup %6017  ;;  %v3098_v59 = vadd.f32 1.0, %v6016_v20 }
 0x3d7   : > { %v3097_v56 = vadd.f32 1.0, %v6018_v26  ;;  %v3157_v48 = vmul.f32 %v3093_v57, %v2901_v28 }
 0x3d8   : > { %v3162_v60 = vmul.f32 %v3098_v59, %v2906_v10 }
 0x3d9   : > { %3583 = vmatmul.mubr.f32.gmra.mrb[82].mxu0 %v3137_v44  ;;  %v3161_v50 = vmul.f32 %v3097_v56, %v2905_v12 }
 0x3da   : > { %3588 = vmatprep.mubr.f32.mxu0 %v3142_v23 }
 0x3dd   : > { %3589 = vmatmul.mubr.f32.gmra.mrb[84].mxu0 %v3141_v53 }
 0x3de   : > { %3594 = vmatprep.mubr.f32.mxu0 %v3146_v54 }
 0x3e1   : > { %3595 = vmatmul.mubr.f32.gmra.mrb[86].mxu0 %v3145_v2 }
 0x3e2   : > { %3600 = vmatprep.mubr.f32.mxu0 %v3150_v9 }
 0x3e5   : > { %3601 = vmatmul.mubr.f32.gmra.mrb[88].mxu0 %v3149_v21 }
 0x3e6   : > { %3606 = vmatprep.mubr.f32.mxu0 %v3154_v45 }
 0x3e9   : > { %3607 = vmatmul.mubr.f32.gmra.mrb[90].mxu0 %v3153_v33 }
 0x3ea   : > { %3612 = vmatprep.mubr.f32.mxu0 %v3158_v29 }
 0x3ed   : > { %3613 = vmatmul.mubr.f32.gmra.mrb[92].mxu0 %v3157_v48 }
 0x3ee   : > { %3618 = vmatprep.mubr.f32.mxu0 %v3162_v60 }
 0x3f1   : > { %3619 = vmatmul.mubr.f32.gmra.mrb[94].mxu0 %v3161_v50 }
 0x488   : > { %v3530_v14 = vpop.f32.mrb[64].mxu0 }
 0x489   : > { %v9771_v46 = vadd.f32 %v3530_v14, %v9765_v4  ;;  %v3532_v32 = vpop.f32.mrb[65].mxu0 }
 0x48a   : > { %v9774_v16 = vadd.f32 %v3532_v32, %v9768_v61 }
 0x48b   : > { %v3625_v3 = vmul.f32 %v9771_v46, %v9771_v46 }
 0x48c   : > { %v3536_v11 = vpop.f32.mrb[66].mxu0  ;;  %v3626_v25 = vmul.f32 %v9774_v16, %v9774_v16 }
 0x48d   : > { %v9781_v35 = vadd.f32 %v3536_v11, %v9765_v4  ;;  %v3538_v18 = vpop.f32.mrb[67].mxu0 }
 0x48e   : > { %v9784_v7 = vadd.f32 %v3538_v18, %v9768_v61  ;;  %v3657_v40 = vadd.f32 %v3626_v25, %v3625_v3 }
 0x48f   : > { %v3627_v6 = vmul.f32 %v9781_v35, %v9781_v35 }
 0x490   : > { %v3628_v15 = vmul.f32 %v9784_v7, %v9784_v7  ;;  %v3542_v47 = vpop.f32.mrb[68].mxu0  ;;  %3658 = vadd.xlane.f32.xlu0 %v3657_v40 }
 0x491   : > { %v9791_v1 = vadd.f32 %v3542_v47, %v9765_v4  ;;  %v3544_v44 = vpop.f32.mrb[69].mxu0 }
 0x492   : > { %v9794_v37 = vadd.f32 %v3544_v44, %v9768_v61  ;;  %v3660_v0 = vadd.f32 %v3628_v15, %v3627_v6 }
 0x493   : > { %v3629_v23 = vmul.f32 %v9791_v1, %v9791_v1 }
 0x494   : > { %v3548_v52 = vpop.f32.mrb[70].mxu0  ;;  %3661 = vadd.xlane.f32.xlu0 %v3660_v0  ;;  %v3630_v22 = vmul.f32 %v9794_v37, %v9794_v37 }
 0x495   : > { %v9801_v17 = vadd.f32 %v3548_v52, %v9765_v4  ;;  %v3550_v42 = vpop.f32.mrb[71].mxu0 }
 0x496   : > { %v9804_v5 = vadd.f32 %v3550_v42, %v9768_v61  ;;  %v3663_v53 = vadd.f32 %v3630_v22, %v3629_v23 }
 0x497   : > { %v3631_v38 = vmul.f32 %v9801_v17, %v9801_v17 }
 0x498   : > { %v3632_v58 = vmul.f32 %v9804_v5, %v9804_v5  ;;  %v3554_v54 = vpop.f32.mrb[72].mxu0  ;;  %3664 = vadd.xlane.f32.xlu1 %v3663_v53 }
 0x499   : > { %v9811_v19 = vadd.f32 %v3554_v54, %v9765_v4  ;;  %v3556_v30 = vpop.f32.mrb[73].mxu0 }
 0x49a   : > { %v9814_v8 = vadd.f32 %v3556_v30, %v9768_v61  ;;  %v3666_v51 = vadd.f32 %v3632_v58, %v3631_v38 }
 0x49b   : > { %v3633_v2 = vmul.f32 %v9811_v19, %v9811_v19 }
 0x49c   : > { %v3634_v41 = vmul.f32 %v9814_v8, %v9814_v8  ;;  %v3560_v62 = vpop.f32.mrb[74].mxu0  ;;  %3667 = vadd.xlane.f32.xlu1 %v3666_v51 }
 0x49d   : > { %v9821_v9 = vadd.f32 %v3560_v62, %v9765_v4  ;;  %v3562_v13 = vpop.f32.mrb[75].mxu0 }
 0x49e   : > { %v9824_v49 = vadd.f32 %v3562_v13, %v9768_v61  ;;  %v3669_v24 = vadd.f32 %v3634_v41, %v3633_v2 }
 0x49f   : > { %v3635_v27 = vmul.f32 %v9821_v9, %v9821_v9 }
 0x4a0   : > { %v3636_v21 = vmul.f32 %v9824_v49, %v9824_v49  ;;  %v3566_v34 = vpop.f32.mrb[76].mxu0  ;;  %3670 = vadd.xlane.f32.xlu0 %v3669_v24 }
 0x4a1   : > { %v9831_v55 = vadd.f32 %v3566_v34, %v9765_v4  ;;  %v3568_v45 = vpop.f32.mrb[77].mxu0 }
 0x4a2   : > { %v9834_v20 = vadd.f32 %v3568_v45, %v9768_v61  ;;  %v3672_v63 = vadd.f32 %v3636_v21, %v3635_v27 }
 0x4a3   : > { %v3637_v36 = vmul.f32 %v9831_v55, %v9831_v55 }
 0x4a4   : > { %v3638_v57 = vmul.f32 %v9834_v20, %v9834_v20  ;;  %v3572_v33 = vpop.f32.mrb[78].mxu0  ;;  %3673 = vadd.xlane.f32.xlu1 %v3672_v63 }
 0x4a5   : > { %v9841_v26 = vadd.f32 %v3572_v33, %v9765_v4  ;;  %v3574_v59 = vpop.f32.mrb[79].mxu0 }
 0x4a6   : > { %v9844_v29 = vadd.f32 %v3574_v59, %v9768_v61  ;;  %v3675_v28 = vadd.f32 %v3638_v57, %v3637_v36 }
 0x4a7   : > { %v3639_v10 = vmul.f32 %v9841_v26, %v9841_v26 }
 0x4a8   : > { %v3640_v56 = vmul.f32 %v9844_v29, %v9844_v29  ;;  %v3578_v48 = vpop.f32.mrb[80].mxu0  ;;  %3676 = vadd.xlane.f32.xlu0 %v3675_v28 }
 0x4a9   : > { %v9851_v60 = vadd.f32 %v3578_v48, %v9765_v4  ;;  %v3580_v12 = vpop.f32.mrb[81].mxu0 }
 0x4aa   : > { %v9854_v50 = vadd.f32 %v3580_v12, %v9768_v61  ;;  %v3678_v39 = vadd.f32 %v3640_v56, %v3639_v10 }
 0x4ab   : > { %v3641_v31 = vmul.f32 %v9851_v60, %v9851_v60 }
 0x4ac   : > { %v3642_v43 = vmul.f32 %v9854_v50, %v9854_v50  ;;  %v3584_v14 = vpop.f32.mrb[82].mxu0  ;;  %3679 = vadd.xlane.f32.xlu1 %v3678_v39 }
 0x4ad   : > { %v9861_v32 = vadd.f32 %v3584_v14, %v9765_v4  ;;  %v3586_v3 = vpop.f32.mrb[83].mxu0 }
 0x4ae   : > { %v9864_v11 = vadd.f32 %v3586_v3, %v9768_v61  ;;  %v3681_v25 = vadd.f32 %v3642_v43, %v3641_v31 }
 0x4af   : > { %v3643_v18 = vmul.f32 %v9861_v32, %v9861_v32 }
 0x4b0   : > { %v3644_v40 = vmul.f32 %v9864_v11, %v9864_v11  ;;  %v3590_v6 = vpop.f32.mrb[84].mxu0  ;;  %3682 = vadd.xlane.f32.xlu0 %v3681_v25 }
 0x4b1   : > { %v9871_v15 = vadd.f32 %v3590_v6, %v9765_v4  ;;  %v3592_v47 = vpop.f32.mrb[85].mxu0 }
 0x4b2   : > { %v9874_v44 = vadd.f32 %v3592_v47, %v9768_v61  ;;  %v3684_v0 = vadd.f32 %v3644_v40, %v3643_v18 }
 0x4b3   : > { %v3645_v23 = vmul.f32 %v9871_v15, %v9871_v15 }
 0x4b4   : > { %v3646_v52 = vmul.f32 %v9874_v44, %v9874_v44  ;;  %v3596_v22 = vpop.f32.mrb[86].mxu0  ;;  %3685 = vadd.xlane.f32.xlu1 %v3684_v0 }
 0x4b5   : > { %v9881_v42 = vadd.f32 %v3596_v22, %v9765_v4  ;;  %v3598_v53 = vpop.f32.mrb[87].mxu0 }
 0x4b6   : > { %v9884_v38 = vadd.f32 %v3598_v53, %v9768_v61  ;;  %v3687_v58 = vadd.f32 %v3646_v52, %v3645_v23 }
 0x4b7   : > { %v3647_v54 = vmul.f32 %v9881_v42, %v9881_v42 }
 0x4b8   : > { %v3648_v30 = vmul.f32 %v9884_v38, %v9884_v38  ;;  %v3602_v51 = vpop.f32.mrb[88].mxu0  ;;  %3688 = vadd.xlane.f32.xlu0 %v3687_v58 }
 0x4b9   : > { %v9891_v2 = vadd.f32 %v3602_v51, %v9765_v4  ;;  %v3604_v41 = vpop.f32.mrb[89].mxu0 }
 0x4ba   : > { %v9894_v62 = vadd.f32 %v3604_v41, %v9768_v61  ;;  %v3690_v13 = vadd.f32 %v3648_v30, %v3647_v54 }
 0x4bb   : > { %v3649_v24 = vmul.f32 %v9891_v2, %v9891_v2 }
 0x4bc   : > { %v3650_v27 = vmul.f32 %v9894_v62, %v9894_v62  ;;  %v3608_v21 = vpop.f32.mrb[90].mxu0  ;;  %3691 = vadd.xlane.f32.xlu1 %v3690_v13 }
 0x4bd   : > { %v9901_v34 = vadd.f32 %v3608_v21, %v9765_v4  ;;  %v3610_v45 = vpop.f32.mrb[91].mxu0 }
 0x4be   : > { %v9904_v63 = vadd.f32 %v3610_v45, %v9768_v61  ;;  %v3693_v36 = vadd.f32 %v3650_v27, %v3649_v24 }
 0x4bf   : > { %v3651_v57 = vmul.f32 %v9901_v34, %v9901_v34 }
 0x4c0   : > { %v3652_v33 = vmul.f32 %v9904_v63, %v9904_v63  ;;  %v3614_v59 = vpop.f32.mrb[92].mxu0  ;;  %3694 = vadd.xlane.f32.xlu0 %v3693_v36 }
 0x4c1   : > { %v9911_v28 = vadd.f32 %v3614_v59, %v9765_v4  ;;  %v3616_v10 = vpop.f32.mrb[93].mxu0 }
 0x4c2   : > { %v9914_v56 = vadd.f32 %v3616_v10, %v9768_v61  ;;  %v3696_v48 = vadd.f32 %v3652_v33, %v3651_v57 }
 0x4c3   : > { %v3653_v12 = vmul.f32 %v9911_v28, %v9911_v28 }
 0x4c4   : > { %v3654_v39 = vmul.f32 %v9914_v56, %v9914_v56  ;;  %v3620_v31 = vpop.f32.mrb[94].mxu0  ;;  %3697 = vadd.xlane.f32.xlu1 %v3696_v48 }
 0x4c5   : > { %v9921_v43 = vadd.f32 %v3620_v31, %v9765_v4  ;;  %v3622_v14 = vpop.f32.mrb[95].mxu0 }
 0x4c6   : > { %v9924_v3 = vadd.f32 %v3622_v14, %v9768_v61  ;;  %v3699_v25 = vadd.f32 %v3654_v39, %v3653_v12 }
 0x4c7   : > { %v3655_v18 = vmul.f32 %v9921_v43, %v9921_v43 }
 0x4c8   : > { %v3656_v40 = vmul.f32 %v9924_v3, %v9924_v3  ;;  %3700 = vadd.xlane.f32.xlu0 %v3699_v25 }
 0x4ca   : > { %v3702_v6 = vadd.f32 %v3656_v40, %v3655_v18 }
 0x4cc   : > { %3703 = vadd.xlane.f32.xlu1 %v3702_v6 }
 0x51d   : > { %v3659_v47 = vpop.xlane.xlu0 %3658 }
 0x51e   : > { %v3705_v0 = vmax.f32 %v3659_v47, 1e-24 }
 0x520   : > { %6019 = vrsqrt.f32 %v3705_v0 }
 0x521   : > { %v3662_v4 = vpop.xlane.xlu0 %3661 }
 0x522   : > { %v3706_v23 = vmax.f32 %v3662_v4, 1e-24 }
 0x524   : > { %6021 = vrsqrt.f32 %v3706_v23 }
 0x525   : > { %v3665_v61 = vpop.xlane.xlu1 %3664 }
 0x526   : > { %v3707_v52 = vmax.f32 %v3665_v61, 1e-24 }
 0x528   : > { %6023 = vrsqrt.f32 %v3707_v52 }
 0x529   : > { %v3668_v22 = vpop.xlane.xlu1 %3667 }
 0x52a   : > { %v6020_v53 = vpop.eup %6019  ;;  %v3708_v58 = vmax.f32 %v3668_v22, 1e-24 }
 0x52b   : > { %v3737_v54 = vmul.f32 %v6020_v53, %v9771_v46  ;;  %v3738_v30 = vmul.f32 %v6020_v53, %v9774_v16 }
 0x52c   : > { %6025 = vrsqrt.f32 %v3708_v58 }
 0x52d   : > { %3769 = vst [vmem:[#allocation2] sm:$0xff] %v3737_v54  ;;  %3770 = vst [vmem:[#allocation2 + $0x8] sm:$0xff] %v3738_v30  ;;  %v3671_v51 = vpop.xlane.xlu0 %3670 }
 0x52e   : > { %3801 = vst [vmem:[%s6862_s29] sm:$0xff] %v3737_v54  ;;  %3802 = vst [vmem:[%s6862_s29 + $0x8] sm:$0xff] %v3738_v30  ;;  %v6022_v41 = vpop.eup %6021  ;;  %v3709_v13 = vmax.f32 %v3671_v51, 1e-24 }
 0x52f   : > { %v3739_v24 = vmul.f32 %v6022_v41, %v9781_v35  ;;  %v3740_v27 = vmul.f32 %v6022_v41, %v9784_v7 }
 0x530   : > { %6027 = vrsqrt.f32 %v3709_v13 }
 0x531   : > { %3771 = vst [vmem:[#allocation2 + $0x10] sm:$0xff] %v3739_v24  ;;  %3772 = vst [vmem:[#allocation2 + $0x18] sm:$0xff] %v3740_v27  ;;  %v3674_v46 = vpop.xlane.xlu1 %3673 }
 0x532   : > { %3803 = vst [vmem:[%s6862_s29 + $0x10] sm:$0xff] %v3739_v24  ;;  %3804 = vst [vmem:[%s6862_s29 + $0x18] sm:$0xff] %v3740_v27  ;;  %v6024_v16 = vpop.eup %6023  ;;  %v3710_v21 = vmax.f32 %v3674_v46, 1e-24 }
 0x533   : > { %v3741_v45 = vmul.f32 %v6024_v16, %v9791_v1  ;;  %v3742_v36 = vmul.f32 %v6024_v16, %v9794_v37 }
 0x534   : > { %6029 = vrsqrt.f32 %v3710_v21 }
 0x535   : > { %3773 = vst [vmem:[#allocation2 + $0x20] sm:$0xff] %v3741_v45  ;;  %3774 = vst [vmem:[#allocation2 + $0x28] sm:$0xff] %v3742_v36  ;;  %v3677_v35 = vpop.xlane.xlu0 %3676 }
 0x536   : > { %3805 = vst [vmem:[%s6862_s29 + $0x20] sm:$0xff] %v3741_v45  ;;  %3806 = vst [vmem:[%s6862_s29 + $0x28] sm:$0xff] %v3742_v36  ;;  %v6026_v7 = vpop.eup %6025  ;;  %v3711_v57 = vmax.f32 %v3677_v35, 1e-24 }
 0x537   : > { %v3743_v33 = vmul.f32 %v6026_v7, %v9801_v17  ;;  %v3744_v59 = vmul.f32 %v6026_v7, %v9804_v5 }
 0x538   : > { %6031 = vrsqrt.f32 %v3711_v57 }
 0x539   : > { %3775 = vst [vmem:[#allocation2 + $0x30] sm:$0xff] %v3743_v33  ;;  %3776 = vst [vmem:[#allocation2 + $0x38] sm:$0xff] %v3744_v59  ;;  %v3680_v1 = vpop.xlane.xlu1 %3679 }
 0x53a   : > { %3807 = vst [vmem:[%s6862_s29 + $0x30] sm:$0xff] %v3743_v33  ;;  %3808 = vst [vmem:[%s6862_s29 + $0x38] sm:$0xff] %v3744_v59  ;;  %v6028_v37 = vpop.eup %6027  ;;  %v3712_v10 = vmax.f32 %v3680_v1, 1e-24 }
 0x53b   : > { %v3745_v48 = vmul.f32 %v6028_v37, %v9811_v19  ;;  %v3746_v12 = vmul.f32 %v6028_v37, %v9814_v8 }
 0x53c   : > { %6033 = vrsqrt.f32 %v3712_v10 }
 0x53d   : > { %3777 = vst [vmem:[#allocation2 + $0x40] sm:$0xff] %v3745_v48  ;;  %3778 = vst [vmem:[#allocation2 + $0x48] sm:$0xff] %v3746_v12  ;;  %v3683_v17 = vpop.xlane.xlu0 %3682 }
 0x53e   : > { %3809 = vst [vmem:[%s6862_s29 + $0x40] sm:$0xff] %v3745_v48  ;;  %3810 = vst [vmem:[%s6862_s29 + $0x48] sm:$0xff] %v3746_v12  ;;  %v6030_v5 = vpop.eup %6029  ;;  %v3713_v39 = vmax.f32 %v3683_v17, 1e-24 }
 0x53f   : > { %v3747_v31 = vmul.f32 %v6030_v5, %v9821_v9  ;;  %v3748_v14 = vmul.f32 %v6030_v5, %v9824_v49 }
 0x540   : > { %6035 = vrsqrt.f32 %v3713_v39 }
 0x541   : > { %3779 = vst [vmem:[#allocation2 + $0x50] sm:$0xff] %v3747_v31  ;;  %3780 = vst [vmem:[#allocation2 + $0x58] sm:$0xff] %v3748_v14  ;;  %v3686_v19 = vpop.xlane.xlu1 %3685 }
 0x542   : > { %3811 = vst [vmem:[%s6862_s29 + $0x50] sm:$0xff] %v3747_v31  ;;  %3812 = vst [vmem:[%s6862_s29 + $0x58] sm:$0xff] %v3748_v14  ;;  %v6032_v8 = vpop.eup %6031  ;;  %v3714_v25 = vmax.f32 %v3686_v19, 1e-24 }
 0x543   : > { %v3749_v18 = vmul.f32 %v6032_v8, %v9831_v55  ;;  %v3750_v40 = vmul.f32 %v6032_v8, %v9834_v20 }
 0x544   : > { %6037 = vrsqrt.f32 %v3714_v25 }
 0x545   : > { %3781 = vst [vmem:[#allocation2 + $0x60] sm:$0xff] %v3749_v18  ;;  %3782 = vst [vmem:[#allocation2 + $0x68] sm:$0xff] %v3750_v40  ;;  %v3689_v9 = vpop.xlane.xlu0 %3688 }
 0x546   : > { %3813 = vst [vmem:[%s6862_s29 + $0x60] sm:$0xff] %v3749_v18  ;;  %3814 = vst [vmem:[%s6862_s29 + $0x68] sm:$0xff] %v3750_v40  ;;  %v6034_v49 = vpop.eup %6033  ;;  %v3715_v6 = vmax.f32 %v3689_v9, 1e-24 }
 0x547   : > { %v3751_v47 = vmul.f32 %v6034_v49, %v9841_v26  ;;  %v3752_v0 = vmul.f32 %v6034_v49, %v9844_v29 }
 0x548   : > { %6039 = vrsqrt.f32 %v3715_v6 }
 0x549   : > { %3783 = vst [vmem:[#allocation2 + $0x70] sm:$0xff] %v3751_v47  ;;  %3784 = vst [vmem:[#allocation2 + $0x78] sm:$0xff] %v3752_v0  ;;  %v3692_v55 = vpop.xlane.xlu1 %3691 }
 0x54a   : > { %3815 = vst [vmem:[%s6862_s29 + $0x70] sm:$0xff] %v3751_v47  ;;  %3816 = vst [vmem:[%s6862_s29 + $0x78] sm:$0xff] %v3752_v0  ;;  %v6036_v20 = vpop.eup %6035  ;;  %v3716_v4 = vmax.f32 %v3692_v55, 1e-24 }
 0x54b   : > { %v3753_v23 = vmul.f32 %v6036_v20, %v9851_v60  ;;  %v3754_v61 = vmul.f32 %v6036_v20, %v9854_v50 }
 0x54c   : > { %6041 = vrsqrt.f32 %v3716_v4 }
 0x54d   : > { %3785 = vst [vmem:[#allocation2 + $0x80] sm:$0xff] %v3753_v23  ;;  %3786 = vst [vmem:[#allocation2 + $0x88] sm:$0xff] %v3754_v61  ;;  %v3695_v26 = vpop.xlane.xlu0 %3694 }
 0x54e   : > { %3817 = vst [vmem:[%s6862_s29 + $0x80] sm:$0xff] %v3753_v23  ;;  %3818 = vst [vmem:[%s6862_s29 + $0x88] sm:$0xff] %v3754_v61  ;;  %v6038_v29 = vpop.eup %6037  ;;  %v3717_v52 = vmax.f32 %v3695_v26, 1e-24 }
 0x54f   : > { %v3755_v22 = vmul.f32 %v6038_v29, %v9861_v32  ;;  %v3756_v53 = vmul.f32 %v6038_v29, %v9864_v11 }
 0x550   : > { %6043 = vrsqrt.f32 %v3717_v52 }
 0x551   : > { %3787 = vst [vmem:[#allocation2 + $0x90] sm:$0xff] %v3755_v22  ;;  %3788 = vst [vmem:[#allocation2 + $0x98] sm:$0xff] %v3756_v53  ;;  %v3698_v60 = vpop.xlane.xlu1 %3697 }
 0x552   : > { %3819 = vst [vmem:[%s6862_s29 + $0x90] sm:$0xff] %v3755_v22  ;;  %3820 = vst [vmem:[%s6862_s29 + $0x98] sm:$0xff] %v3756_v53  ;;  %v6040_v50 = vpop.eup %6039  ;;  %v3718_v58 = vmax.f32 %v3698_v60, 1e-24 }
 0x553   : > { %v3757_v54 = vmul.f32 %v6040_v50, %v9871_v15  ;;  %v3758_v30 = vmul.f32 %v6040_v50, %v9874_v44 }
 0x554   : > { %6045 = vrsqrt.f32 %v3718_v58 }
 0x555   : > { %3789 = vst [vmem:[#allocation2 + $0xa0] sm:$0xff] %v3757_v54  ;;  %3790 = vst [vmem:[#allocation2 + $0xa8] sm:$0xff] %v3758_v30  ;;  %v3701_v32 = vpop.xlane.xlu0 %3700 }
 0x556   : > { %3821 = vst [vmem:[%s6862_s29 + $0xa0] sm:$0xff] %v3757_v54  ;;  %3822 = vst [vmem:[%s6862_s29 + $0xa8] sm:$0xff] %v3758_v30  ;;  %v6042_v11 = vpop.eup %6041  ;;  %v3719_v51 = vmax.f32 %v3701_v32, 1e-24 }
 0x557   : > { %v3759_v41 = vmul.f32 %v6042_v11, %v9881_v42  ;;  %v3760_v13 = vmul.f32 %v6042_v11, %v9884_v38 }
 0x558   : > { %6047 = vrsqrt.f32 %v3719_v51 }
 0x559   : > { %3791 = vst [vmem:[#allocation2 + $0xb0] sm:$0xff] %v3759_v41  ;;  %3792 = vst [vmem:[#allocation2 + $0xb8] sm:$0xff] %v3760_v13  ;;  %v3704_v15 = vpop.xlane.xlu1 %3703 }
 0x55a   : > { %3823 = vst [vmem:[%s6862_s29 + $0xb0] sm:$0xff] %v3759_v41  ;;  %3824 = vst [vmem:[%s6862_s29 + $0xb8] sm:$0xff] %v3760_v13  ;;  %v6044_v44 = vpop.eup %6043  ;;  %v3720_v24 = vmax.f32 %v3704_v15, 1e-24 }
 0x55b   : > { %v3761_v27 = vmul.f32 %v6044_v44, %v9891_v2  ;;  %v3762_v46 = vmul.f32 %v6044_v44, %v9894_v62 }
 0x55c   : > { %6049 = vrsqrt.f32 %v3720_v24 }
 0x55d   : > { %3793 = vst [vmem:[#allocation2 + $0xc0] sm:$0xff] %v3761_v27  ;;  %3794 = vst [vmem:[#allocation2 + $0xc8] sm:$0xff] %v3762_v46 }
 0x55e   : > { %3825 = vst [vmem:[%s6862_s29 + $0xc0] sm:$0xff] %v3761_v27  ;;  %3826 = vst [vmem:[%s6862_s29 + $0xc8] sm:$0xff] %v3762_v46  ;;  %v6046_v42 = vpop.eup %6045 }
 0x55f   : > { %v3763_v38 = vmul.f32 %v6046_v42, %v9901_v34  ;;  %v3764_v16 = vmul.f32 %v6046_v42, %v9904_v63 }
 0x561   : > { %3795 = vst [vmem:[#allocation2 + $0xd0] sm:$0xff] %v3763_v38  ;;  %3796 = vst [vmem:[#allocation2 + $0xd8] sm:$0xff] %v3764_v16 }
 0x562   : > { %3827 = vst [vmem:[%s6862_s29 + $0xd0] sm:$0xff] %v3763_v38  ;;  %3828 = vst [vmem:[%s6862_s29 + $0xd8] sm:$0xff] %v3764_v16  ;;  %v6048_v2 = vpop.eup %6047 }
 0x563   : > { %v3765_v62 = vmul.f32 %v6048_v2, %v9911_v28  ;;  %v3766_v21 = vmul.f32 %v6048_v2, %v9914_v56 }
 0x565   : > { %3797 = vst [vmem:[#allocation2 + $0xe0] sm:$0xff] %v3765_v62  ;;  %3798 = vst [vmem:[#allocation2 + $0xe8] sm:$0xff] %v3766_v21 }
 0x566   : > { %3829 = vst [vmem:[%s6862_s29 + $0xe0] sm:$0xff] %v3765_v62  ;;  %3830 = vst [vmem:[%s6862_s29 + $0xe8] sm:$0xff] %v3766_v21  ;;  %v6050_v45 = vpop.eup %6049 }
 0x567   : > { %v3767_v34 = vmul.f32 %v6050_v45, %v9921_v43  ;;  %v3768_v63 = vmul.f32 %v6050_v45, %v9924_v3 }
 0x569   : > { %3799 = vst [vmem:[#allocation2 + $0xf0] sm:$0xff] %v3767_v34  ;;  %3800 = vst [vmem:[#allocation2 + $0xf8] sm:$0xff] %v3768_v63 }
 0x56a   : > { %3831 = vst [vmem:[%s6862_s29 + $0xf0] sm:$0xff] %v3767_v34  ;;  %3832 = vst [vmem:[%s6862_s29 + $0xf8] sm:$0xff] %v3768_v63 }
 0x56b PF: > { %v3866_v28 = vld [vmem:[%s6858_s24 + $0x8] sm:$0xff]  ;;  %v3868_v43 = vld [vmem:[%s6858_s24 + $0x18] sm:$0xff]  ;;  %v3865_v35 = vld [vmem:[%s6858_s24] sm:$0xff]  ;;  %s10538_s14 = sld [smem:[#allocation26_spill]]  ;;  %s10539_s11 = sld [smem:[#allocation61_spill]] }
 0x56c   : > { %v3870_v56 = vld [vmem:[%s6858_s24 + $0x28] sm:$0xff]  ;;  %v3872_v36 = vld [vmem:[%s6858_s24 + $0x38] sm:$0xff]  ;;  %v3869_v7 = vld [vmem:[%s6858_s24 + $0x20] sm:$0xff]  ;;  %s4418_s12 = sshll.u32 %s6862_s29, 4  ;;  %s4385_s18 = scalar_lea.sflag [#allocation11], %s6839_s27  ;;  %s10129_s12 = int_to_ptr.vmem [resolvable:$true] %s4418_s12 }
 0x56d   : > { %v5173_v3 = vpack.c.bf16 %v3870_v56, %v3866_v28  ;;  %v5237_v57 = vpack.c.bf16 %v3872_v36, %v3868_v43  ;;  %v5175_v33 = vpack.c.bf16 %v3869_v7, %v3865_v35  ;;  %v3867_v59 = vld [vmem:[%s6858_s24 + $0x10] sm:$0xff]  ;;  %v3874_v37 = vld [vmem:[%s6858_s24 + $0x48] sm:$0xff]  ;;  %v3876_v12 = vld [vmem:[%s6858_s24 + $0x58] sm:$0xff]  ;;  %s6108_s22 = scalar_lea.vmem %s10129_s12, 4096  ;;  %s6291_s9 = smov [#allocation10]  }
 0x56e   : > { %v3871_v1 = vld [vmem:[%s6858_s24 + $0x30] sm:$0xff]  ;;  %v3878_v48 = vld [vmem:[%s6858_s24 + $0x68] sm:$0xff]  ;;  %v3880_v17 = vld [vmem:[%s6858_s24 + $0x78] sm:$0xff]  ;;  %p6109_p5 = scmp.ne.s32.totalorder %s10129_s12, %s6108_s22  ;;  %s6112_s4 = sshll.u32 %s6291_s9, 4  ;;  %s6113_s4 = int_to_ptr.vmem [resolvable:$false] %s6112_s4 }
 0x56f   : > { %5174 = vmatprep.subr.bf16.mxu0 %v5173_v3  ;;  %v5239_v10 = vpack.c.bf16 %v3871_v1, %v3867_v59  ;;  %5238 = vmatprep.subr.bf16.mxu1 %v5237_v57  ;;  %v5177_v5 = vpack.c.bf16 %v3878_v48, %v3874_v37  ;;  %v5241_v39 = vpack.c.bf16 %v3880_v17, %v3876_v12  ;;  %v3873_v31 = vld [vmem:[%s6858_s24 + $0x40] sm:$0xff]  ;;  %v3875_v19 = vld [vmem:[%s6858_s24 + $0x50] sm:$0xff]  ;;  %v3882_v18 = vld [vmem:[%s6858_s24 + $0x88] sm:$0xff]  ;;  %s6114_s25 = scalar_lea.vmem %s6113_s4, 8192  ;;  %p6115_p13 = scmp.lt.s32.totalorder %s10129_s12, %s6113_s4 }
 0x570   : > { %5176 = vmatpush1.bf16.msra.mxu0 %v5175_v33  ;;  %v3877_v14 = vld [vmem:[%s6858_s24 + $0x60] sm:$0xff]  ;;  %v3879_v25 = vld [vmem:[%s6858_s24 + $0x70] sm:$0xff]  ;;  %v3886_v40 = vld [vmem:[%s6858_s24 + $0xa8] sm:$0xff]  ;;  %p6116_p4 = scmp.lt.s32.totalorder %s6114_s25, %s6108_s22 }
 0x571   : > { %5240 = vmatpush1.bf16.msra.mxu1 %v5239_v10  ;;  %v5179_v8 = vpack.c.bf16 %v3877_v14, %v3873_v31  ;;  %5178 = vmatprep.subr.bf16.mxu0 %v5177_v5  ;;  %v5243_v9 = vpack.c.bf16 %v3879_v25, %v3875_v19  ;;  %v5181_v49 = vpack.c.bf16 %v3886_v40, %v3882_v18  ;;  %v3884_v6 = vld [vmem:[%s6858_s24 + $0x98] sm:$0xff]  ;;  %v3881_v0 = vld [vmem:[%s6858_s24 + $0x80] sm:$0xff]  ;;  %v3883_v4 = vld [vmem:[%s6858_s24 + $0x90] sm:$0xff]  ;;  %s10540_s26 = smov %s10539_s11  ;;  %p10541_p8 = scmp.ne.s32.totalorder %s10538_s14, 0 }
 0x572   : > { %5242 = vmatprep.subr.bf16.mxu1 %v5241_v39  ;;  %v3888_v47 = vld [vmem:[%s6858_s24 + $0xb8] sm:$0xff]  ;;  %v3885_v20 = vld [vmem:[%s6858_s24 + $0xa0] sm:$0xff]  ;;  %v3887_v23 = vld [vmem:[%s6858_s24 + $0xb0] sm:$0xff]  ;;  %p6117_p1 = por %p6116_p4, %p6115_p13 }
 0x573   : > { %v5245_v55 = vpack.c.bf16 %v3888_v47, %v3884_v6  ;;  %v5183_v61 = vpack.c.bf16 %v3885_v20, %v3881_v0  ;;  %v3890_v26 = vld [vmem:[%s6858_s24 + $0xc8] sm:$0xff]  ;;  %v3892_v52 = vld [vmem:[%s6858_s24 + $0xd8] sm:$0xff]  ;;  %v5247_v22 = vpack.c.bf16 %v3887_v23, %v3883_v4  ;;  %v3889_v50 = vld [vmem:[%s6858_s24 + $0xc0] sm:$0xff]  ;;  %p6110_p2 = pnand %p6109_p5, %p10541_p8 }
 0x574   : > { %5180 = vmatpush1.bf16.msra.mxu0 %v5179_v8  ;;  %v3894_v29 = vld [vmem:[%s6858_s24 + $0xe8] sm:$0xff]  ;;  %v3896_v60 = vld [vmem:[%s6858_s24 + $0xf8] sm:$0xff]  ;;  %v3893_v58 = vld [vmem:[%s6858_s24 + $0xe0] sm:$0xff] }
 0x575   : > { %5244 = vmatpush1.bf16.msra.mxu1 %v5243_v9  ;;  %5182 = vmatprep.subr.bf16.mxu0 %v5181_v49  ;;  %v5185_v53 = vpack.c.bf16 %v3894_v29, %v3890_v26  ;;  %v5249_v54 = vpack.c.bf16 %v3896_v60, %v3892_v52  ;;  %v3891_v30 = vld [vmem:[%s6858_s24 + $0xd0] sm:$0xff]  ;;  %v3898_v11 = vld [vmem:[%s6858_s24 + $0x108] sm:$0xff]  ;;  %v3900_v41 = vld [vmem:[%s6858_s24 + $0x118] sm:$0xff]  ;;  %v5187_v15 = vpack.c.bf16 %v3893_v58, %v3889_v50  ;;  %p6111_p12 = pneg %p6110_p2 }
 0x576   : > { %5246 = vmatprep.subr.bf16.mxu1 %v5245_v55  ;;  %v3895_v32 = vld [vmem:[%s6858_s24 + $0xf0] sm:$0xff]  ;;  %v3902_v51 = vld [vmem:[%s6858_s24 + $0x128] sm:$0xff]  ;;  %v3904_v13 = vld [vmem:[%s6858_s24 + $0x138] sm:$0xff] }
 0x577   : > { %v5251_v44 = vpack.c.bf16 %v3895_v32, %v3891_v30  ;;  %v5189_v24 = vpack.c.bf16 %v3902_v51, %v3898_v11  ;;  %v3897_v27 = vld [vmem:[%s6858_s24 + $0x100] sm:$0xff]  ;;  %v3899_v42 = vld [vmem:[%s6858_s24 + $0x110] sm:$0xff]  ;;  %v5253_v38 = vpack.c.bf16 %v3904_v13, %v3900_v41  ;;  %v3906_v2 = vld [vmem:[%s6858_s24 + $0x148] sm:$0xff]  ;;  %p6118_p6 = pnand %p6117_p1, %p6111_p12 }
 0x578   : > { %5184 = vmatpush1.bf16.msra.mxu0 %v5183_v61  ;;  %v3901_v46 = vld [vmem:[%s6858_s24 + $0x120] sm:$0xff]  ;;  %v3903_v16 = vld [vmem:[%s6858_s24 + $0x130] sm:$0xff]  ;;  %v3910_v62 = vld [vmem:[%s6858_s24 + $0x168] sm:$0xff] }
 0x579   : > { %5248 = vmatpush1.bf16.msra.mxu1 %v5247_v22  ;;  %5186 = vmatprep.subr.bf16.mxu0 %v5185_v53  ;;  %v3908_v21 = vld [vmem:[%s6858_s24 + $0x158] sm:$0xff]  ;;  %v5191_v34 = vpack.c.bf16 %v3901_v46, %v3897_v27  ;;  %v5255_v63 = vpack.c.bf16 %v3903_v16, %v3899_v42  ;;  %v5193_v28 = vpack.c.bf16 %v3910_v62, %v3906_v2  ;;  %v3905_v56 = vld [vmem:[%s6858_s24 + $0x140] sm:$0xff]  ;;  %v3907_v3 = vld [vmem:[%s6858_s24 + $0x150] sm:$0xff] }
 0x57a   : > { %5250 = vmatprep.subr.bf16.mxu1 %v5249_v54  ;;  %v3912_v45 = vld [vmem:[%s6858_s24 + $0x178] sm:$0xff]  ;;  %v3909_v43 = vld [vmem:[%s6858_s24 + $0x160] sm:$0xff]  ;;  %v3911_v35 = vld [vmem:[%s6858_s24 + $0x170] sm:$0xff] }
 0x57b   : > { %v5257_v36 = vpack.c.bf16 %v3912_v45, %v3908_v21  ;;  %v3914_v7 = vld [vmem:[%s6858_s24 + $0x188] sm:$0xff]  ;;  %v3916_v33 = vld [vmem:[%s6858_s24 + $0x198] sm:$0xff]  ;;  %v5195_v1 = vpack.c.bf16 %v3909_v43, %v3905_v56  ;;  %v5259_v37 = vpack.c.bf16 %v3911_v35, %v3907_v3  ;;  %v3913_v48 = vld [vmem:[%s6858_s24 + $0x180] sm:$0xff] }
 0x57c   : > { %5188 = vmatpush1.bf16.msra.mxu0 %v5187_v15  ;;  %v3918_v57 = vld [vmem:[%s6858_s24 + $0x1a8] sm:$0xff]  ;;  %v3920_v59 = vld [vmem:[%s6858_s24 + $0x1b8] sm:$0xff]  ;;  %v3917_v12 = vld [vmem:[%s6858_s24 + $0x1a0] sm:$0xff] }
 0x57d   : > { %5252 = vmatpush1.bf16.msra.mxu1 %v5251_v44  ;;  %5190 = vmatprep.subr.bf16.mxu0 %v5189_v24  ;;  %v5197_v10 = vpack.c.bf16 %v3918_v57, %v3914_v7  ;;  %v3915_v17 = vld [vmem:[%s6858_s24 + $0x190] sm:$0xff]  ;;  %v5261_v5 = vpack.c.bf16 %v3920_v59, %v3916_v33  ;;  %v3922_v31 = vld [vmem:[%s6858_s24 + $0x1c8] sm:$0xff]  ;;  %v3924_v19 = vld [vmem:[%s6858_s24 + $0x1d8] sm:$0xff]  ;;  %v5199_v25 = vpack.c.bf16 %v3917_v12, %v3913_v48 }
 0x57e   : > { %5254 = vmatprep.subr.bf16.mxu1 %v5253_v38  ;;  %v3919_v39 = vld [vmem:[%s6858_s24 + $0x1b0] sm:$0xff]  ;;  %v3926_v14 = vld [vmem:[%s6858_s24 + $0x1e8] sm:$0xff]  ;;  %v3928_v8 = vld [vmem:[%s6858_s24 + $0x1f8] sm:$0xff] }
 0x57f   : > { %v5263_v18 = vpack.c.bf16 %v3919_v39, %v3915_v17  ;;  %v5201_v40 = vpack.c.bf16 %v3926_v14, %v3922_v31  ;;  %v3921_v9 = vld [vmem:[%s6858_s24 + $0x1c0] sm:$0xff]  ;;  %v3923_v6 = vld [vmem:[%s6858_s24 + $0x1d0] sm:$0xff]  ;;  %v5265_v47 = vpack.c.bf16 %v3928_v8, %v3924_v19  ;;  %v3930_v55 = vld [vmem:[%s6858_s24 + $0x208] sm:$0xff] }
 0x580   : > { %5192 = vmatpush1.bf16.msra.mxu0 %v5191_v34  ;;  %v3925_v49 = vld [vmem:[%s6858_s24 + $0x1e0] sm:$0xff]  ;;  %v3927_v0 = vld [vmem:[%s6858_s24 + $0x1f0] sm:$0xff]  ;;  %v3934_v20 = vld [vmem:[%s6858_s24 + $0x228] sm:$0xff] }
 0x581   : > { %5256 = vmatpush1.bf16.msra.mxu1 %v5255_v63  ;;  %5194 = vmatprep.subr.bf16.mxu0 %v5193_v28  ;;  %v3932_v4 = vld [vmem:[%s6858_s24 + $0x218] sm:$0xff]  ;;  %v5203_v61 = vpack.c.bf16 %v3925_v49, %v3921_v9  ;;  %v5267_v26 = vpack.c.bf16 %v3927_v0, %v3923_v6  ;;  %v5205_v29 = vpack.c.bf16 %v3934_v20, %v3930_v55  ;;  %v3929_v52 = vld [vmem:[%s6858_s24 + $0x200] sm:$0xff]  ;;  %v3931_v53 = vld [vmem:[%s6858_s24 + $0x210] sm:$0xff] }
 0x582   : > { %5258 = vmatprep.subr.bf16.mxu1 %v5257_v36  ;;  %v3936_v23 = vld [vmem:[%s6858_s24 + $0x238] sm:$0xff]  ;;  %v3933_v22 = vld [vmem:[%s6858_s24 + $0x220] sm:$0xff]  ;;  %v3935_v50 = vld [vmem:[%s6858_s24 + $0x230] sm:$0xff] }
 0x583   : > { %v5269_v60 = vpack.c.bf16 %v3936_v23, %v3932_v4  ;;  %v3938_v58 = vld [vmem:[%s6858_s24 + $0x248] sm:$0xff]  ;;  %v3940_v30 = vld [vmem:[%s6858_s24 + $0x258] sm:$0xff]  ;;  %v5207_v11 = vpack.c.bf16 %v3933_v22, %v3929_v52  ;;  %v5271_v51 = vpack.c.bf16 %v3935_v50, %v3931_v53  ;;  %v3937_v13 = vld [vmem:[%s6858_s24 + $0x240] sm:$0xff] }
 0x584   : > { %5196 = vmatpush1.bf16.msra.mxu0 %v5195_v1  ;;  %v3942_v54 = vld [vmem:[%s6858_s24 + $0x268] sm:$0xff]  ;;  %v3944_v32 = vld [vmem:[%s6858_s24 + $0x278] sm:$0xff]  ;;  %v3941_v15 = vld [vmem:[%s6858_s24 + $0x260] sm:$0xff] }
 0x585   : > { %5260 = vmatpush1.bf16.msra.mxu1 %v5259_v37  ;;  %5198 = vmatprep.subr.bf16.mxu0 %v5197_v10  ;;  %v5209_v41 = vpack.c.bf16 %v3942_v54, %v3938_v58  ;;  %v3939_v44 = vld [vmem:[%s6858_s24 + $0x250] sm:$0xff]  ;;  %v5273_v24 = vpack.c.bf16 %v3944_v32, %v3940_v30  ;;  %v3946_v46 = vld [vmem:[%s6858_s24 + $0x288] sm:$0xff]  ;;  %v3948_v38 = vld [vmem:[%s6858_s24 + $0x298] sm:$0xff]  ;;  %v5211_v2 = vpack.c.bf16 %v3941_v15, %v3937_v13 }
 0x586   : > { %5262 = vmatprep.subr.bf16.mxu1 %v5261_v5  ;;  %v3943_v27 = vld [vmem:[%s6858_s24 + $0x270] sm:$0xff]  ;;  %v3950_v42 = vld [vmem:[%s6858_s24 + $0x2a8] sm:$0xff]  ;;  %v3952_v16 = vld [vmem:[%s6858_s24 + $0x2b8] sm:$0xff] }
 0x587   : > { %v5275_v62 = vpack.c.bf16 %v3943_v27, %v3939_v44  ;;  %v5213_v21 = vpack.c.bf16 %v3950_v42, %v3946_v46  ;;  %v3945_v45 = vld [vmem:[%s6858_s24 + $0x280] sm:$0xff]  ;;  %v3947_v63 = vld [vmem:[%s6858_s24 + $0x290] sm:$0xff]  ;;  %v5277_v28 = vpack.c.bf16 %v3952_v16, %v3948_v38  ;;  %v3954_v43 = vld [vmem:[%s6858_s24 + $0x2c8] sm:$0xff] }
 0x588   : > { %5200 = vmatpush1.bf16.msra.mxu0 %v5199_v25  ;;  %v3949_v34 = vld [vmem:[%s6858_s24 + $0x2a0] sm:$0xff]  ;;  %v3951_v56 = vld [vmem:[%s6858_s24 + $0x2b0] sm:$0xff]  ;;  %v3958_v3 = vld [vmem:[%s6858_s24 + $0x2e8] sm:$0xff] }
 0x589   : > { %5264 = vmatpush1.bf16.msra.mxu1 %v5263_v18  ;;  %5202 = vmatprep.subr.bf16.mxu0 %v5201_v40  ;;  %v3956_v36 = vld [vmem:[%s6858_s24 + $0x2d8] sm:$0xff]  ;;  %v5215_v7 = vpack.c.bf16 %v3949_v34, %v3945_v45  ;;  %v3953_v57 = vld [vmem:[%s6858_s24 + $0x2c0] sm:$0xff]  ;;  %v5279_v33 = vpack.c.bf16 %v3951_v56, %v3947_v63  ;;  %v5217_v59 = vpack.c.bf16 %v3958_v3, %v3954_v43  ;;  %v3955_v37 = vld [vmem:[%s6858_s24 + $0x2d0] sm:$0xff] }
 0x58a   : > { %5266 = vmatprep.subr.bf16.mxu1 %v5265_v47  ;;  %v3960_v35 = vld [vmem:[%s6858_s24 + $0x2f8] sm:$0xff]  ;;  %v3957_v1 = vld [vmem:[%s6858_s24 + $0x2e0] sm:$0xff]  ;;  %v3959_v10 = vld [vmem:[%s6858_s24 + $0x2f0] sm:$0xff] }
 0x58b   : > { %v5281_v48 = vpack.c.bf16 %v3960_v35, %v3956_v36  ;;  %v3962_v12 = vld [vmem:[%s6858_s24 + $0x308] sm:$0xff]  ;;  %v3964_v39 = vld [vmem:[%s6858_s24 + $0x318] sm:$0xff]  ;;  %v5219_v14 = vpack.c.bf16 %v3957_v1, %v3953_v57  ;;  %v5283_v19 = vpack.c.bf16 %v3959_v10, %v3955_v37  ;;  %v3961_v25 = vld [vmem:[%s6858_s24 + $0x300] sm:$0xff] }
 0x58c   : > { %5204 = vmatpush1.bf16.msra.mxu0 %v5203_v61  ;;  %v3966_v17 = vld [vmem:[%s6858_s24 + $0x328] sm:$0xff]  ;;  %v3968_v31 = vld [vmem:[%s6858_s24 + $0x338] sm:$0xff]  ;;  %v3965_v18 = vld [vmem:[%s6858_s24 + $0x320] sm:$0xff] }
 0x58d   : > { %5268 = vmatpush1.bf16.msra.mxu1 %v5267_v26  ;;  %5206 = vmatprep.subr.bf16.mxu0 %v5205_v29  ;;  %v3834_v5 = vld [vmem:[#allocation2 + $0x8] sm:$0xff]  ;;  %v5221_v8 = vpack.c.bf16 %v3966_v17, %v3962_v12  ;;  %v3963_v40 = vld [vmem:[%s6858_s24 + $0x310] sm:$0xff]  ;;  %v5285_v9 = vpack.c.bf16 %v3968_v31, %v3964_v39  ;;  %v3972_v0 = vld [vmem:[%s6858_s24 + $0x358] sm:$0xff]  ;;  %v5223_v20 = vpack.c.bf16 %v3965_v18, %v3961_v25 }
 0x58e   : > { %5270 = vmatprep.subr.bf16.mxu1 %v5269_v60  ;;  %4057 = vmatprep.mubr.f32.mxu0 %v3834_v5  ;;  %v3967_v49 = vld [vmem:[%s6858_s24 + $0x330] sm:$0xff]  ;;  %v3970_v6 = vld [vmem:[%s6858_s24 + $0x348] sm:$0xff]  ;;  %v3976_v55 = vld [vmem:[%s6858_s24 + $0x378] sm:$0xff] }
 0x58f   : > { %4218 = vmatprep.mubr.f32.mxu1 %v3834_v5  ;;  %v3974_v47 = vld [vmem:[%s6858_s24 + $0x368] sm:$0xff]  ;;  %v5287_v4 = vpack.c.bf16 %v3967_v49, %v3963_v40  ;;  %v3969_v61 = vld [vmem:[%s6858_s24 + $0x340] sm:$0xff]  ;;  %v3971_v29 = vld [vmem:[%s6858_s24 + $0x350] sm:$0xff]  ;;  %v5289_v52 = vpack.c.bf16 %v3976_v55, %v3972_v0 }
 0x590   : > { %5208 = vmatpush1.bf16.msra.mxu0 %v5207_v11  ;;  %v5225_v23 = vpack.c.bf16 %v3974_v47, %v3970_v6  ;;  %v3973_v26 = vld [vmem:[%s6858_s24 + $0x360] sm:$0xff]  ;;  %v3975_v22 = vld [vmem:[%s6858_s24 + $0x370] sm:$0xff]  ;;  %v3978_v53 = vld [vmem:[%s6858_s24 + $0x388] sm:$0xff] }
 0x591   : > { %5272 = vmatpush1.bf16.msra.mxu1 %v5271_v51  ;;  %5210 = vmatprep.subr.bf16.mxu0 %v5209_v41  ;;  %v3982_v60 = vld [vmem:[%s6858_s24 + $0x3a8] sm:$0xff]  ;;  %v3980_v50 = vld [vmem:[%s6858_s24 + $0x398] sm:$0xff]  ;;  %v5227_v54 = vpack.c.bf16 %v3973_v26, %v3969_v61  ;;  %v5291_v30 = vpack.c.bf16 %v3975_v22, %v3971_v29  ;;  %v3977_v11 = vld [vmem:[%s6858_s24 + $0x380] sm:$0xff] }
 0x592   : > { %5274 = vmatprep.subr.bf16.mxu1 %v5273_v24  ;;  %v3984_v58 = vld [vmem:[%s6858_s24 + $0x3b8] sm:$0xff]  ;;  %v5229_v32 = vpack.c.bf16 %v3982_v60, %v3978_v53  ;;  %v3981_v51 = vld [vmem:[%s6858_s24 + $0x3a0] sm:$0xff]  ;;  %v3979_v41 = vld [vmem:[%s6858_s24 + $0x390] sm:$0xff] }
 0x593   : > { %v5293_v13 = vpack.c.bf16 %v3984_v58, %v3980_v50  ;;  %v3983_v15 = vld [vmem:[%s6858_s24 + $0x3b0] sm:$0xff]  ;;  %v3986_v44 = vld [vmem:[%s6858_s24 + $0x3c8] sm:$0xff]  ;;  %v3988_v27 = vld [vmem:[%s6858_s24 + $0x3d8] sm:$0xff]  ;;  %v5231_v42 = vpack.c.bf16 %v3981_v51, %v3977_v11 }
 0x594   : > { %5212 = vmatpush1.bf16.msra.mxu0 %v5211_v2  ;;  %v3990_v24 = vld [vmem:[%s6858_s24 + $0x3e8] sm:$0xff]  ;;  %v3992_v46 = vld [vmem:[%s6858_s24 + $0x3f8] sm:$0xff]  ;;  %v5295_v38 = vpack.c.bf16 %v3983_v15, %v3979_v41  ;;  %v3985_v2 = vld [vmem:[%s6858_s24 + $0x3c0] sm:$0xff] }
 0x595   : > { %5276 = vmatpush1.bf16.msra.mxu1 %v5275_v62  ;;  %5214 = vmatprep.subr.bf16.mxu0 %v5213_v21  ;;  %v5233_v16 = vpack.c.bf16 %v3990_v24, %v3986_v44  ;;  %v3989_v62 = vld [vmem:[%s6858_s24 + $0x3e0] sm:$0xff]  ;;  %v5297_v21 = vpack.c.bf16 %v3992_v46, %v3988_v27  ;;  %v3987_v45 = vld [vmem:[%s6858_s24 + $0x3d0] sm:$0xff]  ;;  %v3836_v43 = vld [vmem:[#allocation2 + $0x18] sm:$0xff] }
 0x596   : > { %5278 = vmatprep.subr.bf16.mxu1 %v5277_v28  ;;  %v3991_v34 = vld [vmem:[%s6858_s24 + $0x3f0] sm:$0xff]  ;;  %v5235_v63 = vpack.c.bf16 %v3989_v62, %v3985_v2  ;;  %v3833_v56 = vld [vmem:[#allocation2] sm:$0xff]  ;;  %v3838_v36 = vld [vmem:[#allocation2 + $0x28] sm:$0xff]  ;;  %s10537_s24 = sld [smem:[#allocation19_spill]] }
 0x597   : > { %v5299_v28 = vpack.c.bf16 %v3991_v34, %v3987_v45  ;;  %v3835_v3 = vld [vmem:[#allocation2 + $0x10] sm:$0xff]  ;;  %v3837_v35 = vld [vmem:[#allocation2 + $0x20] sm:$0xff]  ;;  %v3844_v1 = vld [vmem:[#allocation2 + $0x58] sm:$0xff] }
 0x598   : > { %5216 = vmatpush1.bf16.msra.mxu0 %v5215_v7  ;;  %v3840_v7 = vld [vmem:[#allocation2 + $0x38] sm:$0xff]  ;;  %v3839_v57 = vld [vmem:[#allocation2 + $0x30] sm:$0xff]  ;;  %v3846_v10 = vld [vmem:[#allocation2 + $0x68] sm:$0xff] }
 0x599   : > { %5280 = vmatpush1.bf16.msra.mxu1 %v5279_v33  ;;  %5218 = vmatprep.subr.bf16.mxu0 %v5217_v59  ;;  %v3842_v33 = vld [vmem:[#allocation2 + $0x48] sm:$0xff]  ;;  %v3841_v59 = vld [vmem:[#allocation2 + $0x40] sm:$0xff]  ;;  %v3843_v37 = vld [vmem:[#allocation2 + $0x50] sm:$0xff] }
 0x59a   : > { %5282 = vmatprep.subr.bf16.mxu1 %v5281_v48  ;;  %v3845_v48 = vld [vmem:[#allocation2 + $0x60] sm:$0xff]  ;;  %v3848_v12 = vld [vmem:[#allocation2 + $0x78] sm:$0xff]  ;;  %v3847_v17 = vld [vmem:[#allocation2 + $0x70] sm:$0xff] }
 0x59b   : > { %v3850_v5 = vld [vmem:[#allocation2 + $0x88] sm:$0xff]  ;;  %v3849_v39 = vld [vmem:[#allocation2 + $0x80] sm:$0xff]  ;;  %v3852_v31 = vld [vmem:[#allocation2 + $0x98] sm:$0xff] }
 0x59c   : > { %5220 = vmatpush1.bf16.msra.mxu0 %v5219_v14  ;;  %v3851_v14 = vld [vmem:[#allocation2 + $0x90] sm:$0xff]  ;;  %v3856_v25 = vld [vmem:[#allocation2 + $0xb8] sm:$0xff]  ;;  %v3858_v40 = vld [vmem:[#allocation2 + $0xc8] sm:$0xff]  ;;  %s4596_s2 = sshll.u32 %s10537_s24, 12 }
 0x59d   : > { %5284 = vmatpush1.bf16.msra.mxu1 %v5283_v19  ;;  %5222 = vmatprep.subr.bf16.mxu0 %v5221_v8  ;;  %v3854_v19 = vld [vmem:[#allocation2 + $0xa8] sm:$0xff]  ;;  %v3853_v8 = vld [vmem:[#allocation2 + $0xa0] sm:$0xff]  ;;  %v3855_v18 = vld [vmem:[#allocation2 + $0xb0] sm:$0xff]  ;;  %s10126_s30 = scalar_lea.hbm %s10539_s11, %s4596_s2 }
 0x59e   : > { %5286 = vmatprep.subr.bf16.mxu1 %v5285_v9  ;;  %v3857_v9 = vld [vmem:[#allocation2 + $0xc0] sm:$0xff]  ;;  %v3860_v49 = vld [vmem:[#allocation2 + $0xd8] sm:$0xff]  ;;  %v3859_v6 = vld [vmem:[#allocation2 + $0xd0] sm:$0xff] }
 0x59f   : > { %v3862_v47 = vld [vmem:[#allocation2 + $0xe8] sm:$0xff]  ;;  %v3861_v0 = vld [vmem:[#allocation2 + $0xe0] sm:$0xff]  ;;  %v3864_v55 = vld [vmem:[#allocation2 + $0xf8] sm:$0xff] }
 0x5a0   : > { %5224 = vmatpush1.bf16.msra.mxu0 %v5223_v20  ;;  %v3863_v20 = vld [vmem:[#allocation2 + $0xf0] sm:$0xff] }
 0x5a1   : > { %5288 = vmatpush1.bf16.msra.mxu1 %v5287_v4  ;;  %5226 = vmatprep.subr.bf16.mxu0 %v5225_v23 }
 0x5a2   : > { %5290 = vmatprep.subr.bf16.mxu1 %v5289_v52 }
 0x5a4   : > { %5228 = vmatpush1.bf16.msra.mxu0 %v5227_v54 }
 0x5a5   : > { %5292 = vmatpush1.bf16.msra.mxu1 %v5291_v30  ;;  %5230 = vmatprep.subr.bf16.mxu0 %v5229_v32 }
 0x5a6   : > { %5294 = vmatprep.subr.bf16.mxu1 %v5293_v13 }
 0x5a8   : > { %5232 = vmatpush1.bf16.msra.mxu0 %v5231_v42 }
 0x5a9   : > { %5296 = vmatpush1.bf16.msra.mxu1 %v5295_v38  ;;  %5234 = vmatprep.subr.bf16.mxu0 %v5233_v16 }
 0x5aa   : > { %5298 = vmatprep.subr.bf16.mxu1 %v5297_v21 }
 0x5ac   : > { %5236 = vmatpush1.bf16.msra.mxu0 %v5235_v63 }
 0x5ad   : > { %5300 = vmatpush1.bf16.msra.mxu1 %v5299_v28 }
 0x5af   : > { %4058 = vmatmul.mubr.f32.vlgmr.msra.gmra.mrb[0].mxu0 %v3833_v56 }
 0x5b0   : > { %4219 = vmatmul.mubr.f32.vlgmr.msra.gmra.mrb[0].mxu1 %v3833_v56  ;;  %4063 = vmatprep.mubr.f32.mxu0 %v3836_v43 }
 0x5b1   : > { %4224 = vmatprep.mubr.f32.mxu1 %v3836_v43 }
 0x5b3   : > { %4064 = vmatmul.mubr.f32.gmra.mrb[2].mxu0 %v3835_v3 }
 0x5b4   : > { %4225 = vmatmul.mubr.f32.gmra.mrb[2].mxu1 %v3835_v3  ;;  %4069 = vmatprep.mubr.f32.mxu0 %v3838_v36 }
 0x5b5   : > { %4230 = vmatprep.mubr.f32.mxu1 %v3838_v36 }
 0x5b7   : > { %4070 = vmatmul.mubr.f32.gmra.mrb[4].mxu0 %v3837_v35 }
 0x5b8   : > { %4231 = vmatmul.mubr.f32.gmra.mrb[4].mxu1 %v3837_v35  ;;  %4075 = vmatprep.mubr.f32.mxu0 %v3840_v7 }
 0x5b9   : > { %4236 = vmatprep.mubr.f32.mxu1 %v3840_v7 }
 0x5bb   : > { %4076 = vmatmul.mubr.f32.gmra.mrb[6].mxu0 %v3839_v57 }
 0x5bc   : > { %4237 = vmatmul.mubr.f32.gmra.mrb[6].mxu1 %v3839_v57  ;;  %4081 = vmatprep.mubr.f32.mxu0 %v3842_v33 }
 0x5bd   : > { %4242 = vmatprep.mubr.f32.mxu1 %v3842_v33 }
 0x5bf   : > { %4082 = vmatmul.mubr.f32.gmra.mrb[8].mxu0 %v3841_v59 }
 0x5c0   : > { %4243 = vmatmul.mubr.f32.gmra.mrb[8].mxu1 %v3841_v59  ;;  %4087 = vmatprep.mubr.f32.mxu0 %v3844_v1 }
 0x5c1   : > { %4248 = vmatprep.mubr.f32.mxu1 %v3844_v1 }
 0x5c3   : > { %4088 = vmatmul.mubr.f32.gmra.mrb[10].mxu0 %v3843_v37 }
 0x5c4   : > { %4249 = vmatmul.mubr.f32.gmra.mrb[10].mxu1 %v3843_v37  ;;  %4093 = vmatprep.mubr.f32.mxu0 %v3846_v10 }
 0x5c5   : > { %4254 = vmatprep.mubr.f32.mxu1 %v3846_v10 }
 0x5c7   : > { %4094 = vmatmul.mubr.f32.gmra.mrb[12].mxu0 %v3845_v48 }
 0x5c8   : > { %4255 = vmatmul.mubr.f32.gmra.mrb[12].mxu1 %v3845_v48  ;;  %4099 = vmatprep.mubr.f32.mxu0 %v3848_v12 }
 0x5c9   : > { %4260 = vmatprep.mubr.f32.mxu1 %v3848_v12 }
 0x5cb   : > { %4100 = vmatmul.mubr.f32.gmra.mrb[14].mxu0 %v3847_v17 }
 0x5cc   : > { %4261 = vmatmul.mubr.f32.gmra.mrb[14].mxu1 %v3847_v17  ;;  %4105 = vmatprep.mubr.f32.mxu0 %v3850_v5 }
 0x5cd   : > { %4266 = vmatprep.mubr.f32.mxu1 %v3850_v5 }
 0x5cf   : > { %4106 = vmatmul.mubr.f32.gmra.mrb[16].mxu0 %v3849_v39 }
 0x5d0   : > { %4267 = vmatmul.mubr.f32.gmra.mrb[16].mxu1 %v3849_v39  ;;  %4111 = vmatprep.mubr.f32.mxu0 %v3852_v31 }
 0x5d1   : > { %4272 = vmatprep.mubr.f32.mxu1 %v3852_v31 }
 0x5d3   : > { %4112 = vmatmul.mubr.f32.gmra.mrb[18].mxu0 %v3851_v14 }
 0x5d4   : > { %4273 = vmatmul.mubr.f32.gmra.mrb[18].mxu1 %v3851_v14  ;;  %4117 = vmatprep.mubr.f32.mxu0 %v3854_v19 }
 0x5d5   : > { %4278 = vmatprep.mubr.f32.mxu1 %v3854_v19 }
 0x5d7   : > { %4118 = vmatmul.mubr.f32.gmra.mrb[20].mxu0 %v3853_v8 }
 0x5d8   : > { %4279 = vmatmul.mubr.f32.gmra.mrb[20].mxu1 %v3853_v8  ;;  %4123 = vmatprep.mubr.f32.mxu0 %v3856_v25 }
 0x5d9   : > { %4284 = vmatprep.mubr.f32.mxu1 %v3856_v25 }
 0x5db   : > { %4124 = vmatmul.mubr.f32.gmra.mrb[22].mxu0 %v3855_v18 }
 0x5dc   : > { %4285 = vmatmul.mubr.f32.gmra.mrb[22].mxu1 %v3855_v18  ;;  %4129 = vmatprep.mubr.f32.mxu0 %v3858_v40 }
 0x5dd   : > { %4290 = vmatprep.mubr.f32.mxu1 %v3858_v40 }
 0x5df   : > { %4130 = vmatmul.mubr.f32.gmra.mrb[24].mxu0 %v3857_v9 }
 0x5e0   : > { %4291 = vmatmul.mubr.f32.gmra.mrb[24].mxu1 %v3857_v9  ;;  %4135 = vmatprep.mubr.f32.mxu0 %v3860_v49 }
 0x5e1   : > { %4296 = vmatprep.mubr.f32.mxu1 %v3860_v49 }
 0x5e3   : > { %4136 = vmatmul.mubr.f32.gmra.mrb[26].mxu0 %v3859_v6 }
 0x5e4   : > { %4297 = vmatmul.mubr.f32.gmra.mrb[26].mxu1 %v3859_v6  ;;  %4141 = vmatprep.mubr.f32.mxu0 %v3862_v47 }
 0x5e5   : > { %4302 = vmatprep.mubr.f32.mxu1 %v3862_v47 }
 0x5e7   : > { %4142 = vmatmul.mubr.f32.gmra.mrb[28].mxu0 %v3861_v0 }
 0x5e8   : > { %4303 = vmatmul.mubr.f32.gmra.mrb[28].mxu1 %v3861_v0  ;;  %4147 = vmatprep.mubr.f32.mxu0 %v3864_v55 }
 0x5e9   : > { %4308 = vmatprep.mubr.f32.mxu1 %v3864_v55 }
 0x5eb   : > { %4148 = vmatmul.mubr.f32.gmra.mrb[30].mxu0 %v3863_v20 }
 0x5ec   : > { %4309 = vmatmul.mubr.f32.gmra.mrb[30].mxu1 %v3863_v20 }
 0x5ed   : > { %6121 = shalt.err (!%p6118_p6)
}
 0x5ee   : > { %s6122_s29 = scalar_lea.hbm %s10126_s30, 4096  ;;  %s6126_s28 = scalar_lea.hbm %s10540_s26, 8192 }
 0x5ef   : > { %p6123_p9 = scmp.ne.s32.totalorder %s10126_s30, %s6122_s29  ;;  %p6127_p10 = scmp.lt.u32.totalorder %s10126_s30, %s10540_s26 }
 0x5f0   : > { %p6128_p0 = scmp.lt.u32.totalorder %s6126_s28, %s6122_s29  ;;  %p6130_p5 = scmp.lt.u32.totalorder %s6122_s29, %s10126_s30 }
 0x5f1   : > { %p6124_p7 = pnand %p6123_p9, %p10541_p8 }
 0x5f2   : > { %p6129_p11 = por %p6128_p0, %p6127_p10 }
 0x5f3   : > { %p6125_p3 = pneg %p6124_p7 }
 0x5f4   : > { %p6131_p2 = por %p6130_p5, %p6129_p11 }
 0x5f6   : > { %p6132_p12 = pnand %p6131_p2, %p6125_p3 }
 0x5f8   : > { %6135 = shalt.err (!%p6132_p12)
}
 0x5f9   : > { %s6292_s25 = smov 256   ;;  %s6293_s22 = smov 16  }
 0x5fa   : > { %5631 = dma.vmem_to_hbm [thread:$0]  (%p10541_p8), %s10129_s12, 4096, %s10126_s30, %s4385_s18, %s6292_s25, %s6292_s25, %s6293_s22  }
 0x5fb   : > { %s4585_s27 = sshll.u32 %s6266_s17, 2  ;;  %s4594_s14 = sshll.u32 %s10537_s24, 7 }
 0x5fc   : > { %s4398_s30 = sadd.s32 %s4594_s14, %s4585_s27  ;;  %s4401_s17 = sshll.u32 %s6860_s8, 4  ;;  %s10223_s17 = int_to_ptr.vmem [resolvable:$true] %s4401_s17 }
 0x5fd   : > { %s4587_s12 = sshll.u32 %s4398_s30, 7  ;;  %s10542_s24 = sld [smem:[#allocation25_spill]] }
 0x5fe   : > { %s10543_s29 = sld [smem:[#allocation60_spill]]  ;;  %s10544_s23 = sand.u32 1, %s6238_s10  }
 0x5ff   : > { %s10231_s28 = scalar_lea.sflag [#allocation5], %s10544_s23  ;;  %s6136_s11 = scalar_lea.vmem %s10223_s17, 8192 }
 0x600   : > { %p6137_p8 = scmp.ne.s32.totalorder %s10223_s17, %s6136_s11  ;;  %s6294_s9 = smov [#allocation9]  }
 0x601   : > { %s6140_s25 = sshll.u32 %s6294_s9, 4  ;;  %s6141_s25 = int_to_ptr.vmem [resolvable:$false] %s6140_s25 }
 0x602   : > { %s6142_s22 = scalar_lea.vmem %s6141_s25, 16384  ;;  %p6143_p6 = scmp.lt.s32.totalorder %s10223_s17, %s6141_s25 }
 0x603   : > { %p10545_p13 = scmp.ne.s32.totalorder %s10542_s24, 0  ;;  %p6144_p9 = scmp.lt.s32.totalorder %s6142_s22, %s6136_s11 }
 0x604   : > { %s10221_s2 = scalar_lea.hbm %s10543_s29, %s4587_s12 }
 0x605   : > { %p6138_p4 = pnand %p6137_p8, %p10545_p13  ;;  %p6145_p7 = por %p6144_p9, %p6143_p6 }
 0x607   : > { %p6139_p1 = pneg %p6138_p4 }
 0x609   : > { %p6146_p3 = pnand %p6145_p7, %p6139_p1 }
 0x682   : > { %v4059_v4 = vpop.f32.mrb[0].mxu0 }
 0x683   : > { %4315 = vst [vmem:[%s6860_s8] sm:$0xff] %v4059_v4  ;;  %v4220_v23 = vpop.f32.mrb[0].mxu1  ;;  %v4061_v61 = vpop.f32.mrb[1].mxu0 }
 0x684   : > { %4317 = vst [vmem:[%s6860_s8 + $0x10] sm:$0xff] %v4220_v23  ;;  %4316 = vst [vmem:[%s6860_s8 + $0x8] sm:$0xff] %v4061_v61  ;;  %v4222_v26 = vpop.f32.mrb[1].mxu1 }
 0x685   : > { %4318 = vst [vmem:[%s6860_s8 + $0x18] sm:$0xff] %v4222_v26 }
 0x686   : > { %v4065_v29 = vpop.f32.mrb[2].mxu0 }
 0x687   : > { %4319 = vst [vmem:[%s6860_s8 + $0x20] sm:$0xff] %v4065_v29  ;;  %v4226_v52 = vpop.f32.mrb[2].mxu1  ;;  %v4067_v22 = vpop.f32.mrb[3].mxu0 }
 0x688   : > { %4321 = vst [vmem:[%s6860_s8 + $0x30] sm:$0xff] %v4226_v52  ;;  %4320 = vst [vmem:[%s6860_s8 + $0x28] sm:$0xff] %v4067_v22  ;;  %v4228_v53 = vpop.f32.mrb[3].mxu1 }
 0x689   : > { %4322 = vst [vmem:[%s6860_s8 + $0x38] sm:$0xff] %v4228_v53 }
 0x68a   : > { %v4071_v60 = vpop.f32.mrb[4].mxu0 }
 0x68b   : > { %4323 = vst [vmem:[%s6860_s8 + $0x40] sm:$0xff] %v4071_v60  ;;  %v4232_v50 = vpop.f32.mrb[4].mxu1  ;;  %v4073_v58 = vpop.f32.mrb[5].mxu0 }
 0x68c   : > { %4325 = vst [vmem:[%s6860_s8 + $0x50] sm:$0xff] %v4232_v50  ;;  %4324 = vst [vmem:[%s6860_s8 + $0x48] sm:$0xff] %v4073_v58  ;;  %v4234_v54 = vpop.f32.mrb[5].mxu1 }
 0x68d   : > { %4326 = vst [vmem:[%s6860_s8 + $0x58] sm:$0xff] %v4234_v54 }
 0x68e   : > { %v4077_v30 = vpop.f32.mrb[6].mxu0 }
 0x68f   : > { %4327 = vst [vmem:[%s6860_s8 + $0x60] sm:$0xff] %v4077_v30  ;;  %v4238_v32 = vpop.f32.mrb[6].mxu1  ;;  %v4079_v11 = vpop.f32.mrb[7].mxu0 }
 0x690   : > { %4329 = vst [vmem:[%s6860_s8 + $0x70] sm:$0xff] %v4238_v32  ;;  %4328 = vst [vmem:[%s6860_s8 + $0x68] sm:$0xff] %v4079_v11  ;;  %v4240_v51 = vpop.f32.mrb[7].mxu1 }
 0x691   : > { %4330 = vst [vmem:[%s6860_s8 + $0x78] sm:$0xff] %v4240_v51 }
 0x692   : > { %v4083_v41 = vpop.f32.mrb[8].mxu0 }
 0x693   : > { %4331 = vst [vmem:[%s6860_s8 + $0x80] sm:$0xff] %v4083_v41  ;;  %v4244_v13 = vpop.f32.mrb[8].mxu1  ;;  %v4085_v15 = vpop.f32.mrb[9].mxu0 }
 0x694   : > { %4333 = vst [vmem:[%s6860_s8 + $0x90] sm:$0xff] %v4244_v13  ;;  %4332 = vst [vmem:[%s6860_s8 + $0x88] sm:$0xff] %v4085_v15  ;;  %v4246_v44 = vpop.f32.mrb[9].mxu1 }
 0x695   : > { %4334 = vst [vmem:[%s6860_s8 + $0x98] sm:$0xff] %v4246_v44 }
 0x696   : > { %v4089_v24 = vpop.f32.mrb[10].mxu0 }
 0x697   : > { %4335 = vst [vmem:[%s6860_s8 + $0xa0] sm:$0xff] %v4089_v24  ;;  %v4250_v27 = vpop.f32.mrb[10].mxu1  ;;  %v4091_v46 = vpop.f32.mrb[11].mxu0 }
 0x698   : > { %4337 = vst [vmem:[%s6860_s8 + $0xb0] sm:$0xff] %v4250_v27  ;;  %4336 = vst [vmem:[%s6860_s8 + $0xa8] sm:$0xff] %v4091_v46  ;;  %v4252_v42 = vpop.f32.mrb[11].mxu1 }
 0x699   : > { %4338 = vst [vmem:[%s6860_s8 + $0xb8] sm:$0xff] %v4252_v42 }
 0x69a   : > { %v4095_v38 = vpop.f32.mrb[12].mxu0 }
 0x69b   : > { %4339 = vst [vmem:[%s6860_s8 + $0xc0] sm:$0xff] %v4095_v38  ;;  %v4256_v16 = vpop.f32.mrb[12].mxu1  ;;  %v4097_v2 = vpop.f32.mrb[13].mxu0 }
 0x69c   : > { %4341 = vst [vmem:[%s6860_s8 + $0xd0] sm:$0xff] %v4256_v16  ;;  %4340 = vst [vmem:[%s6860_s8 + $0xc8] sm:$0xff] %v4097_v2  ;;  %v4258_v62 = vpop.f32.mrb[13].mxu1 }
 0x69d   : > { %4342 = vst [vmem:[%s6860_s8 + $0xd8] sm:$0xff] %v4258_v62 }
 0x69e   : > { %v4101_v21 = vpop.f32.mrb[14].mxu0 }
 0x69f   : > { %4343 = vst [vmem:[%s6860_s8 + $0xe0] sm:$0xff] %v4101_v21  ;;  %v4262_v45 = vpop.f32.mrb[14].mxu1  ;;  %v4103_v34 = vpop.f32.mrb[15].mxu0 }
 0x6a0   : > { %4345 = vst [vmem:[%s6860_s8 + $0xf0] sm:$0xff] %v4262_v45  ;;  %4344 = vst [vmem:[%s6860_s8 + $0xe8] sm:$0xff] %v4103_v34  ;;  %v4264_v63 = vpop.f32.mrb[15].mxu1 }
 0x6a1   : > { %4346 = vst [vmem:[%s6860_s8 + $0xf8] sm:$0xff] %v4264_v63 }
 0x6a2   : > { %v4107_v28 = vpop.f32.mrb[16].mxu0 }
 0x6a3   : > { %4347 = vst [vmem:[%s6860_s8 + $0x100] sm:$0xff] %v4107_v28  ;;  %v4268_v56 = vpop.f32.mrb[16].mxu1  ;;  %v4109_v43 = vpop.f32.mrb[17].mxu0 }
 0x6a4   : > { %4349 = vst [vmem:[%s6860_s8 + $0x110] sm:$0xff] %v4268_v56  ;;  %4348 = vst [vmem:[%s6860_s8 + $0x108] sm:$0xff] %v4109_v43  ;;  %v4270_v3 = vpop.f32.mrb[17].mxu1 }
 0x6a5   : > { %4350 = vst [vmem:[%s6860_s8 + $0x118] sm:$0xff] %v4270_v3 }
 0x6a6   : > { %v4113_v36 = vpop.f32.mrb[18].mxu0 }
 0x6a7   : > { %4351 = vst [vmem:[%s6860_s8 + $0x120] sm:$0xff] %v4113_v36  ;;  %v4274_v35 = vpop.f32.mrb[18].mxu1  ;;  %v4115_v7 = vpop.f32.mrb[19].mxu0 }
 0x6a8   : > { %4353 = vst [vmem:[%s6860_s8 + $0x130] sm:$0xff] %v4274_v35  ;;  %4352 = vst [vmem:[%s6860_s8 + $0x128] sm:$0xff] %v4115_v7  ;;  %v4276_v57 = vpop.f32.mrb[19].mxu1 }
 0x6a9   : > { %4354 = vst [vmem:[%s6860_s8 + $0x138] sm:$0xff] %v4276_v57 }
 0x6aa   : > { %v4119_v33 = vpop.f32.mrb[20].mxu0 }
 0x6ab   : > { %4355 = vst [vmem:[%s6860_s8 + $0x140] sm:$0xff] %v4119_v33  ;;  %v4280_v59 = vpop.f32.mrb[20].mxu1  ;;  %v4121_v1 = vpop.f32.mrb[21].mxu0 }
 0x6ac   : > { %4357 = vst [vmem:[%s6860_s8 + $0x150] sm:$0xff] %v4280_v59  ;;  %4356 = vst [vmem:[%s6860_s8 + $0x148] sm:$0xff] %v4121_v1  ;;  %v4282_v37 = vpop.f32.mrb[21].mxu1 }
 0x6ad   : > { %4358 = vst [vmem:[%s6860_s8 + $0x158] sm:$0xff] %v4282_v37 }
 0x6ae   : > { %v4125_v10 = vpop.f32.mrb[22].mxu0 }
 0x6af   : > { %4359 = vst [vmem:[%s6860_s8 + $0x160] sm:$0xff] %v4125_v10  ;;  %v4286_v48 = vpop.f32.mrb[22].mxu1  ;;  %v4127_v12 = vpop.f32.mrb[23].mxu0 }
 0x6b0   : > { %4361 = vst [vmem:[%s6860_s8 + $0x170] sm:$0xff] %v4286_v48  ;;  %4360 = vst [vmem:[%s6860_s8 + $0x168] sm:$0xff] %v4127_v12  ;;  %v4288_v17 = vpop.f32.mrb[23].mxu1 }
 0x6b1   : > { %4362 = vst [vmem:[%s6860_s8 + $0x178] sm:$0xff] %v4288_v17 }
 0x6b2   : > { %v4131_v5 = vpop.f32.mrb[24].mxu0 }
 0x6b3   : > { %4363 = vst [vmem:[%s6860_s8 + $0x180] sm:$0xff] %v4131_v5  ;;  %v4292_v39 = vpop.f32.mrb[24].mxu1  ;;  %v4133_v31 = vpop.f32.mrb[25].mxu0 }
 0x6b4   : > { %4365 = vst [vmem:[%s6860_s8 + $0x190] sm:$0xff] %v4292_v39  ;;  %4364 = vst [vmem:[%s6860_s8 + $0x188] sm:$0xff] %v4133_v31  ;;  %v4294_v14 = vpop.f32.mrb[25].mxu1 }
 0x6b5   : > { %4366 = vst [vmem:[%s6860_s8 + $0x198] sm:$0xff] %v4294_v14 }
 0x6b6   : > { %v4137_v19 = vpop.f32.mrb[26].mxu0 }
 0x6b7   : > { %4367 = vst [vmem:[%s6860_s8 + $0x1a0] sm:$0xff] %v4137_v19  ;;  %v4298_v8 = vpop.f32.mrb[26].mxu1  ;;  %v4139_v25 = vpop.f32.mrb[27].mxu0 }
 0x6b8   : > { %4369 = vst [vmem:[%s6860_s8 + $0x1b0] sm:$0xff] %v4298_v8  ;;  %4368 = vst [vmem:[%s6860_s8 + $0x1a8] sm:$0xff] %v4139_v25  ;;  %v4300_v18 = vpop.f32.mrb[27].mxu1 }
 0x6b9   : > { %4370 = vst [vmem:[%s6860_s8 + $0x1b8] sm:$0xff] %v4300_v18 }
 0x6ba   : > { %v4143_v40 = vpop.f32.mrb[28].mxu0 }
 0x6bb   : > { %4371 = vst [vmem:[%s6860_s8 + $0x1c0] sm:$0xff] %v4143_v40  ;;  %v4304_v9 = vpop.f32.mrb[28].mxu1  ;;  %v4145_v49 = vpop.f32.mrb[29].mxu0 }
 0x6bc   : > { %4373 = vst [vmem:[%s6860_s8 + $0x1d0] sm:$0xff] %v4304_v9  ;;  %4372 = vst [vmem:[%s6860_s8 + $0x1c8] sm:$0xff] %v4145_v49  ;;  %v4306_v6 = vpop.f32.mrb[29].mxu1 }
 0x6bd   : > { %4374 = vst [vmem:[%s6860_s8 + $0x1d8] sm:$0xff] %v4306_v6 }
 0x6be   : > { %v4149_v47 = vpop.f32.mrb[30].mxu0 }
 0x6bf   : > { %4375 = vst [vmem:[%s6860_s8 + $0x1e0] sm:$0xff] %v4149_v47  ;;  %v4310_v0 = vpop.f32.mrb[30].mxu1  ;;  %v4151_v55 = vpop.f32.mrb[31].mxu0 }
 0x6c0   : > { %4377 = vst [vmem:[%s6860_s8 + $0x1f0] sm:$0xff] %v4310_v0  ;;  %4376 = vst [vmem:[%s6860_s8 + $0x1e8] sm:$0xff] %v4151_v55  ;;  %v4312_v20 = vpop.f32.mrb[31].mxu1 }
 0x6c1   : > { %4378 = vst [vmem:[%s6860_s8 + $0x1f8] sm:$0xff] %v4312_v20 }
 0x6c2   : > { %6149 = shalt.err (!%p6146_p3)
}
 0x6c3   : > { %s6150_s8 = scalar_lea.hbm %s10221_s2, 8192  ;;  %s6154_s30 = scalar_lea.hbm %s10543_s29, 32768 }
 0x6c4   : > { %p6151_p10 = scmp.ne.s32.totalorder %s10221_s2, %s6150_s8  ;;  %p6155_p5 = scmp.lt.u32.totalorder %s10221_s2, %s10543_s29 }
 0x6c5   : > { %p6156_p2 = scmp.lt.u32.totalorder %s6154_s30, %s6150_s8  ;;  %p6158_p8 = scmp.lt.u32.totalorder %s6150_s8, %s10221_s2 }
 0x6c6   : > { %p6152_p0 = pnand %p6151_p10, %p10545_p13 }
 0x6c7   : > { %p6157_p12 = por %p6156_p2, %p6155_p5 }
 0x6c8   : > { %p6153_p11 = pneg %p6152_p0 }
 0x6c9   : > { %p6159_p4 = por %p6158_p8, %p6157_p12 }
 0x6cb   : > { %p6160_p1 = pnand %p6159_p4, %p6153_p11 }
 0x6cd   : > { %6163 = shalt.err (!%p6160_p1)
}
 0x6ce   : > { %s6295_s4 = smov 512   ;;  %s6296_s23 = smov 1024  }
 0x6cf   : > { %s6297_s11 = smov 32  }
 0x6d0   : > { %5630 = dma.vmem_to_hbm [thread:$0]  (%p10545_p13), %s10223_s17, 8192, %s10221_s2, %s10231_s28, %s6295_s4, %s6296_s23, %s6297_s11  }
 0x6d1 PF: > { %s10546_s9 = sld [smem:[#allocation16_spill]]  ;;  %s10547_s25 = sld [smem:[#allocation27_spill]] }
 0x6d2   : > { %p5647_p6 = scmp.ge.s32.totalorder %s6282_s21, 2 }
 0x6d7   : > { %s4433_s22 = sand.u32 1, %s10546_s9   ;;  %p10548_p9 = scmp.ne.s32.totalorder %s10547_s25, 0 }
 0x6d8   : > { %s4434_s8 = scalar_lea.sflag [#allocation5], %s4433_s22 }
 0x6d9   : > { %p5639_p7 = pnand %p5647_p6, %p10548_p9 }
 0x6db   : > { %6225 = dma.done.wait (!%p5639_p7), %s4434_s8, 8192  }
 0x6dc   : > { %6227 = vsyncadd (!%p5639_p7), %s4434_s8, 4294959104  ;;  %s10549_s27 = sld [smem:[#allocation18_spill]]  ;;  %s10550_s14 = sld [smem:[#allocation28_spill]] }
 0x6e2   : > { %s4442_s30 = sand.u32 1, %s10549_s27   ;;  %p10551_p3 = scmp.ne.s32.totalorder %s10550_s14, 0 }
 0x6e3   : > { %s4443_s12 = scalar_lea.sflag [#allocation11], %s4442_s30 }
 0x6e4   : > { %p5642_p10 = pnand %p5647_p6, %p10551_p3 }
 0x6e6   : > { %6229 = dma.done.wait (!%p5642_p10), %s4443_s12, 4096  }
 0x6e7   : > { %6231 = vsyncadd (!%p5642_p10), %s4443_s12, 4294963200  ;;  %s30_s21 = sadd.s32 1, %s6282_s21   ;;  %s10553_s24 = sld [smem:[#allocation17_spill]] }
 0x6e8   : > { %p10263_p13 = scmp.ge.s32.totalorder %s30_s21, 6   ;;  %s10554_s11 = sld [smem:[#allocation24_spill]] }
 0x6e9   : > { %s10555_s2 = sld [smem:[#allocation22_spill]]  ;;  %s10556_s28 = sld [smem:[#allocation23_spill]] }
 0x6ea   : > { %s10557_s4 = sld [smem:[#allocation20_spill]]  ;;  %s10558_s23 = sld [smem:[#allocation21_spill]] }
 0x6eb   : > { %s10560_s30 = smov %s6238_s10  ;;  %s10562_s12 = smov %s6250_s13 }
 0x6ec   : > { %s10564_s14 = smov %s6258_s15  ;;  %s10565_s15 = smov %s6262_s16 }
 0x6ed   : > { %s10561_s10 = smov %s10553_s24  ;;  %s10567_s17 = smov %s6274_s19 }
 0x6ee   : > { %s10568_s18 = smov %s6278_s20  ;;  %29 = sbr.rel (!%p10263_p13) target bundleno = 19 (0x13), region = 153 }
 0x6ef   : > { %s10563_s13 = smov %s10555_s2  ;;  %s10566_s16 = smov %s10556_s28 }
 0x6f0   : > { %s10569_s19 = smov %s10557_s4  ;;  %s10570_s20 = smov %s10558_s23 }
 0x6f5   :  { %4448 = vsyncpa [#allocation4], 1 }
 0x6f6   :  { %4450 = vsyncpa [#allocation4 + $0x1], 1 }
 0x6f7   :  { %4451 = vsyncpa [#allocation7], 1 }
 0x6f8   :  { %4452 = vsyncpa [#allocation5], 1 }
 0x6f9   :  { %4454 = vsyncpa [#allocation5 + $0x1], 1 }
 0x6fa   :  { %4455 = vsyncpa [#allocation11], 1 }
 0x6fb   :  { %4457 = vsyncpa [#allocation11 + $0x1], 1 }

</bundles_post_ra>
